<compile_context>
chip_gen: v5e
topology: v5e:2x2
jax: 0.10.0
libtpu: 0.0.40
codegen_flags: <defaults>
</compile_context>

<pallas_src>
import functools

import jax
import jax.numpy as jnp
from jax import lax
from jax.experimental import pallas as pl
from jax.experimental.pallas import tpu as pltpu


def _round_up(x, m):
    return (x + m - 1) // m * m


# ----------------------------------------------------------------------------
# Pallas kernel: both LSTM directions fused in a single invocation.
# ----------------------------------------------------------------------------
def bilstm_kernel(x_ref,       # (S*Bp, Ep)    bf16
                  wih_ref,     # (Ep, 8*Hp)    bf16   [fwd gate cols | bwd gate cols]
                  whh_ref,     # (2*Hp, 8*Hp)  bf16   block-diagonal (fwd / bwd)
                  b_ref,       # (1, 8*Hp)     f32    bias_ih + bias_hh, both dirs
                  wof_ref,     # (Hp, Op)      bf16   fwd half of h2out weight
                  wob_ref,     # (Hp, Op)      bf16   bwd half of h2out weight
                  bo_ref,      # (1, Op)       f32    h2out bias
                  out_ref,     # (S*Bp, Op)    f32
                  xproj_ref,   # VMEM scratch (S*Bp, 8*Hp) f32
                  hf_ref,      # VMEM scratch (S*Bp, Hp)   f32  fwd hiddens
                  hb_ref,      # VMEM scratch (S*Bp, Hp)   f32  bwd hiddens
                  *, seq_len, batch_p, hidden_p, unroll):
    Bp, Hp = batch_p, hidden_p
    G = 4 * Hp

    # ---- Phase 1: one batched input GEMM for all timesteps and BOTH
    #      directions, LSTM biases folded in (no per-step bias add).
    xproj_ref[...] = (
        jnp.dot(x_ref[...], wih_ref[...], preferred_element_type=jnp.float32)
        + b_ref[...])

    # ---- Phase 2: the two independent recurrences interleaved in one loop.
    # NOTE: padded hidden lanes stay exactly 0 only because h0 = c0 = 0 and
    # the padded weight rows/cols are 0 (c stays 0 -> h = sigmoid(0)*tanh(0)
    # = 0).  This invariant breaks if nonzero initial states are ever added.
    def gates_to_hc(gates, c):
        # PyTorch gate order i, f, g, o; each gate block is Hp lanes wide.
        i = jax.nn.sigmoid(gates[:, 0 * Hp:1 * Hp])
        f = jax.nn.sigmoid(gates[:, 1 * Hp:2 * Hp])
        g = jnp.tanh(gates[:, 2 * Hp:3 * Hp])
        o = jax.nn.sigmoid(gates[:, 3 * Hp:4 * Hp])
        c_new = f * c + i * g
        return o * jnp.tanh(c_new), c_new

    def step(k, carry):
        h_f, c_f, h_b, c_b = carry
        row_f = pl.multiple_of(k * Bp, Bp)                  # fwd time  t = k
        row_b = pl.multiple_of((seq_len - 1 - k) * Bp, Bp)  # bwd time  t = S-1-k
        # One block-diagonal recurrent matmul drives both directions' gates.
        h_cat = jnp.concatenate([h_f, h_b], axis=1).astype(jnp.bfloat16)
        rec = jnp.dot(h_cat, whh_ref[...], preferred_element_type=jnp.float32)
        xp_f = xproj_ref[pl.ds(row_f, Bp), :]
        xp_b = xproj_ref[pl.ds(row_b, Bp), :]
        h_f, c_f = gates_to_hc(xp_f[:, :G] + rec[:, :G], c_f)
        h_b, c_b = gates_to_hc(xp_b[:, G:] + rec[:, G:], c_b)
        hf_ref[pl.ds(row_f, Bp), :] = h_f
        hb_ref[pl.ds(row_b, Bp), :] = h_b
        return h_f, c_f, h_b, c_b

    zeros = jnp.zeros((Bp, Hp), jnp.float32)
    lax.fori_loop(0, seq_len, step, (zeros, zeros, zeros, zeros),
                  unroll=unroll)

    # ---- Phase 3: batched output projection for both directions + h2out
    #      bias, fully fused in-kernel (no wrapper-side sum pass).
    out_ref[...] = (
        jnp.dot(hf_ref[...].astype(jnp.bfloat16), wof_ref[...],
                preferred_element_type=jnp.float32)
        + jnp.dot(hb_ref[...].astype(jnp.bfloat16), wob_ref[...],
                  preferred_element_type=jnp.float32)
        + bo_ref[...]).astype(out_ref.dtype)


# ----------------------------------------------------------------------------
# Wrapper
# ----------------------------------------------------------------------------
@jax.jit
def bilstm_block(x, params):
    """x: (S, B, E) float32 -> (S, B, out_dim) float32."""
    S, B, E = x.shape
    H = params["weight_hh_l0"].shape[1]        # per-direction hidden
    O = params["h2out_w"].shape[0]

    Bp = _round_up(B, 8)
    Ep = _round_up(E, 128)
    Hp = _round_up(H, 128)
    Op = _round_up(O, 128)

    def pack_dir(wih, whh, bih, bhh):
        # wih: (4H, E), whh: (4H, H), biases: (4H,).  Pad each gate block to
        # Hp so in-kernel gate slices land on 128-lane boundaries.
        wih_p = jnp.zeros((4, Hp, Ep), jnp.float32).at[:, :H, :E].set(
            wih.reshape(4, H, E)).reshape(4 * Hp, Ep).T      # (Ep, 4Hp)
        whh_p = jnp.zeros((4, Hp, Hp), jnp.float32).at[:, :H, :H].set(
            whh.reshape(4, H, H)).reshape(4 * Hp, Hp).T      # (Hp, 4Hp)
        b_p = jnp.zeros((4, Hp), jnp.float32).at[:, :H].set(
            (bih + bhh).reshape(4, H)).reshape(1, 4 * Hp)    # (1, 4Hp)
        return wih_p, whh_p, b_p

    wih_f, whh_f, b_f = pack_dir(params["weight_ih_l0"], params["weight_hh_l0"],
                                 params["bias_ih_l0"], params["bias_hh_l0"])
    wih_b, whh_b, b_b = pack_dir(params["weight_ih_l0_reverse"],
                                 params["weight_hh_l0_reverse"],
                                 params["bias_ih_l0_reverse"],
                                 params["bias_hh_l0_reverse"])

    # Input projection weights, both directions side by side (bf16 operands).
    wih = jnp.concatenate([wih_f, wih_b], axis=1).astype(jnp.bfloat16)  # (Ep, 8Hp)
    # Block-diagonal recurrent weight: [h_f | h_b] @ whh -> all 8 gate blocks.
    whh = jnp.zeros((2 * Hp, 8 * Hp), jnp.float32)
    whh = whh.at[:Hp, :4 * Hp].set(whh_f).at[Hp:, 4 * Hp:].set(whh_b)
    whh = whh.astype(jnp.bfloat16)                                       # (2Hp, 8Hp)
    b = jnp.concatenate([b_f, b_b], axis=1)                              # (1, 8Hp) f32

    w_out_t = params["h2out_w"].T                  # (2H, O): [fwd rows ; bwd rows]
    wo_f = jnp.zeros((Hp, Op), jnp.float32).at[:H, :O].set(
        w_out_t[:H]).astype(jnp.bfloat16)
    wo_b = jnp.zeros((Hp, Op), jnp.float32).at[:H, :O].set(
        w_out_t[H:]).astype(jnp.bfloat16)
    bo = jnp.zeros((1, Op), jnp.float32).at[0, :O].set(params["h2out_b"])

    x_flat = (jnp.zeros((S, Bp, Ep), jnp.float32).at[:, :B, :E].set(x)
              .reshape(S * Bp, Ep).astype(jnp.bfloat16))

    # VMEM budget: actual working set + headroom, capped at ~75% of this
    # chip's physical VMEM (128 MiB v5e/v6e, 64 MiB per-TC v7x).
    f32, bf16 = 4, 2
    needed = (S * Bp * Ep * bf16                    # x
              + Ep * 8 * Hp * bf16                  # wih
              + 2 * Hp * 8 * Hp * bf16              # whh
              + 8 * Hp * f32 + Op * f32             # biases
              + 2 * Hp * Op * bf16                  # wo_f + wo_b
              + S * Bp * Op * f32                   # out
              + S * Bp * 8 * Hp * f32               # xproj scratch
              + 2 * S * Bp * Hp * f32)              # h_all scratch (fwd + bwd)
    try:
        cap = int(pltpu.get_tpu_info().vmem_capacity_bytes * 3 // 4)
    except Exception:
        cap = 48 << 20
    vmem_limit = int(min(max(2 * needed + (4 << 20), 16 << 20), cap))

    kernel = functools.partial(bilstm_kernel, seq_len=S, batch_p=Bp,
                               hidden_p=Hp, unroll=max(1, min(8, S)))

    out = pl.pallas_call(
        kernel,
        out_shape=jax.ShapeDtypeStruct((S * Bp, Op), jnp.float32),
        # Single invocation, everything resident in VMEM: no grid, no
        # redundant double-buffering of never-refetched operands.
        in_specs=[pl.BlockSpec(memory_space=pltpu.MemorySpace.VMEM)] * 7,
        out_specs=pl.BlockSpec(memory_space=pltpu.MemorySpace.VMEM),
        scratch_shapes=[
            pltpu.VMEM((S * Bp, 8 * Hp), jnp.float32),   # x-projections (both dirs)
            pltpu.VMEM((S * Bp, Hp), jnp.float32),       # fwd hiddens
            pltpu.VMEM((S * Bp, Hp), jnp.float32),       # bwd hiddens
        ],
        compiler_params=pltpu.CompilerParams(vmem_limit_bytes=vmem_limit),
    )(x_flat, wih, whh, b, wo_f, wo_b, bo)

    return out.reshape(S, Bp, Op)[:, :B, :O].astype(x.dtype)


# ----------------------------------------------------------------------------
# Pure-JAX reference (mirrors torch.nn.LSTM + nn.Linear semantics)
# ----------------------------------------------------------------------------
def bilstm_ref(x, params):
    S, B, E = x.shape
    H = params["weight_hh_l0"].shape[1]

    def run_dir(xs, wih, whh, bih, bhh):
        def step(carry, x_t):
            h, c = carry
            gates = x_t @ wih.T + bih + h @ whh.T + bhh
            i = jax.nn.sigmoid(gates[:, 0 * H:1 * H])
            f = jax.nn.sigmoid(gates[:, 1 * H:2 * H])
            g = jnp.tanh(gates[:, 2 * H:3 * H])
            o = jax.nn.sigmoid(gates[:, 3 * H:4 * H])
            c_new = f * c + i * g
            h_new = o * jnp.tanh(c_new)
            return (h_new, c_new), h_new

        h0 = jnp.zeros((B, H), jnp.float32)
        c0 = jnp.zeros((B, H), jnp.float32)
        _, hs = lax.scan(step, (h0, c0), xs)
        return hs

    h_fwd = run_dir(x, params["weight_ih_l0"], params["weight_hh_l0"],
                    params["bias_ih_l0"], params["bias_hh_l0"])
    h_bwd = run_dir(x[::-1], params["weight_ih_l0_reverse"],
                    params["weight_hh_l0_reverse"],
                    params["bias_ih_l0_reverse"],
                    params["bias_hh_l0_reverse"])[::-1]
    h = jnp.concatenate([h_fwd, h_bwd], axis=-1)           # (S, B, 2H)
    return h @ params["h2out_w"].T + params["h2out_b"]


# ----------------------------------------------------------------------------
# Deterministic parameter construction (PyTorch-style uniform init)
# ----------------------------------------------------------------------------
def make_params(key, embed_dim, hidden_dim, out_dim):
    H = hidden_dim // 2
    k_lstm = 1.0 / jnp.sqrt(H)
    k_lin = 1.0 / jnp.sqrt(hidden_dim)
    keys = jax.random.split(key, 10)

    def uni(k, shape, scale):
        return jax.random.uniform(k, shape, jnp.float32, -scale, scale)

    return {
        "weight_ih_l0":          uni(keys[0], (4 * H, embed_dim), k_lstm),
        "weight_hh_l0":          uni(keys[1], (4 * H, H), k_lstm),
        "bias_ih_l0":            uni(keys[2], (4 * H,), k_lstm),
        "bias_hh_l0":            uni(keys[3], (4 * H,), k_lstm),
        "weight_ih_l0_reverse":  uni(keys[4], (4 * H, embed_dim), k_lstm),
        "weight_hh_l0_reverse":  uni(keys[5], (4 * H, H), k_lstm),
        "bias_ih_l0_reverse":    uni(keys[6], (4 * H,), k_lstm),
        "bias_hh_l0_reverse":    uni(keys[7], (4 * H,), k_lstm),
        "h2out_w":               uni(keys[8], (out_dim, hidden_dim), k_lin),
        "h2out_b":               uni(keys[9], (out_dim,), k_lin),
    }


if __name__ == "__main__":
    SEQ, BATCH, EMBED, HIDDEN, OUT = 8, 2, 16, 32, 8

    key = jax.random.PRNGKey(0)
    k_x, k_p = jax.random.split(key)
    x = jax.random.normal(k_x, (SEQ, BATCH, EMBED), jnp.float32)
    params = make_params(k_p, EMBED, HIDDEN, OUT)

    out = jax.block_until_ready(bilstm_block(x, params))
    ref = jax.block_until_ready(bilstm_ref(x, params))

    assert out.shape == (SEQ, BATCH, OUT), out.shape
    # bf16 MXU operands (f32 accumulation) -> looser tolerance than the pure
    # f32 reference.
    assert jnp.allclose(out, ref, rtol=3e-2, atol=3e-2), \
        float(jnp.max(jnp.abs(out - ref)))
    print("KERNEL_OK")
</pallas_src>

<mosaic_0001>
module attributes {stable_mosaic.version = 11 : i64} {
  func.func @bilstm_kernel(%arg0: memref<64x128xbf16, #tpu.memory_space<vmem>>, %arg1: memref<128x1024xbf16, #tpu.memory_space<vmem>>, %arg2: memref<256x1024xbf16, #tpu.memory_space<vmem>>, %arg3: memref<1x1024xf32, #tpu.memory_space<vmem>>, %arg4: memref<128x128xbf16, #tpu.memory_space<vmem>>, %arg5: memref<128x128xbf16, #tpu.memory_space<vmem>>, %arg6: memref<1x128xf32, #tpu.memory_space<vmem>>, %arg7: memref<64x128xf32, #tpu.memory_space<vmem>>, %arg8: memref<64x1024xf32, #tpu.memory_space<vmem>>, %arg9: memref<64x128xf32, #tpu.memory_space<vmem>>, %arg10: memref<64x128xf32, #tpu.memory_space<vmem>>) attributes {dimension_semantics = [], scalar_prefetch = 0 : i64, scratch_operands = 3 : i64, tpu.core_type = #tpu.core_type<tc>} {
    %c0 = arith.constant 0 : index
    %c0_0 = arith.constant 0 : index
    %0 = vector.load %arg0[%c0, %c0_0] : memref<64x128xbf16, #tpu.memory_space<vmem>>, vector<64x128xbf16>
    %c0_1 = arith.constant 0 : index
    %c0_2 = arith.constant 0 : index
    %1 = vector.load %arg1[%c0_1, %c0_2] : memref<128x1024xbf16, #tpu.memory_space<vmem>>, vector<128x1024xbf16>
    %cst = arith.constant dense<0.000000e+00> : vector<64x1024xf32>
    %2 = tpu.matmul %0, %1, %cst {dimension_numbers = #tpu.dot_dimension_numbers<[1], [0], [0], [1], [0, 0, 1, 1], [], []>} : vector<64x128xbf16>, vector<128x1024xbf16>, vector<64x1024xf32> -> vector<64x1024xf32>
    %c0_3 = arith.constant 0 : index
    %c0_4 = arith.constant 0 : index
    %3 = vector.load %arg3[%c0_3, %c0_4] : memref<1x1024xf32, #tpu.memory_space<vmem>>, vector<1x1024xf32>
    %4 = vector.broadcast %3 : vector<1x1024xf32> to vector<64x1024xf32>
    %5 = arith.addf %2, %4 : vector<64x1024xf32>
    %c0_5 = arith.constant 0 : index
    %c0_6 = arith.constant 0 : index
    %6 = vector.load %arg8[%c0_5, %c0_6] : memref<64x1024xf32, #tpu.memory_space<vmem>>, vector<64x1024xf32>
    tpu.vector_store %arg8[%c0_5, %c0_6], %5 {strides = array<i32>} : memref<64x1024xf32, #tpu.memory_space<vmem>>, vector<64x1024xf32>,
    %cst_7 = arith.constant 0.000000e+00 : f32
    %7 = vector.broadcast %cst_7 : f32 to vector<8x128xf32>
    %c0_i32 = arith.constant 0 : i32
    %c8_i32 = arith.constant 8 : i32
    %8 = arith.muli %c0_i32, %c8_i32 : i32
    %9 = tpu.assume_multiple %8, 8 : i32
    %c7_i32 = arith.constant 7 : i32
    %10 = arith.subi %c7_i32, %c0_i32 : i32
    %c8_i32_8 = arith.constant 8 : i32
    %11 = arith.muli %10, %c8_i32_8 : i32
    %12 = tpu.assume_multiple %11, 8 : i32
    %13 = tpu.concatenate %7, %7 in 1 : vector<8x128xf32>, vector<8x128xf32> -> vector<8x256xf32>
    %14 = arith.truncf %13 : vector<8x256xf32> to vector<8x256xbf16>
    %c0_9 = arith.constant 0 : index
    %c0_10 = arith.constant 0 : index
    %15 = vector.load %arg2[%c0_9, %c0_10] : memref<256x1024xbf16, #tpu.memory_space<vmem>>, vector<256x1024xbf16>
    %cst_11 = arith.constant dense<0.000000e+00> : vector<8x1024xf32>
    %16 = tpu.matmul %14, %15, %cst_11 {dimension_numbers = #tpu.dot_dimension_numbers<[1], [0], [0], [1], [0, 0, 1, 1], [], []>} : vector<8x256xbf16>, vector<256x1024xbf16>, vector<8x1024xf32> -> vector<8x1024xf32>
    %17 = arith.index_cast %9 : i32 to index
    %c0_12 = arith.constant 0 : index
    %18 = vector.load %arg8[%17, %c0_12] : memref<64x1024xf32, #tpu.memory_space<vmem>>, vector<8x1024xf32>
    %19 = arith.index_cast %12 : i32 to index
    %c0_13 = arith.constant 0 : index
    %20 = vector.load %arg8[%19, %c0_13] : memref<64x1024xf32, #tpu.memory_space<vmem>>, vector<8x1024xf32>
    %21 = vector.extract_strided_slice %18 {offsets = [0, 0], sizes = [8, 512], strides = [1, 1]} : vector<8x1024xf32> to vector<8x512xf32>
    %22 = vector.extract_strided_slice %16 {offsets = [0, 0], sizes = [8, 512], strides = [1, 1]} : vector<8x1024xf32> to vector<8x512xf32>
    %23 = arith.addf %21, %22 : vector<8x512xf32>
    %24 = vector.extract_strided_slice %23 {offsets = [0, 0], sizes = [8, 128], strides = [1, 1]} : vector<8x512xf32> to vector<8x128xf32>
    %25 = arith.negf %24 : vector<8x128xf32>
    %26 = math.exp %25 : vector<8x128xf32>
    %cst_14 = arith.constant 1.000000e+00 : f32
    %27 = vector.broadcast %cst_14 : f32 to vector<8x128xf32>
    %28 = arith.addf %27, %26 : vector<8x128xf32>
    %29 = arith.divf %27, %28 : vector<8x128xf32>
    %30 = vector.extract_strided_slice %23 {offsets = [0, 128], sizes = [8, 128], strides = [1, 1]} : vector<8x512xf32> to vector<8x128xf32>
    %31 = arith.negf %30 : vector<8x128xf32>
    %32 = math.exp %31 : vector<8x128xf32>
    %cst_15 = arith.constant 1.000000e+00 : f32
    %33 = vector.broadcast %cst_15 : f32 to vector<8x128xf32>
    %34 = arith.addf %33, %32 : vector<8x128xf32>
    %35 = arith.divf %33, %34 : vector<8x128xf32>
    %36 = vector.extract_strided_slice %23 {offsets = [0, 256], sizes = [8, 128], strides = [1, 1]} : vector<8x512xf32> to vector<8x128xf32>
    %37 = math.tanh %36 : vector<8x128xf32>
    %38 = vector.extract_strided_slice %23 {offsets = [0, 384], sizes = [8, 128], strides = [1, 1]} : vector<8x512xf32> to vector<8x128xf32>
    %39 = arith.negf %38 : vector<8x128xf32>
    %40 = math.exp %39 : vector<8x128xf32>
    %cst_16 = arith.constant 1.000000e+00 : f32
    %41 = vector.broadcast %cst_16 : f32 to vector<8x128xf32>
    %42 = arith.addf %41, %40 : vector<8x128xf32>
    %43 = arith.divf %41, %42 : vector<8x128xf32>
    %44 = arith.mulf %35, %7 : vector<8x128xf32>
    %45 = arith.mulf %29, %37 : vector<8x128xf32>
    %46 = arith.addf %44, %45 : vector<8x128xf32>
    %47 = math.tanh %46 : vector<8x128xf32>
    %48 = arith.mulf %43, %47 : vector<8x128xf32>
    %49 = vector.extract_strided_slice %20 {offsets = [0, 512], sizes = [8, 512], strides = [1, 1]} : vector<8x1024xf32> to vector<8x512xf32>
    %50 = vector.extract_strided_slice %16 {offsets = [0, 512], sizes = [8, 512], strides = [1, 1]} : vector<8x1024xf32> to vector<8x512xf32>
    %51 = arith.addf %49, %50 : vector<8x512xf32>
    %52 = vector.extract_strided_slice %51 {offsets = [0, 0], sizes = [8, 128], strides = [1, 1]} : vector<8x512xf32> to vector<8x128xf32>
    %53 = arith.negf %52 : vector<8x128xf32>
    %54 = math.exp %53 : vector<8x128xf32>
    %cst_17 = arith.constant 1.000000e+00 : f32
    %55 = vector.broadcast %cst_17 : f32 to vector<8x128xf32>
    %56 = arith.addf %55, %54 : vector<8x128xf32>
    %57 = arith.divf %55, %56 : vector<8x128xf32>
    %58 = vector.extract_strided_slice %51 {offsets = [0, 128], sizes = [8, 128], strides = [1, 1]} : vector<8x512xf32> to vector<8x128xf32>
    %59 = arith.negf %58 : vector<8x128xf32>
    %60 = math.exp %59 : vector<8x128xf32>
    %cst_18 = arith.constant 1.000000e+00 : f32
    %61 = vector.broadcast %cst_18 : f32 to vector<8x128xf32>
    %62 = arith.addf %61, %60 : vector<8x128xf32>
    %63 = arith.divf %61, %62 : vector<8x128xf32>
    %64 = vector.extract_strided_slice %51 {offsets = [0, 256], sizes = [8, 128], strides = [1, 1]} : vector<8x512xf32> to vector<8x128xf32>
    %65 = math.tanh %64 : vector<8x128xf32>
    %66 = vector.extract_strided_slice %51 {offsets = [0, 384], sizes = [8, 128], strides = [1, 1]} : vector<8x512xf32> to vector<8x128xf32>
    %67 = arith.negf %66 : vector<8x128xf32>
    %68 = math.exp %67 : vector<8x128xf32>
    %cst_19 = arith.constant 1.000000e+00 : f32
    %69 = vector.broadcast %cst_19 : f32 to vector<8x128xf32>
    %70 = arith.addf %69, %68 : vector<8x128xf32>
    %71 = arith.divf %69, %70 : vector<8x128xf32>
    %72 = arith.mulf %63, %7 : vector<8x128xf32>
    %73 = arith.mulf %57, %65 : vector<8x128xf32>
    %74 = arith.addf %72, %73 : vector<8x128xf32>
    %75 = math.tanh %74 : vector<8x128xf32>
    %76 = arith.mulf %71, %75 : vector<8x128xf32>
    %77 = arith.index_cast %9 : i32 to index
    %c0_20 = arith.constant 0 : index
    %78 = vector.load %arg9[%77, %c0_20] : memref<64x128xf32, #tpu.memory_space<vmem>>, vector<8x128xf32>
    tpu.vector_store %arg9[%77, %c0_20], %48 {strides = array<i32>} : memref<64x128xf32, #tpu.memory_space<vmem>>, vector<8x128xf32>,
    %79 = arith.index_cast %12 : i32 to index
    %c0_21 = arith.constant 0 : index
    %80 = vector.load %arg10[%79, %c0_21] : memref<64x128xf32, #tpu.memory_space<vmem>>, vector<8x128xf32>
    tpu.vector_store %arg10[%79, %c0_21], %76 {strides = array<i32>} : memref<64x128xf32, #tpu.memory_space<vmem>>, vector<8x128xf32>,
    %c1_i32 = arith.constant 1 : i32
    %c8_i32_22 = arith.constant 8 : i32
    %81 = arith.muli %c1_i32, %c8_i32_22 : i32
    %82 = tpu.assume_multiple %81, 8 : i32
    %c7_i32_23 = arith.constant 7 : i32
    %83 = arith.subi %c7_i32_23, %c1_i32 : i32
    %c8_i32_24 = arith.constant 8 : i32
    %84 = arith.muli %83, %c8_i32_24 : i32
    %85 = tpu.assume_multiple %84, 8 : i32
    %86 = tpu.concatenate %48, %76 in 1 : vector<8x128xf32>, vector<8x128xf32> -> vector<8x256xf32>
    %87 = arith.truncf %86 : vector<8x256xf32> to vector<8x256xbf16>
    %c0_25 = arith.constant 0 : index
    %c0_26 = arith.constant 0 : index
    %88 = vector.load %arg2[%c0_25, %c0_26] : memref<256x1024xbf16, #tpu.memory_space<vmem>>, vector<256x1024xbf16>
    %cst_27 = arith.constant dense<0.000000e+00> : vector<8x1024xf32>
    %89 = tpu.matmul %87, %88, %cst_27 {dimension_numbers = #tpu.dot_dimension_numbers<[1], [0], [0], [1], [0, 0, 1, 1], [], []>} : vector<8x256xbf16>, vector<256x1024xbf16>, vector<8x1024xf32> -> vector<8x1024xf32>
    %90 = arith.index_cast %82 : i32 to index
    %c0_28 = arith.constant 0 : index
    %91 = vector.load %arg8[%90, %c0_28] : memref<64x1024xf32, #tpu.memory_space<vmem>>, vector<8x1024xf32>
    %92 = arith.index_cast %85 : i32 to index
    %c0_29 = arith.constant 0 : index
    %93 = vector.load %arg8[%92, %c0_29] : memref<64x1024xf32, #tpu.memory_space<vmem>>, vector<8x1024xf32>
    %94 = vector.extract_strided_slice %91 {offsets = [0, 0], sizes = [8, 512], strides = [1, 1]} : vector<8x1024xf32> to vector<8x512xf32>
    %95 = vector.extract_strided_slice %89 {offsets = [0, 0], sizes = [8, 512], strides = [1, 1]} : vector<8x1024xf32> to vector<8x512xf32>
    %96 = arith.addf %94, %95 : vector<8x512xf32>
    %97 = vector.extract_strided_slice %96 {offsets = [0, 0], sizes = [8, 128], strides = [1, 1]} : vector<8x512xf32> to vector<8x128xf32>
    %98 = arith.negf %97 : vector<8x128xf32>
    %99 = math.exp %98 : vector<8x128xf32>
    %cst_30 = arith.constant 1.000000e+00 : f32
    %100 = vector.broadcast %cst_30 : f32 to vector<8x128xf32>
    %101 = arith.addf %100, %99 : vector<8x128xf32>
    %102 = arith.divf %100, %101 : vector<8x128xf32>
    %103 = vector.extract_strided_slice %96 {offsets = [0, 128], sizes = [8, 128], strides = [1, 1]} : vector<8x512xf32> to vector<8x128xf32>
    %104 = arith.negf %103 : vector<8x128xf32>
    %105 = math.exp %104 : vector<8x128xf32>
    %cst_31 = arith.constant 1.000000e+00 : f32
    %106 = vector.broadcast %cst_31 : f32 to vector<8x128xf32>
    %107 = arith.addf %106, %105 : vector<8x128xf32>
    %108 = arith.divf %106, %107 : vector<8x128xf32>
    %109 = vector.extract_strided_slice %96 {offsets = [0, 256], sizes = [8, 128], strides = [1, 1]} : vector<8x512xf32> to vector<8x128xf32>
    %110 = math.tanh %109 : vector<8x128xf32>
    %111 = vector.extract_strided_slice %96 {offsets = [0, 384], sizes = [8, 128], strides = [1, 1]} : vector<8x512xf32> to vector<8x128xf32>
    %112 = arith.negf %111 : vector<8x128xf32>
    %113 = math.exp %112 : vector<8x128xf32>
    %cst_32 = arith.constant 1.000000e+00 : f32
    %114 = vector.broadcast %cst_32 : f32 to vector<8x128xf32>
    %115 = arith.addf %114, %113 : vector<8x128xf32>
    %116 = arith.divf %114, %115 : vector<8x128xf32>
    %117 = arith.mulf %108, %46 : vector<8x128xf32>
    %118 = arith.mulf %102, %110 : vector<8x128xf32>
    %119 = arith.addf %117, %118 : vector<8x128xf32>
    %120 = math.tanh %119 : vector<8x128xf32>
    %121 = arith.mulf %116, %120 : vector<8x128xf32>
    %122 = vector.extract_strided_slice %93 {offsets = [0, 512], sizes = [8, 512], strides = [1, 1]} : vector<8x1024xf32> to vector<8x512xf32>
    %123 = vector.extract_strided_slice %89 {offsets = [0, 512], sizes = [8, 512], strides = [1, 1]} : vector<8x1024xf32> to vector<8x512xf32>
    %124 = arith.addf %122, %123 : vector<8x512xf32>
    %125 = vector.extract_strided_slice %124 {offsets = [0, 0], sizes = [8, 128], strides = [1, 1]} : vector<8x512xf32> to vector<8x128xf32>
    %126 = arith.negf %125 : vector<8x128xf32>
    %127 = math.exp %126 : vector<8x128xf32>
    %cst_33 = arith.constant 1.000000e+00 : f32
    %128 = vector.broadcast %cst_33 : f32 to vector<8x128xf32>
    %129 = arith.addf %128, %127 : vector<8x128xf32>
    %130 = arith.divf %128, %129 : vector<8x128xf32>
    %131 = vector.extract_strided_slice %124 {offsets = [0, 128], sizes = [8, 128], strides = [1, 1]} : vector<8x512xf32> to vector<8x128xf32>
    %132 = arith.negf %131 : vector<8x128xf32>
    %133 = math.exp %132 : vector<8x128xf32>
    %cst_34 = arith.constant 1.000000e+00 : f32
    %134 = vector.broadcast %cst_34 : f32 to vector<8x128xf32>
    %135 = arith.addf %134, %133 : vector<8x128xf32>
    %136 = arith.divf %134, %135 : vector<8x128xf32>
    %137 = vector.extract_strided_slice %124 {offsets = [0, 256], sizes = [8, 128], strides = [1, 1]} : vector<8x512xf32> to vector<8x128xf32>
    %138 = math.tanh %137 : vector<8x128xf32>
    %139 = vector.extract_strided_slice %124 {offsets = [0, 384], sizes = [8, 128], strides = [1, 1]} : vector<8x512xf32> to vector<8x128xf32>
    %140 = arith.negf %139 : vector<8x128xf32>
    %141 = math.exp %140 : vector<8x128xf32>
    %cst_35 = arith.constant 1.000000e+00 : f32
    %142 = vector.broadcast %cst_35 : f32 to vector<8x128xf32>
    %143 = arith.addf %142, %141 : vector<8x128xf32>
    %144 = arith.divf %142, %143 : vector<8x128xf32>
    %145 = arith.mulf %136, %74 : vector<8x128xf32>
    %146 = arith.mulf %130, %138 : vector<8x128xf32>
    %147 = arith.addf %145, %146 : vector<8x128xf32>
    %148 = math.tanh %147 : vector<8x128xf32>
    %149 = arith.mulf %144, %148 : vector<8x128xf32>
    %150 = arith.index_cast %82 : i32 to index
    %c0_36 = arith.constant 0 : index
    %151 = vector.load %arg9[%150, %c0_36] : memref<64x128xf32, #tpu.memory_space<vmem>>, vector<8x128xf32>
    tpu.vector_store %arg9[%150, %c0_36], %121 {strides = array<i32>} : memref<64x128xf32, #tpu.memory_space<vmem>>, vector<8x128xf32>,
    %152 = arith.index_cast %85 : i32 to index
    %c0_37 = arith.constant 0 : index
    %153 = vector.load %arg10[%152, %c0_37] : memref<64x128xf32, #tpu.memory_space<vmem>>, vector<8x128xf32>
    tpu.vector_store %arg10[%152, %c0_37], %149 {strides = array<i32>} : memref<64x128xf32, #tpu.memory_space<vmem>>, vector<8x128xf32>,
    %c2_i32 = arith.constant 2 : i32
    %c8_i32_38 = arith.constant 8 : i32
    %154 = arith.muli %c2_i32, %c8_i32_38 : i32
    %155 = tpu.assume_multiple %154, 8 : i32
    %c7_i32_39 = arith.constant 7 : i32
    %156 = arith.subi %c7_i32_39, %c2_i32 : i32
    %c8_i32_40 = arith.constant 8 : i32
    %157 = arith.muli %156, %c8_i32_40 : i32
    %158 = tpu.assume_multiple %157, 8 : i32
    %159 = tpu.concatenate %121, %149 in 1 : vector<8x128xf32>, vector<8x128xf32> -> vector<8x256xf32>
    %160 = arith.truncf %159 : vector<8x256xf32> to vector<8x256xbf16>
    %c0_41 = arith.constant 0 : index
    %c0_42 = arith.constant 0 : index
    %161 = vector.load %arg2[%c0_41, %c0_42] : memref<256x1024xbf16, #tpu.memory_space<vmem>>, vector<256x1024xbf16>
    %cst_43 = arith.constant dense<0.000000e+00> : vector<8x1024xf32>
    %162 = tpu.matmul %160, %161, %cst_43 {dimension_numbers = #tpu.dot_dimension_numbers<[1], [0], [0], [1], [0, 0, 1, 1], [], []>} : vector<8x256xbf16>, vector<256x1024xbf16>, vector<8x1024xf32> -> vector<8x1024xf32>
    %163 = arith.index_cast %155 : i32 to index
    %c0_44 = arith.constant 0 : index
    %164 = vector.load %arg8[%163, %c0_44] : memref<64x1024xf32, #tpu.memory_space<vmem>>, vector<8x1024xf32>
    %165 = arith.index_cast %158 : i32 to index
    %c0_45 = arith.constant 0 : index
    %166 = vector.load %arg8[%165, %c0_45] : memref<64x1024xf32, #tpu.memory_space<vmem>>, vector<8x1024xf32>
    %167 = vector.extract_strided_slice %164 {offsets = [0, 0], sizes = [8, 512], strides = [1, 1]} : vector<8x1024xf32> to vector<8x512xf32>
    %168 = vector.extract_strided_slice %162 {offsets = [0, 0], sizes = [8, 512], strides = [1, 1]} : vector<8x1024xf32> to vector<8x512xf32>
    %169 = arith.addf %167, %168 : vector<8x512xf32>
    %170 = vector.extract_strided_slice %169 {offsets = [0, 0], sizes = [8, 128], strides = [1, 1]} : vector<8x512xf32> to vector<8x128xf32>
    %171 = arith.negf %170 : vector<8x128xf32>
    %172 = math.exp %171 : vector<8x128xf32>
    %cst_46 = arith.constant 1.000000e+00 : f32
    %173 = vector.broadcast %cst_46 : f32 to vector<8x128xf32>
    %174 = arith.addf %173, %172 : vector<8x128xf32>
    %175 = arith.divf %173, %174 : vector<8x128xf32>
    %176 = vector.extract_strided_slice %169 {offsets = [0, 128], sizes = [8, 128], strides = [1, 1]} : vector<8x512xf32> to vector<8x128xf32>
    %177 = arith.negf %176 : vector<8x128xf32>
    %178 = math.exp %177 : vector<8x128xf32>
    %cst_47 = arith.constant 1.000000e+00 : f32
    %179 = vector.broadcast %cst_47 : f32 to vector<8x128xf32>
    %180 = arith.addf %179, %178 : vector<8x128xf32>
    %181 = arith.divf %179, %180 : vector<8x128xf32>
    %182 = vector.extract_strided_slice %169 {offsets = [0, 256], sizes = [8, 128], strides = [1, 1]} : vector<8x512xf32> to vector<8x128xf32>
    %183 = math.tanh %182 : vector<8x128xf32>
    %184 = vector.extract_strided_slice %169 {offsets = [0, 384], sizes = [8, 128], strides = [1, 1]} : vector<8x512xf32> to vector<8x128xf32>
    %185 = arith.negf %184 : vector<8x128xf32>
    %186 = math.exp %185 : vector<8x128xf32>
    %cst_48 = arith.constant 1.000000e+00 : f32
    %187 = vector.broadcast %cst_48 : f32 to vector<8x128xf32>
    %188 = arith.addf %187, %186 : vector<8x128xf32>
    %189 = arith.divf %187, %188 : vector<8x128xf32>
    %190 = arith.mulf %181, %119 : vector<8x128xf32>
    %191 = arith.mulf %175, %183 : vector<8x128xf32>
    %192 = arith.addf %190, %191 : vector<8x128xf32>
    %193 = math.tanh %192 : vector<8x128xf32>
    %194 = arith.mulf %189, %193 : vector<8x128xf32>
    %195 = vector.extract_strided_slice %166 {offsets = [0, 512], sizes = [8, 512], strides = [1, 1]} : vector<8x1024xf32> to vector<8x512xf32>
    %196 = vector.extract_strided_slice %162 {offsets = [0, 512], sizes = [8, 512], strides = [1, 1]} : vector<8x1024xf32> to vector<8x512xf32>
    %197 = arith.addf %195, %196 : vector<8x512xf32>
    %198 = vector.extract_strided_slice %197 {offsets = [0, 0], sizes = [8, 128], strides = [1, 1]} : vector<8x512xf32> to vector<8x128xf32>
    %199 = arith.negf %198 : vector<8x128xf32>
    %200 = math.exp %199 : vector<8x128xf32>
    %cst_49 = arith.constant 1.000000e+00 : f32
    %201 = vector.broadcast %cst_49 : f32 to vector<8x128xf32>
    %202 = arith.addf %201, %200 : vector<8x128xf32>
    %203 = arith.divf %201, %202 : vector<8x128xf32>
    %204 = vector.extract_strided_slice %197 {offsets = [0, 128], sizes = [8, 128], strides = [1, 1]} : vector<8x512xf32> to vector<8x128xf32>
    %205 = arith.negf %204 : vector<8x128xf32>
    %206 = math.exp %205 : vector<8x128xf32>
    %cst_50 = arith.constant 1.000000e+00 : f32
    %207 = vector.broadcast %cst_50 : f32 to vector<8x128xf32>
    %208 = arith.addf %207, %206 : vector<8x128xf32>
    %209 = arith.divf %207, %208 : vector<8x128xf32>
    %210 = vector.extract_strided_slice %197 {offsets = [0, 256], sizes = [8, 128], strides = [1, 1]} : vector<8x512xf32> to vector<8x128xf32>
    %211 = math.tanh %210 : vector<8x128xf32>
    %212 = vector.extract_strided_slice %197 {offsets = [0, 384], sizes = [8, 128], strides = [1, 1]} : vector<8x512xf32> to vector<8x128xf32>
    %213 = arith.negf %212 : vector<8x128xf32>
    %214 = math.exp %213 : vector<8x128xf32>
    %cst_51 = arith.constant 1.000000e+00 : f32
    %215 = vector.broadcast %cst_51 : f32 to vector<8x128xf32>
    %216 = arith.addf %215, %214 : vector<8x128xf32>
    %217 = arith.divf %215, %216 : vector<8x128xf32>
    %218 = arith.mulf %209, %147 : vector<8x128xf32>
    %219 = arith.mulf %203, %211 : vector<8x128xf32>
    %220 = arith.addf %218, %219 : vector<8x128xf32>
    %221 = math.tanh %220 : vector<8x128xf32>
    %222 = arith.mulf %217, %221 : vector<8x128xf32>
    %223 = arith.index_cast %155 : i32 to index
    %c0_52 = arith.constant 0 : index
    %224 = vector.load %arg9[%223, %c0_52] : memref<64x128xf32, #tpu.memory_space<vmem>>, vector<8x128xf32>
    tpu.vector_store %arg9[%223, %c0_52], %194 {strides = array<i32>} : memref<64x128xf32, #tpu.memory_space<vmem>>, vector<8x128xf32>,
    %225 = arith.index_cast %158 : i32 to index
    %c0_53 = arith.constant 0 : index
    %226 = vector.load %arg10[%225, %c0_53] : memref<64x128xf32, #tpu.memory_space<vmem>>, vector<8x128xf32>
    tpu.vector_store %arg10[%225, %c0_53], %222 {strides = array<i32>} : memref<64x128xf32, #tpu.memory_space<vmem>>, vector<8x128xf32>,
    %c3_i32 = arith.constant 3 : i32
    %c8_i32_54 = arith.constant 8 : i32
    %227 = arith.muli %c3_i32, %c8_i32_54 : i32
    %228 = tpu.assume_multiple %227, 8 : i32
    %c7_i32_55 = arith.constant 7 : i32
    %229 = arith.subi %c7_i32_55, %c3_i32 : i32
    %c8_i32_56 = arith.constant 8 : i32
    %230 = arith.muli %229, %c8_i32_56 : i32
    %231 = tpu.assume_multiple %230, 8 : i32
    %232 = tpu.concatenate %194, %222 in 1 : vector<8x128xf32>, vector<8x128xf32> -> vector<8x256xf32>
    %233 = arith.truncf %232 : vector<8x256xf32> to vector<8x256xbf16>
    %c0_57 = arith.constant 0 : index
    %c0_58 = arith.constant 0 : index
    %234 = vector.load %arg2[%c0_57, %c0_58] : memref<256x1024xbf16, #tpu.memory_space<vmem>>, vector<256x1024xbf16>
    %cst_59 = arith.constant dense<0.000000e+00> : vector<8x1024xf32>
    %235 = tpu.matmul %233, %234, %cst_59 {dimension_numbers = #tpu.dot_dimension_numbers<[1], [0], [0], [1], [0, 0, 1, 1], [], []>} : vector<8x256xbf16>, vector<256x1024xbf16>, vector<8x1024xf32> -> vector<8x1024xf32>
    %236 = arith.index_cast %228 : i32 to index
    %c0_60 = arith.constant 0 : index
    %237 = vector.load %arg8[%236, %c0_60] : memref<64x1024xf32, #tpu.memory_space<vmem>>, vector<8x1024xf32>
    %238 = arith.index_cast %231 : i32 to index
    %c0_61 = arith.constant 0 : index
    %239 = vector.load %arg8[%238, %c0_61] : memref<64x1024xf32, #tpu.memory_space<vmem>>, vector<8x1024xf32>
    %240 = vector.extract_strided_slice %237 {offsets = [0, 0], sizes = [8, 512], strides = [1, 1]} : vector<8x1024xf32> to vector<8x512xf32>
    %241 = vector.extract_strided_slice %235 {offsets = [0, 0], sizes = [8, 512], strides = [1, 1]} : vector<8x1024xf32> to vector<8x512xf32>
    %242 = arith.addf %240, %241 : vector<8x512xf32>
    %243 = vector.extract_strided_slice %242 {offsets = [0, 0], sizes = [8, 128], strides = [1, 1]} : vector<8x512xf32> to vector<8x128xf32>
    %244 = arith.negf %243 : vector<8x128xf32>
    %245 = math.exp %244 : vector<8x128xf32>
    %cst_62 = arith.constant 1.000000e+00 : f32
    %246 = vector.broadcast %cst_62 : f32 to vector<8x128xf32>
    %247 = arith.addf %246, %245 : vector<8x128xf32>
    %248 = arith.divf %246, %247 : vector<8x128xf32>
    %249 = vector.extract_strided_slice %242 {offsets = [0, 128], sizes = [8, 128], strides = [1, 1]} : vector<8x512xf32> to vector<8x128xf32>
    %250 = arith.negf %249 : vector<8x128xf32>
    %251 = math.exp %250 : vector<8x128xf32>
    %cst_63 = arith.constant 1.000000e+00 : f32
    %252 = vector.broadcast %cst_63 : f32 to vector<8x128xf32>
    %253 = arith.addf %252, %251 : vector<8x128xf32>
    %254 = arith.divf %252, %253 : vector<8x128xf32>
    %255 = vector.extract_strided_slice %242 {offsets = [0, 256], sizes = [8, 128], strides = [1, 1]} : vector<8x512xf32> to vector<8x128xf32>
    %256 = math.tanh %255 : vector<8x128xf32>
    %257 = vector.extract_strided_slice %242 {offsets = [0, 384], sizes = [8, 128], strides = [1, 1]} : vector<8x512xf32> to vector<8x128xf32>
    %258 = arith.negf %257 : vector<8x128xf32>
    %259 = math.exp %258 : vector<8x128xf32>
    %cst_64 = arith.constant 1.000000e+00 : f32
    %260 = vector.broadcast %cst_64 : f32 to vector<8x128xf32>
    %261 = arith.addf %260, %259 : vector<8x128xf32>
    %262 = arith.divf %260, %261 : vector<8x128xf32>
    %263 = arith.mulf %254, %192 : vector<8x128xf32>
    %264 = arith.mulf %248, %256 : vector<8x128xf32>
    %265 = arith.addf %263, %264 : vector<8x128xf32>
    %266 = math.tanh %265 : vector<8x128xf32>
    %267 = arith.mulf %262, %266 : vector<8x128xf32>
    %268 = vector.extract_strided_slice %239 {offsets = [0, 512], sizes = [8, 512], strides = [1, 1]} : vector<8x1024xf32> to vector<8x512xf32>
    %269 = vector.extract_strided_slice %235 {offsets = [0, 512], sizes = [8, 512], strides = [1, 1]} : vector<8x1024xf32> to vector<8x512xf32>
    %270 = arith.addf %268, %269 : vector<8x512xf32>
    %271 = vector.extract_strided_slice %270 {offsets = [0, 0], sizes = [8, 128], strides = [1, 1]} : vector<8x512xf32> to vector<8x128xf32>
    %272 = arith.negf %271 : vector<8x128xf32>
    %273 = math.exp %272 : vector<8x128xf32>
    %cst_65 = arith.constant 1.000000e+00 : f32
    %274 = vector.broadcast %cst_65 : f32 to vector<8x128xf32>
    %275 = arith.addf %274, %273 : vector<8x128xf32>
    %276 = arith.divf %274, %275 : vector<8x128xf32>
    %277 = vector.extract_strided_slice %270 {offsets = [0, 128], sizes = [8, 128], strides = [1, 1]} : vector<8x512xf32> to vector<8x128xf32>
    %278 = arith.negf %277 : vector<8x128xf32>
    %279 = math.exp %278 : vector<8x128xf32>
    %cst_66 = arith.constant 1.000000e+00 : f32
    %280 = vector.broadcast %cst_66 : f32 to vector<8x128xf32>
    %281 = arith.addf %280, %279 : vector<8x128xf32>
    %282 = arith.divf %280, %281 : vector<8x128xf32>
    %283 = vector.extract_strided_slice %270 {offsets = [0, 256], sizes = [8, 128], strides = [1, 1]} : vector<8x512xf32> to vector<8x128xf32>
    %284 = math.tanh %283 : vector<8x128xf32>
    %285 = vector.extract_strided_slice %270 {offsets = [0, 384], sizes = [8, 128], strides = [1, 1]} : vector<8x512xf32> to vector<8x128xf32>
    %286 = arith.negf %285 : vector<8x128xf32>
    %287 = math.exp %286 : vector<8x128xf32>
    %cst_67 = arith.constant 1.000000e+00 : f32
    %288 = vector.broadcast %cst_67 : f32 to vector<8x128xf32>
    %289 = arith.addf %288, %287 : vector<8x128xf32>
    %290 = arith.divf %288, %289 : vector<8x128xf32>
    %291 = arith.mulf %282, %220 : vector<8x128xf32>
    %292 = arith.mulf %276, %284 : vector<8x128xf32>
    %293 = arith.addf %291, %292 : vector<8x128xf32>
    %294 = math.tanh %293 : vector<8x128xf32>
    %295 = arith.mulf %290, %294 : vector<8x128xf32>
    %296 = arith.index_cast %228 : i32 to index
    %c0_68 = arith.constant 0 : index
    %297 = vector.load %arg9[%296, %c0_68] : memref<64x128xf32, #tpu.memory_space<vmem>>, vector<8x128xf32>
    tpu.vector_store %arg9[%296, %c0_68], %267 {strides = array<i32>} : memref<64x128xf32, #tpu.memory_space<vmem>>, vector<8x128xf32>,
    %298 = arith.index_cast %231 : i32 to index
    %c0_69 = arith.constant 0 : index
    %299 = vector.load %arg10[%298, %c0_69] : memref<64x128xf32, #tpu.memory_space<vmem>>, vector<8x128xf32>
    tpu.vector_store %arg10[%298, %c0_69], %295 {strides = array<i32>} : memref<64x128xf32, #tpu.memory_space<vmem>>, vector<8x128xf32>,
    %c4_i32 = arith.constant 4 : i32
    %c8_i32_70 = arith.constant 8 : i32
    %300 = arith.muli %c4_i32, %c8_i32_70 : i32
    %301 = tpu.assume_multiple %300, 8 : i32
    %c7_i32_71 = arith.constant 7 : i32
    %302 = arith.subi %c7_i32_71, %c4_i32 : i32
    %c8_i32_72 = arith.constant 8 : i32
    %303 = arith.muli %302, %c8_i32_72 : i32
    %304 = tpu.assume_multiple %303, 8 : i32
    %305 = tpu.concatenate %267, %295 in 1 : vector<8x128xf32>, vector<8x128xf32> -> vector<8x256xf32>
    %306 = arith.truncf %305 : vector<8x256xf32> to vector<8x256xbf16>
    %c0_73 = arith.constant 0 : index
    %c0_74 = arith.constant 0 : index
    %307 = vector.load %arg2[%c0_73, %c0_74] : memref<256x1024xbf16, #tpu.memory_space<vmem>>, vector<256x1024xbf16>
    %cst_75 = arith.constant dense<0.000000e+00> : vector<8x1024xf32>
    %308 = tpu.matmul %306, %307, %cst_75 {dimension_numbers = #tpu.dot_dimension_numbers<[1], [0], [0], [1], [0, 0, 1, 1], [], []>} : vector<8x256xbf16>, vector<256x1024xbf16>, vector<8x1024xf32> -> vector<8x1024xf32>
    %309 = arith.index_cast %301 : i32 to index
    %c0_76 = arith.constant 0 : index
    %310 = vector.load %arg8[%309, %c0_76] : memref<64x1024xf32, #tpu.memory_space<vmem>>, vector<8x1024xf32>
    %311 = arith.index_cast %304 : i32 to index
    %c0_77 = arith.constant 0 : index
    %312 = vector.load %arg8[%311, %c0_77] : memref<64x1024xf32, #tpu.memory_space<vmem>>, vector<8x1024xf32>
    %313 = vector.extract_strided_slice %310 {offsets = [0, 0], sizes = [8, 512], strides = [1, 1]} : vector<8x1024xf32> to vector<8x512xf32>
    %314 = vector.extract_strided_slice %308 {offsets = [0, 0], sizes = [8, 512], strides = [1, 1]} : vector<8x1024xf32> to vector<8x512xf32>
    %315 = arith.addf %313, %314 : vector<8x512xf32>
    %316 = vector.extract_strided_slice %315 {offsets = [0, 0], sizes = [8, 128], strides = [1, 1]} : vector<8x512xf32> to vector<8x128xf32>
    %317 = arith.negf %316 : vector<8x128xf32>
    %318 = math.exp %317 : vector<8x128xf32>
    %cst_78 = arith.constant 1.000000e+00 : f32
    %319 = vector.broadcast %cst_78 : f32 to vector<8x128xf32>
    %320 = arith.addf %319, %318 : vector<8x128xf32>
    %321 = arith.divf %319, %320 : vector<8x128xf32>
    %322 = vector.extract_strided_slice %315 {offsets = [0, 128], sizes = [8, 128], strides = [1, 1]} : vector<8x512xf32> to vector<8x128xf32>
    %323 = arith.negf %322 : vector<8x128xf32>
    %324 = math.exp %323 : vector<8x128xf32>
    %cst_79 = arith.constant 1.000000e+00 : f32
    %325 = vector.broadcast %cst_79 : f32 to vector<8x128xf32>
    %326 = arith.addf %325, %324 : vector<8x128xf32>
    %327 = arith.divf %325, %326 : vector<8x128xf32>
    %328 = vector.extract_strided_slice %315 {offsets = [0, 256], sizes = [8, 128], strides = [1, 1]} : vector<8x512xf32> to vector<8x128xf32>
    %329 = math.tanh %328 : vector<8x128xf32>
    %330 = vector.extract_strided_slice %315 {offsets = [0, 384], sizes = [8, 128], strides = [1, 1]} : vector<8x512xf32> to vector<8x128xf32>
    %331 = arith.negf %330 : vector<8x128xf32>
    %332 = math.exp %331 : vector<8x128xf32>
    %cst_80 = arith.constant 1.000000e+00 : f32
    %333 = vector.broadcast %cst_80 : f32 to vector<8x128xf32>
    %334 = arith.addf %333, %332 : vector<8x128xf32>
    %335 = arith.divf %333, %334 : vector<8x128xf32>
    %336 = arith.mulf %327, %265 : vector<8x128xf32>
    %337 = arith.mulf %321, %329 : vector<8x128xf32>
    %338 = arith.addf %336, %337 : vector<8x128xf32>
    %339 = math.tanh %338 : vector<8x128xf32>
    %340 = arith.mulf %335, %339 : vector<8x128xf32>
    %341 = vector.extract_strided_slice %312 {offsets = [0, 512], sizes = [8, 512], strides = [1, 1]} : vector<8x1024xf32> to vector<8x512xf32>
    %342 = vector.extract_strided_slice %308 {offsets = [0, 512], sizes = [8, 512], strides = [1, 1]} : vector<8x1024xf32> to vector<8x512xf32>
    %343 = arith.addf %341, %342 : vector<8x512xf32>
    %344 = vector.extract_strided_slice %343 {offsets = [0, 0], sizes = [8, 128], strides = [1, 1]} : vector<8x512xf32> to vector<8x128xf32>
    %345 = arith.negf %344 : vector<8x128xf32>
    %346 = math.exp %345 : vector<8x128xf32>
    %cst_81 = arith.constant 1.000000e+00 : f32
    %347 = vector.broadcast %cst_81 : f32 to vector<8x128xf32>
    %348 = arith.addf %347, %346 : vector<8x128xf32>
    %349 = arith.divf %347, %348 : vector<8x128xf32>
    %350 = vector.extract_strided_slice %343 {offsets = [0, 128], sizes = [8, 128], strides = [1, 1]} : vector<8x512xf32> to vector<8x128xf32>
    %351 = arith.negf %350 : vector<8x128xf32>
    %352 = math.exp %351 : vector<8x128xf32>
    %cst_82 = arith.constant 1.000000e+00 : f32
    %353 = vector.broadcast %cst_82 : f32 to vector<8x128xf32>
    %354 = arith.addf %353, %352 : vector<8x128xf32>
    %355 = arith.divf %353, %354 : vector<8x128xf32>
    %356 = vector.extract_strided_slice %343 {offsets = [0, 256], sizes = [8, 128], strides = [1, 1]} : vector<8x512xf32> to vector<8x128xf32>
    %357 = math.tanh %356 : vector<8x128xf32>
    %358 = vector.extract_strided_slice %343 {offsets = [0, 384], sizes = [8, 128], strides = [1, 1]} : vector<8x512xf32> to vector<8x128xf32>
    %359 = arith.negf %358 : vector<8x128xf32>
    %360 = math.exp %359 : vector<8x128xf32>
    %cst_83 = arith.constant 1.000000e+00 : f32
    %361 = vector.broadcast %cst_83 : f32 to vector<8x128xf32>
    %362 = arith.addf %361, %360 : vector<8x128xf32>
    %363 = arith.divf %361, %362 : vector<8x128xf32>
    %364 = arith.mulf %355, %293 : vector<8x128xf32>
    %365 = arith.mulf %349, %357 : vector<8x128xf32>
    %366 = arith.addf %364, %365 : vector<8x128xf32>
    %367 = math.tanh %366 : vector<8x128xf32>
    %368 = arith.mulf %363, %367 : vector<8x128xf32>
    %369 = arith.index_cast %301 : i32 to index
    %c0_84 = arith.constant 0 : index
    %370 = vector.load %arg9[%369, %c0_84] : memref<64x128xf32, #tpu.memory_space<vmem>>, vector<8x128xf32>
    tpu.vector_store %arg9[%369, %c0_84], %340 {strides = array<i32>} : memref<64x128xf32, #tpu.memory_space<vmem>>, vector<8x128xf32>,
    %371 = arith.index_cast %304 : i32 to index
    %c0_85 = arith.constant 0 : index
    %372 = vector.load %arg10[%371, %c0_85] : memref<64x128xf32, #tpu.memory_space<vmem>>, vector<8x128xf32>
    tpu.vector_store %arg10[%371, %c0_85], %368 {strides = array<i32>} : memref<64x128xf32, #tpu.memory_space<vmem>>, vector<8x128xf32>,
    %c5_i32 = arith.constant 5 : i32
    %c8_i32_86 = arith.constant 8 : i32
    %373 = arith.muli %c5_i32, %c8_i32_86 : i32
    %374 = tpu.assume_multiple %373, 8 : i32
    %c7_i32_87 = arith.constant 7 : i32
    %375 = arith.subi %c7_i32_87, %c5_i32 : i32
    %c8_i32_88 = arith.constant 8 : i32
    %376 = arith.muli %375, %c8_i32_88 : i32
    %377 = tpu.assume_multiple %376, 8 : i32
    %378 = tpu.concatenate %340, %368 in 1 : vector<8x128xf32>, vector<8x128xf32> -> vector<8x256xf32>
    %379 = arith.truncf %378 : vector<8x256xf32> to vector<8x256xbf16>
    %c0_89 = arith.constant 0 : index
    %c0_90 = arith.constant 0 : index
    %380 = vector.load %arg2[%c0_89, %c0_90] : memref<256x1024xbf16, #tpu.memory_space<vmem>>, vector<256x1024xbf16>
    %cst_91 = arith.constant dense<0.000000e+00> : vector<8x1024xf32>
    %381 = tpu.matmul %379, %380, %cst_91 {dimension_numbers = #tpu.dot_dimension_numbers<[1], [0], [0], [1], [0, 0, 1, 1], [], []>} : vector<8x256xbf16>, vector<256x1024xbf16>, vector<8x1024xf32> -> vector<8x1024xf32>
    %382 = arith.index_cast %374 : i32 to index
    %c0_92 = arith.constant 0 : index
    %383 = vector.load %arg8[%382, %c0_92] : memref<64x1024xf32, #tpu.memory_space<vmem>>, vector<8x1024xf32>
    %384 = arith.index_cast %377 : i32 to index
    %c0_93 = arith.constant 0 : index
    %385 = vector.load %arg8[%384, %c0_93] : memref<64x1024xf32, #tpu.memory_space<vmem>>, vector<8x1024xf32>
    %386 = vector.extract_strided_slice %383 {offsets = [0, 0], sizes = [8, 512], strides = [1, 1]} : vector<8x1024xf32> to vector<8x512xf32>
    %387 = vector.extract_strided_slice %381 {offsets = [0, 0], sizes = [8, 512], strides = [1, 1]} : vector<8x1024xf32> to vector<8x512xf32>
    %388 = arith.addf %386, %387 : vector<8x512xf32>
    %389 = vector.extract_strided_slice %388 {offsets = [0, 0], sizes = [8, 128], strides = [1, 1]} : vector<8x512xf32> to vector<8x128xf32>
    %390 = arith.negf %389 : vector<8x128xf32>
    %391 = math.exp %390 : vector<8x128xf32>
    %cst_94 = arith.constant 1.000000e+00 : f32
    %392 = vector.broadcast %cst_94 : f32 to vector<8x128xf32>
    %393 = arith.addf %392, %391 : vector<8x128xf32>
    %394 = arith.divf %392, %393 : vector<8x128xf32>
    %395 = vector.extract_strided_slice %388 {offsets = [0, 128], sizes = [8, 128], strides = [1, 1]} : vector<8x512xf32> to vector<8x128xf32>
    %396 = arith.negf %395 : vector<8x128xf32>
    %397 = math.exp %396 : vector<8x128xf32>
    %cst_95 = arith.constant 1.000000e+00 : f32
    %398 = vector.broadcast %cst_95 : f32 to vector<8x128xf32>
    %399 = arith.addf %398, %397 : vector<8x128xf32>
    %400 = arith.divf %398, %399 : vector<8x128xf32>
    %401 = vector.extract_strided_slice %388 {offsets = [0, 256], sizes = [8, 128], strides = [1, 1]} : vector<8x512xf32> to vector<8x128xf32>
    %402 = math.tanh %401 : vector<8x128xf32>
    %403 = vector.extract_strided_slice %388 {offsets = [0, 384], sizes = [8, 128], strides = [1, 1]} : vector<8x512xf32> to vector<8x128xf32>
    %404 = arith.negf %403 : vector<8x128xf32>
    %405 = math.exp %404 : vector<8x128xf32>
    %cst_96 = arith.constant 1.000000e+00 : f32
    %406 = vector.broadcast %cst_96 : f32 to vector<8x128xf32>
    %407 = arith.addf %406, %405 : vector<8x128xf32>
    %408 = arith.divf %406, %407 : vector<8x128xf32>
    %409 = arith.mulf %400, %338 : vector<8x128xf32>
    %410 = arith.mulf %394, %402 : vector<8x128xf32>
    %411 = arith.addf %409, %410 : vector<8x128xf32>
    %412 = math.tanh %411 : vector<8x128xf32>
    %413 = arith.mulf %408, %412 : vector<8x128xf32>
    %414 = vector.extract_strided_slice %385 {offsets = [0, 512], sizes = [8, 512], strides = [1, 1]} : vector<8x1024xf32> to vector<8x512xf32>
    %415 = vector.extract_strided_slice %381 {offsets = [0, 512], sizes = [8, 512], strides = [1, 1]} : vector<8x1024xf32> to vector<8x512xf32>
    %416 = arith.addf %414, %415 : vector<8x512xf32>
    %417 = vector.extract_strided_slice %416 {offsets = [0, 0], sizes = [8, 128], strides = [1, 1]} : vector<8x512xf32> to vector<8x128xf32>
    %418 = arith.negf %417 : vector<8x128xf32>
    %419 = math.exp %418 : vector<8x128xf32>
    %cst_97 = arith.constant 1.000000e+00 : f32
    %420 = vector.broadcast %cst_97 : f32 to vector<8x128xf32>
    %421 = arith.addf %420, %419 : vector<8x128xf32>
    %422 = arith.divf %420, %421 : vector<8x128xf32>
    %423 = vector.extract_strided_slice %416 {offsets = [0, 128], sizes = [8, 128], strides = [1, 1]} : vector<8x512xf32> to vector<8x128xf32>
    %424 = arith.negf %423 : vector<8x128xf32>
    %425 = math.exp %424 : vector<8x128xf32>
    %cst_98 = arith.constant 1.000000e+00 : f32
    %426 = vector.broadcast %cst_98 : f32 to vector<8x128xf32>
    %427 = arith.addf %426, %425 : vector<8x128xf32>
    %428 = arith.divf %426, %427 : vector<8x128xf32>
    %429 = vector.extract_strided_slice %416 {offsets = [0, 256], sizes = [8, 128], strides = [1, 1]} : vector<8x512xf32> to vector<8x128xf32>
    %430 = math.tanh %429 : vector<8x128xf32>
    %431 = vector.extract_strided_slice %416 {offsets = [0, 384], sizes = [8, 128], strides = [1, 1]} : vector<8x512xf32> to vector<8x128xf32>
    %432 = arith.negf %431 : vector<8x128xf32>
    %433 = math.exp %432 : vector<8x128xf32>
    %cst_99 = arith.constant 1.000000e+00 : f32
    %434 = vector.broadcast %cst_99 : f32 to vector<8x128xf32>
    %435 = arith.addf %434, %433 : vector<8x128xf32>
    %436 = arith.divf %434, %435 : vector<8x128xf32>
    %437 = arith.mulf %428, %366 : vector<8x128xf32>
    %438 = arith.mulf %422, %430 : vector<8x128xf32>
    %439 = arith.addf %437, %438 : vector<8x128xf32>
    %440 = math.tanh %439 : vector<8x128xf32>
    %441 = arith.mulf %436, %440 : vector<8x128xf32>
    %442 = arith.index_cast %374 : i32 to index
    %c0_100 = arith.constant 0 : index
    %443 = vector.load %arg9[%442, %c0_100] : memref<64x128xf32, #tpu.memory_space<vmem>>, vector<8x128xf32>
    tpu.vector_store %arg9[%442, %c0_100], %413 {strides = array<i32>} : memref<64x128xf32, #tpu.memory_space<vmem>>, vector<8x128xf32>,
    %444 = arith.index_cast %377 : i32 to index
    %c0_101 = arith.constant 0 : index
    %445 = vector.load %arg10[%444, %c0_101] : memref<64x128xf32, #tpu.memory_space<vmem>>, vector<8x128xf32>
    tpu.vector_store %arg10[%444, %c0_101], %441 {strides = array<i32>} : memref<64x128xf32, #tpu.memory_space<vmem>>, vector<8x128xf32>,
    %c6_i32 = arith.constant 6 : i32
    %c8_i32_102 = arith.constant 8 : i32
    %446 = arith.muli %c6_i32, %c8_i32_102 : i32
    %447 = tpu.assume_multiple %446, 8 : i32
    %c7_i32_103 = arith.constant 7 : i32
    %448 = arith.subi %c7_i32_103, %c6_i32 : i32
    %c8_i32_104 = arith.constant 8 : i32
    %449 = arith.muli %448, %c8_i32_104 : i32
    %450 = tpu.assume_multiple %449, 8 : i32
    %451 = tpu.concatenate %413, %441 in 1 : vector<8x128xf32>, vector<8x128xf32> -> vector<8x256xf32>
    %452 = arith.truncf %451 : vector<8x256xf32> to vector<8x256xbf16>
    %c0_105 = arith.constant 0 : index
    %c0_106 = arith.constant 0 : index
    %453 = vector.load %arg2[%c0_105, %c0_106] : memref<256x1024xbf16, #tpu.memory_space<vmem>>, vector<256x1024xbf16>
    %cst_107 = arith.constant dense<0.000000e+00> : vector<8x1024xf32>
    %454 = tpu.matmul %452, %453, %cst_107 {dimension_numbers = #tpu.dot_dimension_numbers<[1], [0], [0], [1], [0, 0, 1, 1], [], []>} : vector<8x256xbf16>, vector<256x1024xbf16>, vector<8x1024xf32> -> vector<8x1024xf32>
    %455 = arith.index_cast %447 : i32 to index
    %c0_108 = arith.constant 0 : index
    %456 = vector.load %arg8[%455, %c0_108] : memref<64x1024xf32, #tpu.memory_space<vmem>>, vector<8x1024xf32>
    %457 = arith.index_cast %450 : i32 to index
    %c0_109 = arith.constant 0 : index
    %458 = vector.load %arg8[%457, %c0_109] : memref<64x1024xf32, #tpu.memory_space<vmem>>, vector<8x1024xf32>
    %459 = vector.extract_strided_slice %456 {offsets = [0, 0], sizes = [8, 512], strides = [1, 1]} : vector<8x1024xf32> to vector<8x512xf32>
    %460 = vector.extract_strided_slice %454 {offsets = [0, 0], sizes = [8, 512], strides = [1, 1]} : vector<8x1024xf32> to vector<8x512xf32>
    %461 = arith.addf %459, %460 : vector<8x512xf32>
    %462 = vector.extract_strided_slice %461 {offsets = [0, 0], sizes = [8, 128], strides = [1, 1]} : vector<8x512xf32> to vector<8x128xf32>
    %463 = arith.negf %462 : vector<8x128xf32>
    %464 = math.exp %463 : vector<8x128xf32>
    %cst_110 = arith.constant 1.000000e+00 : f32
    %465 = vector.broadcast %cst_110 : f32 to vector<8x128xf32>
    %466 = arith.addf %465, %464 : vector<8x128xf32>
    %467 = arith.divf %465, %466 : vector<8x128xf32>
    %468 = vector.extract_strided_slice %461 {offsets = [0, 128], sizes = [8, 128], strides = [1, 1]} : vector<8x512xf32> to vector<8x128xf32>
    %469 = arith.negf %468 : vector<8x128xf32>
    %470 = math.exp %469 : vector<8x128xf32>
    %cst_111 = arith.constant 1.000000e+00 : f32
    %471 = vector.broadcast %cst_111 : f32 to vector<8x128xf32>
    %472 = arith.addf %471, %470 : vector<8x128xf32>
    %473 = arith.divf %471, %472 : vector<8x128xf32>
    %474 = vector.extract_strided_slice %461 {offsets = [0, 256], sizes = [8, 128], strides = [1, 1]} : vector<8x512xf32> to vector<8x128xf32>
    %475 = math.tanh %474 : vector<8x128xf32>
    %476 = vector.extract_strided_slice %461 {offsets = [0, 384], sizes = [8, 128], strides = [1, 1]} : vector<8x512xf32> to vector<8x128xf32>
    %477 = arith.negf %476 : vector<8x128xf32>
    %478 = math.exp %477 : vector<8x128xf32>
    %cst_112 = arith.constant 1.000000e+00 : f32
    %479 = vector.broadcast %cst_112 : f32 to vector<8x128xf32>
    %480 = arith.addf %479, %478 : vector<8x128xf32>
    %481 = arith.divf %479, %480 : vector<8x128xf32>
    %482 = arith.mulf %473, %411 : vector<8x128xf32>
    %483 = arith.mulf %467, %475 : vector<8x128xf32>
    %484 = arith.addf %482, %483 : vector<8x128xf32>
    %485 = math.tanh %484 : vector<8x128xf32>
    %486 = arith.mulf %481, %485 : vector<8x128xf32>
    %487 = vector.extract_strided_slice %458 {offsets = [0, 512], sizes = [8, 512], strides = [1, 1]} : vector<8x1024xf32> to vector<8x512xf32>
    %488 = vector.extract_strided_slice %454 {offsets = [0, 512], sizes = [8, 512], strides = [1, 1]} : vector<8x1024xf32> to vector<8x512xf32>
    %489 = arith.addf %487, %488 : vector<8x512xf32>
    %490 = vector.extract_strided_slice %489 {offsets = [0, 0], sizes = [8, 128], strides = [1, 1]} : vector<8x512xf32> to vector<8x128xf32>
    %491 = arith.negf %490 : vector<8x128xf32>
    %492 = math.exp %491 : vector<8x128xf32>
    %cst_113 = arith.constant 1.000000e+00 : f32
    %493 = vector.broadcast %cst_113 : f32 to vector<8x128xf32>
    %494 = arith.addf %493, %492 : vector<8x128xf32>
    %495 = arith.divf %493, %494 : vector<8x128xf32>
    %496 = vector.extract_strided_slice %489 {offsets = [0, 128], sizes = [8, 128], strides = [1, 1]} : vector<8x512xf32> to vector<8x128xf32>
    %497 = arith.negf %496 : vector<8x128xf32>
    %498 = math.exp %497 : vector<8x128xf32>
    %cst_114 = arith.constant 1.000000e+00 : f32
    %499 = vector.broadcast %cst_114 : f32 to vector<8x128xf32>
    %500 = arith.addf %499, %498 : vector<8x128xf32>
    %501 = arith.divf %499, %500 : vector<8x128xf32>
    %502 = vector.extract_strided_slice %489 {offsets = [0, 256], sizes = [8, 128], strides = [1, 1]} : vector<8x512xf32> to vector<8x128xf32>
    %503 = math.tanh %502 : vector<8x128xf32>
    %504 = vector.extract_strided_slice %489 {offsets = [0, 384], sizes = [8, 128], strides = [1, 1]} : vector<8x512xf32> to vector<8x128xf32>
    %505 = arith.negf %504 : vector<8x128xf32>
    %506 = math.exp %505 : vector<8x128xf32>
    %cst_115 = arith.constant 1.000000e+00 : f32
    %507 = vector.broadcast %cst_115 : f32 to vector<8x128xf32>
    %508 = arith.addf %507, %506 : vector<8x128xf32>
    %509 = arith.divf %507, %508 : vector<8x128xf32>
    %510 = arith.mulf %501, %439 : vector<8x128xf32>
    %511 = arith.mulf %495, %503 : vector<8x128xf32>
    %512 = arith.addf %510, %511 : vector<8x128xf32>
    %513 = math.tanh %512 : vector<8x128xf32>
    %514 = arith.mulf %509, %513 : vector<8x128xf32>
    %515 = arith.index_cast %447 : i32 to index
    %c0_116 = arith.constant 0 : index
    %516 = vector.load %arg9[%515, %c0_116] : memref<64x128xf32, #tpu.memory_space<vmem>>, vector<8x128xf32>
    tpu.vector_store %arg9[%515, %c0_116], %486 {strides = array<i32>} : memref<64x128xf32, #tpu.memory_space<vmem>>, vector<8x128xf32>,
    %517 = arith.index_cast %450 : i32 to index
    %c0_117 = arith.constant 0 : index
    %518 = vector.load %arg10[%517, %c0_117] : memref<64x128xf32, #tpu.memory_space<vmem>>, vector<8x128xf32>
    tpu.vector_store %arg10[%517, %c0_117], %514 {strides = array<i32>} : memref<64x128xf32, #tpu.memory_space<vmem>>, vector<8x128xf32>,
    %c7_i32_118 = arith.constant 7 : i32
    %c8_i32_119 = arith.constant 8 : i32
    %519 = arith.muli %c7_i32_118, %c8_i32_119 : i32
    %520 = tpu.assume_multiple %519, 8 : i32
    %c7_i32_120 = arith.constant 7 : i32
    %521 = arith.subi %c7_i32_120, %c7_i32_118 : i32
    %c8_i32_121 = arith.constant 8 : i32
    %522 = arith.muli %521, %c8_i32_121 : i32
    %523 = tpu.assume_multiple %522, 8 : i32
    %524 = tpu.concatenate %486, %514 in 1 : vector<8x128xf32>, vector<8x128xf32> -> vector<8x256xf32>
    %525 = arith.truncf %524 : vector<8x256xf32> to vector<8x256xbf16>
    %c0_122 = arith.constant 0 : index
    %c0_123 = arith.constant 0 : index
    %526 = vector.load %arg2[%c0_122, %c0_123] : memref<256x1024xbf16, #tpu.memory_space<vmem>>, vector<256x1024xbf16>
    %cst_124 = arith.constant dense<0.000000e+00> : vector<8x1024xf32>
    %527 = tpu.matmul %525, %526, %cst_124 {dimension_numbers = #tpu.dot_dimension_numbers<[1], [0], [0], [1], [0, 0, 1, 1], [], []>} : vector<8x256xbf16>, vector<256x1024xbf16>, vector<8x1024xf32> -> vector<8x1024xf32>
    %528 = arith.index_cast %520 : i32 to index
    %c0_125 = arith.constant 0 : index
    %529 = vector.load %arg8[%528, %c0_125] : memref<64x1024xf32, #tpu.memory_space<vmem>>, vector<8x1024xf32>
    %530 = arith.index_cast %523 : i32 to index
    %c0_126 = arith.constant 0 : index
    %531 = vector.load %arg8[%530, %c0_126] : memref<64x1024xf32, #tpu.memory_space<vmem>>, vector<8x1024xf32>
    %532 = vector.extract_strided_slice %529 {offsets = [0, 0], sizes = [8, 512], strides = [1, 1]} : vector<8x1024xf32> to vector<8x512xf32>
    %533 = vector.extract_strided_slice %527 {offsets = [0, 0], sizes = [8, 512], strides = [1, 1]} : vector<8x1024xf32> to vector<8x512xf32>
    %534 = arith.addf %532, %533 : vector<8x512xf32>
    %535 = vector.extract_strided_slice %534 {offsets = [0, 0], sizes = [8, 128], strides = [1, 1]} : vector<8x512xf32> to vector<8x128xf32>
    %536 = arith.negf %535 : vector<8x128xf32>
    %537 = math.exp %536 : vector<8x128xf32>
    %cst_127 = arith.constant 1.000000e+00 : f32
    %538 = vector.broadcast %cst_127 : f32 to vector<8x128xf32>
    %539 = arith.addf %538, %537 : vector<8x128xf32>
    %540 = arith.divf %538, %539 : vector<8x128xf32>
    %541 = vector.extract_strided_slice %534 {offsets = [0, 128], sizes = [8, 128], strides = [1, 1]} : vector<8x512xf32> to vector<8x128xf32>
    %542 = arith.negf %541 : vector<8x128xf32>
    %543 = math.exp %542 : vector<8x128xf32>
    %cst_128 = arith.constant 1.000000e+00 : f32
    %544 = vector.broadcast %cst_128 : f32 to vector<8x128xf32>
    %545 = arith.addf %544, %543 : vector<8x128xf32>
    %546 = arith.divf %544, %545 : vector<8x128xf32>
    %547 = vector.extract_strided_slice %534 {offsets = [0, 256], sizes = [8, 128], strides = [1, 1]} : vector<8x512xf32> to vector<8x128xf32>
    %548 = math.tanh %547 : vector<8x128xf32>
    %549 = vector.extract_strided_slice %534 {offsets = [0, 384], sizes = [8, 128], strides = [1, 1]} : vector<8x512xf32> to vector<8x128xf32>
    %550 = arith.negf %549 : vector<8x128xf32>
    %551 = math.exp %550 : vector<8x128xf32>
    %cst_129 = arith.constant 1.000000e+00 : f32
    %552 = vector.broadcast %cst_129 : f32 to vector<8x128xf32>
    %553 = arith.addf %552, %551 : vector<8x128xf32>
    %554 = arith.divf %552, %553 : vector<8x128xf32>
    %555 = arith.mulf %546, %484 : vector<8x128xf32>
    %556 = arith.mulf %540, %548 : vector<8x128xf32>
    %557 = arith.addf %555, %556 : vector<8x128xf32>
    %558 = math.tanh %557 : vector<8x128xf32>
    %559 = arith.mulf %554, %558 : vector<8x128xf32>
    %560 = vector.extract_strided_slice %531 {offsets = [0, 512], sizes = [8, 512], strides = [1, 1]} : vector<8x1024xf32> to vector<8x512xf32>
    %561 = vector.extract_strided_slice %527 {offsets = [0, 512], sizes = [8, 512], strides = [1, 1]} : vector<8x1024xf32> to vector<8x512xf32>
    %562 = arith.addf %560, %561 : vector<8x512xf32>
    %563 = vector.extract_strided_slice %562 {offsets = [0, 0], sizes = [8, 128], strides = [1, 1]} : vector<8x512xf32> to vector<8x128xf32>
    %564 = arith.negf %563 : vector<8x128xf32>
    %565 = math.exp %564 : vector<8x128xf32>
    %cst_130 = arith.constant 1.000000e+00 : f32
    %566 = vector.broadcast %cst_130 : f32 to vector<8x128xf32>
    %567 = arith.addf %566, %565 : vector<8x128xf32>
    %568 = arith.divf %566, %567 : vector<8x128xf32>
    %569 = vector.extract_strided_slice %562 {offsets = [0, 128], sizes = [8, 128], strides = [1, 1]} : vector<8x512xf32> to vector<8x128xf32>
    %570 = arith.negf %569 : vector<8x128xf32>
    %571 = math.exp %570 : vector<8x128xf32>
    %cst_131 = arith.constant 1.000000e+00 : f32
    %572 = vector.broadcast %cst_131 : f32 to vector<8x128xf32>
    %573 = arith.addf %572, %571 : vector<8x128xf32>
    %574 = arith.divf %572, %573 : vector<8x128xf32>
    %575 = vector.extract_strided_slice %562 {offsets = [0, 256], sizes = [8, 128], strides = [1, 1]} : vector<8x512xf32> to vector<8x128xf32>
    %576 = math.tanh %575 : vector<8x128xf32>
    %577 = vector.extract_strided_slice %562 {offsets = [0, 384], sizes = [8, 128], strides = [1, 1]} : vector<8x512xf32> to vector<8x128xf32>
    %578 = arith.negf %577 : vector<8x128xf32>
    %579 = math.exp %578 : vector<8x128xf32>
    %cst_132 = arith.constant 1.000000e+00 : f32
    %580 = vector.broadcast %cst_132 : f32 to vector<8x128xf32>
    %581 = arith.addf %580, %579 : vector<8x128xf32>
    %582 = arith.divf %580, %581 : vector<8x128xf32>
    %583 = arith.mulf %574, %512 : vector<8x128xf32>
    %584 = arith.mulf %568, %576 : vector<8x128xf32>
    %585 = arith.addf %583, %584 : vector<8x128xf32>
    %586 = math.tanh %585 : vector<8x128xf32>
    %587 = arith.mulf %582, %586 : vector<8x128xf32>
    %588 = arith.index_cast %520 : i32 to index
    %c0_133 = arith.constant 0 : index
    %589 = vector.load %arg9[%588, %c0_133] : memref<64x128xf32, #tpu.memory_space<vmem>>, vector<8x128xf32>
    tpu.vector_store %arg9[%588, %c0_133], %559 {strides = array<i32>} : memref<64x128xf32, #tpu.memory_space<vmem>>, vector<8x128xf32>,
    %590 = arith.index_cast %523 : i32 to index
    %c0_134 = arith.constant 0 : index
    %591 = vector.load %arg10[%590, %c0_134] : memref<64x128xf32, #tpu.memory_space<vmem>>, vector<8x128xf32>
    tpu.vector_store %arg10[%590, %c0_134], %587 {strides = array<i32>} : memref<64x128xf32, #tpu.memory_space<vmem>>, vector<8x128xf32>,
    %c8_i32_135 = arith.constant 8 : i32
    %c0_136 = arith.constant 0 : index
    %c0_137 = arith.constant 0 : index
    %592 = vector.load %arg9[%c0_136, %c0_137] : memref<64x128xf32, #tpu.memory_space<vmem>>, vector<64x128xf32>
    %593 = arith.truncf %592 : vector<64x128xf32> to vector<64x128xbf16>
    %c0_138 = arith.constant 0 : index
    %c0_139 = arith.constant 0 : index
    %594 = vector.load %arg4[%c0_138, %c0_139] : memref<128x128xbf16, #tpu.memory_space<vmem>>, vector<128x128xbf16>
    %cst_140 = arith.constant dense<0.000000e+00> : vector<64x128xf32>
    %595 = tpu.matmul %593, %594, %cst_140 {dimension_numbers = #tpu.dot_dimension_numbers<[1], [0], [0], [1], [0, 0, 1, 1], [], []>} : vector<64x128xbf16>, vector<128x128xbf16>, vector<64x128xf32> -> vector<64x128xf32>
    %c0_141 = arith.constant 0 : index
    %c0_142 = arith.constant 0 : index
    %596 = vector.load %arg10[%c0_141, %c0_142] : memref<64x128xf32, #tpu.memory_space<vmem>>, vector<64x128xf32>
    %597 = arith.truncf %596 : vector<64x128xf32> to vector<64x128xbf16>
    %c0_143 = arith.constant 0 : index
    %c0_144 = arith.constant 0 : index
    %598 = vector.load %arg5[%c0_143, %c0_144] : memref<128x128xbf16, #tpu.memory_space<vmem>>, vector<128x128xbf16>
    %cst_145 = arith.constant dense<0.000000e+00> : vector<64x128xf32>
    %599 = tpu.matmul %597, %598, %cst_145 {dimension_numbers = #tpu.dot_dimension_numbers<[1], [0], [0], [1], [0, 0, 1, 1], [], []>} : vector<64x128xbf16>, vector<128x128xbf16>, vector<64x128xf32> -> vector<64x128xf32>
    %600 = arith.addf %595, %599 : vector<64x128xf32>
    %c0_146 = arith.constant 0 : index
    %c0_147 = arith.constant 0 : index
    %601 = vector.load %arg6[%c0_146, %c0_147] : memref<1x128xf32, #tpu.memory_space<vmem>>, vector<1x128xf32>
    %602 = vector.broadcast %601 : vector<1x128xf32> to vector<64x128xf32>
    %603 = arith.addf %600, %602 : vector<64x128xf32>
    %c0_148 = arith.constant 0 : index
    %c0_149 = arith.constant 0 : index
    %604 = vector.load %arg7[%c0_148, %c0_149] : memref<64x128xf32, #tpu.memory_space<vmem>>, vector<64x128xf32>
    tpu.vector_store %arg7[%c0_148, %c0_149], %603 {strides = array<i32>} : memref<64x128xf32, #tpu.memory_space<vmem>>, vector<64x128xf32>,
    return
  }
}

</mosaic_0001>

<bundles_post_ra>
// kernel: bilstm_block.1
= control target key start
LH: loop header
LB: loop body
LE: loop exit
PB: predicated region body
PF: predicated region fallthrough
CT: control target
= control target key end

     0   :  { %s23823_s1 = inlined_call_operand.vmem [shape: bf16[128,1024], index: 1, kind: input, shape index: {}]   ;;  %s23824_s0 = inlined_call_operand.vmem [shape: bf16[64,128], index: 0, kind: input, shape index: {}]   ;;  %s23825_s2 = inlined_call_operand.vmem [shape: bf16[256,1024], index: 2, kind: input, shape index: {}]   ;;  %s23826_s3 = inlined_call_operand.vmem [shape: f32[1,1024], index: 3, kind: input, shape index: {}]   ;;  %s23827_s4 = inlined_call_operand.vmem [shape: bf16[128,128], index: 4, kind: input, shape index: {}]   ;;  %s23828_s5 = inlined_call_operand.vmem [shape: bf16[128,128], index: 5, kind: input, shape index: {}]   ;;  %s23829_s6 = inlined_call_operand.vmem [shape: f32[1,128], index: 6, kind: input, shape index: {}]   ;;  %s23830_s7 = inlined_call_operand.vmem [shape: f32[64,128], index: 7, kind: output, shape index: {}]  }
   0x1   :  { %v10252_v0 = vld [vmem:[%s23823_s1 + $0x1c0] sm:$0xf]  ;;  %v14550_v2 = vld [vmem:[%s23823_s1 + $0x1c4] sm:$0xf]  ;;  %v10260_v46 = vld [vmem:[%s23823_s1 + $0x1c8] sm:$0xf] }
   0x2   :  { %v14554_v1 = vld [vmem:[%s23823_s1 + $0x1dc] sm:$0xf0]  ;;  %v10254_v4 = vld [vmem:[%s23823_s1 + $0x1e0] sm:$0xf0]  ;;  %v14555_v47 = vld [vmem:[%s23823_s1 + $0x1e4] sm:$0xf0] }
   0x3   :  { %v10253_v3 = vor.u32 %v14554_v1, %v10252_v0  ;;  %v10220_v5 = vld [vmem:[%s23823_s1 + $0x180] sm:$0xf]  ;;  %v10257_v7 = vor.u32 %v14550_v2, %v10254_v4  ;;  %v14542_v8 = vld [vmem:[%s23823_s1 + $0x184] sm:$0xf]  ;;  %v14551_v48 = vld [vmem:[%s23823_s1 + $0x1cc] sm:$0xf]  ;;  %v10261_v56 = vor.u32 %v14555_v47, %v10260_v46 }
   0x4   :  { %v14546_v6 = vld [vmem:[%s23823_s1 + $0x19c] sm:$0xf0]  ;;  %v10222_v9 = vld [vmem:[%s23823_s1 + $0x1a0] sm:$0xf0]  ;;  %v10262_v49 = vld [vmem:[%s23823_s1 + $0x1e8] sm:$0xf0] }
   0x5   :  { %460 = vmatpush.bf16.msra.mxu0 %v10253_v3  ;;  %15598 = vmatpush.bf16.msra.mxu2 %v10253_v3  ;;  %v10221_v10 = vor.u32 %v14546_v6, %v10220_v5  ;;  %v10225_v11 = vor.u32 %v14542_v8, %v10222_v9  ;;  %v10188_v12 = vld [vmem:[%s23823_s1 + $0x140] sm:$0xf]  ;;  %v14534_v14 = vld [vmem:[%s23823_s1 + $0x144] sm:$0xf]  ;;  %v16031_v53 = vld [vmem:[%s23824_s0 + $0x10] sm:$0xff]  ;;  %v10265_v57 = vor.u32 %v14551_v48, %v10262_v49 }
   0x6   :  { %489 = vmatpush.bf16.msra.mxu1 %v10257_v7  ;;  %15606 = vmatpush.bf16.msra.mxu3 %v10257_v7  ;;  %v14538_v13 = vld [vmem:[%s23823_s1 + $0x15c] sm:$0xf0]  ;;  %v10190_v15 = vld [vmem:[%s23823_s1 + $0x160] sm:$0xf0]  ;;  %v10268_v54 = vld [vmem:[%s23823_s1 + $0x1d0] sm:$0xf] }
   0x7   :  { %v10189_v16 = vor.u32 %v14538_v13, %v10188_v12  ;;  %v10193_v17 = vor.u32 %v14534_v14, %v10190_v15  ;;  %v10156_v18 = vld [vmem:[%s23823_s1 + $0x100] sm:$0xf]  ;;  %v14526_v20 = vld [vmem:[%s23823_s1 + $0x104] sm:$0xf]  ;;  %v14556_v55 = vld [vmem:[%s23823_s1 + $0x1ec] sm:$0xf0] }
   0x8   :  { %v14530_v19 = vld [vmem:[%s23823_s1 + $0x11c] sm:$0xf0]  ;;  %v10158_v21 = vld [vmem:[%s23823_s1 + $0x120] sm:$0xf0]  ;;  %v14552_v58 = vld [vmem:[%s23823_s1 + $0x1d4] sm:$0xf]  ;;  %v10269_v0 = vor.u32 %v14556_v55, %v10268_v54 }
   0x9   :  { %461 = vmatpush.bf16.msra.mxu0 %v10221_v10  ;;  %15599 = vmatpush.bf16.msra.mxu2 %v10221_v10  ;;  %v10157_v22 = vor.u32 %v14530_v19, %v10156_v18  ;;  %v10161_v23 = vor.u32 %v14526_v20, %v10158_v21  ;;  %v10124_v24 = vld [vmem:[%s23823_s1 + $0xc0] sm:$0xf]  ;;  %v14518_v26 = vld [vmem:[%s23823_s1 + $0xc4] sm:$0xf]  ;;  %v10270_v59 = vld [vmem:[%s23823_s1 + $0x1f0] sm:$0xf0] }
   0xa   :  { %490 = vmatpush.bf16.msra.mxu1 %v10225_v11  ;;  %15607 = vmatpush.bf16.msra.mxu3 %v10225_v11  ;;  %v14522_v25 = vld [vmem:[%s23823_s1 + $0xdc] sm:$0xf0]  ;;  %v10126_v27 = vld [vmem:[%s23823_s1 + $0xe0] sm:$0xf0]  ;;  %v10228_v60 = vld [vmem:[%s23823_s1 + $0x188] sm:$0xf]  ;;  %v10273_v1 = vor.u32 %v14552_v58, %v10270_v59 }
   0xb   :  { %v10125_v28 = vor.u32 %v14522_v25, %v10124_v24  ;;  %v10129_v29 = vor.u32 %v14518_v26, %v10126_v27  ;;  %v10092_v30 = vld [vmem:[%s23823_s1 + $0x80] sm:$0xf]  ;;  %v14510_v32 = vld [vmem:[%s23823_s1 + $0x84] sm:$0xf]  ;;  %v14547_v61 = vld [vmem:[%s23823_s1 + $0x1a4] sm:$0xf0] }
   0xc   :  { %v14514_v31 = vld [vmem:[%s23823_s1 + $0x9c] sm:$0xf0]  ;;  %v10094_v33 = vld [vmem:[%s23823_s1 + $0xa0] sm:$0xf0]  ;;  %v14543_v62 = vld [vmem:[%s23823_s1 + $0x18c] sm:$0xf]  ;;  %v10229_v4 = vor.u32 %v14547_v61, %v10228_v60 }
   0xd   :  { %462 = vmatpush.bf16.msra.mxu0 %v10189_v16  ;;  %15600 = vmatpush.bf16.msra.mxu2 %v10189_v16  ;;  %v10093_v34 = vor.u32 %v14514_v31, %v10092_v30  ;;  %v10097_v35 = vor.u32 %v14510_v32, %v10094_v33  ;;  %v10060_v36 = vld [vmem:[%s23823_s1 + $0x40] sm:$0xf]  ;;  %v14502_v38 = vld [vmem:[%s23823_s1 + $0x44] sm:$0xf]  ;;  %v10230_v63 = vld [vmem:[%s23823_s1 + $0x1a8] sm:$0xf0] }
   0xe   :  { %491 = vmatpush.bf16.msra.mxu1 %v10193_v17  ;;  %15608 = vmatpush.bf16.msra.mxu3 %v10193_v17  ;;  %v14506_v37 = vld [vmem:[%s23823_s1 + $0x5c] sm:$0xf0]  ;;  %v10062_v39 = vld [vmem:[%s23823_s1 + $0x60] sm:$0xf0]  ;;  %v10236_v2 = vld [vmem:[%s23823_s1 + $0x190] sm:$0xf]  ;;  %v10233_v5 = vor.u32 %v14543_v62, %v10230_v63 }
   0xf   :  { %v10061_v40 = vor.u32 %v14506_v37, %v10060_v36  ;;  %v10065_v41 = vor.u32 %v14502_v38, %v10062_v39  ;;  %v10028_v42 = vld [vmem:[%s23823_s1] sm:$0xf]  ;;  %v14494_v44 = vld [vmem:[%s23823_s1 + $0x4] sm:$0xf]  ;;  %v14548_v3 = vld [vmem:[%s23823_s1 + $0x1ac] sm:$0xf0] }
  0x10   :  { %v14498_v43 = vld [vmem:[%s23823_s1 + $0x1c] sm:$0xf0]  ;;  %v10030_v45 = vld [vmem:[%s23823_s1 + $0x20] sm:$0xf0]  ;;  %v14544_v6 = vld [vmem:[%s23823_s1 + $0x194] sm:$0xf]  ;;  %v10237_v12 = vor.u32 %v14548_v3, %v10236_v2 }
  0x11   :  { %463 = vmatpush.bf16.msra.mxu0 %v10157_v22  ;;  %15601 = vmatpush.bf16.msra.mxu2 %v10157_v22  ;;  %v10029_v50 = vor.u32 %v14498_v43, %v10028_v42  ;;  %v10033_v51 = vor.u32 %v14494_v44, %v10030_v45  ;;  %v16026_v52 = vld [vmem:[%s23824_s0] sm:$0xff]  ;;  %v10238_v7 = vld [vmem:[%s23823_s1 + $0x1b0] sm:$0xf0]  ;;  %v10196_v8 = vld [vmem:[%s23823_s1 + $0x148] sm:$0xf] }
  0x12   :  { %492 = vmatpush.bf16.msra.mxu1 %v10161_v23  ;;  %15609 = vmatpush.bf16.msra.mxu3 %v10161_v23  ;;  %v14539_v9 = vld [vmem:[%s23823_s1 + $0x164] sm:$0xf0]  ;;  %v14535_v10 = vld [vmem:[%s23823_s1 + $0x14c] sm:$0xf]  ;;  %v10241_v13 = vor.u32 %v14544_v6, %v10238_v7  ;;  %v10204_v14 = vld [vmem:[%s23823_s1 + $0x150] sm:$0xf] }
  0x13   :  { %v10198_v11 = vld [vmem:[%s23823_s1 + $0x168] sm:$0xf0]  ;;  %v14540_v15 = vld [vmem:[%s23823_s1 + $0x16c] sm:$0xf0]  ;;  %v10197_v16 = vor.u32 %v14539_v9, %v10196_v8  ;;  %v14536_v18 = vld [vmem:[%s23823_s1 + $0x154] sm:$0xf] }
  0x14   :  { %v10201_v17 = vor.u32 %v14535_v10, %v10198_v11  ;;  %v10206_v19 = vld [vmem:[%s23823_s1 + $0x170] sm:$0xf0]  ;;  %v10164_v20 = vld [vmem:[%s23823_s1 + $0x108] sm:$0xf]  ;;  %v14527_v22 = vld [vmem:[%s23823_s1 + $0x10c] sm:$0xf]  ;;  %v10205_v24 = vor.u32 %v14540_v15, %v10204_v14 }
  0x15   :  { %464 = vmatpush.bf16.msra.mxu0 %v10125_v28  ;;  %15602 = vmatpush.bf16.msra.mxu2 %v10125_v28  ;;  %v14531_v21 = vld [vmem:[%s23823_s1 + $0x124] sm:$0xf0]  ;;  %v10166_v23 = vld [vmem:[%s23823_s1 + $0x128] sm:$0xf0]  ;;  %v10209_v25 = vor.u32 %v14536_v18, %v10206_v19  ;;  %v10172_v26 = vld [vmem:[%s23823_s1 + $0x110] sm:$0xf] }
  0x16   :  { %493 = vmatpush.bf16.msra.mxu1 %v10129_v29  ;;  %15610 = vmatpush.bf16.msra.mxu3 %v10129_v29  ;;  %v14532_v27 = vld [vmem:[%s23823_s1 + $0x12c] sm:$0xf0]  ;;  %v10165_v28 = vor.u32 %v14531_v21, %v10164_v20  ;;  %v10169_v29 = vor.u32 %v14527_v22, %v10166_v23  ;;  %v14528_v30 = vld [vmem:[%s23823_s1 + $0x114] sm:$0xf]  ;;  %v10132_v32 = vld [vmem:[%s23823_s1 + $0xc8] sm:$0xf] }
  0x17   :  { %v10174_v31 = vld [vmem:[%s23823_s1 + $0x130] sm:$0xf0]  ;;  %v14523_v33 = vld [vmem:[%s23823_s1 + $0xe4] sm:$0xf0]  ;;  %v10173_v36 = vor.u32 %v14532_v27, %v10172_v26  ;;  %v16141_v39 = vld [vmem:[%s23824_s0 + $0x18] sm:$0xff] }
  0x18   :  { %v10177_v37 = vor.u32 %v14528_v30, %v10174_v31  ;;  %v16136_v38 = vld [vmem:[%s23824_s0 + $0x8] sm:$0xff]  ;;  %v10133_v42 = vor.u32 %v14523_v33, %v10132_v32  ;;  %v14520_v44 = vld [vmem:[%s23823_s1 + $0xd4] sm:$0xf]  ;;  %v10108_v54 = vld [vmem:[%s23823_s1 + $0x90] sm:$0xf] }
  0x19   :  { %465 = vmatpush.bf16.msra.mxu0 %v10093_v34  ;;  %15603 = vmatpush.bf16.msra.mxu2 %v10093_v34  ;;  %v14519_v34 = vld [vmem:[%s23823_s1 + $0xcc] sm:$0xf]  ;;  %v10142_v45 = vld [vmem:[%s23823_s1 + $0xf0] sm:$0xf0]  ;;  %v10100_v46 = vld [vmem:[%s23823_s1 + $0x88] sm:$0xf] }
  0x1a   :  { %494 = vmatpush.bf16.msra.mxu1 %v10097_v35  ;;  %15611 = vmatpush.bf16.msra.mxu3 %v10097_v35  ;;  %v10134_v35 = vld [vmem:[%s23823_s1 + $0xe8] sm:$0xf0]  ;;  %v14515_v47 = vld [vmem:[%s23823_s1 + $0xa4] sm:$0xf0]  ;;  %v14516_v55 = vld [vmem:[%s23823_s1 + $0xac] sm:$0xf0] }
  0x1b   :  { %v10137_v43 = vor.u32 %v14519_v34, %v10134_v35  ;;  %v14511_v48 = vld [vmem:[%s23823_s1 + $0x8c] sm:$0xf]  ;;  %v14512_v58 = vld [vmem:[%s23823_s1 + $0x94] sm:$0xf]  ;;  %v10068_v60 = vld [vmem:[%s23823_s1 + $0x48] sm:$0xf] }
  0x1c   :  { %v10102_v49 = vld [vmem:[%s23823_s1 + $0xa8] sm:$0xf0]  ;;  %v10110_v59 = vld [vmem:[%s23823_s1 + $0xb0] sm:$0xf0]  ;;  %v14507_v61 = vld [vmem:[%s23823_s1 + $0x64] sm:$0xf0] }
  0x1d   :  { %466 = vmatpush.bf16.msra.mxu0 %v10061_v40  ;;  %15604 = vmatpush.bf16.msra.mxu2 %v10061_v40  ;;  %v10140_v40 = vld [vmem:[%s23823_s1 + $0xd0] sm:$0xf]  ;;  %v14503_v62 = vld [vmem:[%s23823_s1 + $0x4c] sm:$0xf]  ;;  %v14504_v6 = vld [vmem:[%s23823_s1 + $0x54] sm:$0xf] }
  0x1e   :  { %495 = vmatpush.bf16.msra.mxu1 %v10065_v41  ;;  %15612 = vmatpush.bf16.msra.mxu3 %v10065_v41  ;;  %v14524_v41 = vld [vmem:[%s23823_s1 + $0xec] sm:$0xf0]  ;;  %v10070_v63 = vld [vmem:[%s23823_s1 + $0x68] sm:$0xf0]  ;;  %v10078_v7 = vld [vmem:[%s23823_s1 + $0x70] sm:$0xf0] }
  0x1f   :  { %v10076_v2 = vld [vmem:[%s23823_s1 + $0x50] sm:$0xf]  ;;  %v10036_v8 = vld [vmem:[%s23823_s1 + $0x8] sm:$0xf]  ;;  %v14495_v10 = vld [vmem:[%s23823_s1 + $0xc] sm:$0xf] }
  0x20   :  { %v14508_v3 = vld [vmem:[%s23823_s1 + $0x6c] sm:$0xf0]  ;;  %v14499_v9 = vld [vmem:[%s23823_s1 + $0x24] sm:$0xf0]  ;;  %v10038_v11 = vld [vmem:[%s23823_s1 + $0x28] sm:$0xf0] }
  0x21   :  { %467 = vmatpush.bf16.msra.mxu0 %v10029_v50  ;;  %15605 = vmatpush.bf16.msra.mxu2 %v10029_v50  ;;  %v10141_v50 = vor.u32 %v14524_v41, %v10140_v40  ;;  %v10044_v14 = vld [vmem:[%s23823_s1 + $0x10] sm:$0xf]  ;;  %v14496_v18 = vld [vmem:[%s23823_s1 + $0x14] sm:$0xf]  ;;  %v10508_v20 = vld [vmem:[%s23825_s2 + $0x1c0] sm:$0xf] }
  0x22   :  { %496 = vmatpush.bf16.msra.mxu1 %v10033_v51  ;;  %15613 = vmatpush.bf16.msra.mxu3 %v10033_v51  ;;  %v10145_v51 = vor.u32 %v14520_v44, %v10142_v45  ;;  %v14500_v15 = vld [vmem:[%s23823_s1 + $0x2c] sm:$0xf0]  ;;  %v10046_v19 = vld [vmem:[%s23823_s1 + $0x30] sm:$0xf0]  ;;  %v14618_v21 = vld [vmem:[%s23825_s2 + $0x1dc] sm:$0xf0] }
  0x23   :  { %v10764_v22 = vld [vmem:[%s23825_s2 + $0x3c0] sm:$0xf]  ;;  %v10509_v26 = vor.u32 %v14618_v21, %v10508_v20  ;;  %v10276_v40 = vld [vmem:[%s23823_s1 + $0x1d8] sm:$0xf]  ;;  %v10278_v44 = vld [vmem:[%s23823_s1 + $0x1f8] sm:$0xf0] }
  0x24   :  { %468 = vmatmul.bf16.vlgmr.msra.gmra.mxu0 %v16026_v52  ;;  %478 = vmatmul.bf16.vlgmr.msra.gmra.mxu2 %v16031_v53  ;;  %v14682_v23 = vld [vmem:[%s23825_s2 + $0x3dc] sm:$0xf0]  ;;  %v14557_v41 = vld [vmem:[%s23823_s1 + $0x1f4] sm:$0xf0] }
  0x25   :  { %518 = vmatpush.bf16.msrb.mxu2 %v10261_v56  ;;  %497 = vmatmul.bf16.vlgmr.msra.gmra.mxu1 %v16026_v52  ;;  %v10101_v56 = vor.u32 %v14515_v47, %v10100_v46  ;;  %v10765_v27 = vor.u32 %v14682_v23, %v10764_v22  ;;  %v10732_v30 = vld [vmem:[%s23825_s2 + $0x380] sm:$0xf] }
  0x26   :  { %547 = vmatpush.bf16.msrb.mxu3 %v10265_v57  ;;  %576 = vmatpush.bf16.msrb.mxu0 %v10269_v0  ;;  %v10105_v57 = vor.u32 %v14511_v48, %v10102_v49  ;;  %v10109_v0 = vor.u32 %v14516_v55, %v10108_v54  ;;  %v14674_v31 = vld [vmem:[%s23825_s2 + $0x39c] sm:$0xf0]  ;;  %v14549_v54 = vld [vmem:[%s23823_s1 + $0x1b4] sm:$0xf0] }
  0x27   :  { %507 = vmatmul.bf16.vlgmr.msra.gmra.mxu3 %v16031_v53  ;;  %605 = vmatpush.bf16.msrb.mxu1 %v10273_v1  ;;  %v10113_v1 = vor.u32 %v14512_v58, %v10110_v59  ;;  %v10733_v33 = vor.u32 %v14674_v31, %v10732_v30  ;;  %v10444_v34 = vld [vmem:[%s23825_s2 + $0x140] sm:$0xf]  ;;  %v10246_v58 = vld [vmem:[%s23823_s1 + $0x1b8] sm:$0xf0] }
  0x28   :  { %v14602_v35 = vld [vmem:[%s23825_s2 + $0x15c] sm:$0xf0] }
  0x29   :  { %519 = vmatpush.bf16.msrb.mxu2 %v10229_v4  ;;  %v10069_v4 = vor.u32 %v14507_v61, %v10068_v60  ;;  %v10412_v45 = vld [vmem:[%s23825_s2 + $0x100] sm:$0xf]  ;;  %v10445_v48 = vor.u32 %v14602_v35, %v10444_v34  ;;  %v10212_v60 = vld [vmem:[%s23823_s1 + $0x158] sm:$0xf] }
  0x2a   :  { %548 = vmatpush.bf16.msrb.mxu3 %v10233_v5  ;;  %577 = vmatpush.bf16.msrb.mxu0 %v10237_v12  ;;  %v10073_v5 = vor.u32 %v14503_v62, %v10070_v63  ;;  %v10077_v12 = vor.u32 %v14508_v3, %v10076_v2  ;;  %v14594_v46 = vld [vmem:[%s23825_s2 + $0x11c] sm:$0xf0]  ;;  %v14541_v61 = vld [vmem:[%s23823_s1 + $0x174] sm:$0xf0]  ;;  %v14537_v62 = vld [vmem:[%s23823_s1 + $0x15c] sm:$0xf] }
  0x2b   :  { %606 = vmatpush.bf16.msrb.mxu1 %v10241_v13  ;;  %v10081_v13 = vor.u32 %v14504_v6, %v10078_v7  ;;  %v14658_v55 = vld [vmem:[%s23825_s2 + $0x31c] sm:$0xf0]  ;;  %v10413_v63 = vor.u32 %v14594_v46, %v10412_v45  ;;  %v10214_v2 = vld [vmem:[%s23823_s1 + $0x178] sm:$0xf0]  ;;  %v10213_v6 = vor.u32 %v14541_v61, %v10212_v60  ;;  %v10116_v34 = vld [vmem:[%s23823_s1 + $0x98] sm:$0xf] }
  0x2c   :  { %v14586_v3 = vld [vmem:[%s23825_s2 + $0xdc] sm:$0xf0]  ;;  %v10217_v7 = vor.u32 %v14537_v62, %v10214_v2  ;;  %v14619_v46 = vld [vmem:[%s23825_s2 + $0x1e4] sm:$0xf0]  ;;  %v14501_v2 = vld [vmem:[%s23823_s1 + $0x34] sm:$0xf0] }
  0x2d   :  { %520 = vmatpush.bf16.msrb.mxu2 %v10197_v16  ;;  %v10037_v16 = vor.u32 %v14499_v9, %v10036_v8  ;;  %v14529_v8 = vld [vmem:[%s23823_s1 + $0x11c] sm:$0xf]  ;;  %v14570_v23 = vld [vmem:[%s23825_s2 + $0x5c] sm:$0xf0]  ;;  %v10484_v60 = vld [vmem:[%s23825_s2 + $0x188] sm:$0xf] }
  0x2e   :  { %549 = vmatpush.bf16.msrb.mxu3 %v10201_v17  ;;  %578 = vmatpush.bf16.msrb.mxu0 %v10205_v24  ;;  %v10041_v17 = vor.u32 %v14495_v10, %v10038_v11  ;;  %v10045_v24 = vor.u32 %v14500_v15, %v10044_v14  ;;  %v10182_v9 = vld [vmem:[%s23823_s1 + $0x138] sm:$0xf0]  ;;  %v14533_v14 = vld [vmem:[%s23823_s1 + $0x134] sm:$0xf0]  ;;  %v14578_v15 = vld [vmem:[%s23825_s2 + $0x9c] sm:$0xf0] }
  0x2f   :  { %607 = vmatpush.bf16.msrb.mxu1 %v10209_v25  ;;  %v10049_v25 = vor.u32 %v14496_v18, %v10046_v19  ;;  %v10185_v18 = vor.u32 %v14529_v8, %v10182_v9  ;;  %v10316_v19 = vld [vmem:[%s23825_s2 + $0x40] sm:$0xf]  ;;  %v14611_v61 = vld [vmem:[%s23825_s2 + $0x1a4] sm:$0xf0] }
  0x30   :  { %v10284_v30 = vld [vmem:[%s23825_s2] sm:$0xf]  ;;  %v10317_v35 = vor.u32 %v14570_v23, %v10316_v19  ;;  %v14603_v8 = vld [vmem:[%s23825_s2 + $0x164] sm:$0xf0]  ;;  %v10510_v19 = vld [vmem:[%s23825_s2 + $0x1e0] sm:$0xf0] }
  0x31   :  { %521 = vmatpush.bf16.msrb.mxu2 %v10165_v28  ;;  %v10476_v28 = vld [vmem:[%s23825_s2 + $0x180] sm:$0xf] }
  0x32   :  { %550 = vmatpush.bf16.msrb.mxu3 %v10169_v29  ;;  %579 = vmatpush.bf16.msrb.mxu0 %v10173_v36  ;;  %v14610_v29 = vld [vmem:[%s23825_s2 + $0x19c] sm:$0xf0] }
  0x33   :  { %608 = vmatpush.bf16.msrb.mxu1 %v10177_v37  ;;  %v10477_v32 = vor.u32 %v14610_v29, %v10476_v28  ;;  %v10700_v36 = vld [vmem:[%s23825_s2 + $0x340] sm:$0xf]  ;;  %v14521_v28 = vld [vmem:[%s23823_s1 + $0xdc] sm:$0xf] }
  0x34   :  { %473 = vmatmul.bf16.gmra.mxu0 %v16136_v38  ;;  %483 = vmatmul.bf16.gmra.mxu2 %v16141_v39  ;;  %v14666_v37 = vld [vmem:[%s23825_s2 + $0x35c] sm:$0xf0]  ;;  %v10150_v29 = vld [vmem:[%s23823_s1 + $0xf8] sm:$0xf0] }
  0x35   :  { %522 = vmatpush.bf16.msrb.mxu2 %v10133_v42  ;;  %502 = vmatmul.bf16.gmra.mxu1 %v16136_v38  ;;  %v10277_v42 = vor.u32 %v14557_v41, %v10276_v40  ;;  %v10701_v49 = vor.u32 %v14666_v37, %v10700_v36  ;;  %v14562_v31 = vld [vmem:[%s23825_s2 + $0x1c] sm:$0xf0]  ;;  %v14517_v37 = vld [vmem:[%s23823_s1 + $0xb4] sm:$0xf0]  ;;  %v14513_v40 = vld [vmem:[%s23823_s1 + $0x9c] sm:$0xf] }
  0x36   :  { %551 = vmatpush.bf16.msrb.mxu3 %v10137_v43  ;;  %580 = vmatpush.bf16.msrb.mxu0 %v10141_v50  ;;  %v14553_v43 = vld [vmem:[%s23823_s1 + $0x1dc] sm:$0xf]  ;;  %v10668_v50 = vld [vmem:[%s23825_s2 + $0x300] sm:$0xf] }
  0x37   :  { %512 = vmatmul.bf16.gmra.mxu3 %v16141_v39  ;;  %609 = vmatpush.bf16.msrb.mxu1 %v10145_v51  ;;  %v10281_v47 = vor.u32 %v14553_v43, %v10278_v44  ;;  %v10244_v51 = vld [vmem:[%s23823_s1 + $0x198] sm:$0xf]  ;;  %v10118_v41 = vld [vmem:[%s23823_s1 + $0xb8] sm:$0xf0]  ;;  %v14626_v43 = vld [vmem:[%s23825_s2 + $0x21c] sm:$0xf0] }
  0x38   :  { %v10516_v44 = vld [vmem:[%s23825_s2 + $0x1c8] sm:$0xf]  ;;  %v10121_v45 = vor.u32 %v14513_v40, %v10118_v41 }
  0x39   :  { %523 = vmatpush.bf16.msrb.mxu2 %v10101_v56  ;;  %v10245_v56 = vor.u32 %v14549_v54, %v10244_v51  ;;  %v10086_v51 = vld [vmem:[%s23823_s1 + $0x78] sm:$0xf0]  ;;  %v10285_v54 = vor.u32 %v14562_v31, %v10284_v30  ;;  %v10478_v30 = vld [vmem:[%s23825_s2 + $0x1a0] sm:$0xf0]  ;;  %v14579_v40 = vld [vmem:[%s23825_s2 + $0xa4] sm:$0xf0] }
  0x3a   :  { %552 = vmatpush.bf16.msrb.mxu3 %v10105_v57  ;;  %581 = vmatpush.bf16.msrb.mxu0 %v10109_v0  ;;  %v14545_v57 = vld [vmem:[%s23823_s1 + $0x19c] sm:$0xf]  ;;  %v10669_v0 = vor.u32 %v14658_v55, %v10668_v50  ;;  %v14670_v31 = vld [vmem:[%s23825_s2 + $0x384] sm:$0xf] }
  0x3b   :  { %610 = vmatpush.bf16.msrb.mxu1 %v10113_v1  ;;  %v10249_v59 = vor.u32 %v14545_v57, %v10246_v58  ;;  %v10380_v1 = vld [vmem:[%s23825_s2 + $0xc0] sm:$0xf]  ;;  %v14505_v50 = vld [vmem:[%s23823_s1 + $0x5c] sm:$0xf]  ;;  %v14509_v57 = vld [vmem:[%s23823_s1 + $0x74] sm:$0xf0]  ;;  %v10517_v58 = vor.u32 %v14619_v46, %v10516_v44 }
  0x3c   :  { %v10381_v10 = vor.u32 %v14586_v3, %v10380_v1  ;;  %v10089_v62 = vor.u32 %v14505_v50, %v10086_v51  ;;  %v10052_v1 = vld [vmem:[%s23823_s1 + $0x18] sm:$0xf]  ;;  %v10485_v3 = vor.u32 %v14611_v61, %v10484_v60  ;;  %v10446_v44 = vld [vmem:[%s23825_s2 + $0x160] sm:$0xf0]  ;;  %v10324_v51 = vld [vmem:[%s23825_s2 + $0x48] sm:$0xf] }
  0x3d   :  { %524 = vmatpush.bf16.msrb.mxu2 %v10069_v4  ;;  %v10636_v4 = vld [vmem:[%s23825_s2 + $0x2c0] sm:$0xf]  ;;  %v10053_v9 = vor.u32 %v14501_v2, %v10052_v1  ;;  %v10702_v50 = vld [vmem:[%s23825_s2 + $0x360] sm:$0xf0]  ;;  %v10292_v60 = vld [vmem:[%s23825_s2 + $0x8] sm:$0xf] }
  0x3e   :  { %553 = vmatpush.bf16.msrb.mxu3 %v10073_v5  ;;  %582 = vmatpush.bf16.msrb.mxu0 %v10077_v12  ;;  %v14650_v5 = vld [vmem:[%s23825_s2 + $0x2dc] sm:$0xf0]  ;;  %v14563_v61 = vld [vmem:[%s23825_s2 + $0x24] sm:$0xf0]  ;;  %v10670_v2 = vld [vmem:[%s23825_s2 + $0x320] sm:$0xf0] }
  0x3f   :  { %611 = vmatpush.bf16.msrb.mxu1 %v10081_v13  ;;  %v10637_v11 = vor.u32 %v14650_v5, %v10636_v4  ;;  %v10348_v12 = vld [vmem:[%s23825_s2 + $0x80] sm:$0xf]  ;;  %v10180_v13 = vld [vmem:[%s23823_s1 + $0x118] sm:$0xf]  ;;  %v14675_v4 = vld [vmem:[%s23825_s2 + $0x3a4] sm:$0xf0] }
  0x40   :  { %v10181_v20 = vor.u32 %v14533_v14, %v10180_v13  ;;  %v10349_v21 = vor.u32 %v14578_v15, %v10348_v12  ;;  %v14497_v5 = vld [vmem:[%s23823_s1 + $0x1c] sm:$0xf]  ;;  %v10708_v13 = vld [vmem:[%s23825_s2 + $0x348] sm:$0xf] }
  0x41   :  { %525 = vmatpush.bf16.msrb.mxu2 %v10037_v16  ;;  %v10604_v16 = vld [vmem:[%s23825_s2 + $0x280] sm:$0xf]  ;;  %v14667_v14 = vld [vmem:[%s23825_s2 + $0x364] sm:$0xf0] }
  0x42   :  { %554 = vmatpush.bf16.msrb.mxu3 %v10041_v17  ;;  %583 = vmatpush.bf16.msrb.mxu0 %v10045_v24  ;;  %v14642_v17 = vld [vmem:[%s23825_s2 + $0x29c] sm:$0xf0]  ;;  %v10420_v15 = vld [vmem:[%s23825_s2 + $0x108] sm:$0xf] }
  0x43   :  { %612 = vmatpush.bf16.msrb.mxu1 %v10049_v25  ;;  %v10605_v22 = vor.u32 %v14642_v17, %v10604_v16  ;;  %v10572_v24 = vld [vmem:[%s23825_s2 + $0x240] sm:$0xf]  ;;  %v14595_v16 = vld [vmem:[%s23825_s2 + $0x124] sm:$0xf0]  ;;  %v10709_v17 = vor.u32 %v14667_v14, %v10708_v13  ;;  %v14574_v14 = vld [vmem:[%s23825_s2 + $0x84] sm:$0xf] }
  0x44   :  { %526 = vmatmul.bf16.vlgmr.msrb.gmra.mxu2 %v16026_v52  ;;  %v14634_v25 = vld [vmem:[%s23825_s2 + $0x25c] sm:$0xf0] }
  0x45   :  { %584 = vmatmul.bf16.vlgmr.msrb.gmra.mxu0 %v16026_v52  ;;  %634 = vmatpush.bf16.msra.mxu2 %v10277_v42  ;;  %v10573_v36 = vor.u32 %v14634_v25, %v10572_v24  ;;  %v10540_v42 = vld [vmem:[%s23825_s2 + $0x200] sm:$0xf]  ;;  %v10766_v24 = vld [vmem:[%s23825_s2 + $0x3e0] sm:$0xf0]  ;;  %v10388_v25 = vld [vmem:[%s23825_s2 + $0xc8] sm:$0xf] }
  0x46   :  { %1525 = vmatpush.bf16.msra.mxu0 %v10509_v26  ;;  %613 = vmatmul.bf16.vlgmr.msrb.gmra.mxu1 %v16026_v52  ;;  %v10148_v26 = vld [vmem:[%s23823_s1 + $0xd8] sm:$0xf]  ;;  %v10541_v55 = vor.u32 %v14626_v43, %v10540_v42  ;;  %v14598_v43 = vld [vmem:[%s23825_s2 + $0x144] sm:$0xf] }
  0x47   :  { %1538 = vmatpush.bf16.msra.mxu1 %v10765_v27  ;;  %555 = vmatmul.bf16.vlgmr.msrb.gmra.mxu3 %v16026_v52  ;;  %v14525_v27 = vld [vmem:[%s23823_s1 + $0xf4] sm:$0xf0] }
  0x48   :  { %663 = vmatpush.bf16.msra.mxu3 %v10281_v47  ;;  %v10772_v47 = vld [vmem:[%s23825_s2 + $0x3c8] sm:$0xf] }
  0x49   :  { %635 = vmatpush.bf16.msra.mxu2 %v10245_v56  ;;  %v10084_v56 = vld [vmem:[%s23823_s1 + $0x58] sm:$0xf] }
  0x4a   :  { %1526 = vmatpush.bf16.msra.mxu0 %v10477_v32  ;;  %v10149_v32 = vor.u32 %v14525_v27, %v10148_v26  ;;  %v14587_v26 = vld [vmem:[%s23825_s2 + $0xe4] sm:$0xf0] }
  0x4b   :  { %1539 = vmatpush.bf16.msra.mxu1 %v10733_v33  ;;  %v10153_v33 = vor.u32 %v14521_v28, %v10150_v29  ;;  %v14606_v29 = vld [vmem:[%s23825_s2 + $0x184] sm:$0xf] }
  0x4c   :  { %664 = vmatpush.bf16.msra.mxu3 %v10249_v59 }
  0x4d   :  { %636 = vmatpush.bf16.msra.mxu2 %v10213_v6  ;;  %v10054_v6 = vld [vmem:[%s23823_s1 + $0x38] sm:$0xf0] }
  0x4e   :  { %1527 = vmatpush.bf16.msra.mxu0 %v10445_v48  ;;  %v14683_v48 = vld [vmem:[%s23825_s2 + $0x3e4] sm:$0xf0] }
  0x4f   :  { %1540 = vmatpush.bf16.msra.mxu1 %v10701_v49  ;;  %v10117_v49 = vor.u32 %v14517_v37, %v10116_v34  ;;  %v10773_v59 = vor.u32 %v14683_v48, %v10772_v47  ;;  %v14651_v34 = vld [vmem:[%s23825_s2 + $0x2e4] sm:$0xf0] }
  0x50   :  { %665 = vmatpush.bf16.msra.mxu3 %v10217_v7  ;;  %v10452_v7 = vld [vmem:[%s23825_s2 + $0x148] sm:$0xf] }
  0x51   :  { %637 = vmatpush.bf16.msra.mxu2 %v10181_v20  ;;  %v10453_v12 = vor.u32 %v14603_v8, %v10452_v7  ;;  %v14678_v20 = vld [vmem:[%s23825_s2 + $0x3c4] sm:$0xf]  ;;  %v10356_v37 = vld [vmem:[%s23825_s2 + $0x88] sm:$0xf]  ;;  %v10293_v7 = vor.u32 %v14563_v61, %v10292_v60  ;;  %v14671_v60 = vld [vmem:[%s23825_s2 + $0x38c] sm:$0xf] }
  0x52   :  { %1528 = vmatpush.bf16.msra.mxu0 %v10413_v63  ;;  %v10085_v63 = vor.u32 %v14509_v57, %v10084_v56  ;;  %v10769_v27 = vor.u32 %v14678_v20, %v10766_v24  ;;  %v10357_v46 = vor.u32 %v14579_v40, %v10356_v37  ;;  %v10612_v47 = vld [vmem:[%s23825_s2 + $0x288] sm:$0xf]  ;;  %v10382_v8 = vld [vmem:[%s23825_s2 + $0xe0] sm:$0xf0]  ;;  %v10524_v20 = vld [vmem:[%s23825_s2 + $0x1d0] sm:$0xf] }
  0x53   :  { %1541 = vmatpush.bf16.msra.mxu1 %v10669_v0  ;;  %v10740_v0 = vld [vmem:[%s23825_s2 + $0x388] sm:$0xf]  ;;  %v10318_v24 = vld [vmem:[%s23825_s2 + $0x60] sm:$0xf0]  ;;  %v14604_v37 = vld [vmem:[%s23825_s2 + $0x16c] sm:$0xf0] }
  0x54   :  { %531 = vmatmul.bf16.gmra.mxu2 %v16136_v38  ;;  %666 = vmatpush.bf16.msra.mxu3 %v10185_v18  ;;  %v14614_v18 = vld [vmem:[%s23825_s2 + $0x1c4] sm:$0xf]  ;;  %v14643_v48 = vld [vmem:[%s23825_s2 + $0x2a4] sm:$0xf0] }
  0x55   :  { %589 = vmatmul.bf16.gmra.mxu0 %v16136_v38  ;;  %638 = vmatpush.bf16.msra.mxu2 %v10149_v32  ;;  %v10513_v23 = vor.u32 %v14614_v18, %v10510_v19  ;;  %v10389_v32 = vor.u32 %v14587_v26, %v10388_v25  ;;  %v10613_v56 = vor.u32 %v14643_v48, %v10612_v47  ;;  %v10580_v57 = vld [vmem:[%s23825_s2 + $0x248] sm:$0xf]  ;;  %v10606_v18 = vld [vmem:[%s23825_s2 + $0x2a0] sm:$0xf0]  ;;  %v10518_v47 = vld [vmem:[%s23825_s2 + $0x1e8] sm:$0xf0] }
  0x56   :  { %1529 = vmatpush.bf16.msra.mxu0 %v10381_v10  ;;  %618 = vmatmul.bf16.gmra.mxu1 %v16136_v38  ;;  %v10741_v10 = vor.u32 %v14675_v4, %v10740_v0  ;;  %v14654_v0 = vld [vmem:[%s23825_s2 + $0x304] sm:$0xf]  ;;  %v10548_v4 = vld [vmem:[%s23825_s2 + $0x208] sm:$0xf]  ;;  %v14679_v48 = vld [vmem:[%s23825_s2 + $0x3cc] sm:$0xf] }
  0x57   :  { %1542 = vmatpush.bf16.msra.mxu1 %v10637_v11  ;;  %560 = vmatmul.bf16.gmra.mxu3 %v16136_v38  ;;  %v10057_v11 = vor.u32 %v14497_v5, %v10054_v6  ;;  %v14627_v5 = vld [vmem:[%s23825_s2 + $0x224] sm:$0xf0]  ;;  %v10673_v6 = vor.u32 %v14654_v0, %v10670_v2  ;;  %v14630_v25 = vld [vmem:[%s23825_s2 + $0x244] sm:$0xf]  ;;  %v10742_v0 = vld [vmem:[%s23825_s2 + $0x3a8] sm:$0xf0] }
  0x58   :  { %667 = vmatpush.bf16.msra.mxu3 %v10153_v33  ;;  %v10644_v33 = vld [vmem:[%s23825_s2 + $0x2c8] sm:$0xf]  ;;  %v10549_v13 = vor.u32 %v14627_v5, %v10548_v4  ;;  %v14558_v40 = vld [vmem:[%s23825_s2 + $0x4] sm:$0xf]  ;;  %v14660_v2 = vld [vmem:[%s23825_s2 + $0x32c] sm:$0xf0]  ;;  %v10745_v4 = vor.u32 %v14671_v60, %v10742_v0 }
  0x59   :  { %639 = vmatpush.bf16.msra.mxu2 %v10117_v49  ;;  %v10645_v42 = vor.u32 %v14651_v34, %v10644_v33  ;;  %v10449_v49 = vor.u32 %v14598_v43, %v10446_v44  ;;  %v14676_v33 = vld [vmem:[%s23825_s2 + $0x3ac] sm:$0xf0]  ;;  %v10542_v43 = vld [vmem:[%s23825_s2 + $0x220] sm:$0xf0]  ;;  %v14615_v44 = vld [vmem:[%s23825_s2 + $0x1cc] sm:$0xf] }
  0x5a   :  { %1530 = vmatpush.bf16.msra.mxu0 %v10349_v21  ;;  %v10421_v21 = vor.u32 %v14595_v16, %v10420_v15  ;;  %v10350_v15 = vld [vmem:[%s23825_s2 + $0xa0] sm:$0xf0]  ;;  %v14613_v60 = vld [vmem:[%s23825_s2 + $0x1b4] sm:$0xf0] }
  0x5b   :  { %1543 = vmatpush.bf16.msra.mxu1 %v10605_v22  ;;  %v14659_v22 = vld [vmem:[%s23825_s2 + $0x324] sm:$0xf0]  ;;  %v14638_v16 = vld [vmem:[%s23825_s2 + $0x284] sm:$0xf]  ;;  %v10756_v0 = vld [vmem:[%s23825_s2 + $0x398] sm:$0xf] }
  0x5c   :  { %668 = vmatpush.bf16.msra.mxu3 %v10121_v45  ;;  %v14662_v45 = vld [vmem:[%s23825_s2 + $0x344] sm:$0xf]  ;;  %v10609_v19 = vor.u32 %v14638_v16, %v10606_v18  ;;  %v10364_v16 = vld [vmem:[%s23825_s2 + $0x90] sm:$0xf] }
  0x5d   :  { %640 = vmatpush.bf16.msra.mxu2 %v10085_v63  ;;  %v10414_v63 = vld [vmem:[%s23825_s2 + $0x120] sm:$0xf0]  ;;  %v10620_v18 = vld [vmem:[%s23825_s2 + $0x290] sm:$0xf] }
  0x5e   :  { %1531 = vmatpush.bf16.msra.mxu0 %v10317_v35  ;;  %v10481_v35 = vor.u32 %v14606_v29, %v10478_v30  ;;  %v10492_v29 = vld [vmem:[%s23825_s2 + $0x190] sm:$0xf] }
  0x5f   :  { %1544 = vmatpush.bf16.msra.mxu1 %v10573_v36  ;;  %v10734_v36 = vld [vmem:[%s23825_s2 + $0x3a0] sm:$0xf0]  ;;  %v14612_v30 = vld [vmem:[%s23825_s2 + $0x1ac] sm:$0xf0] }
  0x60   :  { %669 = vmatpush.bf16.msra.mxu3 %v10089_v62  ;;  %v10737_v41 = vor.u32 %v14670_v31, %v10734_v36  ;;  %v14590_v62 = vld [vmem:[%s23825_s2 + $0x104] sm:$0xf]  ;;  %v10460_v36 = vld [vmem:[%s23825_s2 + $0x150] sm:$0xf] }
  0x61   :  { %641 = vmatpush.bf16.msra.mxu2 %v10053_v9  ;;  %v10417_v1 = vor.u32 %v14590_v62, %v10414_v63  ;;  %v14646_v9 = vld [vmem:[%s23825_s2 + $0x2c4] sm:$0xf]  ;;  %v10428_v62 = vld [vmem:[%s23825_s2 + $0x110] sm:$0xf] }
  0x62   :  { %1532 = vmatpush.bf16.msra.mxu0 %v10285_v54  ;;  %v14571_v54 = vld [vmem:[%s23825_s2 + $0x64] sm:$0xf0]  ;;  %v14596_v63 = vld [vmem:[%s23825_s2 + $0x12c] sm:$0xf0] }
  0x63   :  { %1545 = vmatpush.bf16.msra.mxu1 %v10541_v55  ;;  %v10705_v55 = vor.u32 %v14662_v45, %v10702_v50  ;;  %v10716_v50 = vld [vmem:[%s23825_s2 + $0x350] sm:$0xf]  ;;  %v10429_v5 = vor.u32 %v14596_v63, %v10428_v62  ;;  %v10614_v62 = vld [vmem:[%s23825_s2 + $0x2a8] sm:$0xf0] }
  0x64   :  { %536 = vmatmul.bf16.gmra.mxu2 %v16031_v53  ;;  %670 = vmatpush.bf16.msra.mxu3 %v10057_v11 }
  0x65   :  { %594 = vmatmul.bf16.gmra.mxu0 %v16031_v53  ;;  %1551 = vmatpush.bf16.msrb.mxu2 %v10513_v23  ;;  %v14566_v23 = vld [vmem:[%s23825_s2 + $0x44] sm:$0xf] }
  0x66   :  { %1577 = vmatpush.bf16.msrb.mxu0 %v10517_v58  ;;  %623 = vmatmul.bf16.gmra.mxu1 %v16031_v53  ;;  %v10325_v58 = vor.u32 %v14571_v54, %v10324_v51  ;;  %v10321_v31 = vor.u32 %v14566_v23, %v10318_v24  ;;  %v14668_v51 = vld [vmem:[%s23825_s2 + $0x36c] sm:$0xf0]  ;;  %v14655_v23 = vld [vmem:[%s23825_s2 + $0x30c] sm:$0xf] }
  0x67   :  { %1590 = vmatpush.bf16.msrb.mxu1 %v10773_v59  ;;  %565 = vmatmul.bf16.gmra.mxu3 %v16031_v53  ;;  %v10676_v53 = vld [vmem:[%s23825_s2 + $0x308] sm:$0xf]  ;;  %v10717_v61 = vor.u32 %v14668_v51, %v10716_v50  ;;  %v10678_v24 = vld [vmem:[%s23825_s2 + $0x328] sm:$0xf0]  ;;  %v16810_v50 = vld [vmem:[%s23826_s3] sm:$0xff] }
  0x68   :  { %v10677_v28 = vor.u32 %v14659_v22, %v10676_v53  ;;  %1564 = vmatpush.bf16.msrb.mxu3 %v10769_v27  ;;  %v14635_v59 = vld [vmem:[%s23825_s2 + $0x264] sm:$0xf0]  ;;  %v10780_v53 = vld [vmem:[%s23825_s2 + $0x3d0] sm:$0xf]  ;;  %v10574_v27 = vld [vmem:[%s23825_s2 + $0x260] sm:$0xf0] }
  0x69   :  { %1552 = vmatpush.bf16.msrb.mxu2 %v10481_v35  ;;  %v14684_v22 = vld [vmem:[%s23825_s2 + $0x3ec] sm:$0xf0]  ;;  %v10577_v34 = vor.u32 %v14630_v25, %v10574_v27  ;;  %v23831_v35 = vmov 0.0|0.0  }
  0x6a   :  { %1578 = vmatpush.bf16.msrb.mxu0 %v10485_v3  ;;  %v10581_v3 = vor.u32 %v14635_v59, %v10580_v57  ;;  %v10461_v57 = vor.u32 %v14604_v37, %v10460_v36  ;;  %v10486_v59 = vld [vmem:[%s23825_s2 + $0x1a8] sm:$0xf0]  ;;  %v14572_v27 = vld [vmem:[%s23825_s2 + $0x6c] sm:$0xf0] }
  0x6b   :  { %1591 = vmatpush.bf16.msrb.mxu1 %v10741_v10  ;;  %v10638_v10 = vld [vmem:[%s23825_s2 + $0x2e0] sm:$0xf0]  ;;  %v10646_v36 = vld [vmem:[%s23825_s2 + $0x2e8] sm:$0xf0] }
  0x6c   :  { %1565 = vmatpush.bf16.msrb.mxu3 %v10737_v41  ;;  %v10286_v41 = vld [vmem:[%s23825_s2 + $0x20] sm:$0xf0] }
  0x6d   :  { %1553 = vmatpush.bf16.msrb.mxu2 %v10449_v49  ;;  %v10774_v49 = vld [vmem:[%s23825_s2 + $0x3e8] sm:$0xf0] }
  0x6e   :  { %1579 = vmatpush.bf16.msrb.mxu0 %v10453_v12  ;;  %v10641_v12 = vor.u32 %v14646_v9, %v10638_v10  ;;  %v14652_v9 = vld [vmem:[%s23825_s2 + $0x2ec] sm:$0xf0]  ;;  %v14599_v10 = vld [vmem:[%s23825_s2 + $0x14c] sm:$0xf] }
  0x6f   :  { %1592 = vmatpush.bf16.msrb.mxu1 %v10709_v17  ;;  %v10353_v17 = vor.u32 %v14574_v14, %v10350_v15 }
  0x70   :  { %1566 = vmatpush.bf16.msrb.mxu3 %v10705_v55  ;;  %v10521_v55 = vor.u32 %v14615_v44, %v10518_v47  ;;  %v14628_v44 = vld [vmem:[%s23825_s2 + $0x22c] sm:$0xf0] }
  0x71   :  { %1554 = vmatpush.bf16.msrb.mxu2 %v10417_v1  ;;  %v10684_v1 = vld [vmem:[%s23825_s2 + $0x310] sm:$0xf] }
  0x72   :  { %1580 = vmatpush.bf16.msrb.mxu0 %v10421_v21  ;;  %v14620_v21 = vld [vmem:[%s23825_s2 + $0x1ec] sm:$0xf0] }
  0x73   :  { %1593 = vmatpush.bf16.msrb.mxu1 %v10677_v28  ;;  %v10525_v26 = vor.u32 %v14620_v21, %v10524_v20  ;;  %v10781_v28 = vor.u32 %v14684_v22, %v10780_v53  ;;  %v14644_v20 = vld [vmem:[%s23825_s2 + $0x2ac] sm:$0xf0]  ;;  %v14591_v53 = vld [vmem:[%s23825_s2 + $0x10c] sm:$0xf] }
  0x74   :  { %541 = vmatmul.bf16.gmra.mxu2 %v16141_v39  ;;  %1567 = vmatpush.bf16.msrb.mxu3 %v10673_v6  ;;  %v10685_v6 = vor.u32 %v14660_v2, %v10684_v1  ;;  %v10422_v22 = vld [vmem:[%s23825_s2 + $0x128] sm:$0xf0]  ;;  %v14677_v1 = vld [vmem:[%s23825_s2 + $0x3b4] sm:$0xf0]  ;;  %v16839_v2 = vperm.slane %v16810_v50, 0 }
  0x75   :  { %599 = vmatmul.bf16.gmra.mxu0 %v16141_v39 }
  0x76   :  { %1581 = vmatpush.bf16.msrb.mxu0 %v10389_v32  ;;  %628 = vmatmul.bf16.gmra.mxu1 %v16141_v39  ;;  %v10748_v32 = vld [vmem:[%s23825_s2 + $0x390] sm:$0xf] }
  0x77   :  { %1594 = vmatpush.bf16.msrb.mxu1 %v10645_v42  ;;  %570 = vmatmul.bf16.gmra.mxu3 %v16141_v39  ;;  %v14582_v39 = vld [vmem:[%s23825_s2 + $0xc4] sm:$0xf]  ;;  %v10749_v45 = vor.u32 %v14676_v33, %v10748_v32  ;;  %v14583_v32 = vld [vmem:[%s23825_s2 + $0xcc] sm:$0xf] }
  0x78   :  { %v10385_v11 = vor.u32 %v14582_v39, %v10382_v8  ;;  %1568 = vmatpush.bf16.msrb.mxu3 %v10641_v12  ;;  %v14622_v42 = vld [vmem:[%s23825_s2 + $0x204] sm:$0xf]  ;;  %v10396_v39 = vld [vmem:[%s23825_s2 + $0xd0] sm:$0xf]  ;;  %v14663_v12 = vld [vmem:[%s23825_s2 + $0x34c] sm:$0xf] }
  0x79   :  { %v10545_v54 = vor.u32 %v14622_v42, %v10542_v43  ;;  %v10652_v8 = vld [vmem:[%s23825_s2 + $0x2d0] sm:$0xf]  ;;  %v10390_v33 = vld [vmem:[%s23825_s2 + $0xe8] sm:$0xf0] }
  0x7a   :  { %1582 = vmatpush.bf16.msrb.mxu0 %v10357_v46  ;;  %1555 = vmatpush.bf16.msrb.mxu2 %v10385_v11  ;;  %v10289_v46 = vor.u32 %v14558_v40, %v10286_v41  ;;  %v10454_v11 = vld [vmem:[%s23825_s2 + $0x168] sm:$0xf0]  ;;  %v10653_v15 = vor.u32 %v14652_v9, %v10652_v8  ;;  %v10300_v41 = vld [vmem:[%s23825_s2 + $0x10] sm:$0xf]  ;;  %v10393_v43 = vor.u32 %v14583_v32, %v10390_v33 }
  0x7b   :  { %1595 = vmatpush.bf16.msrb.mxu1 %v10613_v56  ;;  %v10777_v56 = vor.u32 %v14679_v48, %v10774_v49  ;;  %v10556_v42 = vld [vmem:[%s23825_s2 + $0x210] sm:$0xf]  ;;  %v10788_v48 = vld [vmem:[%s23825_s2 + $0x3d8] sm:$0xf]  ;;  %v10326_v8 = vld [vmem:[%s23825_s2 + $0x68] sm:$0xf0] }
  0x7c   :  { %1569 = vmatpush.bf16.msrb.mxu3 %v10609_v19  ;;  %v10457_v19 = vor.u32 %v14599_v10, %v10454_v11  ;;  %v14685_v49 = vld [vmem:[%s23825_s2 + $0x3f4] sm:$0xf0]  ;;  %v15872_v9 = vld [vmem:[%s23824_s0 + $0x10] sm:$0xff]  ;;  %v10757_v10 = vor.u32 %v14677_v1, %v10756_v0 }
  0x7d   :  { %v14605_v11 = vld [vmem:[%s23825_s2 + $0x174] sm:$0xf0] }
  0x7e   :  { %1583 = vmatpush.bf16.msrb.mxu0 %v10325_v58  ;;  %1556 = vmatpush.bf16.msrb.mxu2 %v10353_v17  ;;  %v14607_v58 = vld [vmem:[%s23825_s2 + $0x18c] sm:$0xf]  ;;  %v14580_v17 = vld [vmem:[%s23825_s2 + $0xac] sm:$0xf0]  ;;  %v10340_v0 = vld [vmem:[%s23825_s2 + $0x58] sm:$0xf] }
  0x7f   :  { %1596 = vmatpush.bf16.msrb.mxu1 %v10581_v3  ;;  %v10489_v3 = vor.u32 %v14607_v58, %v10486_v59  ;;  %v10365_v25 = vor.u32 %v14580_v17, %v10364_v16  ;;  %v10358_v58 = vld [vmem:[%s23825_s2 + $0xa8] sm:$0xf0]  ;;  %v10789_v59 = vor.u32 %v14685_v49, %v10788_v48  ;;  %v14669_v16 = vld [vmem:[%s23825_s2 + $0x374] sm:$0xf0] }
  0x80   :  { %1570 = vmatpush.bf16.msrb.mxu3 %v10577_v34  ;;  %v14647_v34 = vld [vmem:[%s23825_s2 + $0x2cc] sm:$0xf]  ;;  %v10372_v48 = vld [vmem:[%s23825_s2 + $0x98] sm:$0xf] }
  0x81   :  { %v10649_v47 = vor.u32 %v14647_v34, %v10646_v36  ;;  %v14581_v49 = vld [vmem:[%s23825_s2 + $0xb4] sm:$0xf0] }
  0x82   :  { %1584 = vmatpush.bf16.msrb.mxu0 %v10293_v7  ;;  %1557 = vmatpush.bf16.msrb.mxu2 %v10321_v31  ;;  %v14588_v7 = vld [vmem:[%s23825_s2 + $0xec] sm:$0xf0]  ;;  %v10681_v31 = vor.u32 %v14655_v23, %v10678_v24  ;;  %v14573_v1 = vld [vmem:[%s23825_s2 + $0x74] sm:$0xf0] }
  0x83   :  { %1597 = vmatpush.bf16.msrb.mxu1 %v10549_v13  ;;  %v10710_v13 = vld [vmem:[%s23825_s2 + $0x368] sm:$0xf0]  ;;  %v10397_v14 = vor.u32 %v14588_v7, %v10396_v39 }
  0x84   :  { %642 = vmatmul.bf16.vlgmr.msra.gmra.mxu2 %v16026_v52  ;;  %1571 = vmatpush.bf16.msrb.mxu3 %v10545_v54  ;;  %v10713_v21 = vor.u32 %v14663_v12, %v10710_v13  ;;  %v10557_v54 = vor.u32 %v14628_v44, %v10556_v42  ;;  %v14567_v7 = vld [vmem:[%s23825_s2 + $0x4c] sm:$0xf]  ;;  %v14653_v42 = vld [vmem:[%s23825_s2 + $0x2f4] sm:$0xf0] }
  0x85   :  { %1533 = vmatmul.bf16.vlgmr.msra.gmra.mxu0 %v23831_v35  ;;  %v14631_v12 = vld [vmem:[%s23825_s2 + $0x24c] sm:$0xf]  ;;  %v10329_v17 = vor.u32 %v14567_v7, %v10326_v8 }
  0x86   :  { %1546 = vmatmul.bf16.vlgmr.msra.gmra.mxu1 %v23831_v35  ;;  %1629 = vmatpush.bf16.msra.mxu0 %v10525_v26  ;;  %v10621_v26 = vor.u32 %v14644_v20, %v10620_v18  ;;  %v10582_v13 = vld [vmem:[%s23825_s2 + $0x268] sm:$0xf0]  ;;  %v10436_v20 = vld [vmem:[%s23825_s2 + $0x118] sm:$0xf] }
  0x87   :  { %671 = vmatmul.bf16.vlgmr.msra.gmra.mxu3 %v16026_v52  ;;  %v10493_v52 = vor.u32 %v14612_v30, %v10492_v29  ;;  %1642 = vmatpush.bf16.msra.mxu1 %v10781_v28  ;;  %v10588_v28 = vld [vmem:[%s23825_s2 + $0x250] sm:$0xf]  ;;  %v10425_v29 = vor.u32 %v14591_v53, %v10422_v22  ;;  %v14559_v53 = vld [vmem:[%s23825_s2 + $0xc] sm:$0xf] }
  0x88   :  { %1558 = vmatpush.bf16.msrb.mxu2 %v10289_v46  ;;  %1616 = vmatpush.bf16.msra.mxu3 %v10777_v56  ;;  %v14636_v30 = vld [vmem:[%s23825_s2 + $0x26c] sm:$0xf0]  ;;  %v14621_v46 = vld [vmem:[%s23825_s2 + $0x1f4] sm:$0xf0]  ;;  %v10294_v22 = vld [vmem:[%s23825_s2 + $0x28] sm:$0xf0] }
  0x89   :  { %v10589_v40 = vor.u32 %v14636_v30, %v10588_v28  ;;  %v10500_v56 = vld [vmem:[%s23825_s2 + $0x198] sm:$0xf]  ;;  %v10297_v33 = vor.u32 %v14559_v53, %v10294_v22  ;;  %v16991_v22 = vperm.slane %v16810_v50, 4 }
  0x8a   :  { %1630 = vmatpush.bf16.msra.mxu0 %v10493_v52  ;;  %v14564_v52 = vld [vmem:[%s23825_s2 + $0x2c] sm:$0xf0]  ;;  %v10692_v30 = vld [vmem:[%s23825_s2 + $0x318] sm:$0xf] }
  0x8b   :  { %1643 = vmatpush.bf16.msra.mxu1 %v10749_v45  ;;  %v10532_v45 = vld [vmem:[%s23825_s2 + $0x1d8] sm:$0xf]  ;;  %v10301_v51 = vor.u32 %v14564_v52, %v10300_v41 }
  0x8c   :  { %1603 = vmatpush.bf16.msra.mxu2 %v10521_v55  ;;  %1617 = vmatpush.bf16.msra.mxu3 %v10745_v4  ;;  %v10533_v55 = vor.u32 %v14621_v46, %v10532_v45  ;;  %v14589_v41 = vld [vmem:[%s23825_s2 + $0xf4] sm:$0xf0] }
  0x8d   :  { %v10660_v52 = vld [vmem:[%s23825_s2 + $0x2d8] sm:$0xf] }
  0x8e   :  { %1631 = vmatpush.bf16.msra.mxu0 %v10461_v57  ;;  %v14575_v57 = vld [vmem:[%s23825_s2 + $0x8c] sm:$0xf] }
  0x8f   :  { %1644 = vmatpush.bf16.msra.mxu1 %v10717_v61  ;;  %v14639_v61 = vld [vmem:[%s23825_s2 + $0x28c] sm:$0xf]  ;;  %v10361_v4 = vor.u32 %v14575_v57, %v10358_v58 }
  0x90   :  { %1604 = vmatpush.bf16.msra.mxu2 %v10489_v3  ;;  %1618 = vmatpush.bf16.msra.mxu3 %v10713_v21  ;;  %v10617_v39 = vor.u32 %v14639_v61, %v10614_v62  ;;  %v10585_v21 = vor.u32 %v14631_v12, %v10582_v13  ;;  %v15873_v61 = vld [vmem:[%s23824_s0 + $0x18] sm:$0xff] }
  0x92   :  { %1632 = vmatpush.bf16.msra.mxu0 %v10429_v5  ;;  %v10501_v5 = vor.u32 %v14613_v60, %v10500_v56  ;;  %v14645_v56 = vld [vmem:[%s23825_s2 + $0x2b4] sm:$0xf0]  ;;  %v10373_v60 = vor.u32 %v14581_v49, %v10372_v48  ;;  %v14664_v48 = vld [vmem:[%s23825_s2 + $0x354] sm:$0xf] }
  0x93   :  { %1645 = vmatpush.bf16.msra.mxu1 %v10685_v6  ;;  %v10468_v6 = vld [vmem:[%s23825_s2 + $0x158] sm:$0xf]  ;;  %v10718_v49 = vld [vmem:[%s23825_s2 + $0x370] sm:$0xf0] }
  0x94   :  { %647 = vmatmul.bf16.gmra.mxu2 %v16136_v38  ;;  %1619 = vmatpush.bf16.msra.mxu3 %v10681_v31  ;;  %v14661_v31 = vld [vmem:[%s23825_s2 + $0x334] sm:$0xf0] }
  0x95   :  { %1585 = vmatmul.bf16.vlgmr.msrb.gmra.mxu0 %v23831_v35  ;;  %1605 = vmatpush.bf16.msra.mxu2 %v10457_v19  ;;  %v10469_v19 = vor.u32 %v14605_v11, %v10468_v6  ;;  %v14565_v11 = vld [vmem:[%s23825_s2 + $0x34] sm:$0xf0] }
  0x96   :  { %1598 = vmatmul.bf16.vlgmr.msrb.gmra.mxu1 %v23831_v35  ;;  %1633 = vmatpush.bf16.msra.mxu0 %v10397_v14  ;;  %v16865_v14 = vperm.slane %v16810_v50, 1 }
  0x97   :  { %676 = vmatmul.bf16.gmra.mxu3 %v16136_v38  ;;  %1646 = vmatpush.bf16.msra.mxu1 %v10653_v15  ;;  %v10332_v38 = vld [vmem:[%s23825_s2 + $0x50] sm:$0xf]  ;;  %v10724_v15 = vld [vmem:[%s23825_s2 + $0x358] sm:$0xf] }
  0x98   :  { %v10333_v37 = vor.u32 %v14572_v27, %v10332_v38  ;;  %1620 = vmatpush.bf16.msra.mxu3 %v10649_v47  ;;  %v14623_v38 = vld [vmem:[%s23825_s2 + $0x20c] sm:$0xf]  ;;  %v10661_v47 = vor.u32 %v14653_v42, %v10660_v52 }
  0x99   :  { %1606 = vmatpush.bf16.msra.mxu2 %v10425_v29  ;;  %v10550_v27 = vld [vmem:[%s23825_s2 + $0x228] sm:$0xf0] }
  0x9a   :  { %1634 = vmatpush.bf16.msra.mxu0 %v10365_v25  ;;  %v10725_v25 = vor.u32 %v14669_v16, %v10724_v15  ;;  %v10553_v36 = vor.u32 %v14623_v38, %v10550_v27  ;;  %v10564_v15 = vld [vmem:[%s23825_s2 + $0x218] sm:$0xf]  ;;  %v17002_v38 = vperm.slane %v16810_v50, 5 }
  0x9b   :  { %1647 = vmatpush.bf16.msra.mxu1 %v10621_v26  ;;  %v14597_v26 = vld [vmem:[%s23825_s2 + $0x134] sm:$0xf0] }
  0x9c   :  { %1621 = vmatpush.bf16.msra.mxu3 %v10617_v39  ;;  %v10437_v34 = vor.u32 %v14597_v26, %v10436_v20  ;;  %v10341_v39 = vor.u32 %v14573_v1, %v10340_v0  ;;  %v14629_v16 = vld [vmem:[%s23825_s2 + $0x234] sm:$0xf0]  ;;  %v14616_v20 = vld [vmem:[%s23825_s2 + $0x1d4] sm:$0xf] }
  0x9d   :  { %1607 = vmatpush.bf16.msra.mxu2 %v10393_v43  ;;  %v14656_v0 = vld [vmem:[%s23825_s2 + $0x314] sm:$0xf] }
  0x9e   :  { %1635 = vmatpush.bf16.msra.mxu0 %v10333_v37  ;;  %v10693_v37 = vor.u32 %v14661_v31, %v10692_v30  ;;  %v10686_v1 = vld [vmem:[%s23825_s2 + $0x330] sm:$0xf0] }
  0x9f   :  { %1648 = vmatpush.bf16.msra.mxu1 %v10589_v40  ;;  %v10404_v40 = vld [vmem:[%s23825_s2 + $0xd8] sm:$0xf] }
  0xa0   :  { %1622 = vmatpush.bf16.msra.mxu3 %v10585_v21  ;;  %v10405_v44 = vor.u32 %v14589_v41, %v10404_v40  ;;  %v10526_v21 = vld [vmem:[%s23825_s2 + $0x1f0] sm:$0xf0] }
  0xa1   :  { %v16830_v63 = vpop.f32.mrf.mxu0  ;;  %1608 = vmatpush.bf16.msra.mxu2 %v10361_v4  ;;  %v10596_v4 = vld [vmem:[%s23825_s2 + $0x258] sm:$0xf]  ;;  %v10529_v27 = vor.u32 %v14616_v20, %v10526_v21  ;;  %v14672_v40 = vld [vmem:[%s23825_s2 + $0x394] sm:$0xf] }
  0xa2   :  { %v16841_v3 = vpop.f32.mrf.mxu1  ;;  %1636 = vmatpush.bf16.msra.mxu0 %v10301_v51  ;;  %v10750_v41 = vld [vmem:[%s23825_s2 + $0x3b0] sm:$0xf0] }
  0xa3   :  { %1649 = vmatpush.bf16.msra.mxu1 %v10557_v54  ;;  %v10366_v20 = vld [vmem:[%s23825_s2 + $0xb0] sm:$0xf0] }
  0xa4   :  { %652 = vmatmul.bf16.gmra.mxu2 %v15872_v9  ;;  %1623 = vmatpush.bf16.msra.mxu3 %v10553_v36 }
  0xa5   :  { %1637 = vmatmul.bf16.vlgmr.msra.gmra.mxu0 %v23831_v35  ;;  %1609 = vmatpush.bf16.msra.mxu2 %v10329_v17 }
  0xa6   :  { %1681 = vmatpush.bf16.msrb.mxu0 %v10533_v55  ;;  %1650 = vmatmul.bf16.vlgmr.msra.gmra.mxu1 %v23831_v35  ;;  %v10628_v55 = vld [vmem:[%s23825_s2 + $0x298] sm:$0xf] }
  0xa7   :  { %1694 = vmatpush.bf16.msrb.mxu1 %v10789_v59  ;;  %681 = vmatmul.bf16.gmra.mxu3 %v15872_v9  ;;  %v479_v18 = vpop.f32.mrf.mxu2  ;;  %v10629_v62 = vor.u32 %v14645_v56, %v10628_v55 }
  0xa8   :  { %v16885_v23 = vadd.f32 %v479_v18, %v16839_v2 }
  0xa9   :  { %v16899_v29 = vpop.f32.mrf.mxu0  ;;  %1610 = vmatpush.bf16.msra.mxu2 %v10297_v33  ;;  %v14608_v33 = vld [vmem:[%s23825_s2 + $0x194] sm:$0xf] }
  0xaa   :  { %1682 = vmatpush.bf16.msrb.mxu0 %v10501_v5  ;;  %v508_v24 = vpop.f32.mrf.mxu3  ;;  %v16907_v32 = vpop.f32.mrf.mxu1  ;;  %v14637_v5 = vld [vmem:[%s23825_s2 + $0x274] sm:$0xf0] }
  0xab   :  { %1695 = vmatpush.bf16.msrb.mxu1 %v10757_v10  ;;  %v16897_v28 = vadd.f32 %v508_v24, %v16865_v14  ;;  %v10597_v9 = vor.u32 %v14637_v5, %v10596_v4  ;;  %v10308_v10 = vld [vmem:[%s23825_s2 + $0x18] sm:$0xf]  ;;  %v14680_v24 = vld [vmem:[%s23825_s2 + $0x3d4] sm:$0xf]  ;;  %v10689_v5 = vor.u32 %v14656_v0, %v10686_v1 }
  0xac   :  { %v10309_v18 = vor.u32 %v14565_v11, %v10308_v10  ;;  %v10654_v10 = vld [vmem:[%s23825_s2 + $0x2f0] sm:$0xf0] }
  0xad   :  { %v10302_v0 = vld [vmem:[%s23825_s2 + $0x30] sm:$0xf0] }
  0xae   :  { %1683 = vmatpush.bf16.msrb.mxu0 %v10469_v19  ;;  %v10565_v19 = vor.u32 %v14629_v16, %v10564_v15  ;;  %v14624_v1 = vld [vmem:[%s23825_s2 + $0x214] sm:$0xf] }
  0xaf   :  { %1696 = vmatpush.bf16.msrb.mxu1 %v10725_v25  ;;  %v481_v43 = vpop.f32.mrf.mxu2  ;;  %v10782_v25 = vld [vmem:[%s23825_s2 + $0x3f0] sm:$0xf0] }
  0xb0   :  { %v16922_v45 = vadd.f32 %v481_v43, %v16839_v2  ;;  %v10785_v31 = vor.u32 %v14680_v24, %v10782_v25  ;;  %v10753_v43 = vor.u32 %v14672_v40, %v10750_v41  ;;  %v14640_v25 = vld [vmem:[%s23825_s2 + $0x294] sm:$0xf]  ;;  %v17104_v41 = vperm.slane %v16810_v50, 3 }
  0xb1   :  { %v474_v54 = vpop.f32.mrf.mxu0  ;;  %v10334_v40 = vld [vmem:[%s23825_s2 + $0x70] sm:$0xf0] }
  0xb2   :  { %1684 = vmatpush.bf16.msrb.mxu0 %v10437_v34  ;;  %23835 = vst [vmem:[#allocation5_spill] sm:$0xff] %v16922_v45  ;;  %v510_v46 = vpop.f32.mrf.mxu3  ;;  %v16940_v57 = vadd.f32 %v474_v54, %v16839_v2  ;;  %v503_v58 = vpop.f32.mrf.mxu1  ;;  %v10494_v34 = vld [vmem:[%s23825_s2 + $0x1b0] sm:$0xf0] }
  0xb3   :  { %1697 = vmatpush.bf16.msrb.mxu1 %v10693_v37  ;;  %v16931_v51 = vadd.f32 %v510_v46, %v16865_v14  ;;  %v16943_v59 = vadd.f32 %v503_v58, %v16865_v14  ;;  %v10497_v42 = vor.u32 %v14608_v33, %v10494_v34  ;;  %v10462_v46 = vld [vmem:[%s23825_s2 + $0x170] sm:$0xf0]  ;;  %v10721_v58 = vor.u32 %v14664_v48, %v10718_v49 }
  0xb4   :  { %657 = vmatmul.bf16.gmra.mxu2 %v15873_v61  ;;  %v17095_v33 = vperm.slane %v16810_v50, 2 }
  0xb5   :  { %23836 = vst [vmem:[#allocation6_spill] sm:$0xff] %v16931_v51  ;;  %v14739_v51 = vld [vmem:[%s23825_s2 + $0x1a4] sm:$0xf0] }
  0xb6   :  { %1685 = vmatpush.bf16.msrb.mxu0 %v10405_v44  ;;  %v14600_v44 = vld [vmem:[%s23825_s2 + $0x154] sm:$0xf] }
  0xb7   :  { %1698 = vmatpush.bf16.msrb.mxu1 %v10661_v47  ;;  %686 = vmatmul.bf16.gmra.mxu3 %v15873_v61  ;;  %v484_v6 = vpop.f32.mrf.mxu2  ;;  %v10465_v55 = vor.u32 %v14600_v44, %v10462_v46  ;;  %v10430_v61 = vld [vmem:[%s23825_s2 + $0x130] sm:$0xf0] }
  0xb8   :  { %v16961_v7 = vadd.f32 %v484_v6, %v16839_v2  ;;  %v14584_v6 = vld [vmem:[%s23825_s2 + $0xd4] sm:$0xf] }
  0xb9   :  { %v16972_v13 = vpop.f32.mrf.mxu0  ;;  %v10590_v44 = vld [vmem:[%s23825_s2 + $0x270] sm:$0xf0] }
  0xba   :  { %1686 = vmatpush.bf16.msrb.mxu0 %v10373_v60  ;;  %23837 = vst [vmem:[#allocation7_spill] sm:$0xff] %v16961_v7  ;;  %v513_v8 = vpop.f32.mrf.mxu3  ;;  %v16980_v17 = vpop.f32.mrf.mxu1  ;;  %v14592_v60 = vld [vmem:[%s23825_s2 + $0x114] sm:$0xf] }
  0xbb   :  { %1699 = vmatpush.bf16.msrb.mxu1 %v10629_v62  ;;  %v16970_v12 = vadd.f32 %v513_v8, %v16865_v14  ;;  %v10433_v4 = vor.u32 %v14592_v60, %v10430_v61  ;;  %v14560_v61 = vld [vmem:[%s23825_s2 + $0x14] sm:$0xf] }
  0xbd   :  { %23838 = vst [vmem:[#allocation8_spill] sm:$0xff] %v16970_v12 }
  0xbe   :  { %1687 = vmatpush.bf16.msrb.mxu0 %v10341_v39  ;;  %v10398_v39 = vld [vmem:[%s23825_s2 + $0xf0] sm:$0xf0] }
  0xbf   :  { %1700 = vmatpush.bf16.msrb.mxu1 %v10597_v9  ;;  %v16988_v53 = vpop.f32.mrf.mxu2  ;;  %v14648_v9 = vld [vmem:[%s23825_s2 + $0x2d4] sm:$0xf]  ;;  %v10401_v15 = vor.u32 %v14584_v6, %v10398_v39  ;;  %v14617_v6 = vld [vmem:[%s23825_s2 + $0x1dc] sm:$0xf] }
  0xc0   :  { %23839 = vst [vmem:[#allocation9_spill] sm:$0xff] %v16988_v53  ;;  %v10534_v39 = vld [vmem:[%s23825_s2 + $0x1f8] sm:$0xf0] }
  0xc2   :  { %1688 = vmatpush.bf16.msrb.mxu0 %v10309_v18  ;;  %v16999_v26 = vpop.f32.mrf.mxu3  ;;  %v585_v30 = vpop.f32.mrf.mxu0  ;;  %v10657_v18 = vor.u32 %v14648_v9, %v10654_v10  ;;  %v14681_v9 = vld [vmem:[%s23825_s2 + $0x3dc] sm:$0xf] }
  0xc3   :  { %23840 = vst [vmem:[#allocation10_spill] sm:$0xff] %v16999_v26  ;;  %1701 = vmatpush.bf16.msrb.mxu1 %v10565_v19  ;;  %v17012_v36 = vadd.f32 %v585_v30, %v16991_v22  ;;  %v614_v37 = vpop.f32.mrf.mxu1  ;;  %v14576_v19 = vld [vmem:[%s23825_s2 + $0x94] sm:$0xf]  ;;  %v10790_v10 = vld [vmem:[%s23825_s2 + $0x3f8] sm:$0xf0] }
  0xc4   :  { %v17022_v52 = vadd.f32 %v614_v37, %v17002_v38  ;;  %1559 = vmatmul.bf16.vlgmr.msrb.gmra.mxu2 %v23831_v35  ;;  %v14568_v37 = vld [vmem:[%s23825_s2 + $0x54] sm:$0xf] }
  0xc5   :  { %1689 = vmatmul.bf16.vlgmr.msrb.gmra.mxu0 %v23831_v35  ;;  %23841 = vst [vmem:[#allocation11_spill] sm:$0xff] %v17012_v36  ;;  %1655 = vmatpush.bf16.msrb.mxu2 %v10529_v27  ;;  %v10622_v27 = vld [vmem:[%s23825_s2 + $0x2b0] sm:$0xf0] }
  0xc6   :  { %1702 = vmatmul.bf16.vlgmr.msrb.gmra.mxu1 %v23831_v35  ;;  %23842 = vst [vmem:[#allocation12_spill] sm:$0xff] %v17022_v52  ;;  %v10625_v34 = vor.u32 %v14640_v25, %v10622_v27  ;;  %v10502_v25 = vld [vmem:[%s23825_s2 + $0x1b8] sm:$0xf0]  ;;  %v23855_v52 = vmov 0.0|0.0  }
  0xc7   :  { %1572 = vmatmul.bf16.vlgmr.msrb.gmra.mxu3 %v23831_v35  ;;  %v17032_v47 = vpop.f32.mrf.mxu2 }
  0xc8   :  { %1668 = vmatpush.bf16.msrb.mxu3 %v10785_v31  ;;  %v10369_v31 = vor.u32 %v14576_v19, %v10366_v20  ;;  %v10793_v20 = vor.u32 %v14681_v9, %v10790_v10  ;;  %v10438_v9 = vld [vmem:[%s23825_s2 + $0x138] sm:$0xf0] }
  0xc9   :  { %1656 = vmatpush.bf16.msrb.mxu2 %v10497_v42 }
  0xca   :  { %v17040_v54 = vpop.f32.mrf.mxu3  ;;  %v17042_v56 = vpop.f32.mrf.mxu0 }
  0xcb   :  { %23843 = vst [vmem:[#allocation13_spill] sm:$0xff] %v17042_v56  ;;  %v17050_v62 = vpop.f32.mrf.mxu1 }
  0xcc   :  { %1669 = vmatpush.bf16.msrb.mxu3 %v10753_v43  ;;  %23844 = vst [vmem:[#allocation14_spill] sm:$0xff] %v17050_v62  ;;  %v14632_v43 = vld [vmem:[%s23825_s2 + $0x254] sm:$0xf] }
  0xcd   :  { %1657 = vmatpush.bf16.msrb.mxu2 %v10465_v55  ;;  %v10337_v55 = vor.u32 %v14568_v37, %v10334_v40  ;;  %v10593_v60 = vor.u32 %v14632_v43, %v10590_v44 }
  0xcf   :  { %v17064_v8 = vpop.f32.mrf.mxu2 }
  0xd0   :  { %1670 = vmatpush.bf16.msrb.mxu3 %v10721_v58 }
  0xd1   :  { %1658 = vmatpush.bf16.msrb.mxu2 %v10433_v4 }
  0xd2   :  { %v17072_v11 = vpop.f32.mrf.mxu3  ;;  %v590_v16 = vpop.f32.mrf.mxu0 }
  0xd3   :  { %v17081_v21 = vadd.f32 %v590_v16, %v16991_v22  ;;  %v619_v24 = vpop.f32.mrf.mxu1 }
  0xd4   :  { %1671 = vmatpush.bf16.msrb.mxu3 %v10689_v5  ;;  %v17090_v30 = vadd.f32 %v619_v24, %v17002_v38  ;;  %1611 = vmatmul.bf16.vlgmr.msra.gmra.mxu2 %v23831_v35  ;;  %v10558_v5 = vld [vmem:[%s23825_s2 + $0x230] sm:$0xf0]  ;;  %v14609_v24 = vld [vmem:[%s23825_s2 + $0x19c] sm:$0xf] }
  0xd5   :  { %23845 = vst [vmem:[#allocation15_spill] sm:$0xff] %v17081_v21  ;;  %1659 = vmatpush.bf16.msrb.mxu2 %v10401_v15  ;;  %v10305_v15 = vor.u32 %v14560_v61, %v10302_v0  ;;  %v10561_v16 = vor.u32 %v14624_v1, %v10558_v5  ;;  %v10505_v40 = vor.u32 %v14609_v24, %v10502_v25  ;;  %v14665_v61 = vld [vmem:[%s23825_s2 + $0x35c] sm:$0xf] }
  0xd6   :  { %23846 = vst [vmem:[#allocation16_spill] sm:$0xff] %v17090_v30  ;;  %v10726_v0 = vld [vmem:[%s23825_s2 + $0x378] sm:$0xf0] }
  0xd7   :  { %1624 = vmatmul.bf16.vlgmr.msra.gmra.mxu3 %v23831_v35  ;;  %v532_v42 = vpop.f32.mrf.mxu2 }
  0xd8   :  { %1672 = vmatpush.bf16.msrb.mxu3 %v10657_v18  ;;  %v17113_v46 = vadd.f32 %v532_v42, %v17095_v33  ;;  %v10537_v18 = vor.u32 %v14617_v6, %v10534_v39  ;;  %v10729_v6 = vor.u32 %v14665_v61, %v10726_v0  ;;  %v14593_v39 = vld [vmem:[%s23825_s2 + $0x11c] sm:$0xf] }
  0xd9   :  { %1660 = vmatpush.bf16.msrb.mxu2 %v10369_v31  ;;  %v14673_v31 = vld [vmem:[%s23825_s2 + $0x39c] sm:$0xf]  ;;  %v10441_v25 = vor.u32 %v14593_v39, %v10438_v9 }
  0xda   :  { %v561_v48 = vpop.f32.mrf.mxu3  ;;  %v17118_v58 = vpop.f32.mrf.mxu0  ;;  %v14577_v0 = vld [vmem:[%s23825_s2 + $0x9c] sm:$0xf] }
  0xdb   :  { %v17116_v49 = vadd.f32 %v561_v48, %v17104_v41  ;;  %23847 = vst [vmem:[#allocation17_spill] sm:$0xff] %v17118_v58  ;;  %v17129_v4 = vpop.f32.mrf.mxu1  ;;  %v14601_v48 = vld [vmem:[%s23825_s2 + $0x15c] sm:$0xf]  ;;  %v10882_v58 = vld [vmem:[%s23825_s2 + $0x90] sm:$0xf] }
  0xdc   :  { %1673 = vmatpush.bf16.msrb.mxu3 %v10625_v34  ;;  %23848 = vst [vmem:[#allocation18_spill] sm:$0xff] %v17129_v4  ;;  %v10758_v34 = vld [vmem:[%s23825_s2 + $0x3b8] sm:$0xf0] }
  0xdd   :  { %1661 = vmatpush.bf16.msrb.mxu2 %v10337_v55  ;;  %v10761_v44 = vor.u32 %v14673_v31, %v10758_v34  ;;  %v10470_v55 = vld [vmem:[%s23825_s2 + $0x178] sm:$0xf0] }
  0xde   :  { %v10473_v1 = vor.u32 %v14601_v48, %v10470_v55  ;;  %v10630_v39 = vld [vmem:[%s23825_s2 + $0x2b8] sm:$0xf0] }
  0xdf   :  { %v17146_v19 = vpop.f32.mrf.mxu2 }
  0xe0   :  { %1674 = vmatpush.bf16.msrb.mxu3 %v10593_v60 }
  0xe1   :  { %1662 = vmatpush.bf16.msrb.mxu2 %v10305_v15 }
  0xe2   :  { %v17154_v27 = vpop.f32.mrf.mxu3  ;;  %v595_v37 = vpop.f32.mrf.mxu0 }
  0xe3   :  { %v17163_v42 = vadd.f32 %v595_v37, %v16991_v22  ;;  %v624_v43 = vpop.f32.mrf.mxu1  ;;  %v14585_v37 = vld [vmem:[%s23825_s2 + $0xdc] sm:$0xf] }
  0xe4   :  { %1675 = vmatpush.bf16.msrb.mxu3 %v10561_v16  ;;  %v17172_v60 = vadd.f32 %v624_v43, %v17002_v38  ;;  %1663 = vmatmul.bf16.vlgmr.msrb.gmra.mxu2 %v23831_v35  ;;  %v14657_v16 = vld [vmem:[%s23825_s2 + $0x31c] sm:$0xf] }
  0xe5   :  { %1707 = vmatpush.bf16.msra.mxu2 %v10537_v18  ;;  %v10694_v18 = vld [vmem:[%s23825_s2 + $0x338] sm:$0xf0] }
  0xe6   :  { %v10697_v34 = vor.u32 %v14657_v16, %v10694_v18  ;;  %v14649_v43 = vld [vmem:[%s23825_s2 + $0x2dc] sm:$0xf] }
  0xe7   :  { %1676 = vmatmul.bf16.vlgmr.msrb.gmra.mxu3 %v23831_v35  ;;  %v537_v5 = vpop.f32.mrf.mxu2 }
  0xe8   :  { %1720 = vmatpush.bf16.msra.mxu3 %v10793_v20  ;;  %v17189_v10 = vadd.f32 %v537_v5, %v17095_v33 }
  0xe9   :  { %1708 = vmatpush.bf16.msra.mxu2 %v10505_v40  ;;  %v10406_v40 = vld [vmem:[%s23825_s2 + $0xf8] sm:$0xf0] }
  0xea   :  { %v566_v15 = vpop.f32.mrf.mxu3  ;;  %v17200_v24 = vpop.f32.mrf.mxu0  ;;  %v10409_v48 = vor.u32 %v14585_v37, %v10406_v40  ;;  %v10342_v37 = vld [vmem:[%s23825_s2 + $0x78] sm:$0xf0] }
  0xeb   :  { %v17198_v20 = vadd.f32 %v566_v15, %v17104_v41  ;;  %v17202_v31 = vpop.f32.mrf.mxu1 }
  0xec   :  { %1721 = vmatpush.bf16.msra.mxu3 %v10761_v44  ;;  %v10662_v44 = vld [vmem:[%s23825_s2 + $0x2f8] sm:$0xf0] }
  0xed   :  { %1709 = vmatpush.bf16.msra.mxu2 %v10473_v1  ;;  %v10665_v61 = vor.u32 %v14649_v43, %v10662_v44  ;;  %v10374_v1 = vld [vmem:[%s23825_s2 + $0xb8] sm:$0xf0] }
  0xee   :  { %v10377_v15 = vor.u32 %v14577_v0, %v10374_v1  ;;  %v14633_v43 = vld [vmem:[%s23825_s2 + $0x25c] sm:$0xf] }
  0xef   :  { %v17216_v55 = vpop.f32.mrf.mxu2  ;;  %v10598_v44 = vld [vmem:[%s23825_s2 + $0x278] sm:$0xf0] }
  0xf0   :  { %1722 = vmatpush.bf16.msra.mxu3 %v10729_v6  ;;  %23849 = vst [vmem:[#allocation19_spill] sm:$0xff] %v17216_v55  ;;  %v14641_v6 = vld [vmem:[%s23825_s2 + $0x29c] sm:$0xf]  ;;  %v10601_v0 = vor.u32 %v14633_v43, %v10598_v44 }
  0xf1   :  { %1710 = vmatpush.bf16.msra.mxu2 %v10441_v25  ;;  %v10633_v25 = vor.u32 %v14641_v6, %v10630_v39  ;;  %v14561_v1 = vld [vmem:[%s23825_s2 + $0x1c] sm:$0xf] }
  0xf2   :  { %v17224_v5 = vpop.f32.mrf.mxu3  ;;  %v600_v9 = vpop.f32.mrf.mxu0  ;;  %v10310_v6 = vld [vmem:[%s23825_s2 + $0x38] sm:$0xf0] }
  0xf3   :  { %23850 = vst [vmem:[#allocation20_spill] sm:$0xff] %v17224_v5  ;;  %v17233_v16 = vadd.f32 %v600_v9, %v16991_v22  ;;  %v629_v18 = vpop.f32.mrf.mxu1 }
  0xf4   :  { %1723 = vmatpush.bf16.msra.mxu3 %v10697_v34  ;;  %v14569_v34 = vld [vmem:[%s23825_s2 + $0x5c] sm:$0xf]  ;;  %v17242_v40 = vadd.f32 %v629_v18, %v17002_v38 }
  0xf5   :  { %1711 = vmatpush.bf16.msra.mxu2 %v10409_v48  ;;  %v10345_v48 = vor.u32 %v14569_v34, %v10342_v37  ;;  %v10566_v18 = vld [vmem:[%s23825_s2 + $0x238] sm:$0xf0]  ;;  %v10313_v37 = vor.u32 %v14561_v1, %v10310_v6  ;;  %v17279_v6 = vperm.slane %v16810_v50, 6 }
  0xf8   :  { %1724 = vmatpush.bf16.msra.mxu3 %v10665_v61  ;;  %v542_v61 = vpop.f32.mrf.mxu2 }
  0xf9   :  { %1712 = vmatpush.bf16.msra.mxu2 %v10377_v15  ;;  %v17257_v39 = vadd.f32 %v542_v61, %v17095_v33  ;;  %v14625_v15 = vld [vmem:[%s23825_s2 + $0x21c] sm:$0xf] }
  0xfa   :  { %v571_v9 = vpop.f32.mrf.mxu3  ;;  %v602_v34 = vpop.f32.mrf.mxu0  ;;  %v10569_v44 = vor.u32 %v14625_v15, %v10566_v18 }
  0xfb   :  { %23851 = vst [vmem:[#allocation21_spill] sm:$0xff] %v17257_v39  ;;  %v17268_v43 = vpop.f32.mrf.mxu1 }
  0xfc   :  { %1725 = vmatpush.bf16.msra.mxu3 %v10633_v25  ;;  %v17266_v25 = vadd.f32 %v571_v9, %v17104_v41 }
  0xfd   :  { %1713 = vmatpush.bf16.msra.mxu2 %v10345_v48  ;;  %v470_v48 = vadd.f32 %v16830_v63, %v16839_v2 }
  0xfe   :  { %23852 = vst [vmem:[#allocation22_spill] sm:$0xff] %v17266_v25 }
 0x100   :  { %1726 = vmatpush.bf16.msra.mxu3 %v10601_v0  ;;  %v17270_v61 = vpop.f32.mrf.mxu2  ;;  %v17282_v0 = vperm.slane %v16810_v50, 7 }
 0x101   :  { %1714 = vmatpush.bf16.msra.mxu2 %v10313_v37  ;;  %23853 = vst [vmem:[#allocation23_spill] sm:$0xff] %v17270_v61 }
 0x102   :  { %v17272_v35 = vpop.f32.mrf.mxu3  ;;  %v1534_v36 = vpop.f32.mrf.mxu0 }
 0x103   :  { %23854 = vst [vmem:[#allocation24_spill] sm:$0xff] %v17272_v35  ;;  %v1547_v9 = vpop.f32.mrf.mxu1 }
 0x104   :  { %1727 = vmatpush.bf16.msra.mxu3 %v10569_v44  ;;  %1715 = vmatmul.bf16.vlgmr.msra.gmra.mxu2 %v23855_v52  ;;  %v1548_v1 = vadd.f32 %v1547_v9, %v1534_v36 }
 0x106   :  { %v1747_v15 = vadd.f32 %v1548_v1, %v470_v48  ;;  %v528_v1 = vadd.f32 %v17032_v47, %v17095_v33 }
 0x107   :  { %1728 = vmatmul.bf16.vlgmr.msra.gmra.mxu3 %v23855_v52 }
 0x108   :  { %v643_v18 = vpop.f32.mrf.mxu2  ;;  %v10794_v37 = vmul.f32 -1.442695, %v1747_v15 }
 0x109   :  { %v17285_v44 = vadd.f32 %v643_v18, %v17279_v6 }
 0x10a   :  { %v672_v35 = vpop.f32.mrf.mxu3  ;;  %15616 = vpow2.f32 %v10794_v37  ;;  %v1536_v61 = vpop.f32.mrf.mxu0 }
 0x10b   :  { %23856 = vst [vmem:[#allocation25_spill] sm:$0xff] %v17285_v44  ;;  %v17288_v52 = vadd.f32 %v672_v35, %v17282_v0  ;;  %v1549_v63 = vpop.f32.mrf.mxu1 }
 0x10d   :  { %23857 = vst [vmem:[#allocation26_spill] sm:$0xff] %v17288_v52 }
 0x110   :  { %v17290_v36 = vpop.f32.mrf.mxu2  ;;  %v15617_v9 = vpop.eup %15616 }
 0x111   :  { %23858 = vst [vmem:[#allocation27_spill] sm:$0xff] %v17290_v36  ;;  %v1754_v50 = vadd.f32 1.0, %v15617_v9 }
 0x112   :  { %v17292_v26 = vpop.f32.mrf.mxu3  ;;  %v1586_v53 = vpop.f32.mrf.mxu0 }
 0x113   :  { %23859 = vst [vmem:[#allocation28_spill] sm:$0xff] %v17292_v26  ;;  %15618 = vrcp.f32 %v1754_v50  ;;  %v1599_v48 = vpop.f32.mrf.mxu1  ;;  %v1766_v62 = vand.u32 2147483648, %v1754_v50  ;;  %v1764_v47 = vand.u32 2147483647, %v1754_v50  ;;  %vm1760_vm1 = vweird.f32 %v1754_v50 }
 0x114   :  { %v1600_v15 = vadd.f32 %v1599_v48, %v1586_v53 }
 0x115   :  { %vm1765_vm3 = vcmp.eq.f32.partialorder %v1764_v47, 8.507059e+37  ;;  %v14734_v47 = vld [vmem:[%s23825_s2 + $0x184] sm:$0xf] }
 0x116   :  { %v1749_v18 = vadd.f32 %v1600_v15, %v528_v1  ;;  %v11026_v15 = vld [vmem:[%s23825_s2 + $0x1c0] sm:$0xf] }
 0x118   :  { %v648_v44 = vpop.f32.mrf.mxu2  ;;  %15620 = vtanh.f32 %v1749_v18  ;;  %v11028_v18 = vld [vmem:[%s23825_s2 + $0x1e0] sm:$0xf0] }
 0x119   :  { %v17297_v35 = vadd.f32 %v648_v44, %v17279_v6  ;;  %v15619_v37 = vpop.eup %15618  ;;  %v1767_v44 = vor.u32 1.1754944e-38, %v1766_v62 }
 0x11a   :  { %v677_v61 = vpop.f32.mrf.mxu3  ;;  %v1756_v52 = vmul.f32 %v15619_v37, %v1754_v50  ;;  %v1588_v26 = vpop.f32.mrf.mxu0  ;;  %vm1761_vm0 = vweird.f32 %v15619_v37 }
 0x11b   :  { %23860 = vst [vmem:[#allocation29_spill] sm:$0xff] %v17297_v35  ;;  %v17300_v63 = vadd.f32 %v677_v61, %v17282_v0  ;;  %v1601_v9 = vpop.f32.mrf.mxu1  ;;  %vm1762_vm2 = vmor %vm1760_vm1, %vm1761_vm0  ;;  %v14746_v26 = vld [vmem:[%s23825_s2 + $0x1dc] sm:$0xf0] }
 0x11c   :  { %v1757_v36 = vsub.f32 1.0, %v1756_v52  ;;  %v14742_v52 = vld [vmem:[%s23825_s2 + $0x1c4] sm:$0xf]  ;;  %v11027_v62 = vor.u32 %v14746_v26, %v11026_v15 }
 0x11d   :  { %23861 = vst [vmem:[#allocation30_spill] sm:$0xff] %v17300_v63  ;;  %v11031_v39 = vor.u32 %v14742_v52, %v11028_v18  ;;  %v14690_v63 = vld [vmem:[%s23825_s2 + $0x1c] sm:$0xf0] }
 0x11e   :  { %v1758_v56 = vmul.f32 %v15619_v37, %v1757_v36  ;;  %v603_v36 = vadd.f32 %v602_v34, %v16991_v22  ;;  %v15621_v61 = vpop.eup %15620  ;;  %2654 = vmatpush.bf16.msra.mxu0 %v11027_v62  ;;  %v10994_v34 = vld [vmem:[%s23825_s2 + $0x180] sm:$0xf]  ;;  %v14726_v62 = vld [vmem:[%s23825_s2 + $0x144] sm:$0xf] }
 0x11f   :  { %2680 = vmatpush.bf16.msrb.mxu2 %v11031_v39 }
 0x120   :  { %v17302_v53 = vpop.f32.mrf.mxu2  ;;  %v1759_v48 = vadd.f32 %v15619_v37, %v1758_v56 }
 0x121   :  { %23862 = vst [vmem:[#allocation31_spill] sm:$0xff] %v17302_v53  ;;  %v10914_v53 = vld [vmem:[%s23825_s2 + $0xd0] sm:$0xf] }
 0x122   :  { %v17304_v1 = vpop.f32.mrf.mxu3  ;;  %v1763_v50 = vsel %vm1762_vm2, %v15619_v37, %v1759_v48  ;;  %v1638_v56 = vpop.f32.mrf.mxu0  ;;  %v14738_v37 = vld [vmem:[%s23825_s2 + $0x19c] sm:$0xf0] }
 0x123   :  { %23863 = vst [vmem:[#allocation32_spill] sm:$0xff] %v17304_v1  ;;  %v1768_v9 = vsel %vm1765_vm3, %v1767_v44, %v1763_v50  ;;  %v1651_v25 = vpop.f32.mrf.mxu1  ;;  %v10995_v44 = vor.u32 %v14738_v37, %v10994_v34  ;;  %v14771_v1 = vld [vmem:[%s23825_s2 + $0x2a4] sm:$0xf0] }
 0x124   :  { %v17319_v12 = vmul.f32 %v15621_v61, %v1768_v9  ;;  %v1652_v7 = vadd.f32 %v1651_v25, %v1638_v56  ;;  %v10996_v25 = vld [vmem:[%s23825_s2 + $0x1a0] sm:$0xf0] }
 0x125   :  { %v10999_v39 = vor.u32 %v14734_v47, %v10996_v25  ;;  %2655 = vmatpush.bf16.msra.mxu0 %v10995_v44  ;;  %v10964_v9 = vld [vmem:[%s23825_s2 + $0x160] sm:$0xf0]  ;;  %v10930_v47 = vld [vmem:[%s23825_s2 + $0x100] sm:$0xf] }
 0x126   :  { %v1814_v48 = vadd.f32 %v1652_v7, %v603_v36  ;;  %v10962_v7 = vld [vmem:[%s23825_s2 + $0x140] sm:$0xf]  ;;  %v10967_v37 = vor.u32 %v14726_v62, %v10964_v9  ;;  %v14718_v44 = vld [vmem:[%s23825_s2 + $0x104] sm:$0xf] }
 0x127   :  { %2681 = vmatpush.bf16.msrb.mxu2 %v10999_v39  ;;  %v14730_v36 = vld [vmem:[%s23825_s2 + $0x15c] sm:$0xf0]  ;;  %v14710_v9 = vld [vmem:[%s23825_s2 + $0xc4] sm:$0xf] }
 0x128   :  { %v653_v15 = vpop.f32.mrf.mxu2  ;;  %v10797_v50 = vmul.f32 -1.442695, %v1814_v48  ;;  %v10963_v61 = vor.u32 %v14730_v36, %v10962_v7  ;;  %v14722_v48 = vld [vmem:[%s23825_s2 + $0x11c] sm:$0xf0] }
 0x129   :  { %v17334_v26 = vadd.f32 %v653_v15, %v17279_v6  ;;  %v10931_v25 = vor.u32 %v14722_v48, %v10930_v47  ;;  %v10932_v15 = vld [vmem:[%s23825_s2 + $0x120] sm:$0xf0]  ;;  %v10898_v62 = vld [vmem:[%s23825_s2 + $0xc0] sm:$0xf] }
 0x12a   :  { %v682_v52 = vpop.f32.mrf.mxu3  ;;  %15622 = vpow2.f32 %v10797_v50  ;;  %v1640_v18 = vpop.f32.mrf.mxu0  ;;  %2656 = vmatpush.bf16.msra.mxu0 %v10963_v61  ;;  %v10866_v47 = vld [vmem:[%s23825_s2 + $0x80] sm:$0xf] }
 0x12b   :  { %v17337_v56 = vadd.f32 %v682_v52, %v17282_v0  ;;  %v1653_v34 = vpop.f32.mrf.mxu1  ;;  %2682 = vmatpush.bf16.msrb.mxu2 %v10967_v37  ;;  %v10935_v52 = vor.u32 %v14718_v44, %v10932_v15  ;;  %v14714_v18 = vld [vmem:[%s23825_s2 + $0xdc] sm:$0xf0]  ;;  %v10868_v15 = vld [vmem:[%s23825_s2 + $0xa0] sm:$0xf0] }
 0x12c   :  { %v10899_v61 = vor.u32 %v14714_v18, %v10898_v62  ;;  %v10900_v34 = vld [vmem:[%s23825_s2 + $0xe0] sm:$0xf0]  ;;  %v14706_v48 = vld [vmem:[%s23825_s2 + $0x9c] sm:$0xf0] }
 0x12d   :  { %v10903_v37 = vor.u32 %v14710_v9, %v10900_v34  ;;  %v10867_v44 = vor.u32 %v14706_v48, %v10866_v47  ;;  %v10834_v34 = vld [vmem:[%s23825_s2 + $0x40] sm:$0xf]  ;;  %v14694_v47 = vld [vmem:[%s23825_s2 + $0x44] sm:$0xf] }
 0x12e   :  { %2657 = vmatpush.bf16.msra.mxu0 %v10931_v25  ;;  %v14702_v25 = vld [vmem:[%s23825_s2 + $0x84] sm:$0xf] }
 0x12f   :  { %2683 = vmatpush.bf16.msrb.mxu2 %v10935_v52 }
 0x130   :  { %v17363_v39 = vpop.f32.mrf.mxu2  ;;  %v15623_v50 = vpop.eup %15622 }
 0x131   :  { %v17367_v36 = vadd.f32 1.0, %v15623_v50  ;;  %v10871_v50 = vor.u32 %v14702_v25, %v10868_v15  ;;  %v10836_v25 = vld [vmem:[%s23825_s2 + $0x60] sm:$0xf0] }
 0x132   :  { %v17365_v7 = vpop.f32.mrf.mxu3  ;;  %2658 = vmatpush.bf16.msra.mxu0 %v10899_v61  ;;  %v10839_v15 = vor.u32 %v14694_v47, %v10836_v25  ;;  %v10804_v47 = vld [vmem:[%s23825_s2 + $0x20] sm:$0xf0] }
 0x133   :  { %15624 = vrcp.f32 %v17367_v36  ;;  %2684 = vmatpush.bf16.msrb.mxu2 %v10903_v37  ;;  %v14698_v37 = vld [vmem:[%s23825_s2 + $0x5c] sm:$0xf0]  ;;  %vm1827_vm4 = vweird.f32 %v17367_v36 }
 0x136   :  { %2659 = vmatpush.bf16.msra.mxu0 %v10867_v44  ;;  %v10835_v44 = vor.u32 %v14698_v37, %v10834_v34 }
 0x137   :  { %2685 = vmatpush.bf16.msrb.mxu2 %v10871_v50  ;;  %v14686_v50 = vld [vmem:[%s23825_s2 + $0x4] sm:$0xf] }
 0x138   :  { %v658_v52 = vpop.f32.mrf.mxu2  ;;  %v10807_v30 = vor.u32 %v14686_v50, %v10804_v47 }
 0x139   :  { %v17395_v62 = vadd.f32 %v658_v52, %v17279_v6  ;;  %v17397_v61 = vpop.eup %15624 }
 0x13a   :  { %v687_v18 = vpop.f32.mrf.mxu3  ;;  %v1823_v48 = vmul.f32 %v17397_v61, %v17367_v36  ;;  %2660 = vmatpush.bf16.msra.mxu0 %v10835_v44  ;;  %v14747_v44 = vld [vmem:[%s23825_s2 + $0x1e4] sm:$0xf0]  ;;  %vm1828_vm5 = vweird.f32 %v17397_v61 }
 0x13b   :  { %v17400_v9 = vadd.f32 %v687_v18, %v17282_v0  ;;  %v10802_v18 = vld [vmem:[%s23825_s2] sm:$0xf]  ;;  %2686 = vmatpush.bf16.msrb.mxu2 %v10839_v15  ;;  %v11036_v15 = vld [vmem:[%s23825_s2 + $0x1e8] sm:$0xf0]  ;;  %vm17458_vm6 = vmor %vm1827_vm4, %vm1828_vm5 }
 0x13c   :  { %v1824_v52 = vsub.f32 1.0, %v1823_v48  ;;  %v10803_v37 = vor.u32 %v14690_v63, %v10802_v18  ;;  %v11034_v48 = vld [vmem:[%s23825_s2 + $0x1c8] sm:$0xf]  ;;  %v14743_v63 = vld [vmem:[%s23825_s2 + $0x1cc] sm:$0xf] }
 0x13d   :  { %v11035_v21 = vor.u32 %v14747_v44, %v11034_v48  ;;  %v11039_v50 = vor.u32 %v14743_v63, %v11036_v15  ;;  %v1831_v48 = vand.u32 2147483647, %v17367_v36  ;;  %v1833_v44 = vand.u32 2147483648, %v17367_v36 }
 0x13e   :  { %v1825_v34 = vmul.f32 %v17397_v61, %v1824_v52  ;;  %2661 = vmatpush.bf16.msra.mxu0 %v10803_v37 }
 0x13f   :  { %2687 = vmatpush.bf16.msrb.mxu2 %v10807_v30  ;;  %v11004_v30 = vld [vmem:[%s23825_s2 + $0x1a8] sm:$0xf0]  ;;  %vm17465_vm7 = vcmp.eq.f32.partialorder %v1831_v48, 8.507059e+37  ;;  %v1834_v63 = vor.u32 1.1754944e-38, %v1833_v44 }
 0x140   :  { %v660_v25 = vpop.f32.mrf.mxu2  ;;  %v1826_v55 = vadd.f32 %v17397_v61, %v1825_v34  ;;  %v10972_v44 = vld [vmem:[%s23825_s2 + $0x168] sm:$0xf0] }
 0x141   :  { %v661_v52 = vadd.f32 %v660_v25, %v17279_v6  ;;  %v11002_v25 = vld [vmem:[%s23825_s2 + $0x188] sm:$0xf]  ;;  %v10940_v34 = vld [vmem:[%s23825_s2 + $0x128] sm:$0xf0] }
 0x142   :  { %v1690_v35 = vpop.f32.mrf.mxu0  ;;  %v17442_v18 = vpop.f32.mrf.mxu3  ;;  %2706 = vmatpush.bf16.msrb.mxu0 %v11035_v21  ;;  %v11003_v21 = vor.u32 %v14739_v51, %v11002_v25  ;;  %v1830_v15 = vsel %vm17458_vm6, %v17397_v61, %v1826_v55  ;;  %v10970_v51 = vld [vmem:[%s23825_s2 + $0x148] sm:$0xf] }
 0x143   :  { %v1703_v5 = vpop.f32.mrf.mxu1  ;;  %2732 = vmatpush.bf16.msra.mxu2 %v11039_v50  ;;  %v14727_v50 = vld [vmem:[%s23825_s2 + $0x14c] sm:$0xf]  ;;  %v1835_v37 = vsel %vm17465_vm7, %v1834_v63, %v1830_v15 }
 0x144   :  { %v1704_v47 = vadd.f32 %v1703_v5, %v1690_v35  ;;  %v14735_v5 = vld [vmem:[%s23825_s2 + $0x18c] sm:$0xf]  ;;  %v10975_v25 = vor.u32 %v14727_v50, %v10972_v44  ;;  %v14810_v44 = vld [vmem:[%s23825_s2 + $0x3dc] sm:$0xf0] }
 0x145   :  { %v11007_v36 = vor.u32 %v14735_v5, %v11004_v30  ;;  %v10938_v30 = vld [vmem:[%s23825_s2 + $0x108] sm:$0xf] }
 0x146   :  { %v1816_v35 = vadd.f32 %v1704_v47, %v661_v52  ;;  %2707 = vmatpush.bf16.msrb.mxu0 %v11003_v21  ;;  %v14731_v52 = vld [vmem:[%s23825_s2 + $0x164] sm:$0xf0] }
 0x147   :  { %2733 = vmatpush.bf16.msra.mxu2 %v11007_v36  ;;  %v10971_v48 = vor.u32 %v14731_v52, %v10970_v51  ;;  %v14723_v36 = vld [vmem:[%s23825_s2 + $0x124] sm:$0xf0]  ;;  %v14719_v51 = vld [vmem:[%s23825_s2 + $0x10c] sm:$0xf] }
 0x148   :  { %15626 = vtanh.f32 %v1816_v35  ;;  %v1560_v47 = vpop.f32.mrf.mxu2  ;;  %v499_v35 = vadd.f32 %v16841_v3, %v16865_v14  ;;  %v10939_v3 = vor.u32 %v14723_v36, %v10938_v30  ;;  %v10943_v15 = vor.u32 %v14719_v51, %v10940_v34  ;;  %v14711_v30 = vld [vmem:[%s23825_s2 + $0xcc] sm:$0xf]  ;;  %v14802_v34 = vld [vmem:[%s23825_s2 + $0x39c] sm:$0xf0] }
 0x149   :  { %v10908_v36 = vld [vmem:[%s23825_s2 + $0xe8] sm:$0xf0] }
 0x14a   :  { %v1692_v55 = vpop.f32.mrf.mxu0  ;;  %v1573_v61 = vpop.f32.mrf.mxu3  ;;  %2708 = vmatpush.bf16.msrb.mxu0 %v10971_v48  ;;  %v11282_v48 = vld [vmem:[%s23825_s2 + $0x3c0] sm:$0xf] }
 0x14b   :  { %v1705_v5 = vpop.f32.mrf.mxu1  ;;  %v1574_v21 = vadd.f32 %v1573_v61, %v1560_v47  ;;  %2734 = vmatpush.bf16.msra.mxu2 %v10975_v25  ;;  %v11283_v55 = vor.u32 %v14810_v44, %v11282_v48  ;;  %v14806_v61 = vld [vmem:[%s23825_s2 + $0x3c4] sm:$0xf]  ;;  %v10874_v44 = vld [vmem:[%s23825_s2 + $0x88] sm:$0xf] }
 0x14c   :  { %v11284_v25 = vld [vmem:[%s23825_s2 + $0x3e0] sm:$0xf0]  ;;  %v10906_v5 = vld [vmem:[%s23825_s2 + $0xc8] sm:$0xf] }
 0x14d   :  { %v1748_v50 = vadd.f32 %v1574_v21, %v499_v35  ;;  %v14715_v21 = vld [vmem:[%s23825_s2 + $0xe4] sm:$0xf0]  ;;  %2667 = vmatpush.bf16.msra.mxu1 %v11283_v55  ;;  %v11252_v48 = vld [vmem:[%s23825_s2 + $0x3a0] sm:$0xf0] }
 0x14e   :  { %v15627_v52 = vpop.eup %15626  ;;  %2709 = vmatpush.bf16.msrb.mxu0 %v10939_v3  ;;  %v11250_v3 = vld [vmem:[%s23825_s2 + $0x380] sm:$0xf]  ;;  %v14707_v55 = vld [vmem:[%s23825_s2 + $0xa4] sm:$0xf0] }
 0x14f   :  { %v17500_v63 = vmul.f32 %v15627_v52, %v1835_v37  ;;  %v10795_v47 = vmul.f32 -1.442695, %v1748_v50  ;;  %2735 = vmatpush.bf16.msra.mxu2 %v10943_v15  ;;  %v11287_v37 = vor.u32 %v14806_v61, %v11284_v25  ;;  %v10907_v52 = vor.u32 %v14715_v21, %v10906_v5  ;;  %v14798_v15 = vld [vmem:[%s23825_s2 + $0x384] sm:$0xf]  ;;  %v14703_v5 = vld [vmem:[%s23825_s2 + $0x8c] sm:$0xf] }
 0x150   :  { %v1562_v35 = vpop.f32.mrf.mxu2  ;;  %v10911_v50 = vor.u32 %v14711_v30, %v10908_v36  ;;  %v11255_v61 = vor.u32 %v14798_v15, %v11252_v48  ;;  %v10875_v25 = vor.u32 %v14707_v55, %v10874_v44  ;;  %v11218_v30 = vld [vmem:[%s23825_s2 + $0x340] sm:$0xf]  ;;  %v14699_v48 = vld [vmem:[%s23825_s2 + $0x64] sm:$0xf0]  ;;  %v14695_v44 = vld [vmem:[%s23825_s2 + $0x4c] sm:$0xf] }
 0x151   :  { %15628 = vpow2.f32 %v10795_v47  ;;  %2693 = vmatpush.bf16.msrb.mxu3 %v11287_v37  ;;  %v11251_v47 = vor.u32 %v14802_v34, %v11250_v3  ;;  %v10876_v35 = vld [vmem:[%s23825_s2 + $0xa8] sm:$0xf0]  ;;  %v14794_v36 = vld [vmem:[%s23825_s2 + $0x35c] sm:$0xf0]  ;;  %v11220_v3 = vld [vmem:[%s23825_s2 + $0x360] sm:$0xf0] }
 0x152   :  { %v1575_v51 = vpop.f32.mrf.mxu3  ;;  %2710 = vmatpush.bf16.msrb.mxu0 %v10907_v52  ;;  %v10879_v37 = vor.u32 %v14703_v5, %v10876_v35  ;;  %v10842_v34 = vld [vmem:[%s23825_s2 + $0x48] sm:$0xf]  ;;  %v10844_v55 = vld [vmem:[%s23825_s2 + $0x68] sm:$0xf0] }
 0x153   :  { %2736 = vmatpush.bf16.msra.mxu2 %v10911_v50  ;;  %2668 = vmatpush.bf16.msra.mxu1 %v11251_v47  ;;  %v14790_v51 = vld [vmem:[%s23825_s2 + $0x344] sm:$0xf]  ;;  %v11219_v50 = vor.u32 %v14794_v36, %v11218_v30  ;;  %v10843_v35 = vor.u32 %v14699_v48, %v10842_v34  ;;  %v14786_v30 = vld [vmem:[%s23825_s2 + $0x31c] sm:$0xf0]  ;;  %v10812_v48 = vld [vmem:[%s23825_s2 + $0x28] sm:$0xf0] }
 0x154   :  { %v11223_v47 = vor.u32 %v14790_v51, %v11220_v3  ;;  %v14782_v36 = vld [vmem:[%s23825_s2 + $0x304] sm:$0xf] }
 0x155   :  { %2694 = vmatpush.bf16.msrb.mxu3 %v11255_v61 }
 0x156   :  { %2711 = vmatpush.bf16.msrb.mxu0 %v10875_v25  ;;  %v557_v25 = vadd.f32 %v17040_v54, %v17104_v41  ;;  %v11188_v54 = vld [vmem:[%s23825_s2 + $0x320] sm:$0xf0] }
 0x157   :  { %v15629_v21 = vpop.eup %15628  ;;  %2737 = vmatpush.bf16.msra.mxu2 %v10879_v37  ;;  %2669 = vmatpush.bf16.msra.mxu1 %v11219_v50  ;;  %v10847_v37 = vor.u32 %v14695_v44, %v10844_v55  ;;  %v10810_v50 = vld [vmem:[%s23825_s2 + $0x8] sm:$0xf]  ;;  %v11191_v34 = vor.u32 %v14782_v36, %v11188_v54 }
 0x158   :  { %v17559_v52 = vadd.f32 1.0, %v15629_v21  ;;  %v1612_v15 = vpop.f32.mrf.mxu2  ;;  %v11186_v21 = vld [vmem:[%s23825_s2 + $0x300] sm:$0xf] }
 0x159   :  { %2695 = vmatpush.bf16.msrb.mxu3 %v11223_v47  ;;  %v11187_v51 = vor.u32 %v14786_v30, %v11186_v21  ;;  %v14687_v47 = vld [vmem:[%s23825_s2 + $0xc] sm:$0xf]  ;;  %v11156_v21 = vld [vmem:[%s23825_s2 + $0x2e0] sm:$0xf0] }
 0x15a   :  { %15630 = vrcp.f32 %v17559_v52  ;;  %v1625_v61 = vpop.f32.mrf.mxu3  ;;  %2712 = vmatpush.bf16.msrb.mxu0 %v10843_v35  ;;  %v10815_v55 = vor.u32 %v14687_v47, %v10812_v48  ;;  %v14778_v35 = vld [vmem:[%s23825_s2 + $0x2dc] sm:$0xf0]  ;;  %v1785_v47 = vand.u32 2147483648, %v17559_v52  ;;  %vm1779_vm9 = vweird.f32 %v17559_v52 }
 0x15b   :  { %v1626_v5 = vadd.f32 %v1625_v61, %v1612_v15  ;;  %2738 = vmatpush.bf16.msra.mxu2 %v10847_v37  ;;  %v14691_v15 = vld [vmem:[%s23825_s2 + $0x24] sm:$0xf0]  ;;  %2670 = vmatpush.bf16.msra.mxu1 %v11187_v51  ;;  %v14774_v37 = vld [vmem:[%s23825_s2 + $0x2c4] sm:$0xf] }
 0x15c   :  { %v10811_v44 = vor.u32 %v14691_v15, %v10810_v50  ;;  %v11159_v50 = vor.u32 %v14774_v37, %v11156_v21  ;;  %v14770_v15 = vld [vmem:[%s23825_s2 + $0x29c] sm:$0xf0] }
 0x15d   :  { %v1750_v3 = vadd.f32 %v1626_v5, %v557_v25  ;;  %2696 = vmatpush.bf16.msrb.mxu3 %v11191_v34  ;;  %v11154_v25 = vld [vmem:[%s23825_s2 + $0x2c0] sm:$0xf] }
 0x15e   :  { %2713 = vmatpush.bf16.msrb.mxu0 %v10811_v44  ;;  %v11155_v51 = vor.u32 %v14778_v35, %v11154_v25  ;;  %v11122_v34 = vld [vmem:[%s23825_s2 + $0x280] sm:$0xf]  ;;  %v14766_v44 = vld [vmem:[%s23825_s2 + $0x284] sm:$0xf]  ;;  %v1783_v25 = vand.u32 2147483647, %v17559_v52 }
 0x15f   :  { %v10796_v61 = vmul.f32 -1.442695, %v1750_v3  ;;  %2739 = vmatpush.bf16.msra.mxu2 %v10815_v55  ;;  %v11123_v48 = vor.u32 %v14770_v15, %v11122_v34  ;;  %v11124_v55 = vld [vmem:[%s23825_s2 + $0x2a0] sm:$0xf0] }
 0x160   :  { %v15631_v5 = vpop.eup %15630  ;;  %v1614_v36 = vpop.f32.mrf.mxu2  ;;  %2671 = vmatpush.bf16.msra.mxu1 %v11155_v51  ;;  %v11127_v35 = vor.u32 %v14766_v44, %v11124_v55  ;;  %v14758_v51 = vld [vmem:[%s23825_s2 + $0x244] sm:$0xf]  ;;  %vm1784_vm11 = vcmp.eq.f32.partialorder %v1783_v25, 8.507059e+37 }
 0x161   :  { %v1775_v30 = vmul.f32 %v15631_v5, %v17559_v52  ;;  %15632 = vpow2.f32 %v10796_v61  ;;  %2697 = vmatpush.bf16.msrb.mxu3 %v11159_v50  ;;  %vm1780_vm8 = vweird.f32 %v15631_v5  ;;  %v14762_v36 = vld [vmem:[%s23825_s2 + $0x25c] sm:$0xf0]  ;;  %v11092_v52 = vld [vmem:[%s23825_s2 + $0x260] sm:$0xf0] }
 0x162   :  { %v1627_v54 = vpop.f32.mrf.mxu3  ;;  %vm1781_vm10 = vmor %vm1779_vm9, %vm1780_vm8 }
 0x163   :  { %v1776_v3 = vsub.f32 1.0, %v1775_v30  ;;  %v11090_v30 = vld [vmem:[%s23825_s2 + $0x240] sm:$0xf]  ;;  %v1786_v54 = vor.u32 1.1754944e-38, %v1785_v47 }
 0x164   :  { %2672 = vmatpush.bf16.msra.mxu1 %v11123_v48  ;;  %v11095_v48 = vor.u32 %v14758_v51, %v11092_v52 }
 0x165   :  { %v1777_v61 = vmul.f32 %v15631_v5, %v1776_v3  ;;  %2698 = vmatpush.bf16.msrb.mxu3 %v11127_v35  ;;  %v11091_v3 = vor.u32 %v14762_v36, %v11090_v30  ;;  %v11058_v35 = vld [vmem:[%s23825_s2 + $0x200] sm:$0xf] }
 0x167   :  { %v15633_v37 = vpop.eup %15632  ;;  %v1778_v21 = vadd.f32 %v15631_v5, %v1777_v61  ;;  %v632_v61 = vadd.f32 %v17268_v43, %v17002_v38  ;;  %v11060_v43 = vld [vmem:[%s23825_s2 + $0x220] sm:$0xf0] }
 0x168   :  { %v17640_v50 = vadd.f32 1.0, %v15633_v37  ;;  %v1664_v15 = vpop.f32.mrf.mxu2  ;;  %2673 = vmatpush.bf16.msra.mxu1 %v11091_v3  ;;  %v14811_v3 = vld [vmem:[%s23825_s2 + $0x3e4] sm:$0xf0] }
 0x169   :  { %v1782_v34 = vsel %vm1781_vm10, %v15631_v5, %v1778_v21  ;;  %v14754_v5 = vld [vmem:[%s23825_s2 + $0x21c] sm:$0xf0]  ;;  %2699 = vmatpush.bf16.msrb.mxu3 %v11095_v48  ;;  %v14750_v21 = vld [vmem:[%s23825_s2 + $0x204] sm:$0xf] }
 0x16a   :  { %v1787_v44 = vsel %vm1784_vm11, %v1786_v54, %v1782_v34  ;;  %15634 = vrcp.f32 %v17640_v50  ;;  %v1677_v55 = vpop.f32.mrf.mxu3  ;;  %v11059_v25 = vor.u32 %v14754_v5, %v11058_v35  ;;  %v11063_v51 = vor.u32 %v14750_v21, %v11060_v43  ;;  %v11290_v54 = vld [vmem:[%s23825_s2 + $0x3c8] sm:$0xf]  ;;  %v14807_v34 = vld [vmem:[%s23825_s2 + $0x3cc] sm:$0xf] }
 0x16b   :  { %v1809_v47 = vmul.f32 0.0, %v1787_v44  ;;  %v1678_v37 = vadd.f32 %v1677_v55, %v1664_v15  ;;  %v11291_v52 = vor.u32 %v14811_v3, %v11290_v54  ;;  %v11258_v55 = vld [vmem:[%s23825_s2 + $0x388] sm:$0xf]  ;;  %v14799_v35 = vld [vmem:[%s23825_s2 + $0x38c] sm:$0xf]  ;;  %vm1799_vm13 = vweird.f32 %v17640_v50 }
 0x16c   :  { %2674 = vmatpush.bf16.msra.mxu1 %v11059_v25  ;;  %v11260_v5 = vld [vmem:[%s23825_s2 + $0x3a8] sm:$0xf0]  ;;  %v11226_v54 = vld [vmem:[%s23825_s2 + $0x348] sm:$0xf] }
 0x16d   :  { %v17661_v30 = vadd.f32 %v17319_v12, %v1809_v47  ;;  %v1815_v36 = vadd.f32 %v1678_v37, %v632_v61  ;;  %v11292_v12 = vld [vmem:[%s23825_s2 + $0x3e8] sm:$0xf0]  ;;  %2700 = vmatpush.bf16.msrb.mxu3 %v11063_v51  ;;  %v14803_v61 = vld [vmem:[%s23825_s2 + $0x3a4] sm:$0xf0]  ;;  %v11263_v43 = vor.u32 %v14799_v35, %v11260_v5  ;;  %v1805_v51 = vand.u32 2147483648, %v17640_v50 }
 0x16e   :  { %v11295_v48 = vor.u32 %v14807_v34, %v11292_v12  ;;  %v11259_v21 = vor.u32 %v14803_v61, %v11258_v55  ;;  %v14795_v3 = vld [vmem:[%s23825_s2 + $0x364] sm:$0xf0]  ;;  %v1803_v12 = vand.u32 2147483647, %v17640_v50  ;;  %v14748_v35 = vld [vmem:[%s23825_s2 + $0x1ec] sm:$0xf0] }
 0x16f   :  { %v10798_v15 = vmul.f32 -1.442695, %v1815_v36  ;;  %v14744_v5 = vld [vmem:[%s23825_s2 + $0x1d4] sm:$0xf] }
 0x170   :  { %v15635_v44 = vpop.eup %15634  ;;  %2719 = vmatpush.bf16.msrb.mxu1 %v11291_v52  ;;  %v1666_v37 = vpop.f32.mrf.mxu2  ;;  %v14791_v52 = vld [vmem:[%s23825_s2 + $0x34c] sm:$0xf]  ;;  %vm1804_vm15 = vcmp.eq.f32.partialorder %v1803_v12, 8.507059e+37  ;;  %v11010_v12 = vld [vmem:[%s23825_s2 + $0x190] sm:$0xf] }
 0x171   :  { %v1795_v47 = vmul.f32 %v15635_v44, %v17640_v50  ;;  %15636 = vpow2.f32 %v10798_v15  ;;  %2745 = vmatpush.bf16.msra.mxu3 %v11295_v48  ;;  %vm1800_vm12 = vweird.f32 %v15635_v44  ;;  %v11227_v15 = vor.u32 %v14795_v3, %v11226_v54  ;;  %v11228_v48 = vld [vmem:[%s23825_s2 + $0x368] sm:$0xf0]  ;;  %v11042_v37 = vld [vmem:[%s23825_s2 + $0x1d0] sm:$0xf]  ;;  %v11194_v50 = vld [vmem:[%s23825_s2 + $0x308] sm:$0xf] }
 0x172   :  { %v1679_v25 = vpop.f32.mrf.mxu3  ;;  %15638 = vtanh.f32 %v17661_v30  ;;  %v11231_v55 = vor.u32 %v14791_v52, %v11228_v48  ;;  %vm1801_vm14 = vmor %vm1799_vm13, %vm1800_vm12  ;;  %v14783_v52 = vld [vmem:[%s23825_s2 + $0x30c] sm:$0xf]  ;;  %v11043_v45 = vor.u32 %v14748_v35, %v11042_v37  ;;  %v11012_v37 = vld [vmem:[%s23825_s2 + $0x1b0] sm:$0xf0] }
 0x173   :  { %v1796_v36 = vsub.f32 1.0, %v1795_v47  ;;  %v11044_v25 = vld [vmem:[%s23825_s2 + $0x1f0] sm:$0xf0]  ;;  %v11162_v35 = vld [vmem:[%s23825_s2 + $0x2c8] sm:$0xf] }
 0x174   :  { %2720 = vmatpush.bf16.msrb.mxu1 %v11259_v21  ;;  %v1806_v21 = vor.u32 1.1754944e-38, %v1805_v51  ;;  %v11196_v51 = vld [vmem:[%s23825_s2 + $0x328] sm:$0xf0] }
 0x175   :  { %v1797_v34 = vmul.f32 %v15635_v44, %v1796_v36  ;;  %2746 = vmatpush.bf16.msra.mxu3 %v11263_v43  ;;  %v14787_v36 = vld [vmem:[%s23825_s2 + $0x324] sm:$0xf0] }
 0x176   :  { %v11195_v3 = vor.u32 %v14787_v36, %v11194_v50  ;;  %v11164_v50 = vld [vmem:[%s23825_s2 + $0x2e8] sm:$0xf0]  ;;  %v10978_v36 = vld [vmem:[%s23825_s2 + $0x150] sm:$0xf] }
 0x177   :  { %v15637_v61 = vpop.eup %15636  ;;  %v1798_v47 = vadd.f32 %v15635_v44, %v1797_v34 }
 0x178   :  { %v17716_v43 = vadd.f32 1.0, %v15637_v61  ;;  %2721 = vmatpush.bf16.msrb.mxu1 %v11227_v15  ;;  %v15639_v34 = vpop.eup %15638  ;;  %v11199_v61 = vor.u32 %v14783_v52, %v11196_v51 }
 0x179   :  { %v1802_v54 = vsel %vm1801_vm14, %v15635_v44, %v1798_v47  ;;  %2747 = vmatpush.bf16.msra.mxu3 %v11231_v55  ;;  %v11047_v44 = vor.u32 %v14744_v5, %v11044_v25  ;;  %v14740_v55 = vld [vmem:[%s23825_s2 + $0x1ac] sm:$0xf0]  ;;  %v14779_v5 = vld [vmem:[%s23825_s2 + $0x2e4] sm:$0xf0]  ;;  %v14775_v25 = vld [vmem:[%s23825_s2 + $0x2cc] sm:$0xf] }
 0x17a   :  { %v1807_v15 = vsel %vm1804_vm15, %v1806_v21, %v1802_v54  ;;  %15640 = vrcp.f32 %v17716_v43  ;;  %v14736_v21 = vld [vmem:[%s23825_s2 + $0x194] sm:$0xf]  ;;  %v14732_v54 = vld [vmem:[%s23825_s2 + $0x16c] sm:$0xf0]  ;;  %v11167_v52 = vor.u32 %v14775_v25, %v11164_v50  ;;  %v11098_v25 = vld [vmem:[%s23825_s2 + $0x248] sm:$0xf]  ;;  %vm1846_vm1 = vweird.f32 %v17716_v43 }
 0x17b   :  { %v17731_v48 = vmul.f32 %v15639_v34, %v1807_v15  ;;  %v11011_v34 = vor.u32 %v14740_v55, %v11010_v12  ;;  %v11015_v15 = vor.u32 %v14736_v21, %v11012_v37  ;;  %v11132_v12 = vld [vmem:[%s23825_s2 + $0x2a8] sm:$0xf0]  ;;  %v10946_v37 = vld [vmem:[%s23825_s2 + $0x110] sm:$0xf]  ;;  %v14763_v50 = vld [vmem:[%s23825_s2 + $0x264] sm:$0xf0] }
 0x17c   :  { %2722 = vmatpush.bf16.msrb.mxu1 %v11195_v3  ;;  %v11163_v3 = vor.u32 %v14779_v5, %v11162_v35  ;;  %v10980_v35 = vld [vmem:[%s23825_s2 + $0x170] sm:$0xf0] }
 0x17d   :  { %23868 = vst [vmem:[#allocation33_spill] sm:$0xff] %v17731_v48  ;;  %v17741_v47 = vpack.c.bf16 %v17731_v48, %v17731_v48  ;;  %2748 = vmatpush.bf16.msra.mxu3 %v11199_v61  ;;  %v14728_v61 = vld [vmem:[%s23825_s2 + $0x154] sm:$0xf]  ;;  %v11130_v48 = vld [vmem:[%s23825_s2 + $0x288] sm:$0xf] }
 0x17e   :  { %v10983_v5 = vor.u32 %v14728_v61, %v10980_v35  ;;  %v690_v35 = vadd.f32 %v17442_v18, %v17282_v0  ;;  %v14755_v18 = vld [vmem:[%s23825_s2 + $0x224] sm:$0xf0] }
 0x17f   :  { %2662 = vmatmul.bf16.vlgmr.msra.gmra.mxu0 %v17741_v47  ;;  %2688 = vmatmul.bf16.vlgmr.msrb.gmra.mxu2 %v17741_v47 }
 0x180   :  { %v17769_v51 = vpop.eup %15640  ;;  %2758 = vmatpush.bf16.msra.mxu0 %v11043_v45  ;;  %2784 = vmatpush.bf16.msrb.mxu2 %v11047_v44  ;;  %v11131_v45 = vor.u32 %v14771_v1, %v11130_v48  ;;  %v14767_v44 = vld [vmem:[%s23825_s2 + $0x28c] sm:$0xf]  ;;  %v14724_v1 = vld [vmem:[%s23825_s2 + $0x12c] sm:$0xf0]  ;;  %v10979_v48 = vor.u32 %v14732_v54, %v10978_v36  ;;  %v10948_v36 = vld [vmem:[%s23825_s2 + $0x130] sm:$0xf0]  ;;  %v11099_v54 = vor.u32 %v14763_v50, %v11098_v25 }
 0x181   :  { %2723 = vmatpush.bf16.msrb.mxu1 %v11163_v3  ;;  %2749 = vmatpush.bf16.msra.mxu3 %v11167_v52  ;;  %v11135_v55 = vor.u32 %v14767_v44, %v11132_v12  ;;  %v1842_v21 = vmul.f32 %v17769_v51, %v17716_v43  ;;  %v14759_v3 = vld [vmem:[%s23825_s2 + $0x24c] sm:$0xf]  ;;  %v14720_v52 = vld [vmem:[%s23825_s2 + $0x114] sm:$0xf]  ;;  %v10947_v25 = vor.u32 %v14724_v1, %v10946_v37  ;;  %vm1847_vm0 = vweird.f32 %v17769_v51 }
 0x182   :  { %v10951_v50 = vor.u32 %v14720_v52, %v10948_v36  ;;  %v10916_v37 = vld [vmem:[%s23825_s2 + $0xf0] sm:$0xf0]  ;;  %vm17875_vm2 = vmor %vm1846_vm1, %vm1847_vm0 }
 0x183   :  { %v1843_v44 = vsub.f32 1.0, %v1842_v21  ;;  %v14751_v21 = vld [vmem:[%s23825_s2 + $0x20c] sm:$0xf] }
 0x184   :  { %2759 = vmatpush.bf16.msra.mxu0 %v11011_v34  ;;  %2785 = vmatpush.bf16.msrb.mxu2 %v11015_v15  ;;  %v11100_v34 = vld [vmem:[%s23825_s2 + $0x268] sm:$0xf0] }
 0x185   :  { %2724 = vmatpush.bf16.msrb.mxu1 %v11131_v45  ;;  %2750 = vmatpush.bf16.msra.mxu3 %v11135_v55  ;;  %v11103_v61 = vor.u32 %v14759_v3, %v11100_v34  ;;  %v14716_v45 = vld [vmem:[%s23825_s2 + $0xec] sm:$0xf0]  ;;  %v11066_v3 = vld [vmem:[%s23825_s2 + $0x208] sm:$0xf]  ;;  %v14712_v34 = vld [vmem:[%s23825_s2 + $0xd4] sm:$0xf]  ;;  %v1844_v36 = vmul.f32 %v17769_v51, %v1843_v44 }
 0x186   :  { %v11067_v1 = vor.u32 %v14755_v18, %v11066_v3  ;;  %v10919_v4 = vor.u32 %v14712_v34, %v10916_v37  ;;  %v10850_v3 = vld [vmem:[%s23825_s2 + $0x50] sm:$0xf]  ;;  %v14696_v34 = vld [vmem:[%s23825_s2 + $0x54] sm:$0xf] }
 0x187   :  { %v1716_v15 = vpop.f32.mrf.mxu2  ;;  %v1845_v44 = vadd.f32 %v17769_v51, %v1844_v36  ;;  %v14700_v18 = vld [vmem:[%s23825_s2 + $0x6c] sm:$0xf0] }
 0x188   :  { %2760 = vmatpush.bf16.msra.mxu0 %v10979_v48  ;;  %2786 = vmatpush.bf16.msrb.mxu2 %v10983_v5  ;;  %v11068_v48 = vld [vmem:[%s23825_s2 + $0x228] sm:$0xf0]  ;;  %v14692_v36 = vld [vmem:[%s23825_s2 + $0x2c] sm:$0xf0] }
 0x189   :  { %2725 = vmatpush.bf16.msrb.mxu1 %v11099_v54  ;;  %2751 = vmatpush.bf16.msra.mxu3 %v11103_v61  ;;  %v11071_v52 = vor.u32 %v14751_v21, %v11068_v48  ;;  %v14708_v54 = vld [vmem:[%s23825_s2 + $0xac] sm:$0xf0]  ;;  %v14704_v61 = vld [vmem:[%s23825_s2 + $0x94] sm:$0xf]  ;;  %v1850_v21 = vand.u32 2147483647, %v17716_v43  ;;  %v1849_v37 = vsel %vm17875_vm2, %v17769_v51, %v1845_v44 }
 0x18a   :  { %v1729_v12 = vpop.f32.mrf.mxu3  ;;  %v11052_v44 = vld [vmem:[%s23825_s2 + $0x1f8] sm:$0xf0] }
 0x18b   :  { %v1730_v55 = vadd.f32 %v1729_v12, %v1716_v15  ;;  %v10915_v12 = vor.u32 %v14716_v45, %v10914_v53  ;;  %vm1851_vm3 = vcmp.eq.f32.partialorder %v1850_v21, 8.507059e+37  ;;  %v14741_v21 = vld [vmem:[%s23825_s2 + $0x1b4] sm:$0xf0] }
 0x18c   :  { %2761 = vmatpush.bf16.msra.mxu0 %v10947_v25  ;;  %2787 = vmatpush.bf16.msrb.mxu2 %v10951_v50  ;;  %v10883_v25 = vor.u32 %v14708_v54, %v10882_v58  ;;  %v10852_v58 = vld [vmem:[%s23825_s2 + $0x70] sm:$0xf0]  ;;  %v11050_v54 = vld [vmem:[%s23825_s2 + $0x1d8] sm:$0xf] }
 0x18d   :  { %v1817_v5 = vadd.f32 %v1730_v55, %v690_v35  ;;  %v10884_v35 = vld [vmem:[%s23825_s2 + $0xb0] sm:$0xf0]  ;;  %2726 = vmatpush.bf16.msrb.mxu1 %v11067_v1  ;;  %2752 = vmatpush.bf16.msra.mxu3 %v11071_v52  ;;  %v1852_v55 = vand.u32 2147483648, %v17716_v43  ;;  %v10818_v43 = vld [vmem:[%s23825_s2 + $0x10] sm:$0xf]  ;;  %v10855_v52 = vor.u32 %v14696_v34, %v10852_v58 }
 0x18e   :  { %v10887_v50 = vor.u32 %v14704_v61, %v10884_v35  ;;  %v14749_v35 = vld [vmem:[%s23825_s2 + $0x1f4] sm:$0xf0]  ;;  %v14737_v34 = vld [vmem:[%s23825_s2 + $0x19c] sm:$0xf] }
 0x18f   :  { %v10799_v15 = vmul.f32 -1.442695, %v1817_v5  ;;  %v1718_v53 = vpop.f32.mrf.mxu2  ;;  %2714 = vmatmul.bf16.vlgmr.msrb.gmra.mxu0 %v17741_v47  ;;  %2740 = vmatmul.bf16.vlgmr.msra.gmra.mxu2 %v17741_v47  ;;  %v1853_v48 = vor.u32 1.1754944e-38, %v1852_v55  ;;  %v10851_v5 = vor.u32 %v14700_v18, %v10850_v3  ;;  %v11018_v18 = vld [vmem:[%s23825_s2 + $0x198] sm:$0xf] }
 0x190   :  { %2762 = vmatpush.bf16.msra.mxu0 %v10915_v12  ;;  %2788 = vmatpush.bf16.msrb.mxu2 %v10919_v4  ;;  %v10820_v12 = vld [vmem:[%s23825_s2 + $0x30] sm:$0xf0]  ;;  %v14745_v53 = vld [vmem:[%s23825_s2 + $0x1dc] sm:$0xf] }
 0x191   :  { %15642 = vpow2.f32 %v10799_v15  ;;  %v14688_v15 = vld [vmem:[%s23825_s2 + $0x14] sm:$0xf]  ;;  %v1854_v61 = vsel %vm1851_vm3, %v1853_v48, %v1849_v37  ;;  %v11055_v3 = vor.u32 %v14745_v53, %v11052_v44  ;;  %v11020_v58 = vld [vmem:[%s23825_s2 + $0x1b8] sm:$0xf0]  ;;  %v10986_v48 = vld [vmem:[%s23825_s2 + $0x158] sm:$0xf] }
 0x192   :  { %v1731_v45 = vpop.f32.mrf.mxu3  ;;  %v10823_v55 = vor.u32 %v14688_v15, %v10820_v12  ;;  %v14725_v53 = vld [vmem:[%s23825_s2 + $0x134] sm:$0xf0] }
 0x193   :  { %v10819_v45 = vor.u32 %v14692_v36, %v10818_v43  ;;  %v11019_v43 = vor.u32 %v14741_v21, %v11018_v18  ;;  %v14729_v36 = vld [vmem:[%s23825_s2 + $0x15c] sm:$0xf] }
 0x194   :  { %2763 = vmatpush.bf16.msra.mxu0 %v10883_v25  ;;  %2789 = vmatpush.bf16.msrb.mxu2 %v10887_v50  ;;  %v1876_v25 = vmul.f32 0.0, %v1854_v61  ;;  %v11051_v50 = vor.u32 %v14749_v35, %v11050_v54  ;;  %v10954_v35 = vld [vmem:[%s23825_s2 + $0x118] sm:$0xf] }
 0x195   :  { %v10955_v21 = vor.u32 %v14725_v53, %v10954_v35  ;;  %v14804_v35 = vld [vmem:[%s23825_s2 + $0x3ac] sm:$0xf0] }
 0x196   :  { %v17919_v37 = vadd.f32 %v17500_v63, %v1876_v25  ;;  %v10988_v63 = vld [vmem:[%s23825_s2 + $0x178] sm:$0xf0] }
 0x197   :  { %v15643_v1 = vpop.eup %15642  ;;  %v10991_v61 = vor.u32 %v14729_v36, %v10988_v63  ;;  %v10956_v25 = vld [vmem:[%s23825_s2 + $0x138] sm:$0xf0]  ;;  %v14717_v36 = vld [vmem:[%s23825_s2 + $0xf4] sm:$0xf0] }
 0x198   :  { %v1860_v51 = vadd.f32 1.0, %v15643_v1  ;;  %2764 = vmatpush.bf16.msra.mxu0 %v10851_v5  ;;  %2790 = vmatpush.bf16.msrb.mxu2 %v10855_v52  ;;  %v11023_v1 = vor.u32 %v14737_v34, %v11020_v58  ;;  %v14733_v52 = vld [vmem:[%s23825_s2 + $0x174] sm:$0xf0]  ;;  %v14812_v58 = vld [vmem:[%s23825_s2 + $0x3ec] sm:$0xf0] }
 0x199   :  { %v10987_v54 = vor.u32 %v14733_v52, %v10986_v48  ;;  %v10922_v48 = vld [vmem:[%s23825_s2 + $0xd8] sm:$0xf]  ;;  %v14713_v63 = vld [vmem:[%s23825_s2 + $0xdc] sm:$0xf] }
 0x19a   :  { %15644 = vrcp.f32 %v1860_v51  ;;  %v1872_v12 = vand.u32 2147483648, %v1860_v51  ;;  %vm1866_vm5 = vweird.f32 %v1860_v51 }
 0x19b   :  { %15646 = vtanh.f32 %v17919_v37 }
 0x19c   :  { %2765 = vmatpush.bf16.msra.mxu0 %v10819_v45  ;;  %2791 = vmatpush.bf16.msrb.mxu2 %v10823_v55  ;;  %v1870_v45 = vand.u32 2147483647, %v1860_v51  ;;  %v14721_v55 = vld [vmem:[%s23825_s2 + $0x11c] sm:$0xf]  ;;  %v1873_v18 = vor.u32 1.1754944e-38, %v1872_v12 }
 0x19d   :  { %v10959_v34 = vor.u32 %v14721_v55, %v10956_v25  ;;  %v14800_v55 = vld [vmem:[%s23825_s2 + $0x394] sm:$0xf] }
 0x19e   :  { %vm1871_vm7 = vcmp.eq.f32.partialorder %v1870_v45, 8.507059e+37  ;;  %v11268_v25 = vld [vmem:[%s23825_s2 + $0x3b0] sm:$0xf0] }
 0x19f   :  { %2766 = vmatmul.bf16.vlgmr.msra.gmra.mxu0 %v17741_v47  ;;  %2792 = vmatmul.bf16.vlgmr.msrb.gmra.mxu2 %v17741_v47 }
 0x1a0   :  { %v15645_v4 = vpop.eup %15644  ;;  %2810 = vmatpush.bf16.msrb.mxu0 %v11051_v50  ;;  %2836 = vmatpush.bf16.msra.mxu2 %v11055_v3  ;;  %v11298_v3 = vld [vmem:[%s23825_s2 + $0x3d0] sm:$0xf] }
 0x1a1   :  { %v1862_v5 = vmul.f32 %v15645_v4, %v1860_v51  ;;  %vm1867_vm4 = vweird.f32 %v15645_v4  ;;  %v11300_v51 = vld [vmem:[%s23825_s2 + $0x3f0] sm:$0xf0]  ;;  %v11299_v12 = vor.u32 %v14812_v58, %v11298_v3  ;;  %v14709_v3 = vld [vmem:[%s23825_s2 + $0xb4] sm:$0xf0]  ;;  %v11271_v58 = vor.u32 %v14800_v55, %v11268_v25 }
 0x1a2   :  { %vm1868_vm6 = vmor %vm1866_vm5, %vm1867_vm4  ;;  %v14784_v25 = vld [vmem:[%s23825_s2 + $0x314] sm:$0xf] }
 0x1a3   :  { %v1863_v15 = vsub.f32 1.0, %v1862_v5  ;;  %v15647_v5 = vpop.eup %15646 }
 0x1a4   :  { %2811 = vmatpush.bf16.msrb.mxu0 %v11019_v43  ;;  %2837 = vmatpush.bf16.msra.mxu2 %v11023_v1  ;;  %v14808_v43 = vld [vmem:[%s23825_s2 + $0x3d4] sm:$0xf] }
 0x1a5   :  { %v1864_v44 = vmul.f32 %v15645_v4, %v1863_v15 }
 0x1a7   :  { %v1865_v50 = vadd.f32 %v15645_v4, %v1864_v44  ;;  %v10923_v44 = vor.u32 %v14717_v36, %v10922_v48  ;;  %v10858_v36 = vld [vmem:[%s23825_s2 + $0x58] sm:$0xf] }
 0x1a8   :  { %2812 = vmatpush.bf16.msrb.mxu0 %v10987_v54  ;;  %2838 = vmatpush.bf16.msra.mxu2 %v10991_v61  ;;  %v11303_v54 = vor.u32 %v14808_v43, %v11300_v51  ;;  %v11266_v61 = vld [vmem:[%s23825_s2 + $0x390] sm:$0xf] }
 0x1a9   :  { %v1869_v1 = vsel %vm1868_vm6, %v15645_v4, %v1865_v50  ;;  %v10924_v4 = vld [vmem:[%s23825_s2 + $0xf8] sm:$0xf0]  ;;  %v10890_v50 = vld [vmem:[%s23825_s2 + $0x98] sm:$0xf]  ;;  %v11234_v43 = vld [vmem:[%s23825_s2 + $0x350] sm:$0xf] }
 0x1aa   :  { %v1874_v52 = vsel %vm1871_vm7, %v1873_v18, %v1869_v1  ;;  %v10927_v45 = vor.u32 %v14713_v63, %v10924_v4  ;;  %v14705_v18 = vld [vmem:[%s23825_s2 + $0x9c] sm:$0xf]  ;;  %v14796_v1 = vld [vmem:[%s23825_s2 + $0x36c] sm:$0xf0]  ;;  %v10891_v51 = vor.u32 %v14709_v3, %v10890_v50  ;;  %v14701_v63 = vld [vmem:[%s23825_s2 + $0x74] sm:$0xf0] }
 0x1ab   :  { %v17972_v15 = vmul.f32 %v15647_v5, %v1874_v52  ;;  %v14792_v5 = vld [vmem:[%s23825_s2 + $0x354] sm:$0xf]  ;;  %v14697_v4 = vld [vmem:[%s23825_s2 + $0x5c] sm:$0xf]  ;;  %v10826_v3 = vld [vmem:[%s23825_s2 + $0x18] sm:$0xf] }
 0x1ac   :  { %2813 = vmatpush.bf16.msrb.mxu0 %v10955_v21  ;;  %2839 = vmatpush.bf16.msra.mxu2 %v10959_v34  ;;  %v10892_v21 = vld [vmem:[%s23825_s2 + $0xb8] sm:$0xf0]  ;;  %v11267_v34 = vor.u32 %v14804_v35, %v11266_v61  ;;  %v11236_v52 = vld [vmem:[%s23825_s2 + $0x370] sm:$0xf0]  ;;  %v11202_v35 = vld [vmem:[%s23825_s2 + $0x310] sm:$0xf] }
 0x1ad   :  { %23871 = vst [vmem:[#allocation34_spill] sm:$0xff] %v17972_v15  ;;  %v17982_v53 = vpack.c.bf16 %v17972_v15, %v17972_v15  ;;  %v10895_v48 = vor.u32 %v14705_v18, %v10892_v21  ;;  %v11239_v61 = vor.u32 %v14792_v5, %v11236_v52  ;;  %v11204_v50 = vld [vmem:[%s23825_s2 + $0x330] sm:$0xf0]  ;;  %v14693_v18 = vld [vmem:[%s23825_s2 + $0x34] sm:$0xf0] }
 0x1ae   :  { %v14689_v21 = vld [vmem:[%s23825_s2 + $0x1c] sm:$0xf]  ;;  %v14780_v5 = vld [vmem:[%s23825_s2 + $0x2ec] sm:$0xf0]  ;;  %v14776_v52 = vld [vmem:[%s23825_s2 + $0x2d4] sm:$0xf] }
 0x1af   :  { %2675 = vmatmul.bf16.vlgmr.msra.gmra.mxu1 %v17982_v53  ;;  %2701 = vmatmul.bf16.vlgmr.msrb.gmra.mxu3 %v17982_v53 }
 0x1b0   :  { %2771 = vmatpush.bf16.msra.mxu1 %v11299_v12  ;;  %2797 = vmatpush.bf16.msrb.mxu3 %v11303_v54  ;;  %v10860_v12 = vld [vmem:[%s23825_s2 + $0x78] sm:$0xf0]  ;;  %v11235_v54 = vor.u32 %v14796_v1, %v11234_v43  ;;  %v11207_v43 = vor.u32 %v14784_v25, %v11204_v50  ;;  %v11170_v1 = vld [vmem:[%s23825_s2 + $0x2d0] sm:$0xf]  ;;  %v14760_v50 = vld [vmem:[%s23825_s2 + $0x254] sm:$0xf] }
 0x1b1   :  { %2814 = vmatpush.bf16.msrb.mxu0 %v10923_v44  ;;  %2840 = vmatpush.bf16.msra.mxu2 %v10927_v45  ;;  %v14788_v44 = vld [vmem:[%s23825_s2 + $0x32c] sm:$0xf0]  ;;  %v10859_v45 = vor.u32 %v14701_v63, %v10858_v36  ;;  %v10863_v55 = vor.u32 %v14697_v4, %v10860_v12  ;;  %v11172_v36 = vld [vmem:[%s23825_s2 + $0x2f0] sm:$0xf0]  ;;  %v11171_v63 = vor.u32 %v14780_v5, %v11170_v1  ;;  %v11306_v1 = vld [vmem:[%s23825_s2 + $0x3d8] sm:$0xf] }
 0x1b2   :  { %v11175_v4 = vor.u32 %v14776_v52, %v11172_v36  ;;  %v11138_v12 = vld [vmem:[%s23825_s2 + $0x290] sm:$0xf]  ;;  %v11308_v5 = vld [vmem:[%s23825_s2 + $0x3f8] sm:$0xf0] }
 0x1b3   :  { %v14764_v25 = vld [vmem:[%s23825_s2 + $0x26c] sm:$0xf0] }
 0x1b4   :  { %2772 = vmatpush.bf16.msra.mxu1 %v11267_v34  ;;  %2798 = vmatpush.bf16.msrb.mxu3 %v11271_v58  ;;  %v10828_v34 = vld [vmem:[%s23825_s2 + $0x38] sm:$0xf0]  ;;  %v11203_v58 = vor.u32 %v14788_v44, %v11202_v35  ;;  %v11140_v35 = vld [vmem:[%s23825_s2 + $0x2b0] sm:$0xf0] }
 0x1b5   :  { %2815 = vmatpush.bf16.msrb.mxu0 %v10891_v51  ;;  %2841 = vmatpush.bf16.msra.mxu2 %v10895_v48  ;;  %v10827_v51 = vor.u32 %v14693_v18, %v10826_v3  ;;  %v10831_v48 = vor.u32 %v14689_v21, %v10828_v34  ;;  %v11108_v3 = vld [vmem:[%s23825_s2 + $0x270] sm:$0xf0]  ;;  %v14756_v34 = vld [vmem:[%s23825_s2 + $0x22c] sm:$0xf0] }
 0x1b6   :  { %v11111_v21 = vor.u32 %v14760_v50, %v11108_v3  ;;  %v14793_v50 = vld [vmem:[%s23825_s2 + $0x35c] sm:$0xf] }
 0x1b7   :  { %v11244_v3 = vld [vmem:[%s23825_s2 + $0x378] sm:$0xf0] }
 0x1b8   :  { %2773 = vmatpush.bf16.msra.mxu1 %v11235_v54  ;;  %2799 = vmatpush.bf16.msrb.mxu3 %v11239_v61  ;;  %v14772_v54 = vld [vmem:[%s23825_s2 + $0x2ac] sm:$0xf0]  ;;  %v14768_v61 = vld [vmem:[%s23825_s2 + $0x294] sm:$0xf] }
 0x1b9   :  { %2816 = vmatpush.bf16.msrb.mxu0 %v10859_v45  ;;  %2842 = vmatpush.bf16.msra.mxu2 %v10863_v55  ;;  %v11139_v44 = vor.u32 %v14772_v54, %v11138_v12  ;;  %v11143_v45 = vor.u32 %v14768_v61, %v11140_v35  ;;  %v11106_v55 = vld [vmem:[%s23825_s2 + $0x250] sm:$0xf]  ;;  %v11274_v12 = vld [vmem:[%s23825_s2 + $0x398] sm:$0xf]  ;;  %v14801_v61 = vld [vmem:[%s23825_s2 + $0x39c] sm:$0xf] }
 0x1ba   :  { %v11107_v18 = vor.u32 %v14764_v25, %v11106_v55  ;;  %v14805_v54 = vld [vmem:[%s23825_s2 + $0x3b4] sm:$0xf0]  ;;  %v11276_v35 = vld [vmem:[%s23825_s2 + $0x3b8] sm:$0xf0] }
 0x1bb   :  { %v11242_v55 = vld [vmem:[%s23825_s2 + $0x358] sm:$0xf] }
 0x1bc   :  { %2774 = vmatpush.bf16.msra.mxu1 %v11203_v58  ;;  %2800 = vmatpush.bf16.msrb.mxu3 %v11207_v43  ;;  %v14752_v58 = vld [vmem:[%s23825_s2 + $0x214] sm:$0xf]  ;;  %v14797_v25 = vld [vmem:[%s23825_s2 + $0x374] sm:$0xf0] }
 0x1bd   :  { %2817 = vmatpush.bf16.msrb.mxu0 %v10827_v51  ;;  %2843 = vmatpush.bf16.msra.mxu2 %v10831_v48  ;;  %v11076_v43 = vld [vmem:[%s23825_s2 + $0x230] sm:$0xf0]  ;;  %v14813_v51 = vld [vmem:[%s23825_s2 + $0x3f4] sm:$0xf0]  ;;  %v14809_v48 = vld [vmem:[%s23825_s2 + $0x3dc] sm:$0xf] }
 0x1be   :  { %v11079_v36 = vor.u32 %v14752_v58, %v11076_v43  ;;  %v14785_v58 = vld [vmem:[%s23825_s2 + $0x31c] sm:$0xf] }
 0x1bf   :  { %2727 = vmatmul.bf16.vlgmr.msrb.gmra.mxu1 %v17982_v53  ;;  %2753 = vmatmul.bf16.vlgmr.msra.gmra.mxu3 %v17982_v53  ;;  %v11212_v43 = vld [vmem:[%s23825_s2 + $0x338] sm:$0xf0] }
 0x1c0   :  { %2775 = vmatpush.bf16.msra.mxu1 %v11171_v63  ;;  %2801 = vmatpush.bf16.msrb.mxu3 %v11175_v4  ;;  %v11307_v63 = vor.u32 %v14813_v51, %v11306_v1  ;;  %v11311_v4 = vor.u32 %v14809_v48, %v11308_v5  ;;  %v11215_v51 = vor.u32 %v14785_v58, %v11212_v43  ;;  %v11178_v48 = vld [vmem:[%s23825_s2 + $0x2d8] sm:$0xf]  ;;  %v14753_v58 = vld [vmem:[%s23825_s2 + $0x21c] sm:$0xf] }
 0x1c1   :  { %2818 = vmatmul.bf16.vlgmr.msrb.gmra.mxu0 %v17741_v47  ;;  %2844 = vmatmul.bf16.vlgmr.msra.gmra.mxu2 %v17741_v47  ;;  %v11074_v47 = vld [vmem:[%s23825_s2 + $0x210] sm:$0xf]  ;;  %v14781_v5 = vld [vmem:[%s23825_s2 + $0x2f4] sm:$0xf0]  ;;  %v11084_v43 = vld [vmem:[%s23825_s2 + $0x238] sm:$0xf0] }
 0x1c2   :  { %v11075_v52 = vor.u32 %v14756_v34, %v11074_v47  ;;  %v11210_v47 = vld [vmem:[%s23825_s2 + $0x318] sm:$0xf] }
 0x1c3   :  { %v14789_v34 = vld [vmem:[%s23825_s2 + $0x334] sm:$0xf0] }
 0x1c4   :  { %2776 = vmatpush.bf16.msra.mxu1 %v11139_v44  ;;  %2802 = vmatpush.bf16.msrb.mxu3 %v11143_v45  ;;  %v11275_v44 = vor.u32 %v14805_v54, %v11274_v12  ;;  %v11279_v45 = vor.u32 %v14801_v61, %v11276_v35  ;;  %v11211_v1 = vor.u32 %v14789_v34, %v11210_v47  ;;  %v11146_v12 = vld [vmem:[%s23825_s2 + $0x298] sm:$0xf]  ;;  %v14769_v61 = vld [vmem:[%s23825_s2 + $0x29c] sm:$0xf] }
 0x1c5   :  { %v14773_v54 = vld [vmem:[%s23825_s2 + $0x2b4] sm:$0xf0]  ;;  %v11148_v35 = vld [vmem:[%s23825_s2 + $0x2b8] sm:$0xf0] }
 0x1c6   :  { %v11082_v47 = vld [vmem:[%s23825_s2 + $0x218] sm:$0xf] }
 0x1c7   :  { %v14757_v34 = vld [vmem:[%s23825_s2 + $0x234] sm:$0xf0] }
 0x1c8   :  { %2777 = vmatpush.bf16.msra.mxu1 %v11107_v18  ;;  %2803 = vmatpush.bf16.msrb.mxu3 %v11111_v21  ;;  %v11243_v18 = vor.u32 %v14797_v25, %v11242_v55  ;;  %v11247_v21 = vor.u32 %v14793_v50, %v11244_v3  ;;  %v11114_v55 = vld [vmem:[%s23825_s2 + $0x258] sm:$0xf]  ;;  %v14761_v50 = vld [vmem:[%s23825_s2 + $0x25c] sm:$0xf] }
 0x1c9   :  { %v14765_v25 = vld [vmem:[%s23825_s2 + $0x274] sm:$0xf0]  ;;  %v11116_v3 = vld [vmem:[%s23825_s2 + $0x278] sm:$0xf0] }
 0x1cc   :  { %2778 = vmatpush.bf16.msra.mxu1 %v11075_v52  ;;  %2804 = vmatpush.bf16.msrb.mxu3 %v11079_v36  ;;  %v14777_v52 = vld [vmem:[%s23825_s2 + $0x2dc] sm:$0xf] }
 0x1cd   :  { %v11180_v36 = vld [vmem:[%s23825_s2 + $0x2f8] sm:$0xf0] }
 0x1cf   :  { %2779 = vmatmul.bf16.vlgmr.msra.gmra.mxu1 %v17982_v53  ;;  %2805 = vmatmul.bf16.vlgmr.msrb.gmra.mxu3 %v17982_v53 }
 0x1d0   :  { %2823 = vmatpush.bf16.msrb.mxu1 %v11307_v63  ;;  %2849 = vmatpush.bf16.msra.mxu3 %v11311_v4  ;;  %v11179_v63 = vor.u32 %v14781_v5, %v11178_v48  ;;  %v11183_v4 = vor.u32 %v14777_v52, %v11180_v36  ;;  %v11544_v36 = vld [vmem:[%s23825_s2 + $0x1c0] sm:$0xf] }
 0x1d4   :  { %2824 = vmatpush.bf16.msrb.mxu1 %v11275_v44  ;;  %2850 = vmatpush.bf16.msra.mxu3 %v11279_v45  ;;  %v11147_v44 = vor.u32 %v14773_v54, %v11146_v12  ;;  %v11151_v45 = vor.u32 %v14769_v61, %v11148_v35 }
 0x1d8   :  { %2825 = vmatpush.bf16.msrb.mxu1 %v11243_v18  ;;  %2851 = vmatpush.bf16.msra.mxu3 %v11247_v21  ;;  %v11115_v18 = vor.u32 %v14765_v25, %v11114_v55  ;;  %v11119_v21 = vor.u32 %v14761_v50, %v11116_v3  ;;  %v14862_v55 = vld [vmem:[%s23825_s2 + $0x184] sm:$0xf] }
 0x1d9   :  { %v11514_v50 = vld [vmem:[%s23825_s2 + $0x1a0] sm:$0xf0] }
 0x1da   :  { %v11517_v3 = vor.u32 %v14862_v55, %v11514_v50 }
 0x1dc   :  { %2826 = vmatpush.bf16.msrb.mxu1 %v11211_v1  ;;  %2852 = vmatpush.bf16.msra.mxu3 %v11215_v51  ;;  %v11083_v1 = vor.u32 %v14757_v34, %v11082_v47  ;;  %v11087_v51 = vor.u32 %v14753_v58, %v11084_v43  ;;  %v14854_v47 = vld [vmem:[%s23825_s2 + $0x144] sm:$0xf] }
 0x1dd   :  { %v11482_v43 = vld [vmem:[%s23825_s2 + $0x160] sm:$0xf0] }
 0x1e0   :  { %2827 = vmatpush.bf16.msrb.mxu1 %v11179_v63  ;;  %2853 = vmatpush.bf16.msra.mxu3 %v11183_v4  ;;  %v14874_v63 = vld [vmem:[%s23825_s2 + $0x1dc] sm:$0xf0]  ;;  %v14870_v4 = vld [vmem:[%s23825_s2 + $0x1c4] sm:$0xf] }
 0x1e1   :  { %v11545_v54 = vor.u32 %v14874_v63, %v11544_v36  ;;  %v14850_v36 = vld [vmem:[%s23825_s2 + $0x11c] sm:$0xf0]  ;;  %v14846_v63 = vld [vmem:[%s23825_s2 + $0x104] sm:$0xf] }
 0x1e3   :  { %3784 = vmatpush.bf16.msra.mxu0 %v11545_v54 }
 0x1e4   :  { %2828 = vmatpush.bf16.msrb.mxu1 %v11147_v44  ;;  %2854 = vmatpush.bf16.msra.mxu3 %v11151_v45  ;;  %v11512_v44 = vld [vmem:[%s23825_s2 + $0x180] sm:$0xf] }
 0x1e5   :  { %v14866_v45 = vld [vmem:[%s23825_s2 + $0x19c] sm:$0xf0] }
 0x1e6   :  { %v11513_v25 = vor.u32 %v14866_v45, %v11512_v44  ;;  %v14838_v44 = vld [vmem:[%s23825_s2 + $0xc4] sm:$0xf] }
 0x1e8   :  { %2829 = vmatpush.bf16.msrb.mxu1 %v11115_v18  ;;  %2855 = vmatpush.bf16.msra.mxu3 %v11119_v21  ;;  %v11480_v18 = vld [vmem:[%s23825_s2 + $0x140] sm:$0xf] }
 0x1e9   :  { %3785 = vmatpush.bf16.msra.mxu0 %v11513_v25  ;;  %v14858_v21 = vld [vmem:[%s23825_s2 + $0x15c] sm:$0xf0]  ;;  %v11418_v25 = vld [vmem:[%s23825_s2 + $0xe0] sm:$0xf0] }
 0x1ea   :  { %v11481_v58 = vor.u32 %v14858_v21, %v11480_v18  ;;  %v11421_v50 = vor.u32 %v14838_v44, %v11418_v25  ;;  %v11384_v18 = vld [vmem:[%s23825_s2 + $0x80] sm:$0xf]  ;;  %v11322_v25 = vld [vmem:[%s23825_s2 + $0x20] sm:$0xf0] }
 0x1eb   :  { %v14834_v21 = vld [vmem:[%s23825_s2 + $0x9c] sm:$0xf0] }
 0x1ec   :  { %2830 = vmatpush.bf16.msrb.mxu1 %v11083_v1  ;;  %2856 = vmatpush.bf16.msra.mxu3 %v11087_v51  ;;  %v11485_v1 = vor.u32 %v14854_v47, %v11482_v43  ;;  %v14830_v47 = vld [vmem:[%s23825_s2 + $0x84] sm:$0xf]  ;;  %v14818_v44 = vld [vmem:[%s23825_s2 + $0x1c] sm:$0xf0] }
 0x1ed   :  { %3786 = vmatpush.bf16.msra.mxu0 %v11481_v58  ;;  %v11385_v58 = vor.u32 %v14834_v21, %v11384_v18  ;;  %v11386_v43 = vld [vmem:[%s23825_s2 + $0xa0] sm:$0xf0]  ;;  %v14875_v18 = vld [vmem:[%s23825_s2 + $0x1e4] sm:$0xf0] }
 0x1ef   :  { %2831 = vmatmul.bf16.vlgmr.msrb.gmra.mxu1 %v17982_v53  ;;  %2857 = vmatmul.bf16.vlgmr.msra.gmra.mxu3 %v17982_v53  ;;  %v11546_v53 = vld [vmem:[%s23825_s2 + $0x1e0] sm:$0xf0] }
 0x1f0   :  { %v11549_v61 = vor.u32 %v14870_v4, %v11546_v53  ;;  %v11416_v53 = vld [vmem:[%s23825_s2 + $0xc0] sm:$0xf] }
 0x1f2   :  { %3810 = vmatpush.bf16.msrb.mxu2 %v11549_v61  ;;  %v14842_v61 = vld [vmem:[%s23825_s2 + $0xdc] sm:$0xf0] }
 0x1f3   :  { %v11417_v55 = vor.u32 %v14842_v61, %v11416_v53  ;;  %v11320_v61 = vld [vmem:[%s23825_s2] sm:$0xf] }
 0x1f6   :  { %3811 = vmatpush.bf16.msrb.mxu2 %v11517_v3 }
 0x1fa   :  { %3812 = vmatpush.bf16.msrb.mxu2 %v11485_v1  ;;  %v11389_v1 = vor.u32 %v14830_v47, %v11386_v43  ;;  %v11554_v43 = vld [vmem:[%s23825_s2 + $0x1e8] sm:$0xf0] }
 0x1fc   :  { %v18204_v48 = vpop.f32.mrf.mxu0 }
 0x202   :  { %v18206_v5 = vpop.f32.mrf.mxu2 }
 0x204   :  { %v2665_v52 = vpop.f32.mrf.mxu0 }
 0x205   :  { %v11448_v52 = vld [vmem:[%s23825_s2 + $0x100] sm:$0xf] }
 0x206   :  { %v11449_v4 = vor.u32 %v14850_v36, %v11448_v52  ;;  %v14826_v52 = vld [vmem:[%s23825_s2 + $0x5c] sm:$0xf0]  ;;  %v14822_v36 = vld [vmem:[%s23825_s2 + $0x44] sm:$0xf] }
 0x208   :  { %3787 = vmatpush.bf16.msra.mxu0 %v11449_v4 }
 0x20a   :  { %v2691_v12 = vpop.f32.mrf.mxu2 }
 0x20b   :  { %v11450_v12 = vld [vmem:[%s23825_s2 + $0x120] sm:$0xf0] }
 0x20c   :  { %v18220_v35 = vpop.f32.mrf.mxu0  ;;  %v11453_v54 = vor.u32 %v14846_v63, %v11450_v12  ;;  %3788 = vmatpush.bf16.msra.mxu0 %v11417_v55  ;;  %v11354_v12 = vld [vmem:[%s23825_s2 + $0x60] sm:$0xf0]  ;;  %v11321_v55 = vor.u32 %v14818_v44, %v11320_v61 }
 0x20e   :  { %3813 = vmatpush.bf16.msrb.mxu2 %v11453_v54  ;;  %v11357_v54 = vor.u32 %v14822_v36, %v11354_v12  ;;  %v11520_v12 = vld [vmem:[%s23825_s2 + $0x188] sm:$0xf] }
 0x210   :  { %3789 = vmatpush.bf16.msra.mxu0 %v11385_v58  ;;  %v14871_v58 = vld [vmem:[%s23825_s2 + $0x1cc] sm:$0xf] }
 0x212   :  { %v18243_v34 = vpop.f32.mrf.mxu2  ;;  %3814 = vmatpush.bf16.msrb.mxu2 %v11421_v50  ;;  %v11552_v50 = vld [vmem:[%s23825_s2 + $0x1c8] sm:$0xf] }
 0x213   :  { %v11553_v47 = vor.u32 %v14875_v18, %v11552_v50 }
 0x214   :  { %v2717_v51 = vpop.f32.mrf.mxu0 }
 0x215   :  { %v11352_v51 = vld [vmem:[%s23825_s2 + $0x40] sm:$0xf] }
 0x216   :  { %3815 = vmatpush.bf16.msrb.mxu2 %v11389_v1  ;;  %v11353_v4 = vor.u32 %v14826_v52, %v11352_v51  ;;  %v11557_v1 = vor.u32 %v14871_v58, %v11554_v43  ;;  %v472_v52 = vadd.f32 %v16899_v29, %v16839_v2  ;;  %v11522_v29 = vld [vmem:[%s23825_s2 + $0x1a8] sm:$0xf0]  ;;  %v501_v58 = vadd.f32 %v16907_v32, %v16865_v14 }
 0x217   :  { %v14847_v32 = vld [vmem:[%s23825_s2 + $0x10c] sm:$0xf] }
 0x218   :  { %3790 = vmatpush.bf16.msra.mxu0 %v11353_v4 }
 0x21a   :  { %v2743_v45 = vpop.f32.mrf.mxu2  ;;  %3816 = vmatpush.bf16.msrb.mxu2 %v11357_v54  ;;  %v14867_v54 = vld [vmem:[%s23825_s2 + $0x1a4] sm:$0xf0] }
 0x21b   :  { %v14814_v45 = vld [vmem:[%s23825_s2 + $0x4] sm:$0xf]  ;;  %v11521_v61 = vor.u32 %v14867_v54, %v11520_v12 }
 0x21c   :  { %v18272_v3 = vpop.f32.mrf.mxu0  ;;  %v11325_v21 = vor.u32 %v14814_v45, %v11322_v25  ;;  %3791 = vmatpush.bf16.msra.mxu0 %v11321_v55  ;;  %v11488_v55 = vld [vmem:[%s23825_s2 + $0x148] sm:$0xf] }
 0x21d   :  { %v14859_v25 = vld [vmem:[%s23825_s2 + $0x164] sm:$0xf0] }
 0x21e   :  { %3817 = vmatpush.bf16.msrb.mxu2 %v11325_v21  ;;  %v11489_v18 = vor.u32 %v14859_v25, %v11488_v55  ;;  %v14855_v21 = vld [vmem:[%s23825_s2 + $0x14c] sm:$0xf]  ;;  %v11802_v55 = vld [vmem:[%s23825_s2 + $0x3e0] sm:$0xf0]  ;;  %v11424_v25 = vld [vmem:[%s23825_s2 + $0xc8] sm:$0xf] }
 0x220   :  { %3836 = vmatpush.bf16.msrb.mxu0 %v11553_v47  ;;  %v11490_v47 = vld [vmem:[%s23825_s2 + $0x168] sm:$0xf0] }
 0x222   :  { %v18295_v63 = vpop.f32.mrf.mxu2  ;;  %3862 = vmatpush.bf16.msra.mxu2 %v11557_v1  ;;  %v11493_v1 = vor.u32 %v14855_v21, %v11490_v47 }
 0x224   :  { %v2769_v53 = vpop.f32.mrf.mxu0  ;;  %3837 = vmatpush.bf16.msrb.mxu0 %v11521_v61  ;;  %v11800_v61 = vld [vmem:[%s23825_s2 + $0x3c0] sm:$0xf] }
 0x225   :  { %v14863_v53 = vld [vmem:[%s23825_s2 + $0x18c] sm:$0xf] }
 0x226   :  { %v11525_v44 = vor.u32 %v14863_v53, %v11522_v29  ;;  %v14938_v29 = vld [vmem:[%s23825_s2 + $0x3dc] sm:$0xf0] }
 0x228   :  { %3863 = vmatpush.bf16.msra.mxu2 %v11525_v44  ;;  %3838 = vmatpush.bf16.msrb.mxu0 %v11489_v18 }
 0x22a   :  { %v2795_v4 = vpop.f32.mrf.mxu2 }
 0x22b   :  { %v14851_v4 = vld [vmem:[%s23825_s2 + $0x124] sm:$0xf0] }
 0x22c   :  { %v2676_v51 = vpop.f32.mrf.mxu1  ;;  %3864 = vmatpush.bf16.msra.mxu2 %v11493_v1  ;;  %v11426_v1 = vld [vmem:[%s23825_s2 + $0xe8] sm:$0xf0] }
 0x22d   :  { %v2677_v36 = vadd.f32 %v2676_v51, %v18204_v48 }
 0x22f   :  { %v2876_v48 = vadd.f32 %v2677_v36, %v472_v52  ;;  %v11456_v36 = vld [vmem:[%s23825_s2 + $0x108] sm:$0xf] }
 0x230   :  { %v11457_v12 = vor.u32 %v14851_v4, %v11456_v36  ;;  %v11768_v36 = vld [vmem:[%s23825_s2 + $0x380] sm:$0xf] }
 0x231   :  { %v11312_v45 = vmul.f32 -1.442695, %v2876_v48  ;;  %v14934_v48 = vld [vmem:[%s23825_s2 + $0x3c4] sm:$0xf]  ;;  %v14930_v4 = vld [vmem:[%s23825_s2 + $0x39c] sm:$0xf0] }
 0x232   :  { %v2702_v50 = vpop.f32.mrf.mxu3  ;;  %3839 = vmatpush.bf16.msrb.mxu0 %v11457_v12  ;;  %v11805_v47 = vor.u32 %v14934_v48, %v11802_v55  ;;  %v11770_v12 = vld [vmem:[%s23825_s2 + $0x3a0] sm:$0xf0]  ;;  %v14835_v48 = vld [vmem:[%s23825_s2 + $0xa4] sm:$0xf0]  ;;  %v14831_v55 = vld [vmem:[%s23825_s2 + $0x8c] sm:$0xf] }
 0x233   :  { %15648 = vpow2.f32 %v11312_v45  ;;  %v2703_v43 = vadd.f32 %v2702_v50, %v18206_v5  ;;  %v11458_v5 = vld [vmem:[%s23825_s2 + $0x128] sm:$0xf0]  ;;  %v11801_v45 = vor.u32 %v14938_v29, %v11800_v61  ;;  %v14843_v50 = vld [vmem:[%s23825_s2 + $0xe4] sm:$0xf0] }
 0x234   :  { %v2678_v51 = vpop.f32.mrf.mxu1  ;;  %v11461_v53 = vor.u32 %v14847_v32, %v11458_v5  ;;  %3823 = vmatpush.bf16.msrb.mxu3 %v11805_v47  ;;  %v14926_v32 = vld [vmem:[%s23825_s2 + $0x384] sm:$0xf]  ;;  %v11392_v29 = vld [vmem:[%s23825_s2 + $0x88] sm:$0xf]  ;;  %v11736_v47 = vld [vmem:[%s23825_s2 + $0x340] sm:$0xf] }
 0x235   :  { %v2877_v52 = vadd.f32 %v2703_v43, %v501_v58  ;;  %v11425_v58 = vor.u32 %v14843_v50, %v11424_v25  ;;  %v14839_v43 = vld [vmem:[%s23825_s2 + $0xcc] sm:$0xf]  ;;  %3797 = vmatpush.bf16.msra.mxu1 %v11801_v45  ;;  %v11773_v61 = vor.u32 %v14926_v32, %v11770_v12  ;;  %v11393_v45 = vor.u32 %v14835_v48, %v11392_v29  ;;  %v14827_v32 = vld [vmem:[%s23825_s2 + $0x64] sm:$0xf0] }
 0x236   :  { %3865 = vmatpush.bf16.msra.mxu2 %v11461_v53  ;;  %v11429_v51 = vor.u32 %v14839_v43, %v11426_v1  ;;  %v11769_v53 = vor.u32 %v14930_v4, %v11768_v36  ;;  %v530_v25 = vadd.f32 %v17064_v8, %v17095_v33  ;;  %v14918_v1 = vld [vmem:[%s23825_s2 + $0x344] sm:$0xf]  ;;  %v559_v12 = vadd.f32 %v17072_v11, %v17104_v41  ;;  %v14823_v48 = vld [vmem:[%s23825_s2 + $0x4c] sm:$0xf] }
 0x237   :  { %v11313_v54 = vmul.f32 -1.442695, %v2877_v52  ;;  %3840 = vmatpush.bf16.msrb.mxu0 %v11425_v58  ;;  %v14922_v58 = vld [vmem:[%s23825_s2 + $0x35c] sm:$0xf0]  ;;  %v11738_v8 = vld [vmem:[%s23825_s2 + $0x360] sm:$0xf0] }
 0x238   :  { %3824 = vmatpush.bf16.msrb.mxu3 %v11773_v61  ;;  %v11737_v43 = vor.u32 %v14922_v58, %v11736_v47  ;;  %v11741_v29 = vor.u32 %v14918_v1, %v11738_v8  ;;  %v11706_v8 = vld [vmem:[%s23825_s2 + $0x320] sm:$0xf0] }
 0x239   :  { %v15649_v44 = vpop.eup %15648  ;;  %15650 = vpow2.f32 %v11313_v54  ;;  %3798 = vmatpush.bf16.msra.mxu1 %v11769_v53 }
 0x23a   :  { %v18384_v18 = vadd.f32 1.0, %v15649_v44  ;;  %v2704_v21 = vpop.f32.mrf.mxu3  ;;  %3866 = vmatpush.bf16.msra.mxu2 %v11429_v51  ;;  %v11360_v51 = vld [vmem:[%s23825_s2 + $0x48] sm:$0xf] }
 0x23b   :  { %3841 = vmatpush.bf16.msrb.mxu0 %v11393_v45  ;;  %v11361_v11 = vor.u32 %v14827_v32, %v11360_v51  ;;  %v11328_v32 = vld [vmem:[%s23825_s2 + $0x8] sm:$0xf] }
 0x23c   :  { %15652 = vrcp.f32 %v18384_v18  ;;  %v2728_v52 = vpop.f32.mrf.mxu1  ;;  %v2895_v47 = vand.u32 2147483648, %v18384_v18  ;;  %3825 = vmatpush.bf16.msrb.mxu3 %v11741_v29  ;;  %vm2889_vm9 = vweird.f32 %v18384_v18 }
 0x23d   :  { %v2729_v5 = vadd.f32 %v2728_v52, %v18220_v35  ;;  %v11394_v35 = vld [vmem:[%s23825_s2 + $0xa8] sm:$0xf0]  ;;  %3799 = vmatpush.bf16.msra.mxu1 %v11737_v43  ;;  %v14910_v43 = vld [vmem:[%s23825_s2 + $0x304] sm:$0xf] }
 0x23e   :  { %v18406_v54 = vpop.f32.mrf.mxu0  ;;  %v11397_v21 = vor.u32 %v14831_v55, %v11394_v35 }
 0x23f   :  { %v15651_v44 = vpop.eup %15650  ;;  %v2878_v36 = vadd.f32 %v2729_v5, %v530_v25  ;;  %v11362_v5 = vld [vmem:[%s23825_s2 + $0x68] sm:$0xf0]  ;;  %v14914_v25 = vld [vmem:[%s23825_s2 + $0x31c] sm:$0xf0]  ;;  %3842 = vmatpush.bf16.msrb.mxu0 %v11361_v11 }
 0x240   :  { %v18422_v50 = vadd.f32 1.0, %v15651_v44  ;;  %3867 = vmatpush.bf16.msra.mxu2 %v11397_v21  ;;  %v2893_v44 = vand.u32 2147483647, %v18384_v18  ;;  %v11365_v35 = vor.u32 %v14823_v48, %v11362_v5  ;;  %v11330_v48 = vld [vmem:[%s23825_s2 + $0x28] sm:$0xf0] }
 0x242   :  { %v18439_v52 = vpop.eup %15652  ;;  %15654 = vrcp.f32 %v18422_v50  ;;  %v2754_v4 = vpop.f32.mrf.mxu3  ;;  %vm2894_vm11 = vcmp.eq.f32.partialorder %v2893_v44, 8.507059e+37  ;;  %vm2908_vm13 = vweird.f32 %v18422_v50 }
 0x243   :  { %v2885_v53 = vmul.f32 %v18439_v52, %v18384_v18  ;;  %v2755_v61 = vadd.f32 %v2754_v4, %v18243_v34  ;;  %v11704_v34 = vld [vmem:[%s23825_s2 + $0x300] sm:$0xf]  ;;  %15656 = vtanh.f32 %v2878_v36  ;;  %v11709_v4 = vor.u32 %v14910_v43, %v11706_v8  ;;  %v11674_v43 = vld [vmem:[%s23825_s2 + $0x2e0] sm:$0xf0] }
 0x244   :  { %v18457_v45 = vpop.f32.mrf.mxu2  ;;  %v2730_v55 = vpop.f32.mrf.mxu1  ;;  %v11705_v1 = vor.u32 %v14914_v25, %v11704_v34  ;;  %3868 = vmatpush.bf16.msra.mxu2 %v11365_v35  ;;  %vm2890_vm8 = vweird.f32 %v18439_v52  ;;  %v11672_v34 = vld [vmem:[%s23825_s2 + $0x2c0] sm:$0xf] }
 0x245   :  { %v2886_v21 = vsub.f32 1.0, %v2885_v53  ;;  %v2879_v58 = vadd.f32 %v2755_v61, %v559_v12  ;;  %v14819_v12 = vld [vmem:[%s23825_s2 + $0x24] sm:$0xf0]  ;;  %v14815_v53 = vld [vmem:[%s23825_s2 + $0xc] sm:$0xf]  ;;  %3826 = vmatpush.bf16.msrb.mxu3 %v11709_v4  ;;  %vm2891_vm10 = vmor %vm2889_vm9, %vm2890_vm8 }
 0x246   :  { %v2821_v51 = vpop.f32.mrf.mxu0  ;;  %v11329_v29 = vor.u32 %v14819_v12, %v11328_v32  ;;  %3800 = vmatpush.bf16.msra.mxu1 %v11705_v1  ;;  %v11333_v55 = vor.u32 %v14815_v53, %v11330_v48  ;;  %v14906_v25 = vld [vmem:[%s23825_s2 + $0x2dc] sm:$0xf0] }
 0x247   :  { %v2887_v61 = vmul.f32 %v18439_v52, %v2886_v21  ;;  %v11314_v36 = vmul.f32 -1.442695, %v2879_v58  ;;  %v14902_v21 = vld [vmem:[%s23825_s2 + $0x2c4] sm:$0xf]  ;;  %v2896_v58 = vor.u32 1.1754944e-38, %v2895_v47  ;;  %v11673_v1 = vor.u32 %v14906_v25, %v11672_v34 }
 0x248   :  { %v15655_v5 = vpop.eup %15654  ;;  %3843 = vmatpush.bf16.msrb.mxu0 %v11329_v29  ;;  %3869 = vmatpush.bf16.msra.mxu2 %v11333_v55  ;;  %v2914_v51 = vand.u32 2147483648, %v18422_v50  ;;  %v11677_v32 = vor.u32 %v14902_v21, %v11674_v43  ;;  %v14898_v29 = vld [vmem:[%s23825_s2 + $0x29c] sm:$0xf0] }
 0x249   :  { %v2904_v11 = vmul.f32 %v15655_v5, %v18422_v50  ;;  %v2888_v35 = vadd.f32 %v18439_v52, %v2887_v61  ;;  %15658 = vpow2.f32 %v11314_v36  ;;  %v15657_v12 = vpop.eup %15656  ;;  %v2912_v61 = vand.u32 2147483647, %v18422_v50  ;;  %v11640_v36 = vld [vmem:[%s23825_s2 + $0x280] sm:$0xf] }
 0x24a   :  { %v2756_v18 = vpop.f32.mrf.mxu3  ;;  %3801 = vmatpush.bf16.msra.mxu1 %v11673_v1  ;;  %vm2909_vm12 = vweird.f32 %v15655_v5  ;;  %3827 = vmatpush.bf16.msrb.mxu3 %v11677_v32  ;;  %v11641_v34 = vor.u32 %v14898_v29, %v11640_v36  ;;  %v11608_v43 = vld [vmem:[%s23825_s2 + $0x240] sm:$0xf] }
 0x24b   :  { %v2905_v8 = vsub.f32 1.0, %v2904_v11  ;;  %v2892_v4 = vsel %vm2891_vm10, %v18439_v52, %v2888_v35  ;;  %v14894_v11 = vld [vmem:[%s23825_s2 + $0x284] sm:$0xf]  ;;  %vm2910_vm14 = vmor %vm2908_vm13, %vm2909_vm12  ;;  %vm2913_vm15 = vcmp.eq.f32.partialorder %v2912_v61, 8.507059e+37  ;;  %v11576_v36 = vld [vmem:[%s23825_s2 + $0x200] sm:$0xf] }
 0x24c   :  { %v2897_v53 = vsel %vm2894_vm11, %v2896_v58, %v2892_v4  ;;  %v2847_v44 = vpop.f32.mrf.mxu2  ;;  %v2780_v47 = vpop.f32.mrf.mxu1  ;;  %v11642_v35 = vld [vmem:[%s23825_s2 + $0x2a0] sm:$0xf0]  ;;  %v2915_v58 = vor.u32 1.1754944e-38, %v2914_v51  ;;  %v14882_v29 = vld [vmem:[%s23825_s2 + $0x21c] sm:$0xf0] }
 0x24d   :  { %v2906_v48 = vmul.f32 %v15655_v5, %v2905_v8  ;;  %v2939_v55 = vmul.f32 %v15657_v12, %v2897_v53  ;;  %v2781_v52 = vadd.f32 %v2780_v47, %v18272_v3  ;;  %v11645_v25 = vor.u32 %v14894_v11, %v11642_v35  ;;  %v14890_v8 = vld [vmem:[%s23825_s2 + $0x25c] sm:$0xf0]  ;;  %v11610_v51 = vld [vmem:[%s23825_s2 + $0x260] sm:$0xf0] }
 0x24e   :  { %3802 = vmatpush.bf16.msra.mxu1 %v11641_v34  ;;  %v11609_v50 = vor.u32 %v14890_v8, %v11608_v43  ;;  %v11577_v11 = vor.u32 %v14882_v29, %v11576_v36  ;;  %v11808_v34 = vld [vmem:[%s23825_s2 + $0x3c8] sm:$0xf] }
 0x24f   :  { %v15659_v21 = vpop.eup %15658  ;;  %v2907_v18 = vadd.f32 %v15655_v5, %v2906_v48  ;;  %v2943_v1 = vadd.f32 %v2781_v52, %v17233_v16  ;;  %3828 = vmatpush.bf16.msrb.mxu3 %v11645_v25  ;;  %v14886_v16 = vld [vmem:[%s23825_s2 + $0x244] sm:$0xf]  ;;  %v11744_v29 = vld [vmem:[%s23825_s2 + $0x348] sm:$0xf] }
 0x250   :  { %v18521_v3 = vadd.f32 1.0, %v15659_v21  ;;  %v11613_v47 = vor.u32 %v14886_v16, %v11610_v51 }
 0x251   :  { %v2911_v4 = vsel %vm2910_vm14, %v15655_v5, %v2907_v18  ;;  %v11315_v32 = vmul.f32 -1.442695, %v2943_v1 }
 0x252   :  { %v2916_v12 = vsel %vm2913_vm15, %v2915_v58, %v2911_v4  ;;  %15660 = vrcp.f32 %v18521_v3  ;;  %v2806_v53 = vpop.f32.mrf.mxu3  ;;  %3803 = vmatpush.bf16.msra.mxu1 %v11609_v50  ;;  %v11810_v58 = vld [vmem:[%s23825_s2 + $0x3e8] sm:$0xf0]  ;;  %v11776_v4 = vld [vmem:[%s23825_s2 + $0x388] sm:$0xf]  ;;  %vm2928_vm1 = vweird.f32 %v18521_v3 }
 0x253   :  { %v2938_v61 = vmul.f32 %v2916_v12, %v17661_v30  ;;  %15662 = vpow2.f32 %v11315_v32  ;;  %v2807_v5 = vadd.f32 %v2806_v53, %v18295_v63  ;;  %v14878_v30 = vld [vmem:[%s23825_s2 + $0x204] sm:$0xf]  ;;  %3829 = vmatpush.bf16.msrb.mxu3 %v11613_v47  ;;  %v14931_v32 = vld [vmem:[%s23825_s2 + $0x3a4] sm:$0xf0]  ;;  %v14927_v50 = vld [vmem:[%s23825_s2 + $0x38c] sm:$0xf] }
 0x254   :  { %v2782_v44 = vpop.f32.mrf.mxu1  ;;  %v11578_v63 = vld [vmem:[%s23825_s2 + $0x220] sm:$0xf0]  ;;  %v11777_v12 = vor.u32 %v14931_v32, %v11776_v4  ;;  %v11778_v53 = vld [vmem:[%s23825_s2 + $0x3a8] sm:$0xf0]  ;;  %v2934_v47 = vand.u32 2147483648, %v18521_v3 }
 0x255   :  { %v18544_v48 = vadd.f32 %v2939_v55, %v2938_v61  ;;  %v2944_v52 = vadd.f32 %v2807_v5, %v17242_v40  ;;  %v11581_v35 = vor.u32 %v14878_v30, %v11578_v63  ;;  %v14939_v55 = vld [vmem:[%s23825_s2 + $0x3e4] sm:$0xf0]  ;;  %v14935_v40 = vld [vmem:[%s23825_s2 + $0x3cc] sm:$0xf]  ;;  %v11781_v5 = vor.u32 %v14927_v50, %v11778_v53 }
 0x256   :  { %v11809_v21 = vor.u32 %v14939_v55, %v11808_v34  ;;  %3804 = vmatpush.bf16.msra.mxu1 %v11577_v11  ;;  %v11813_v1 = vor.u32 %v14935_v40, %v11810_v58  ;;  %v2932_v44 = vand.u32 2147483647, %v18521_v3  ;;  %v14919_v11 = vld [vmem:[%s23825_s2 + $0x34c] sm:$0xf]  ;;  %v11560_v55 = vld [vmem:[%s23825_s2 + $0x1d0] sm:$0xf] }
 0x257   :  { %v11316_v25 = vmul.f32 -1.442695, %v2944_v52  ;;  %3830 = vmatpush.bf16.msrb.mxu3 %v11581_v35  ;;  %v14923_v52 = vld [vmem:[%s23825_s2 + $0x364] sm:$0xf0]  ;;  %v11746_v63 = vld [vmem:[%s23825_s2 + $0x368] sm:$0xf0] }
 0x258   :  { %v15661_v18 = vpop.eup %15660  ;;  %v11745_v30 = vor.u32 %v14923_v52, %v11744_v29  ;;  %v14876_v40 = vld [vmem:[%s23825_s2 + $0x1ec] sm:$0xf0]  ;;  %vm2933_vm3 = vcmp.eq.f32.partialorder %v2932_v44, 8.507059e+37  ;;  %v11712_v4 = vld [vmem:[%s23825_s2 + $0x308] sm:$0xf] }
 0x259   :  { %v15663_v43 = vpop.eup %15662  ;;  %v2924_v8 = vmul.f32 %v15661_v18, %v18521_v3  ;;  %15664 = vpow2.f32 %v11316_v25  ;;  %vm2929_vm0 = vweird.f32 %v15661_v18  ;;  %v11749_v25 = vor.u32 %v14919_v11, %v11746_v63  ;;  %v11562_v3 = vld [vmem:[%s23825_s2 + $0x1f0] sm:$0xf0]  ;;  %v14915_v32 = vld [vmem:[%s23825_s2 + $0x324] sm:$0xf0] }
 0x25a   :  { %3849 = vmatpush.bf16.msrb.mxu1 %v11809_v21  ;;  %v18575_v16 = vadd.f32 1.0, %v15663_v43  ;;  %v2808_v51 = vpop.f32.mrf.mxu3  ;;  %15666 = vtanh.f32 %v18544_v48  ;;  %vm2930_vm2 = vmor %vm2928_vm1, %vm2929_vm0  ;;  %v2935_v21 = vor.u32 1.1754944e-38, %v2934_v47  ;;  %v11528_v47 = vld [vmem:[%s23825_s2 + $0x190] sm:$0xf]  ;;  %v11713_v29 = vor.u32 %v14915_v32, %v11712_v4  ;;  %v11530_v63 = vld [vmem:[%s23825_s2 + $0x1b0] sm:$0xf0] }
 0x25b   :  { %v2925_v61 = vsub.f32 1.0, %v2924_v8  ;;  %3875 = vmatpush.bf16.msra.mxu3 %v11813_v1  ;;  %v14872_v1 = vld [vmem:[%s23825_s2 + $0x1d4] sm:$0xf]  ;;  %v14860_v4 = vld [vmem:[%s23825_s2 + $0x16c] sm:$0xf0] }
 0x25c   :  { %15668 = vrcp.f32 %v18575_v16  ;;  %v11565_v44 = vor.u32 %v14872_v1, %v11562_v3  ;;  %v11682_v1 = vld [vmem:[%s23825_s2 + $0x2e8] sm:$0xf0]  ;;  %v14856_v32 = vld [vmem:[%s23825_s2 + $0x154] sm:$0xf]  ;;  %vm2956_vm6 = vweird.f32 %v18575_v16 }
 0x25d   :  { %v2926_v36 = vmul.f32 %v15661_v18, %v2925_v61 }
 0x25e   :  { %3850 = vmatpush.bf16.msrb.mxu1 %v11777_v12  ;;  %v14911_v12 = vld [vmem:[%s23825_s2 + $0x30c] sm:$0xf] }
 0x25f   :  { %v15665_v35 = vpop.eup %15664  ;;  %v2927_v34 = vadd.f32 %v15661_v18, %v2926_v36  ;;  %3876 = vmatpush.bf16.msra.mxu3 %v11781_v5  ;;  %v11561_v5 = vor.u32 %v14876_v40, %v11560_v55  ;;  %v14868_v36 = vld [vmem:[%s23825_s2 + $0x1ac] sm:$0xf0]  ;;  %v14907_v55 = vld [vmem:[%s23825_s2 + $0x2e4] sm:$0xf0] }
 0x260   :  { %v18603_v58 = vadd.f32 1.0, %v15665_v35  ;;  %v15667_v43 = vpop.eup %15666  ;;  %v11496_v40 = vld [vmem:[%s23825_s2 + $0x150] sm:$0xf] }
 0x261   :  { %v2931_v8 = vsel %vm2930_vm2, %v15661_v18, %v2927_v34  ;;  %v11714_v18 = vld [vmem:[%s23825_s2 + $0x328] sm:$0xf0]  ;;  %v11680_v34 = vld [vmem:[%s23825_s2 + $0x2c8] sm:$0xf] }
 0x262   :  { %3851 = vmatpush.bf16.msrb.mxu1 %v11745_v30  ;;  %v18617_v50 = vpop.eup %15668  ;;  %v2936_v51 = vsel %vm2933_vm3, %v2935_v21, %v2931_v8  ;;  %15670 = vrcp.f32 %v18603_v58  ;;  %v14864_v30 = vld [vmem:[%s23825_s2 + $0x194] sm:$0xf]  ;;  %v11717_v35 = vor.u32 %v14911_v12, %v11714_v18  ;;  %v14903_v21 = vld [vmem:[%s23825_s2 + $0x2cc] sm:$0xf]  ;;  %vm2975_vm7 = vweird.f32 %v18603_v58 }
 0x263   :  { %v18626_v53 = vmul.f32 %v15667_v43, %v2936_v51  ;;  %v2952_v61 = vmul.f32 %v18617_v50, %v18575_v16  ;;  %3877 = vmatpush.bf16.msra.mxu3 %v11749_v25  ;;  %v11681_v25 = vor.u32 %v14907_v55, %v11680_v34  ;;  %v11529_v43 = vor.u32 %v14868_v36, %v11528_v47  ;;  %v11498_v51 = vld [vmem:[%s23825_s2 + $0x170] sm:$0xf0]  ;;  %v14899_v47 = vld [vmem:[%s23825_s2 + $0x2a4] sm:$0xf0]  ;;  %v11464_v55 = vld [vmem:[%s23825_s2 + $0x110] sm:$0xf] }
 0x264   :  { %v11533_v8 = vor.u32 %v14864_v30, %v11530_v63  ;;  %v14895_v30 = vld [vmem:[%s23825_s2 + $0x28c] sm:$0xf]  ;;  %v11501_v34 = vor.u32 %v14856_v32, %v11498_v51  ;;  %vm2957_vm4 = vweird.f32 %v18617_v50 }
 0x265   :  { %v18638_v52 = vpack.c.bf16 %v18626_v53, %v18626_v53  ;;  %v2953_v11 = vsub.f32 1.0, %v2952_v61  ;;  %vm18726_vm8 = vmor %vm2956_vm6, %vm2957_vm4 }
 0x266   :  { %3852 = vmatpush.bf16.msrb.mxu1 %v11713_v29 }
 0x267   :  { %3792 = vmatmul.bf16.vlgmr.msra.gmra.mxu0 %v18638_v52  ;;  %3818 = vmatmul.bf16.vlgmr.msrb.gmra.mxu2 %v18638_v52  ;;  %v2954_v61 = vmul.f32 %v18617_v50, %v2953_v11  ;;  %v11650_v11 = vld [vmem:[%s23825_s2 + $0x2a8] sm:$0xf0] }
 0x268   :  { %v18663_v3 = vpop.eup %15670  ;;  %3888 = vmatpush.bf16.msra.mxu0 %v11561_v5  ;;  %3914 = vmatpush.bf16.msrb.mxu2 %v11565_v44  ;;  %v11685_v5 = vor.u32 %v14903_v21, %v11682_v1  ;;  %v11648_v44 = vld [vmem:[%s23825_s2 + $0x288] sm:$0xf]  ;;  %v2979_v1 = vand.u32 2147483647, %v18603_v58  ;;  %v11653_v51 = vor.u32 %v14895_v30, %v11650_v11  ;;  %v11432_v30 = vld [vmem:[%s23825_s2 + $0xd0] sm:$0xf] }
 0x269   :  { %v2971_v12 = vmul.f32 %v18663_v3, %v18603_v58  ;;  %3878 = vmatpush.bf16.msra.mxu3 %v11717_v35  ;;  %v11649_v29 = vor.u32 %v14899_v47, %v11648_v44  ;;  %v11497_v35 = vor.u32 %v14860_v4, %v11496_v40  ;;  %v14848_v40 = vld [vmem:[%s23825_s2 + $0x114] sm:$0xf]  ;;  %vm2976_vm5 = vweird.f32 %v18663_v3  ;;  %v14844_v11 = vld [vmem:[%s23825_s2 + $0xec] sm:$0xf0] }
 0x26a   :  { %3853 = vmatpush.bf16.msrb.mxu1 %v11681_v25  ;;  %v2981_v25 = vand.u32 2147483648, %v18603_v58  ;;  %v2955_v32 = vadd.f32 %v18617_v50, %v2954_v61  ;;  %v14887_v61 = vld [vmem:[%s23825_s2 + $0x24c] sm:$0xf]  ;;  %v2960_v47 = vand.u32 2147483647, %v18575_v16  ;;  %vm18740_vm9 = vmor %vm2975_vm7, %vm2976_vm5  ;;  %vm2980_vm10 = vcmp.eq.f32.partialorder %v2979_v1, 8.507059e+37 }
 0x26b   :  { %v2972_v63 = vsub.f32 1.0, %v2971_v12  ;;  %v2962_v12 = vand.u32 2147483648, %v18575_v16  ;;  %v11586_v1 = vld [vmem:[%s23825_s2 + $0x228] sm:$0xf0] }
 0x26c   :  { %v2832_v18 = vpop.f32.mrf.mxu1  ;;  %3889 = vmatpush.bf16.msra.mxu0 %v11529_v43  ;;  %3915 = vmatpush.bf16.msrb.mxu2 %v11533_v8  ;;  %v11616_v43 = vld [vmem:[%s23825_s2 + $0x248] sm:$0xf]  ;;  %v2959_v15 = vsel %vm18726_vm8, %v18617_v50, %v2955_v32  ;;  %vm2961_vm11 = vcmp.eq.f32.partialorder %v2960_v47, 8.507059e+37 }
 0x26d   :  { %v2833_v36 = vadd.f32 %v2832_v18, %v18406_v54  ;;  %v14852_v54 = vld [vmem:[%s23825_s2 + $0x12c] sm:$0xf0]  ;;  %v2973_v4 = vmul.f32 %v18663_v3, %v2972_v63  ;;  %3879 = vmatpush.bf16.msra.mxu3 %v11685_v5  ;;  %v14891_v8 = vld [vmem:[%s23825_s2 + $0x264] sm:$0xf0]  ;;  %v11618_v5 = vld [vmem:[%s23825_s2 + $0x268] sm:$0xf0] }
 0x26e   :  { %3854 = vmatpush.bf16.msrb.mxu1 %v11649_v29  ;;  %v11617_v18 = vor.u32 %v14891_v8, %v11616_v43  ;;  %v2982_v63 = vor.u32 1.1754944e-38, %v2981_v25  ;;  %v14840_v43 = vld [vmem:[%s23825_s2 + $0xd4] sm:$0xf]  ;;  %v2963_v25 = vor.u32 1.1754944e-38, %v2962_v12  ;;  %v11433_v12 = vor.u32 %v14844_v11, %v11432_v30 }
 0x26f   :  { %v2945_v21 = vadd.f32 %v2833_v36, %v17395_v62  ;;  %v11466_v62 = vld [vmem:[%s23825_s2 + $0x130] sm:$0xf0]  ;;  %v2974_v36 = vadd.f32 %v18663_v3, %v2973_v4 }
 0x270   :  { %3890 = vmatpush.bf16.msra.mxu0 %v11497_v35  ;;  %3916 = vmatpush.bf16.msrb.mxu2 %v11501_v34  ;;  %v11469_v4 = vor.u32 %v14848_v40, %v11466_v62  ;;  %v11434_v8 = vld [vmem:[%s23825_s2 + $0xf0] sm:$0xf0]  ;;  %v11621_v34 = vor.u32 %v14887_v61, %v11618_v5  ;;  %v2964_v61 = vsel %vm2961_vm11, %v2963_v25, %v2959_v15 }
 0x271   :  { %15672 = vtanh.f32 %v2945_v21  ;;  %v11465_v21 = vor.u32 %v14852_v54, %v11464_v55  ;;  %3880 = vmatpush.bf16.msra.mxu3 %v11653_v51  ;;  %v11584_v55 = vld [vmem:[%s23825_s2 + $0x208] sm:$0xf]  ;;  %v11402_v15 = vld [vmem:[%s23825_s2 + $0xb0] sm:$0xf0] }
 0x272   :  { %v2858_v29 = vpop.f32.mrf.mxu3  ;;  %v14883_v54 = vld [vmem:[%s23825_s2 + $0x224] sm:$0xf0]  ;;  %3855 = vmatpush.bf16.msrb.mxu1 %v11617_v18  ;;  %v11400_v18 = vld [vmem:[%s23825_s2 + $0x90] sm:$0xf]  ;;  %v11338_v25 = vld [vmem:[%s23825_s2 + $0x30] sm:$0xf0] }
 0x273   :  { %v2859_v16 = vadd.f32 %v2858_v29, %v18457_v45  ;;  %v2978_v45 = vsel %vm18740_vm9, %v18663_v3, %v2974_v36  ;;  %v11585_v32 = vor.u32 %v14883_v54, %v11584_v55  ;;  %v14879_v3 = vld [vmem:[%s23825_s2 + $0x20c] sm:$0xf]  ;;  %v14836_v36 = vld [vmem:[%s23825_s2 + $0xac] sm:$0xf0]  ;;  %v14816_v55 = vld [vmem:[%s23825_s2 + $0x14] sm:$0xf] }
 0x274   :  { %v2834_v35 = vpop.f32.mrf.mxu1  ;;  %v2983_v40 = vsel %vm2980_vm10, %v2982_v63, %v2978_v45  ;;  %3891 = vmatpush.bf16.msra.mxu0 %v11465_v21  ;;  %3917 = vmatpush.bf16.msrb.mxu2 %v11469_v4  ;;  %v11589_v47 = vor.u32 %v14879_v3, %v11586_v1  ;;  %v11401_v11 = vor.u32 %v14836_v36, %v11400_v18  ;;  %v11368_v63 = vld [vmem:[%s23825_s2 + $0x50] sm:$0xf]  ;;  %v14824_v21 = vld [vmem:[%s23825_s2 + $0x54] sm:$0xf]  ;;  %v11570_v3 = vld [vmem:[%s23825_s2 + $0x1f8] sm:$0xf0] }
 0x275   :  { %v2946_v50 = vadd.f32 %v2859_v16, %v17400_v9  ;;  %v3005_v62 = vmul.f32 %v2983_v40, %v17919_v37  ;;  %v11437_v9 = vor.u32 %v14840_v43, %v11434_v8  ;;  %v14832_v37 = vld [vmem:[%s23825_s2 + $0x94] sm:$0xf]  ;;  %3881 = vmatpush.bf16.msra.mxu3 %v11621_v34  ;;  %v14828_v16 = vld [vmem:[%s23825_s2 + $0x6c] sm:$0xf0]  ;;  %v11568_v40 = vld [vmem:[%s23825_s2 + $0x1d8] sm:$0xf] }
 0x276   :  { %3856 = vmatpush.bf16.msrb.mxu1 %v11585_v32  ;;  %v11405_v58 = vor.u32 %v14832_v37, %v11402_v15  ;;  %v11370_v4 = vld [vmem:[%s23825_s2 + $0x70] sm:$0xf0]  ;;  %v11369_v8 = vor.u32 %v14828_v16, %v11368_v63  ;;  %v11336_v35 = vld [vmem:[%s23825_s2 + $0x10] sm:$0xf]  ;;  %v14873_v32 = vld [vmem:[%s23825_s2 + $0x1dc] sm:$0xf] }
 0x277   :  { %v15673_v51 = vpop.eup %15672  ;;  %v11317_v5 = vmul.f32 -1.442695, %v2946_v50  ;;  %3844 = vmatmul.bf16.vlgmr.msrb.gmra.mxu0 %v18638_v52  ;;  %3870 = vmatmul.bf16.vlgmr.msra.gmra.mxu2 %v18638_v52  ;;  %v11373_v45 = vor.u32 %v14824_v21, %v11370_v4  ;;  %v14820_v34 = vld [vmem:[%s23825_s2 + $0x2c] sm:$0xf0]  ;;  %v14877_v50 = vld [vmem:[%s23825_s2 + $0x1f4] sm:$0xf0] }
 0x278   :  { %v3006_v44 = vmul.f32 %v15673_v51, %v2964_v61  ;;  %3892 = vmatpush.bf16.msra.mxu0 %v11433_v12  ;;  %3918 = vmatpush.bf16.msrb.mxu2 %v11437_v9  ;;  %v11337_v1 = vor.u32 %v14820_v34, %v11336_v35  ;;  %v11569_v51 = vor.u32 %v14877_v50, %v11568_v40  ;;  %v14869_v12 = vld [vmem:[%s23825_s2 + $0x1b4] sm:$0xf0]  ;;  %v14865_v9 = vld [vmem:[%s23825_s2 + $0x19c] sm:$0xf]  ;;  %v11816_v40 = vld [vmem:[%s23825_s2 + $0x3d0] sm:$0xf] }
 0x279   :  { %15674 = vpow2.f32 %v11317_v5  ;;  %3882 = vmatpush.bf16.msra.mxu3 %v11589_v47  ;;  %v11573_v61 = vor.u32 %v14873_v32, %v11570_v3  ;;  %v11536_v5 = vld [vmem:[%s23825_s2 + $0x198] sm:$0xf]  ;;  %v11538_v18 = vld [vmem:[%s23825_s2 + $0x1b8] sm:$0xf0] }
 0x27a   :  { %v18783_v29 = vadd.f32 %v3006_v44, %v3005_v62  ;;  %v2860_v30 = vpop.f32.mrf.mxu3  ;;  %v11341_v62 = vor.u32 %v14816_v55, %v11338_v25  ;;  %v11537_v36 = vor.u32 %v14869_v12, %v11536_v5  ;;  %v11541_v37 = vor.u32 %v14865_v9, %v11538_v18  ;;  %v11504_v15 = vld [vmem:[%s23825_s2 + $0x158] sm:$0xf]  ;;  %v14849_v34 = vld [vmem:[%s23825_s2 + $0x11c] sm:$0xf] }
 0x27b   :  { %v14861_v30 = vld [vmem:[%s23825_s2 + $0x174] sm:$0xf0]  ;;  %v11474_v55 = vld [vmem:[%s23825_s2 + $0x138] sm:$0xf0] }
 0x27c   :  { %3893 = vmatpush.bf16.msra.mxu0 %v11401_v11  ;;  %3919 = vmatpush.bf16.msrb.mxu2 %v11405_v58  ;;  %v14857_v11 = vld [vmem:[%s23825_s2 + $0x15c] sm:$0xf]  ;;  %v11505_v21 = vor.u32 %v14861_v30, %v11504_v15  ;;  %v11477_v3 = vor.u32 %v14849_v34, %v11474_v55  ;;  %v14845_v9 = vld [vmem:[%s23825_s2 + $0xf4] sm:$0xf0]  ;;  %v14932_v30 = vld [vmem:[%s23825_s2 + $0x3ac] sm:$0xf0] }
 0x27d   :  { %v11506_v58 = vld [vmem:[%s23825_s2 + $0x178] sm:$0xf0]  ;;  %v11752_v55 = vld [vmem:[%s23825_s2 + $0x350] sm:$0xf] }
 0x27e   :  { %v11509_v4 = vor.u32 %v14857_v11, %v11506_v58  ;;  %v14841_v18 = vld [vmem:[%s23825_s2 + $0xdc] sm:$0xf] }
 0x27f   :  { %v15675_v43 = vpop.eup %15674 }
 0x280   :  { %v2989_v54 = vadd.f32 1.0, %v15675_v43  ;;  %3894 = vmatpush.bf16.msra.mxu0 %v11369_v8  ;;  %3920 = vmatpush.bf16.msrb.mxu2 %v11373_v45  ;;  %v11472_v43 = vld [vmem:[%s23825_s2 + $0x118] sm:$0xf] }
 0x281   :  { %v14853_v8 = vld [vmem:[%s23825_s2 + $0x134] sm:$0xf0] }
 0x282   :  { %15676 = vrcp.f32 %v2989_v54  ;;  %v3001_v16 = vand.u32 2147483648, %v2989_v54  ;;  %v2999_v35 = vand.u32 2147483647, %v2989_v54  ;;  %vm2995_vm13 = vweird.f32 %v2989_v54 }
 0x283   :  { %15678 = vtanh.f32 %v18783_v29  ;;  %v11473_v32 = vor.u32 %v14853_v8, %v11472_v43  ;;  %v14837_v43 = vld [vmem:[%s23825_s2 + $0xb4] sm:$0xf0]  ;;  %v14833_v8 = vld [vmem:[%s23825_s2 + $0x9c] sm:$0xf] }
 0x284   :  { %3895 = vmatpush.bf16.msra.mxu0 %v11337_v1  ;;  %3921 = vmatpush.bf16.msrb.mxu2 %v11341_v62  ;;  %v3002_v50 = vor.u32 1.1754944e-38, %v3001_v16  ;;  %v14940_v1 = vld [vmem:[%s23825_s2 + $0x3ec] sm:$0xf0]  ;;  %v14936_v62 = vld [vmem:[%s23825_s2 + $0x3d4] sm:$0xf]  ;;  %vm3000_vm15 = vcmp.eq.f32.partialorder %v2999_v35, 8.507059e+37 }
 0x285   :  { %v14928_v16 = vld [vmem:[%s23825_s2 + $0x394] sm:$0xf] }
 0x287   :  { %3896 = vmatmul.bf16.vlgmr.msra.gmra.mxu0 %v18638_v52  ;;  %3922 = vmatmul.bf16.vlgmr.msrb.gmra.mxu2 %v18638_v52 }
 0x288   :  { %v15677_v44 = vpop.eup %15676  ;;  %3940 = vmatpush.bf16.msrb.mxu0 %v11569_v51  ;;  %3966 = vmatpush.bf16.msra.mxu2 %v11573_v61  ;;  %v11440_v61 = vld [vmem:[%s23825_s2 + $0xd8] sm:$0xf] }
 0x289   :  { %v2991_v47 = vmul.f32 %v15677_v44, %v2989_v54  ;;  %vm2996_vm12 = vweird.f32 %v15677_v44  ;;  %v11818_v54 = vld [vmem:[%s23825_s2 + $0x3f0] sm:$0xf0]  ;;  %v15679_v5 = vpop.eup %15678  ;;  %v11441_v58 = vor.u32 %v14845_v9, %v11440_v61  ;;  %v14916_v9 = vld [vmem:[%s23825_s2 + $0x32c] sm:$0xf0] }
 0x28a   :  { %vm2997_vm14 = vmor %vm2995_vm13, %vm2996_vm12  ;;  %v11821_v15 = vor.u32 %v14936_v62, %v11818_v54  ;;  %v14829_v62 = vld [vmem:[%s23825_s2 + $0x74] sm:$0xf0]  ;;  %v11378_v54 = vld [vmem:[%s23825_s2 + $0x78] sm:$0xf0] }
 0x28b   :  { %v2992_v63 = vsub.f32 1.0, %v2991_v47  ;;  %v11784_v47 = vld [vmem:[%s23825_s2 + $0x390] sm:$0xf] }
 0x28c   :  { %3941 = vmatpush.bf16.msrb.mxu0 %v11537_v36  ;;  %3967 = vmatpush.bf16.msra.mxu2 %v11541_v37  ;;  %v11817_v37 = vor.u32 %v14940_v1, %v11816_v40  ;;  %v11785_v35 = vor.u32 %v14932_v30, %v11784_v47  ;;  %v11376_v1 = vld [vmem:[%s23825_s2 + $0x58] sm:$0xf] }
 0x28d   :  { %v2993_v45 = vmul.f32 %v15677_v44, %v2992_v63  ;;  %v11344_v47 = vld [vmem:[%s23825_s2 + $0x18] sm:$0xf] }
 0x28e   :  { %v14821_v30 = vld [vmem:[%s23825_s2 + $0x34] sm:$0xf0] }
 0x28f   :  { %v2994_v25 = vadd.f32 %v15677_v44, %v2993_v45  ;;  %v11410_v45 = vld [vmem:[%s23825_s2 + $0xb8] sm:$0xf0] }
 0x290   :  { %3942 = vmatpush.bf16.msrb.mxu0 %v11505_v21  ;;  %3968 = vmatpush.bf16.msra.mxu2 %v11509_v4  ;;  %v11786_v21 = vld [vmem:[%s23825_s2 + $0x3b0] sm:$0xf0]  ;;  %v11408_v4 = vld [vmem:[%s23825_s2 + $0x98] sm:$0xf] }
 0x291   :  { %v2998_v51 = vsel %vm2997_vm14, %v15677_v44, %v2994_v25  ;;  %v11442_v44 = vld [vmem:[%s23825_s2 + $0xf8] sm:$0xf0]  ;;  %v11789_v34 = vor.u32 %v14928_v16, %v11786_v21  ;;  %v14924_v25 = vld [vmem:[%s23825_s2 + $0x36c] sm:$0xf0]  ;;  %v11409_v40 = vor.u32 %v14837_v43, %v11408_v4  ;;  %v11345_v43 = vor.u32 %v14821_v30, %v11344_v47  ;;  %v14941_v47 = vld [vmem:[%s23825_s2 + $0x3f4] sm:$0xf0] }
 0x292   :  { %v3003_v12 = vsel %vm3000_vm15, %v3002_v50, %v2998_v51  ;;  %v11445_v63 = vor.u32 %v14841_v18, %v11442_v44  ;;  %v11413_v50 = vor.u32 %v14833_v8, %v11410_v45  ;;  %v14825_v51 = vld [vmem:[%s23825_s2 + $0x5c] sm:$0xf]  ;;  %v11753_v61 = vor.u32 %v14924_v25, %v11752_v55  ;;  %v11688_v4 = vld [vmem:[%s23825_s2 + $0x2d0] sm:$0xf] }
 0x293   :  { %v18886_v36 = vmul.f32 %v15679_v5, %v3003_v12  ;;  %v11720_v12 = vld [vmem:[%s23825_s2 + $0x310] sm:$0xf]  ;;  %v11377_v18 = vor.u32 %v14829_v62, %v11376_v1  ;;  %v11381_v44 = vor.u32 %v14825_v51, %v11378_v54  ;;  %v14937_v30 = vld [vmem:[%s23825_s2 + $0x3dc] sm:$0xf] }
 0x294   :  { %3943 = vmatpush.bf16.msrb.mxu0 %v11473_v32  ;;  %3969 = vmatpush.bf16.msra.mxu2 %v11477_v3  ;;  %v14920_v32 = vld [vmem:[%s23825_s2 + $0x354] sm:$0xf]  ;;  %v11721_v16 = vor.u32 %v14916_v9, %v11720_v12  ;;  %v14908_v45 = vld [vmem:[%s23825_s2 + $0x2ec] sm:$0xf0] }
 0x295   :  { %v18896_v11 = vpack.c.bf16 %v18886_v36, %v18886_v36  ;;  %v11754_v3 = vld [vmem:[%s23825_s2 + $0x370] sm:$0xf0]  ;;  %v11689_v55 = vor.u32 %v14908_v45, %v11688_v4  ;;  %v11624_v51 = vld [vmem:[%s23825_s2 + $0x250] sm:$0xf]  ;;  %v14929_v45 = vld [vmem:[%s23825_s2 + $0x39c] sm:$0xf] }
 0x296   :  { %v11757_v5 = vor.u32 %v14920_v32, %v11754_v3  ;;  %v14896_v32 = vld [vmem:[%s23825_s2 + $0x294] sm:$0xf]  ;;  %v14892_v54 = vld [vmem:[%s23825_s2 + $0x26c] sm:$0xf0] }
 0x297   :  { %3805 = vmatmul.bf16.vlgmr.msra.gmra.mxu1 %v18896_v11  ;;  %3831 = vmatmul.bf16.vlgmr.msrb.gmra.mxu3 %v18896_v11  ;;  %v11658_v3 = vld [vmem:[%s23825_s2 + $0x2b0] sm:$0xf0]  ;;  %v11625_v12 = vor.u32 %v14892_v54, %v11624_v51  ;;  %v14917_v51 = vld [vmem:[%s23825_s2 + $0x334] sm:$0xf0]  ;;  %v14913_v54 = vld [vmem:[%s23825_s2 + $0x31c] sm:$0xf] }
 0x298   :  { %3901 = vmatpush.bf16.msra.mxu1 %v11817_v37  ;;  %3927 = vmatpush.bf16.msrb.mxu3 %v11821_v15  ;;  %v14912_v37 = vld [vmem:[%s23825_s2 + $0x314] sm:$0xf]  ;;  %v11661_v62 = vor.u32 %v14896_v32, %v11658_v3  ;;  %v11762_v32 = vld [vmem:[%s23825_s2 + $0x378] sm:$0xf0] }
 0x299   :  { %3944 = vmatpush.bf16.msrb.mxu0 %v11441_v58  ;;  %3970 = vmatpush.bf16.msra.mxu2 %v11445_v63  ;;  %v11722_v15 = vld [vmem:[%s23825_s2 + $0x330] sm:$0xf0]  ;;  %v14817_v58 = vld [vmem:[%s23825_s2 + $0x1c] sm:$0xf] }
 0x29a   :  { %v11346_v63 = vld [vmem:[%s23825_s2 + $0x38] sm:$0xf0]  ;;  %v11725_v21 = vor.u32 %v14912_v37, %v11722_v15  ;;  %v11594_v37 = vld [vmem:[%s23825_s2 + $0x230] sm:$0xf0]  ;;  %v11824_v15 = vld [vmem:[%s23825_s2 + $0x3d8] sm:$0xf] }
 0x29b   :  { %v11349_v8 = vor.u32 %v14817_v58, %v11346_v63  ;;  %v11826_v58 = vld [vmem:[%s23825_s2 + $0x3f8] sm:$0xf0] }
 0x29c   :  { %3902 = vmatpush.bf16.msra.mxu1 %v11785_v35  ;;  %3928 = vmatpush.bf16.msrb.mxu3 %v11789_v34  ;;  %v14904_v35 = vld [vmem:[%s23825_s2 + $0x2d4] sm:$0xf]  ;;  %v11829_v4 = vor.u32 %v14937_v30, %v11826_v58  ;;  %v14901_v30 = vld [vmem:[%s23825_s2 + $0x2b4] sm:$0xf0]  ;;  %v14897_v58 = vld [vmem:[%s23825_s2 + $0x29c] sm:$0xf] }
 0x29d   :  { %3945 = vmatpush.bf16.msrb.mxu0 %v11409_v40  ;;  %3971 = vmatpush.bf16.msra.mxu2 %v11413_v50  ;;  %v11690_v34 = vld [vmem:[%s23825_s2 + $0x2f0] sm:$0xf0]  ;;  %v11656_v40 = vld [vmem:[%s23825_s2 + $0x290] sm:$0xf] }
 0x29e   :  { %v11693_v25 = vor.u32 %v14904_v35, %v11690_v34  ;;  %v14900_v50 = vld [vmem:[%s23825_s2 + $0x2ac] sm:$0xf0]  ;;  %v11794_v35 = vld [vmem:[%s23825_s2 + $0x3b8] sm:$0xf0] }
 0x29f   :  { %v11657_v1 = vor.u32 %v14900_v50, %v11656_v40  ;;  %v14925_v40 = vld [vmem:[%s23825_s2 + $0x374] sm:$0xf0]  ;;  %v14921_v50 = vld [vmem:[%s23825_s2 + $0x35c] sm:$0xf] }
 0x2a0   :  { %3903 = vmatpush.bf16.msra.mxu1 %v11753_v61  ;;  %3929 = vmatpush.bf16.msrb.mxu3 %v11757_v5  ;;  %v14888_v61 = vld [vmem:[%s23825_s2 + $0x254] sm:$0xf] }
 0x2a1   :  { %3946 = vmatpush.bf16.msrb.mxu0 %v11377_v18  ;;  %3972 = vmatpush.bf16.msra.mxu2 %v11381_v44  ;;  %v11626_v5 = vld [vmem:[%s23825_s2 + $0x270] sm:$0xf0]  ;;  %v14884_v18 = vld [vmem:[%s23825_s2 + $0x22c] sm:$0xf0] }
 0x2a2   :  { %v11629_v9 = vor.u32 %v14888_v61, %v11626_v5  ;;  %v14880_v44 = vld [vmem:[%s23825_s2 + $0x214] sm:$0xf]  ;;  %v11730_v61 = vld [vmem:[%s23825_s2 + $0x338] sm:$0xf0] }
 0x2a4   :  { %3904 = vmatpush.bf16.msra.mxu1 %v11721_v16  ;;  %3930 = vmatpush.bf16.msrb.mxu3 %v11725_v21  ;;  %v11597_v16 = vor.u32 %v14880_v44, %v11594_v37  ;;  %v11825_v21 = vor.u32 %v14941_v47, %v11824_v15  ;;  %v11698_v44 = vld [vmem:[%s23825_s2 + $0x2f8] sm:$0xf0]  ;;  %v11664_v47 = vld [vmem:[%s23825_s2 + $0x298] sm:$0xf] }
 0x2a5   :  { %3947 = vmatpush.bf16.msrb.mxu0 %v11345_v43  ;;  %3973 = vmatpush.bf16.msra.mxu2 %v11349_v8  ;;  %v11792_v43 = vld [vmem:[%s23825_s2 + $0x398] sm:$0xf] }
 0x2a6   :  { %v14933_v8 = vld [vmem:[%s23825_s2 + $0x3b4] sm:$0xf0] }
 0x2a7   :  { %3857 = vmatmul.bf16.vlgmr.msrb.gmra.mxu1 %v18896_v11  ;;  %3883 = vmatmul.bf16.vlgmr.msra.gmra.mxu3 %v18896_v11  ;;  %v11793_v34 = vor.u32 %v14933_v8, %v11792_v43  ;;  %v14893_v43 = vld [vmem:[%s23825_s2 + $0x274] sm:$0xf0]  ;;  %v14889_v8 = vld [vmem:[%s23825_s2 + $0x25c] sm:$0xf] }
 0x2a8   :  { %3905 = vmatpush.bf16.msra.mxu1 %v11689_v55  ;;  %3931 = vmatpush.bf16.msrb.mxu3 %v11693_v25  ;;  %v11797_v55 = vor.u32 %v14929_v45, %v11794_v35  ;;  %v11760_v25 = vld [vmem:[%s23825_s2 + $0x358] sm:$0xf]  ;;  %v11634_v45 = vld [vmem:[%s23825_s2 + $0x278] sm:$0xf0] }
 0x2a9   :  { %3948 = vmatmul.bf16.vlgmr.msrb.gmra.mxu0 %v18638_v52  ;;  %3974 = vmatmul.bf16.vlgmr.msra.gmra.mxu2 %v18638_v52  ;;  %v11592_v52 = vld [vmem:[%s23825_s2 + $0x210] sm:$0xf]  ;;  %v11761_v3 = vor.u32 %v14925_v40, %v11760_v25  ;;  %v14885_v25 = vld [vmem:[%s23825_s2 + $0x234] sm:$0xf0]  ;;  %v14881_v40 = vld [vmem:[%s23825_s2 + $0x21c] sm:$0xf] }
 0x2aa   :  { %v11593_v63 = vor.u32 %v14884_v18, %v11592_v52  ;;  %v14909_v52 = vld [vmem:[%s23825_s2 + $0x2f4] sm:$0xf0]  ;;  %v14905_v18 = vld [vmem:[%s23825_s2 + $0x2dc] sm:$0xf] }
 0x2ab   :  { %v11701_v15 = vor.u32 %v14905_v18, %v11698_v44  ;;  %v12030_v44 = vld [vmem:[%s23825_s2 + $0x180] sm:$0xf] }
 0x2ac   :  { %3906 = vmatpush.bf16.msra.mxu1 %v11657_v1  ;;  %3932 = vmatpush.bf16.msrb.mxu3 %v11661_v62  ;;  %v11765_v1 = vor.u32 %v14921_v50, %v11762_v32  ;;  %v11728_v62 = vld [vmem:[%s23825_s2 + $0x318] sm:$0xf]  ;;  %v11602_v50 = vld [vmem:[%s23825_s2 + $0x238] sm:$0xf0] }
 0x2ad   :  { %v11729_v5 = vor.u32 %v14917_v51, %v11728_v62 }
 0x2b0   :  { %3907 = vmatpush.bf16.msra.mxu1 %v11625_v12  ;;  %3933 = vmatpush.bf16.msrb.mxu3 %v11629_v9  ;;  %v11733_v12 = vor.u32 %v14913_v54, %v11730_v61  ;;  %v11696_v9 = vld [vmem:[%s23825_s2 + $0x2d8] sm:$0xf]  ;;  %v12062_v54 = vld [vmem:[%s23825_s2 + $0x1c0] sm:$0xf] }
 0x2b1   :  { %v11697_v37 = vor.u32 %v14909_v52, %v11696_v9  ;;  %v15002_v61 = vld [vmem:[%s23825_s2 + $0x1dc] sm:$0xf0] }
 0x2b2   :  { %v12063_v9 = vor.u32 %v15002_v61, %v12062_v54  ;;  %v14966_v54 = vld [vmem:[%s23825_s2 + $0xc4] sm:$0xf] }
 0x2b4   :  { %3908 = vmatpush.bf16.msra.mxu1 %v11593_v63  ;;  %3934 = vmatpush.bf16.msrb.mxu3 %v11597_v16  ;;  %v11666_v63 = vld [vmem:[%s23825_s2 + $0x2b8] sm:$0xf0]  ;;  %v11665_v16 = vor.u32 %v14901_v30, %v11664_v47  ;;  %v12032_v30 = vld [vmem:[%s23825_s2 + $0x1a0] sm:$0xf0] }
 0x2b5   :  { %4914 = vmatpush.bf16.msra.mxu0 %v12063_v9 }
 0x2b7   :  { %3909 = vmatmul.bf16.vlgmr.msra.gmra.mxu1 %v18896_v11  ;;  %3935 = vmatmul.bf16.vlgmr.msrb.gmra.mxu3 %v18896_v11 }
 0x2b8   :  { %3953 = vmatpush.bf16.msrb.mxu1 %v11825_v21  ;;  %3979 = vmatpush.bf16.msra.mxu3 %v11829_v4  ;;  %v11669_v21 = vor.u32 %v14897_v58, %v11666_v63  ;;  %v11632_v4 = vld [vmem:[%s23825_s2 + $0x258] sm:$0xf]  ;;  %v11998_v63 = vld [vmem:[%s23825_s2 + $0x140] sm:$0xf] }
 0x2b9   :  { %v11633_v35 = vor.u32 %v14893_v43, %v11632_v4 }
 0x2bc   :  { %3954 = vmatpush.bf16.msrb.mxu1 %v11793_v34  ;;  %3980 = vmatpush.bf16.msra.mxu3 %v11797_v55  ;;  %v11637_v34 = vor.u32 %v14889_v8, %v11634_v45  ;;  %v11600_v55 = vld [vmem:[%s23825_s2 + $0x218] sm:$0xf]  ;;  %v12000_v8 = vld [vmem:[%s23825_s2 + $0x160] sm:$0xf0] }
 0x2bd   :  { %v11601_v32 = vor.u32 %v14885_v25, %v11600_v55  ;;  %v14978_v55 = vld [vmem:[%s23825_s2 + $0x11c] sm:$0xf0]  ;;  %v14974_v25 = vld [vmem:[%s23825_s2 + $0x104] sm:$0xf] }
 0x2c0   :  { %3955 = vmatpush.bf16.msrb.mxu1 %v11761_v3  ;;  %3981 = vmatpush.bf16.msra.mxu3 %v11765_v1  ;;  %v11605_v3 = vor.u32 %v14881_v40, %v11602_v50  ;;  %v11968_v50 = vld [vmem:[%s23825_s2 + $0x120] sm:$0xf0] }
 0x2c4   :  { %3956 = vmatpush.bf16.msrb.mxu1 %v11729_v5  ;;  %3982 = vmatpush.bf16.msra.mxu3 %v11733_v12  ;;  %v14998_v5 = vld [vmem:[%s23825_s2 + $0x1c4] sm:$0xf] }
 0x2c8   :  { %3957 = vmatpush.bf16.msrb.mxu1 %v11697_v37  ;;  %3983 = vmatpush.bf16.msra.mxu3 %v11701_v15  ;;  %v14994_v37 = vld [vmem:[%s23825_s2 + $0x19c] sm:$0xf0]  ;;  %v14990_v15 = vld [vmem:[%s23825_s2 + $0x184] sm:$0xf] }
 0x2c9   :  { %v12031_v47 = vor.u32 %v14994_v37, %v12030_v44  ;;  %v12035_v58 = vor.u32 %v14990_v15, %v12032_v30  ;;  %v14962_v44 = vld [vmem:[%s23825_s2 + $0x9c] sm:$0xf0]  ;;  %v14958_v37 = vld [vmem:[%s23825_s2 + $0x84] sm:$0xf] }
 0x2cb   :  { %4915 = vmatpush.bf16.msra.mxu0 %v12031_v47  ;;  %v11904_v47 = vld [vmem:[%s23825_s2 + $0xa0] sm:$0xf0] }
 0x2cc   :  { %3958 = vmatpush.bf16.msrb.mxu1 %v11665_v16  ;;  %3984 = vmatpush.bf16.msra.mxu3 %v11669_v21  ;;  %v14986_v16 = vld [vmem:[%s23825_s2 + $0x15c] sm:$0xf0]  ;;  %v14982_v21 = vld [vmem:[%s23825_s2 + $0x144] sm:$0xf]  ;;  %v11907_v30 = vor.u32 %v14958_v37, %v11904_v47  ;;  %v12038_v37 = vld [vmem:[%s23825_s2 + $0x188] sm:$0xf] }
 0x2cd   :  { %v11999_v43 = vor.u32 %v14986_v16, %v11998_v63  ;;  %v12003_v45 = vor.u32 %v14982_v21, %v12000_v8  ;;  %v14954_v63 = vld [vmem:[%s23825_s2 + $0x5c] sm:$0xf0]  ;;  %v14950_v16 = vld [vmem:[%s23825_s2 + $0x44] sm:$0xf]  ;;  %v14991_v47 = vld [vmem:[%s23825_s2 + $0x18c] sm:$0xf] }
 0x2ce   :  { %v11872_v8 = vld [vmem:[%s23825_s2 + $0x60] sm:$0xf0] }
 0x2cf   :  { %4916 = vmatpush.bf16.msra.mxu0 %v11999_v43 }
 0x2d0   :  { %3959 = vmatpush.bf16.msrb.mxu1 %v11633_v35  ;;  %3985 = vmatpush.bf16.msra.mxu3 %v11637_v34  ;;  %v11966_v34 = vld [vmem:[%s23825_s2 + $0x100] sm:$0xf] }
 0x2d1   :  { %v11967_v40 = vor.u32 %v14978_v55, %v11966_v34  ;;  %v11838_v34 = vld [vmem:[%s23825_s2] sm:$0xf] }
 0x2d2   :  { %v14946_v55 = vld [vmem:[%s23825_s2 + $0x1c] sm:$0xf0] }
 0x2d3   :  { %4917 = vmatpush.bf16.msra.mxu0 %v11967_v40  ;;  %v11839_v40 = vor.u32 %v14946_v55, %v11838_v34  ;;  %v14983_v34 = vld [vmem:[%s23825_s2 + $0x14c] sm:$0xf] }
 0x2d4   :  { %3960 = vmatpush.bf16.msrb.mxu1 %v11601_v32  ;;  %3986 = vmatpush.bf16.msra.mxu3 %v11605_v3  ;;  %v11971_v32 = vor.u32 %v14974_v25, %v11968_v50  ;;  %v11934_v3 = vld [vmem:[%s23825_s2 + $0xc0] sm:$0xf]  ;;  %v14942_v25 = vld [vmem:[%s23825_s2 + $0x4] sm:$0xf] }
 0x2d5   :  { %v11840_v50 = vld [vmem:[%s23825_s2 + $0x20] sm:$0xf0] }
 0x2d7   :  { %3961 = vmatmul.bf16.vlgmr.msrb.gmra.mxu1 %v18896_v11  ;;  %3987 = vmatmul.bf16.vlgmr.msra.gmra.mxu3 %v18896_v11  ;;  %v12064_v11 = vld [vmem:[%s23825_s2 + $0x1e0] sm:$0xf0] }
 0x2d8   :  { %v12067_v52 = vor.u32 %v14998_v5, %v12064_v11 }
 0x2da   :  { %4940 = vmatpush.bf16.msrb.mxu2 %v12067_v52  ;;  %v11902_v52 = vld [vmem:[%s23825_s2 + $0x80] sm:$0xf] }
 0x2db   :  { %v11903_v15 = vor.u32 %v14962_v44, %v11902_v52 }
 0x2de   :  { %4941 = vmatpush.bf16.msrb.mxu2 %v12035_v58  ;;  %v11870_v58 = vld [vmem:[%s23825_s2 + $0x40] sm:$0xf] }
 0x2df   :  { %v11871_v43 = vor.u32 %v14954_v63, %v11870_v58  ;;  %v12040_v58 = vld [vmem:[%s23825_s2 + $0x1a8] sm:$0xf0] }
 0x2e0   :  { %v12043_v63 = vor.u32 %v14991_v47, %v12040_v58  ;;  %v14971_v47 = vld [vmem:[%s23825_s2 + $0xe4] sm:$0xf0] }
 0x2e2   :  { %4942 = vmatpush.bf16.msrb.mxu2 %v12003_v45  ;;  %v11875_v45 = vor.u32 %v14950_v16, %v11872_v8  ;;  %v14987_v8 = vld [vmem:[%s23825_s2 + $0x164] sm:$0xf0] }
 0x2e4   :  { %v19118_v1 = vpop.f32.mrf.mxu0 }
 0x2e6   :  { %4943 = vmatpush.bf16.msrb.mxu2 %v11971_v32  ;;  %v12070_v32 = vld [vmem:[%s23825_s2 + $0x1c8] sm:$0xf] }
 0x2ea   :  { %v19120_v62 = vpop.f32.mrf.mxu2 }
 0x2ec   :  { %v3795_v51 = vpop.f32.mrf.mxu0 }
 0x2ed   :  { %v14970_v51 = vld [vmem:[%s23825_s2 + $0xdc] sm:$0xf0] }
 0x2ee   :  { %v11935_v5 = vor.u32 %v14970_v51, %v11934_v3  ;;  %v15003_v3 = vld [vmem:[%s23825_s2 + $0x1e4] sm:$0xf0]  ;;  %v11843_v51 = vor.u32 %v14942_v25, %v11840_v50 }
 0x2f0   :  { %4918 = vmatpush.bf16.msra.mxu0 %v11935_v5  ;;  %v12072_v5 = vld [vmem:[%s23825_s2 + $0x1e8] sm:$0xf0] }
 0x2f2   :  { %v3821_v12 = vpop.f32.mrf.mxu2 }
 0x2f3   :  { %v11936_v12 = vld [vmem:[%s23825_s2 + $0xe0] sm:$0xf0] }
 0x2f4   :  { %v19134_v18 = vpop.f32.mrf.mxu0  ;;  %v11939_v9 = vor.u32 %v14966_v54, %v11936_v12  ;;  %4919 = vmatpush.bf16.msra.mxu0 %v11903_v15  ;;  %v12071_v54 = vor.u32 %v15003_v3, %v12070_v32  ;;  %v14995_v15 = vld [vmem:[%s23825_s2 + $0x1a4] sm:$0xf0] }
 0x2f5   :  { %v11974_v32 = vld [vmem:[%s23825_s2 + $0x108] sm:$0xf] }
 0x2f6   :  { %4944 = vmatpush.bf16.msrb.mxu2 %v11939_v9  ;;  %v14979_v3 = vld [vmem:[%s23825_s2 + $0x124] sm:$0xf0] }
 0x2f8   :  { %4920 = vmatpush.bf16.msra.mxu0 %v11871_v43  ;;  %v12006_v43 = vld [vmem:[%s23825_s2 + $0x148] sm:$0xf] }
 0x2fa   :  { %v19157_v4 = vpop.f32.mrf.mxu2  ;;  %4945 = vmatpush.bf16.msrb.mxu2 %v11907_v30  ;;  %v12039_v30 = vor.u32 %v14995_v15, %v12038_v37  ;;  %v12320_v37 = vld [vmem:[%s23825_s2 + $0x3e0] sm:$0xf0]  ;;  %v11942_v15 = vld [vmem:[%s23825_s2 + $0xc8] sm:$0xf] }
 0x2fc   :  { %v3847_v35 = vpop.f32.mrf.mxu0  ;;  %4921 = vmatpush.bf16.msra.mxu0 %v11839_v40 }
 0x2fe   :  { %4946 = vmatpush.bf16.msrb.mxu2 %v11875_v45 }
 0x300   :  { %4966 = vmatpush.bf16.msrb.mxu0 %v12071_v54  ;;  %v11975_v54 = vor.u32 %v14979_v3, %v11974_v32  ;;  %v11910_v3 = vld [vmem:[%s23825_s2 + $0x88] sm:$0xf] }
 0x302   :  { %v3873_v61 = vpop.f32.mrf.mxu2  ;;  %4947 = vmatpush.bf16.msrb.mxu2 %v11843_v51  ;;  %v14975_v51 = vld [vmem:[%s23825_s2 + $0x10c] sm:$0xf] }
 0x303   :  { %v14999_v61 = vld [vmem:[%s23825_s2 + $0x1cc] sm:$0xf] }
 0x304   :  { %v19186_v11 = vpop.f32.mrf.mxu0  ;;  %v12075_v12 = vor.u32 %v14999_v61, %v12072_v5  ;;  %4967 = vmatpush.bf16.msrb.mxu0 %v12039_v30  ;;  %v12318_v5 = vld [vmem:[%s23825_s2 + $0x3c0] sm:$0xf] }
 0x306   :  { %4992 = vmatpush.bf16.msra.mxu2 %v12075_v12  ;;  %v15066_v12 = vld [vmem:[%s23825_s2 + $0x3dc] sm:$0xf0] }
 0x30a   :  { %v19209_v21 = vpop.f32.mrf.mxu2  ;;  %4993 = vmatpush.bf16.msra.mxu2 %v12043_v63  ;;  %v11943_v63 = vor.u32 %v14971_v47, %v11942_v15  ;;  %v11878_v15 = vld [vmem:[%s23825_s2 + $0x48] sm:$0xf] }
 0x30c   :  { %v3899_v35 = vpop.f32.mrf.mxu0 }
 0x30d   :  { %v12007_v35 = vor.u32 %v14987_v8, %v12006_v43  ;;  %v11944_v43 = vld [vmem:[%s23825_s2 + $0xe8] sm:$0xf0] }
 0x30f   :  { %4968 = vmatpush.bf16.msrb.mxu0 %v12007_v35  ;;  %v12286_v35 = vld [vmem:[%s23825_s2 + $0x380] sm:$0xf] }
 0x312   :  { %v3925_v44 = vpop.f32.mrf.mxu2 }
 0x313   :  { %4969 = vmatpush.bf16.msrb.mxu0 %v11975_v54  ;;  %v12319_v44 = vor.u32 %v15066_v12, %v12318_v5  ;;  %v12254_v12 = vld [vmem:[%s23825_s2 + $0x340] sm:$0xf] }
 0x314   :  { %v3806_v9 = vpop.f32.mrf.mxu1 }
 0x315   :  { %v3807_v52 = vadd.f32 %v3806_v9, %v19118_v1  ;;  %v15062_v9 = vld [vmem:[%s23825_s2 + $0x3c4] sm:$0xf]  ;;  %4927 = vmatpush.bf16.msra.mxu1 %v12319_v44 }
 0x316   :  { %v15046_v44 = vld [vmem:[%s23825_s2 + $0x344] sm:$0xf] }
 0x317   :  { %v4006_v1 = vadd.f32 %v3807_v52, %v16940_v57  ;;  %v12008_v57 = vld [vmem:[%s23825_s2 + $0x168] sm:$0xf0]  ;;  %4970 = vmatpush.bf16.msrb.mxu0 %v11943_v63  ;;  %v14955_v63 = vld [vmem:[%s23825_s2 + $0x64] sm:$0xf0] }
 0x318   :  { %v12011_v25 = vor.u32 %v14983_v34, %v12008_v57  ;;  %v15058_v34 = vld [vmem:[%s23825_s2 + $0x39c] sm:$0xf0]  ;;  %v15054_v57 = vld [vmem:[%s23825_s2 + $0x384] sm:$0xf] }
 0x319   :  { %v11830_v16 = vmul.f32 -1.442695, %v4006_v1  ;;  %v12323_v1 = vor.u32 %v15062_v9, %v12320_v37  ;;  %v15050_v9 = vld [vmem:[%s23825_s2 + $0x35c] sm:$0xf0]  ;;  %v12256_v37 = vld [vmem:[%s23825_s2 + $0x360] sm:$0xf0] }
 0x31a   :  { %v3832_v45 = vpop.f32.mrf.mxu3  ;;  %4994 = vmatpush.bf16.msra.mxu2 %v12011_v25 }
 0x31b   :  { %15680 = vpow2.f32 %v11830_v16  ;;  %v3833_v55 = vadd.f32 %v3832_v45, %v19120_v62  ;;  %v11976_v62 = vld [vmem:[%s23825_s2 + $0x128] sm:$0xf0]  ;;  %4953 = vmatpush.bf16.msrb.mxu3 %v12323_v1 }
 0x31c   :  { %v3808_v40 = vpop.f32.mrf.mxu1  ;;  %v14967_v16 = vld [vmem:[%s23825_s2 + $0xcc] sm:$0xf] }
 0x31d   :  { %v4007_v50 = vadd.f32 %v3833_v55, %v16943_v59  ;;  %v11979_v59 = vor.u32 %v14975_v51, %v11976_v62  ;;  %v11947_v8 = vor.u32 %v14967_v16, %v11944_v43  ;;  %v12288_v55 = vld [vmem:[%s23825_s2 + $0x3a0] sm:$0xf0]  ;;  %v14963_v51 = vld [vmem:[%s23825_s2 + $0xa4] sm:$0xf0] }
 0x31e   :  { %v12291_v32 = vor.u32 %v15054_v57, %v12288_v55  ;;  %v11911_v62 = vor.u32 %v14963_v51, %v11910_v3  ;;  %v11879_v55 = vor.u32 %v14955_v63, %v11878_v15  ;;  %v11848_v15 = vld [vmem:[%s23825_s2 + $0x28] sm:$0xf0] }
 0x31f   :  { %v11831_v61 = vmul.f32 -1.442695, %v4007_v50  ;;  %4995 = vmatpush.bf16.msra.mxu2 %v11979_v59  ;;  %v12287_v50 = vor.u32 %v15058_v34, %v12286_v35 }
 0x320   :  { %4954 = vmatpush.bf16.msrb.mxu3 %v12291_v32  ;;  %4971 = vmatpush.bf16.msrb.mxu0 %v11911_v62  ;;  %v15038_v62 = vld [vmem:[%s23825_s2 + $0x304] sm:$0xf] }
 0x321   :  { %v15681_v52 = vpop.eup %15680  ;;  %15682 = vpow2.f32 %v11831_v61  ;;  %v14959_v61 = vld [vmem:[%s23825_s2 + $0x8c] sm:$0xf]  ;;  %4928 = vmatpush.bf16.msra.mxu1 %v12287_v50  ;;  %v15042_v50 = vld [vmem:[%s23825_s2 + $0x31c] sm:$0xf0] }
 0x322   :  { %v19296_v30 = vadd.f32 1.0, %v15681_v52  ;;  %v3834_v58 = vpop.f32.mrf.mxu3  ;;  %v12255_v52 = vor.u32 %v15050_v9, %v12254_v12  ;;  %v11846_v12 = vld [vmem:[%s23825_s2 + $0x8] sm:$0xf]  ;;  %v14943_v9 = vld [vmem:[%s23825_s2 + $0xc] sm:$0xf] }
 0x323   :  { %4996 = vmatpush.bf16.msra.mxu2 %v11947_v8  ;;  %v12259_v8 = vor.u32 %v15046_v44, %v12256_v37 }
 0x324   :  { %15684 = vrcp.f32 %v19296_v30  ;;  %v3858_v45 = vpop.f32.mrf.mxu1  ;;  %v4023_v35 = vand.u32 2147483647, %v19296_v30  ;;  %v4025_v3 = vand.u32 2147483648, %v19296_v30  ;;  %4972 = vmatpush.bf16.msrb.mxu0 %v11879_v55  ;;  %vm4019_vm1 = vweird.f32 %v19296_v30  ;;  %v12192_v55 = vld [vmem:[%s23825_s2 + $0x2e0] sm:$0xf0] }
 0x325   :  { %v3859_v25 = vadd.f32 %v3858_v45, %v19134_v18  ;;  %v11912_v18 = vld [vmem:[%s23825_s2 + $0xa8] sm:$0xf0]  ;;  %4929 = vmatpush.bf16.msra.mxu1 %v12255_v52  ;;  %4955 = vmatpush.bf16.msrb.mxu3 %v12259_v8  ;;  %v15034_v8 = vld [vmem:[%s23825_s2 + $0x2dc] sm:$0xf0] }
 0x326   :  { %v19318_v40 = vpop.f32.mrf.mxu0  ;;  %v11915_v5 = vor.u32 %v14959_v61, %v11912_v18  ;;  %v14951_v45 = vld [vmem:[%s23825_s2 + $0x4c] sm:$0xf]  ;;  %v12224_v61 = vld [vmem:[%s23825_s2 + $0x320] sm:$0xf0]  ;;  %vm4024_vm3 = vcmp.eq.f32.partialorder %v4023_v35, 8.507059e+37 }
 0x327   :  { %v15683_v54 = vpop.eup %15682  ;;  %v4008_v58 = vadd.f32 %v3859_v25, %v17113_v46  ;;  %v11880_v46 = vld [vmem:[%s23825_s2 + $0x68] sm:$0xf0] }
 0x328   :  { %v19332_v59 = vadd.f32 1.0, %v15683_v54  ;;  %4997 = vmatpush.bf16.msra.mxu2 %v11915_v5  ;;  %v11883_v25 = vor.u32 %v14951_v45, %v11880_v46  ;;  %v12227_v5 = vor.u32 %v15038_v62, %v12224_v61  ;;  %v15030_v45 = vld [vmem:[%s23825_s2 + $0x2c4] sm:$0xf]  ;;  %v4026_v46 = vor.u32 1.1754944e-38, %v4025_v3 }
 0x32a   :  { %v19349_v47 = vpop.eup %15684  ;;  %15686 = vrcp.f32 %v19332_v59  ;;  %v3884_v1 = vpop.f32.mrf.mxu3  ;;  %4956 = vmatpush.bf16.msrb.mxu3 %v12227_v5  ;;  %v4042_v3 = vand.u32 2147483647, %v19332_v59  ;;  %v15026_v5 = vld [vmem:[%s23825_s2 + $0x29c] sm:$0xf0]  ;;  %vm4038_vm5 = vweird.f32 %v19332_v59 }
 0x32b   :  { %v4015_v16 = vmul.f32 %v19349_v47, %v19296_v30  ;;  %v3885_v43 = vadd.f32 %v3884_v1, %v19157_v4  ;;  %v12222_v4 = vld [vmem:[%s23825_s2 + $0x300] sm:$0xf]  ;;  %15688 = vtanh.f32 %v4008_v58  ;;  %vm4020_vm0 = vweird.f32 %v19349_v47 }
 0x32c   :  { %v19366_v34 = vpop.f32.mrf.mxu2  ;;  %v3860_v57 = vpop.f32.mrf.mxu1  ;;  %v12223_v54 = vor.u32 %v15042_v50, %v12222_v4  ;;  %4998 = vmatpush.bf16.msra.mxu2 %v11883_v25  ;;  %v11851_v1 = vor.u32 %v14943_v9, %v11848_v15  ;;  %vm4021_vm2 = vmor %vm4019_vm1, %vm4020_vm0  ;;  %v4044_v4 = vand.u32 2147483648, %v19332_v59  ;;  %v12160_v9 = vld [vmem:[%s23825_s2 + $0x2a0] sm:$0xf0]  ;;  %vm4043_vm7 = vcmp.eq.f32.partialorder %v4042_v3, 8.507059e+37 }
 0x32d   :  { %v4016_v32 = vsub.f32 1.0, %v4015_v16  ;;  %v4009_v51 = vadd.f32 %v3885_v43, %v17116_v49  ;;  %v14947_v49 = vld [vmem:[%s23825_s2 + $0x24] sm:$0xf0]  ;;  %v12190_v43 = vld [vmem:[%s23825_s2 + $0x2c0] sm:$0xf] }
 0x32e   :  { %v3951_v18 = vpop.f32.mrf.mxu0  ;;  %v11847_v37 = vor.u32 %v14947_v49, %v11846_v12  ;;  %4930 = vmatpush.bf16.msra.mxu1 %v12223_v54  ;;  %v12191_v57 = vor.u32 %v15034_v8, %v12190_v43  ;;  %v598_v54 = vadd.f32 %v17200_v24, %v16991_v22  ;;  %v15022_v24 = vld [vmem:[%s23825_s2 + $0x284] sm:$0xf]  ;;  %v4045_v15 = vor.u32 1.1754944e-38, %v4044_v4  ;;  %v15018_v43 = vld [vmem:[%s23825_s2 + $0x25c] sm:$0xf0] }
 0x32f   :  { %v4017_v52 = vmul.f32 %v19349_v47, %v4016_v32  ;;  %v11832_v44 = vmul.f32 -1.442695, %v4009_v51  ;;  %v12195_v32 = vor.u32 %v15030_v45, %v12192_v55  ;;  %v12158_v18 = vld [vmem:[%s23825_s2 + $0x280] sm:$0xf] }
 0x330   :  { %v15687_v58 = vpop.eup %15686  ;;  %4973 = vmatpush.bf16.msrb.mxu0 %v11847_v37  ;;  %4999 = vmatpush.bf16.msra.mxu2 %v11851_v1 }
 0x331   :  { %v4034_v63 = vmul.f32 %v15687_v58, %v19332_v59  ;;  %v4018_v16 = vadd.f32 %v19349_v47, %v4017_v52  ;;  %15690 = vpow2.f32 %v11832_v44  ;;  %v15689_v51 = vpop.eup %15688  ;;  %vm4039_vm4 = vweird.f32 %v15687_v58  ;;  %4957 = vmatpush.bf16.msrb.mxu3 %v12195_v32 }
 0x332   :  { %v3886_v30 = vpop.f32.mrf.mxu3  ;;  %4931 = vmatpush.bf16.msra.mxu1 %v12191_v57  ;;  %v12159_v52 = vor.u32 %v15026_v5, %v12158_v18  ;;  %v12163_v44 = vor.u32 %v15022_v24, %v12160_v9  ;;  %vm4040_vm6 = vmor %vm4038_vm5, %vm4039_vm4  ;;  %v15067_v18 = vld [vmem:[%s23825_s2 + $0x3e4] sm:$0xf0]  ;;  %v15063_v5 = vld [vmem:[%s23825_s2 + $0x3cc] sm:$0xf] }
 0x333   :  { %v4035_v25 = vsub.f32 1.0, %v4034_v63  ;;  %v4022_v50 = vsel %vm4021_vm2, %v19349_v47, %v4018_v16  ;;  %v12126_v16 = vld [vmem:[%s23825_s2 + $0x240] sm:$0xf]  ;;  %v12128_v30 = vld [vmem:[%s23825_s2 + $0x260] sm:$0xf0] }
 0x334   :  { %v4027_v35 = vsel %vm4024_vm3, %v4026_v46, %v4022_v50  ;;  %v3977_v62 = vpop.f32.mrf.mxu2  ;;  %v3910_v61 = vpop.f32.mrf.mxu1  ;;  %v12127_v59 = vor.u32 %v15018_v43, %v12126_v16  ;;  %v15014_v46 = vld [vmem:[%s23825_s2 + $0x244] sm:$0xf] }
 0x335   :  { %v4036_v47 = vmul.f32 %v15687_v58, %v4035_v25  ;;  %v4069_v12 = vmul.f32 %v15689_v51, %v4027_v35  ;;  %v3911_v49 = vadd.f32 %v3910_v61, %v19186_v11  ;;  %4958 = vmatpush.bf16.msrb.mxu3 %v12163_v44  ;;  %v627_v25 = vadd.f32 %v17202_v31, %v17002_v38  ;;  %v12094_v51 = vld [vmem:[%s23825_s2 + $0x200] sm:$0xf]  ;;  %v12326_v61 = vld [vmem:[%s23825_s2 + $0x3c8] sm:$0xf] }
 0x336   :  { %4932 = vmatpush.bf16.msra.mxu1 %v12159_v52  ;;  %v12131_v32 = vor.u32 %v15014_v46, %v12128_v30 }
 0x337   :  { %v15691_v37 = vpop.eup %15690  ;;  %v4037_v1 = vadd.f32 %v15687_v58, %v4036_v47  ;;  %v4073_v63 = vadd.f32 %v3911_v49, %v598_v54  ;;  %v15010_v54 = vld [vmem:[%s23825_s2 + $0x21c] sm:$0xf0]  ;;  %v12328_v49 = vld [vmem:[%s23825_s2 + $0x3e8] sm:$0xf0] }
 0x338   :  { %v19432_v11 = vadd.f32 1.0, %v15691_v37  ;;  %v12095_v31 = vor.u32 %v15010_v54, %v12094_v51  ;;  %v12331_v9 = vor.u32 %v15063_v5, %v12328_v49  ;;  %v12294_v37 = vld [vmem:[%s23825_s2 + $0x388] sm:$0xf]  ;;  %v12078_v54 = vld [vmem:[%s23825_s2 + $0x1d0] sm:$0xf] }
 0x339   :  { %v4041_v8 = vsel %vm4040_vm6, %v15687_v58, %v4037_v1  ;;  %v11833_v45 = vmul.f32 -1.442695, %v4073_v63  ;;  %4959 = vmatpush.bf16.msrb.mxu3 %v12131_v32  ;;  %v15055_v1 = vld [vmem:[%s23825_s2 + $0x38c] sm:$0xf]  ;;  %v12230_v5 = vld [vmem:[%s23825_s2 + $0x308] sm:$0xf] }
 0x33a   :  { %v4046_v57 = vsel %vm4043_vm7, %v4045_v15, %v4041_v8  ;;  %15692 = vrcp.f32 %v19432_v11  ;;  %v3936_v55 = vpop.f32.mrf.mxu3  ;;  %4933 = vmatpush.bf16.msra.mxu1 %v12127_v59  ;;  %v15059_v15 = vld [vmem:[%s23825_s2 + $0x3a4] sm:$0xf0]  ;;  %v12296_v8 = vld [vmem:[%s23825_s2 + $0x3a8] sm:$0xf0]  ;;  %v4062_v46 = vand.u32 2147483647, %v19432_v11  ;;  %vm4058_vm9 = vweird.f32 %v19432_v11 }
 0x33b   :  { %v4068_v58 = vmul.f32 %v4046_v57, %v18544_v48  ;;  %15694 = vpow2.f32 %v11833_v45  ;;  %v3937_v4 = vadd.f32 %v3936_v55, %v19209_v21  ;;  %v15006_v48 = vld [vmem:[%s23825_s2 + $0x204] sm:$0xf]  ;;  %v12295_v43 = vor.u32 %v15059_v15, %v12294_v37  ;;  %v12262_v55 = vld [vmem:[%s23825_s2 + $0x348] sm:$0xf] }
 0x33c   :  { %v3912_v50 = vpop.f32.mrf.mxu1  ;;  %v12096_v21 = vld [vmem:[%s23825_s2 + $0x220] sm:$0xf0]  ;;  %v12299_v59 = vor.u32 %v15055_v1, %v12296_v8  ;;  %v4064_v30 = vand.u32 2147483648, %v19432_v11  ;;  %vm4063_vm11 = vcmp.eq.f32.partialorder %v4062_v46, 8.507059e+37  ;;  %v12046_v1 = vld [vmem:[%s23825_s2 + $0x190] sm:$0xf] }
 0x33d   :  { %v19457_v35 = vadd.f32 %v4069_v12, %v4068_v58  ;;  %v4074_v3 = vadd.f32 %v3937_v4, %v627_v25  ;;  %v12099_v62 = vor.u32 %v15006_v48, %v12096_v21  ;;  %v12327_v12 = vor.u32 %v15067_v18, %v12326_v61  ;;  %v15051_v25 = vld [vmem:[%s23825_s2 + $0x364] sm:$0xf0]  ;;  %v15047_v58 = vld [vmem:[%s23825_s2 + $0x34c] sm:$0xf]  ;;  %v12048_v46 = vld [vmem:[%s23825_s2 + $0x1b0] sm:$0xf0] }
 0x33e   :  { %4934 = vmatpush.bf16.msra.mxu1 %v12095_v31  ;;  %v12263_v4 = vor.u32 %v15051_v25, %v12262_v55  ;;  %v12264_v50 = vld [vmem:[%s23825_s2 + $0x368] sm:$0xf0]  ;;  %v4065_v48 = vor.u32 1.1754944e-38, %v4064_v30  ;;  %v15035_v55 = vld [vmem:[%s23825_s2 + $0x2e4] sm:$0xf0] }
 0x33f   :  { %v11834_v47 = vmul.f32 -1.442695, %v4074_v3  ;;  %4960 = vmatpush.bf16.msrb.mxu3 %v12099_v62  ;;  %v15004_v3 = vld [vmem:[%s23825_s2 + $0x1ec] sm:$0xf0]  ;;  %v12267_v31 = vor.u32 %v15047_v58, %v12264_v50  ;;  %v15000_v62 = vld [vmem:[%s23825_s2 + $0x1d4] sm:$0xf] }
 0x340   :  { %v15693_v24 = vpop.eup %15692  ;;  %v12079_v37 = vor.u32 %v15004_v3, %v12078_v54  ;;  %v19569_v25 = vld [vmem:[%s23825_s2 + $0x150] sm:$0xf]  ;;  %v12200_v50 = vld [vmem:[%s23825_s2 + $0x2e8] sm:$0xf0] }
 0x341   :  { %v15695_v52 = vpop.eup %15694  ;;  %v4054_v44 = vmul.f32 %v15693_v24, %v19432_v11  ;;  %15696 = vpow2.f32 %v11834_v47  ;;  %vm4059_vm8 = vweird.f32 %v15693_v24  ;;  %v12080_v11 = vld [vmem:[%s23825_s2 + $0x1f0] sm:$0xf0]  ;;  %v15043_v47 = vld [vmem:[%s23825_s2 + $0x324] sm:$0xf0]  ;;  %v14988_v3 = vld [vmem:[%s23825_s2 + $0x16c] sm:$0xf0] }
 0x342   :  { %4979 = vmatpush.bf16.msrb.mxu1 %v12327_v12  ;;  %v19487_v63 = vadd.f32 1.0, %v15695_v52  ;;  %v3938_v16 = vpop.f32.mrf.mxu3  ;;  %15698 = vtanh.f32 %v19457_v35  ;;  %vm4060_vm10 = vmor %vm4058_vm9, %vm4059_vm8  ;;  %v12083_v15 = vor.u32 %v15000_v62, %v12080_v11 }
 0x343   :  { %v4055_v45 = vsub.f32 1.0, %v4054_v44  ;;  %5005 = vmatpush.bf16.msra.mxu3 %v12331_v9  ;;  %v15039_v9 = vld [vmem:[%s23825_s2 + $0x30c] sm:$0xf]  ;;  %v14996_v16 = vld [vmem:[%s23825_s2 + $0x1ac] sm:$0xf0] }
 0x344   :  { %15700 = vrcp.f32 %v19487_v63  ;;  %vm4086_vm14 = vweird.f32 %v19487_v63 }
 0x345   :  { %v4056_v57 = vmul.f32 %v15693_v24, %v4055_v45 }
 0x346   :  { %4980 = vmatpush.bf16.msrb.mxu1 %v12295_v43  ;;  %v12231_v43 = vor.u32 %v15043_v47, %v12230_v5  ;;  %v12166_v5 = vld [vmem:[%s23825_s2 + $0x288] sm:$0xf] }
 0x347   :  { %v15697_v32 = vpop.eup %15696  ;;  %v4057_v51 = vadd.f32 %v15693_v24, %v4056_v57  ;;  %5006 = vmatpush.bf16.msra.mxu3 %v12299_v59  ;;  %v14992_v59 = vld [vmem:[%s23825_s2 + $0x194] sm:$0xf]  ;;  %v12198_v57 = vld [vmem:[%s23825_s2 + $0x2c8] sm:$0xf] }
 0x348   :  { %v19515_v21 = vadd.f32 1.0, %v15697_v32  ;;  %v15699_v61 = vpop.eup %15698  ;;  %v12199_v58 = vor.u32 %v15035_v55, %v12198_v57  ;;  %v12051_v54 = vor.u32 %v14992_v59, %v12048_v46  ;;  %v15027_v47 = vld [vmem:[%s23825_s2 + $0x2a4] sm:$0xf0]  ;;  %v14976_v46 = vld [vmem:[%s23825_s2 + $0x114] sm:$0xf] }
 0x349   :  { %v4061_v18 = vsel %vm4060_vm10, %v15693_v24, %v4057_v51  ;;  %v12232_v24 = vld [vmem:[%s23825_s2 + $0x328] sm:$0xf0]  ;;  %v12047_v51 = vor.u32 %v14996_v16, %v12046_v1  ;;  %v12015_v1 = vor.u32 %v14988_v3, %v19569_v25  ;;  %v11984_v55 = vld [vmem:[%s23825_s2 + $0x130] sm:$0xf0] }
 0x34a   :  { %4981 = vmatpush.bf16.msrb.mxu1 %v12263_v4  ;;  %v19529_v12 = vpop.eup %15700  ;;  %v4066_v49 = vsel %vm4063_vm11, %v4065_v48, %v4061_v18  ;;  %15702 = vrcp.f32 %v19515_v21  ;;  %v12235_v30 = vor.u32 %v15039_v9, %v12232_v24  ;;  %v15031_v4 = vld [vmem:[%s23825_s2 + $0x2cc] sm:$0xf]  ;;  %v12016_v48 = vld [vmem:[%s23825_s2 + $0x170] sm:$0xf0]  ;;  %v12167_v24 = vor.u32 %v15027_v47, %v12166_v5 }
 0x34b   :  { %v19538_v52 = vmul.f32 %v15699_v61, %v4066_v49  ;;  %v4082_v44 = vmul.f32 %v19529_v12, %v19487_v63  ;;  %5007 = vmatpush.bf16.msra.mxu3 %v12267_v31  ;;  %v14984_v31 = vld [vmem:[%s23825_s2 + $0x154] sm:$0xf]  ;;  %v12203_v18 = vor.u32 %v15031_v4, %v12200_v50  ;;  %v656_v49 = vadd.f32 %v17363_v39, %v17279_v6  ;;  %v11982_v39 = vld [vmem:[%s23825_s2 + $0x110] sm:$0xf]  ;;  %v15019_v4 = vld [vmem:[%s23825_s2 + $0x264] sm:$0xf0] }
 0x34c   :  { %v12019_v16 = vor.u32 %v14984_v31, %v12016_v48  ;;  %vm4087_vm12 = vweird.f32 %v19529_v12  ;;  %v4109_v59 = vand.u32 2147483647, %v19515_v21  ;;  %v4092_v50 = vand.u32 2147483648, %v19487_v63  ;;  %v12136_v3 = vld [vmem:[%s23825_s2 + $0x268] sm:$0xf0] }
 0x34d   :  { %v19550_v8 = vpack.c.bf16 %v19538_v52, %v19538_v52  ;;  %v4083_v45 = vsub.f32 1.0, %v4082_v44  ;;  %v15023_v44 = vld [vmem:[%s23825_s2 + $0x28c] sm:$0xf]  ;;  %v685_v31 = vadd.f32 %v17365_v7, %v17282_v0  ;;  %vm4105_vm15 = vweird.f32 %v19515_v21  ;;  %vm19644_vm0 = vmor %vm4086_vm14, %vm4087_vm12  ;;  %v14972_v7 = vld [vmem:[%s23825_s2 + $0xec] sm:$0xf0] }
 0x34e   :  { %4982 = vmatpush.bf16.msrb.mxu1 %v12231_v43  ;;  %v4111_v43 = vand.u32 2147483648, %v19515_v21  ;;  %vm4110_vm2 = vcmp.eq.f32.partialorder %v4109_v59, 8.507059e+37 }
 0x34f   :  { %4922 = vmatmul.bf16.vlgmr.msra.gmra.mxu0 %v19550_v8  ;;  %4948 = vmatmul.bf16.vlgmr.msrb.gmra.mxu2 %v19550_v8  ;;  %v4084_v61 = vmul.f32 %v19529_v12, %v4083_v45 }
 0x350   :  { %v19577_v32 = vpop.eup %15702  ;;  %5018 = vmatpush.bf16.msra.mxu0 %v12079_v37  ;;  %5044 = vmatpush.bf16.msrb.mxu2 %v12083_v15  ;;  %v12168_v37 = vld [vmem:[%s23825_s2 + $0x2a8] sm:$0xf0]  ;;  %v4112_v5 = vor.u32 1.1754944e-38, %v4111_v43 }
 0x351   :  { %v4101_v62 = vmul.f32 %v19577_v32, %v19515_v21  ;;  %5008 = vmatpush.bf16.msra.mxu3 %v12235_v30  ;;  %vm4106_vm13 = vweird.f32 %v19577_v32  ;;  %v4085_v57 = vadd.f32 %v19529_v12, %v4084_v61  ;;  %v12171_v25 = vor.u32 %v15023_v44, %v12168_v37 }
 0x352   :  { %4983 = vmatpush.bf16.msrb.mxu1 %v12199_v58  ;;  %v12134_v58 = vld [vmem:[%s23825_s2 + $0x248] sm:$0xf]  ;;  %vm19658_vm1 = vmor %vm4105_vm15, %vm4106_vm13 }
 0x353   :  { %v4102_v15 = vsub.f32 1.0, %v4101_v62  ;;  %v4090_v62 = vand.u32 2147483647, %v19487_v63  ;;  %v4089_v44 = vsel %vm19644_vm0, %v19529_v12, %v4085_v57 }
 0x354   :  { %v3962_v11 = vpop.f32.mrf.mxu1  ;;  %5019 = vmatpush.bf16.msra.mxu0 %v12047_v51  ;;  %5045 = vmatpush.bf16.msrb.mxu2 %v12051_v54  ;;  %v12135_v51 = vor.u32 %v15019_v4, %v12134_v58  ;;  %v15015_v54 = vld [vmem:[%s23825_s2 + $0x24c] sm:$0xf]  ;;  %v11918_v58 = vld [vmem:[%s23825_s2 + $0x90] sm:$0xf] }
 0x355   :  { %v3963_v9 = vadd.f32 %v3962_v11, %v19318_v40  ;;  %v14980_v40 = vld [vmem:[%s23825_s2 + $0x12c] sm:$0xf0]  ;;  %v4103_v30 = vmul.f32 %v19577_v32, %v4102_v15  ;;  %5009 = vmatpush.bf16.msra.mxu3 %v12203_v18  ;;  %v12139_v15 = vor.u32 %v15015_v54, %v12136_v3  ;;  %vm4091_vm3 = vcmp.eq.f32.partialorder %v4090_v62, 8.507059e+37 }
 0x356   :  { %4984 = vmatpush.bf16.msrb.mxu1 %v12167_v24  ;;  %v11950_v18 = vld [vmem:[%s23825_s2 + $0xd0] sm:$0xf]  ;;  %v11983_v47 = vor.u32 %v14980_v40, %v11982_v39  ;;  %v11952_v24 = vld [vmem:[%s23825_s2 + $0xf0] sm:$0xf0]  ;;  %v4093_v39 = vor.u32 1.1754944e-38, %v4092_v50 }
 0x357   :  { %v4075_v45 = vadd.f32 %v3963_v9, %v656_v49  ;;  %v4104_v11 = vadd.f32 %v19577_v32, %v4103_v30  ;;  %v11987_v49 = vor.u32 %v14976_v46, %v11984_v55  ;;  %v14968_v9 = vld [vmem:[%s23825_s2 + $0xd4] sm:$0xf]  ;;  %v11951_v55 = vor.u32 %v14972_v7, %v11950_v18  ;;  %v14964_v50 = vld [vmem:[%s23825_s2 + $0xac] sm:$0xf0] }
 0x358   :  { %5020 = vmatpush.bf16.msra.mxu0 %v12015_v1  ;;  %5046 = vmatpush.bf16.msrb.mxu2 %v12019_v16  ;;  %v12102_v1 = vld [vmem:[%s23825_s2 + $0x208] sm:$0xf]  ;;  %v4094_v30 = vsel %vm4091_vm3, %v4093_v39, %v4089_v44  ;;  %v11919_v48 = vor.u32 %v14964_v50, %v11918_v58  ;;  %v14952_v18 = vld [vmem:[%s23825_s2 + $0x54] sm:$0xf]  ;;  %v14989_v58 = vld [vmem:[%s23825_s2 + $0x174] sm:$0xf0] }
 0x359   :  { %15704 = vtanh.f32 %v4075_v45  ;;  %5010 = vmatpush.bf16.msra.mxu3 %v12171_v25  ;;  %v15011_v16 = vld [vmem:[%s23825_s2 + $0x224] sm:$0xf0]  ;;  %v12104_v45 = vld [vmem:[%s23825_s2 + $0x228] sm:$0xf0]  ;;  %v11955_v25 = vor.u32 %v14968_v9, %v11952_v24  ;;  %v11888_v7 = vld [vmem:[%s23825_s2 + $0x70] sm:$0xf0] }
 0x35a   :  { %v3988_v61 = vpop.f32.mrf.mxu3  ;;  %4985 = vmatpush.bf16.msrb.mxu1 %v12135_v51  ;;  %v12103_v12 = vor.u32 %v15011_v16, %v12102_v1  ;;  %v11920_v51 = vld [vmem:[%s23825_s2 + $0xb0] sm:$0xf0]  ;;  %v12088_v1 = vld [vmem:[%s23825_s2 + $0x1f8] sm:$0xf0] }
 0x35b   :  { %v3989_v63 = vadd.f32 %v3988_v61, %v19366_v34  ;;  %v4108_v34 = vsel %vm19658_vm1, %v19577_v32, %v4104_v11  ;;  %v15007_v32 = vld [vmem:[%s23825_s2 + $0x20c] sm:$0xf]  ;;  %v11886_v11 = vld [vmem:[%s23825_s2 + $0x50] sm:$0xf]  ;;  %v14944_v9 = vld [vmem:[%s23825_s2 + $0x14] sm:$0xf] }
 0x35c   :  { %v3964_v37 = vpop.f32.mrf.mxu1  ;;  %v4113_v40 = vsel %vm4110_vm2, %v4112_v5, %v4108_v34  ;;  %5021 = vmatpush.bf16.msra.mxu0 %v11983_v47  ;;  %5047 = vmatpush.bf16.msrb.mxu2 %v11987_v49  ;;  %v12107_v54 = vor.u32 %v15007_v32, %v12104_v45  ;;  %v14956_v61 = vld [vmem:[%s23825_s2 + $0x6c] sm:$0xf0]  ;;  %v11856_v44 = vld [vmem:[%s23825_s2 + $0x30] sm:$0xf0]  ;;  %v12086_v34 = vld [vmem:[%s23825_s2 + $0x1d8] sm:$0xf] }
 0x35d   :  { %v4076_v43 = vadd.f32 %v3989_v63, %v685_v31  ;;  %v4135_v59 = vmul.f32 %v4113_v40, %v18783_v29  ;;  %v14960_v29 = vld [vmem:[%s23825_s2 + $0x94] sm:$0xf]  ;;  %5011 = vmatpush.bf16.msra.mxu3 %v12139_v15  ;;  %v11887_v5 = vor.u32 %v14956_v61, %v11886_v11  ;;  %v11891_v63 = vor.u32 %v14952_v18, %v11888_v7  ;;  %v11854_v47 = vld [vmem:[%s23825_s2 + $0x10] sm:$0xf]  ;;  %v15005_v37 = vld [vmem:[%s23825_s2 + $0x1f4] sm:$0xf0] }
 0x35e   :  { %4986 = vmatpush.bf16.msrb.mxu1 %v12103_v12  ;;  %v11923_v62 = vor.u32 %v14960_v29, %v11920_v51  ;;  %v14948_v49 = vld [vmem:[%s23825_s2 + $0x2c] sm:$0xf0]  ;;  %v15001_v15 = vld [vmem:[%s23825_s2 + $0x1dc] sm:$0xf]  ;;  %v11859_v39 = vor.u32 %v14944_v9, %v11856_v44  ;;  %v12087_v40 = vor.u32 %v15005_v37, %v12086_v34  ;;  %v12054_v12 = vld [vmem:[%s23825_s2 + $0x198] sm:$0xf] }
 0x35f   :  { %v15705_v46 = vpop.eup %15704  ;;  %v11835_v57 = vmul.f32 -1.442695, %v4076_v43  ;;  %4974 = vmatmul.bf16.vlgmr.msrb.gmra.mxu0 %v19550_v8  ;;  %5000 = vmatmul.bf16.vlgmr.msra.gmra.mxu2 %v19550_v8  ;;  %v11855_v16 = vor.u32 %v14948_v49, %v11854_v47  ;;  %v12091_v43 = vor.u32 %v15001_v15, %v12088_v1  ;;  %v14997_v32 = vld [vmem:[%s23825_s2 + $0x1b4] sm:$0xf0]  ;;  %v14993_v45 = vld [vmem:[%s23825_s2 + $0x19c] sm:$0xf] }
 0x360   :  { %v4136_v4 = vmul.f32 %v15705_v46, %v4094_v30  ;;  %5022 = vmatpush.bf16.msra.mxu0 %v11951_v55  ;;  %5048 = vmatpush.bf16.msrb.mxu2 %v11955_v25  ;;  %v12055_v30 = vor.u32 %v14997_v32, %v12054_v12  ;;  %v12022_v55 = vld [vmem:[%s23825_s2 + $0x158] sm:$0xf]  ;;  %v12024_v50 = vld [vmem:[%s23825_s2 + $0x178] sm:$0xf0]  ;;  %v15068_v9 = vld [vmem:[%s23825_s2 + $0x3ec] sm:$0xf0] }
 0x361   :  { %15706 = vpow2.f32 %v11835_v57  ;;  %5012 = vmatpush.bf16.msra.mxu3 %v12107_v54  ;;  %v12023_v54 = vor.u32 %v14989_v58, %v12022_v55  ;;  %v14977_v18 = vld [vmem:[%s23825_s2 + $0x11c] sm:$0xf]  ;;  %v15064_v44 = vld [vmem:[%s23825_s2 + $0x3d4] sm:$0xf]  ;;  %v11958_v37 = vld [vmem:[%s23825_s2 + $0xd8] sm:$0xf] }
 0x362   :  { %v19700_v3 = vadd.f32 %v4136_v4, %v4135_v59  ;;  %v3990_v31 = vpop.f32.mrf.mxu3  ;;  %v12056_v59 = vld [vmem:[%s23825_s2 + $0x1b8] sm:$0xf0]  ;;  %v15056_v55 = vld [vmem:[%s23825_s2 + $0x394] sm:$0xf]  ;;  %v11926_v58 = vld [vmem:[%s23825_s2 + $0x98] sm:$0xf] }
 0x363   :  { %v12059_v57 = vor.u32 %v14993_v45, %v12056_v59  ;;  %v14985_v4 = vld [vmem:[%s23825_s2 + $0x15c] sm:$0xf]  ;;  %v12302_v45 = vld [vmem:[%s23825_s2 + $0x390] sm:$0xf] }
 0x364   :  { %5023 = vmatpush.bf16.msra.mxu0 %v11919_v48  ;;  %5049 = vmatpush.bf16.msrb.mxu2 %v11923_v62  ;;  %v12027_v31 = vor.u32 %v14985_v4, %v12024_v50  ;;  %v11990_v48 = vld [vmem:[%s23825_s2 + $0x118] sm:$0xf]  ;;  %v11992_v7 = vld [vmem:[%s23825_s2 + $0x138] sm:$0xf0]  ;;  %v15060_v59 = vld [vmem:[%s23825_s2 + $0x3ac] sm:$0xf0] }
 0x365   :  { %v14981_v62 = vld [vmem:[%s23825_s2 + $0x134] sm:$0xf0]  ;;  %v11995_v49 = vor.u32 %v14977_v18, %v11992_v7  ;;  %v14961_v50 = vld [vmem:[%s23825_s2 + $0x9c] sm:$0xf]  ;;  %v12272_v18 = vld [vmem:[%s23825_s2 + $0x370] sm:$0xf0] }
 0x366   :  { %v11991_v47 = vor.u32 %v14981_v62, %v11990_v48  ;;  %v14965_v4 = vld [vmem:[%s23825_s2 + $0xb4] sm:$0xf0]  ;;  %v15052_v48 = vld [vmem:[%s23825_s2 + $0x36c] sm:$0xf0] }
 0x367   :  { %v15707_v21 = vpop.eup %15706  ;;  %v11927_v62 = vor.u32 %v14965_v4, %v11926_v58  ;;  %v11894_v7 = vld [vmem:[%s23825_s2 + $0x58] sm:$0xf] }
 0x368   :  { %v4119_v24 = vadd.f32 1.0, %v15707_v21  ;;  %5024 = vmatpush.bf16.msra.mxu0 %v11887_v5  ;;  %5050 = vmatpush.bf16.msrb.mxu2 %v11891_v63  ;;  %v12334_v5 = vld [vmem:[%s23825_s2 + $0x3d0] sm:$0xf] }
 0x369   :  { %v12335_v12 = vor.u32 %v15068_v9, %v12334_v5  ;;  %v14953_v5 = vld [vmem:[%s23825_s2 + $0x5c] sm:$0xf]  ;;  %v12238_v9 = vld [vmem:[%s23825_s2 + $0x310] sm:$0xf] }
 0x36a   :  { %15708 = vrcp.f32 %v4119_v24  ;;  %v4131_v51 = vand.u32 2147483648, %v4119_v24  ;;  %v4129_v61 = vand.u32 2147483647, %v4119_v24  ;;  %vm4125_vm5 = vweird.f32 %v4119_v24 }
 0x36b   :  { %15710 = vtanh.f32 %v19700_v3 }
 0x36c   :  { %5025 = vmatpush.bf16.msra.mxu0 %v11855_v16  ;;  %5051 = vmatpush.bf16.msrb.mxu2 %v11859_v39  ;;  %v4132_v63 = vor.u32 1.1754944e-38, %v4131_v51  ;;  %vm4130_vm7 = vcmp.eq.f32.partialorder %v4129_v61, 8.507059e+37  ;;  %v14973_v16 = vld [vmem:[%s23825_s2 + $0xf4] sm:$0xf0]  ;;  %v14969_v39 = vld [vmem:[%s23825_s2 + $0xdc] sm:$0xf]  ;;  %v12303_v51 = vor.u32 %v15060_v59, %v12302_v45 }
 0x36d   :  { %v15048_v61 = vld [vmem:[%s23825_s2 + $0x354] sm:$0xf]  ;;  %v12206_v45 = vld [vmem:[%s23825_s2 + $0x2d0] sm:$0xf] }
 0x36f   :  { %5026 = vmatmul.bf16.vlgmr.msra.gmra.mxu0 %v19550_v8  ;;  %5052 = vmatmul.bf16.vlgmr.msrb.gmra.mxu2 %v19550_v8 }
 0x370   :  { %v15709_v46 = vpop.eup %15708  ;;  %5070 = vmatpush.bf16.msrb.mxu0 %v12087_v40  ;;  %5096 = vmatpush.bf16.msra.mxu2 %v12091_v43  ;;  %v11960_v40 = vld [vmem:[%s23825_s2 + $0xf8] sm:$0xf0] }
 0x371   :  { %v4121_v25 = vmul.f32 %v15709_v46, %v4119_v24  ;;  %vm4126_vm4 = vweird.f32 %v15709_v46  ;;  %v12336_v24 = vld [vmem:[%s23825_s2 + $0x3f0] sm:$0xf0]  ;;  %v15711_v15 = vpop.eup %15710 }
 0x372   :  { %vm4127_vm6 = vmor %vm4125_vm5, %vm4126_vm4  ;;  %v12339_v32 = vor.u32 %v15064_v44, %v12336_v24  ;;  %v15044_v44 = vld [vmem:[%s23825_s2 + $0x32c] sm:$0xf0] }
 0x373   :  { %v4122_v29 = vsub.f32 1.0, %v4121_v25  ;;  %v12304_v25 = vld [vmem:[%s23825_s2 + $0x3b0] sm:$0xf0] }
 0x374   :  { %5071 = vmatpush.bf16.msrb.mxu0 %v12055_v30  ;;  %5097 = vmatpush.bf16.msra.mxu2 %v12059_v57  ;;  %v11959_v30 = vor.u32 %v14973_v16, %v11958_v37  ;;  %v11963_v57 = vor.u32 %v14969_v39, %v11960_v40  ;;  %v15040_v37 = vld [vmem:[%s23825_s2 + $0x314] sm:$0xf]  ;;  %v14949_v16 = vld [vmem:[%s23825_s2 + $0x34] sm:$0xf0]  ;;  %v14945_v39 = vld [vmem:[%s23825_s2 + $0x1c] sm:$0xf] }
 0x375   :  { %v4123_v11 = vmul.f32 %v15709_v46, %v4122_v29  ;;  %v11928_v29 = vld [vmem:[%s23825_s2 + $0xb8] sm:$0xf0] }
 0x376   :  { %v11864_v40 = vld [vmem:[%s23825_s2 + $0x38] sm:$0xf0] }
 0x377   :  { %v4124_v21 = vadd.f32 %v15709_v46, %v4123_v11  ;;  %v11931_v11 = vor.u32 %v14961_v50, %v11928_v29  ;;  %v12174_v50 = vld [vmem:[%s23825_s2 + $0x290] sm:$0xf] }
 0x378   :  { %5072 = vmatpush.bf16.msrb.mxu0 %v12023_v54  ;;  %5098 = vmatpush.bf16.msra.mxu2 %v12027_v31  ;;  %v12307_v54 = vor.u32 %v15056_v55, %v12304_v25  ;;  %v12270_v31 = vld [vmem:[%s23825_s2 + $0x350] sm:$0xf]  ;;  %v15032_v55 = vld [vmem:[%s23825_s2 + $0x2d4] sm:$0xf] }
 0x379   :  { %v4128_v34 = vsel %vm4127_vm6, %v15709_v46, %v4124_v21  ;;  %v14957_v21 = vld [vmem:[%s23825_s2 + $0x74] sm:$0xf0]  ;;  %v12208_v25 = vld [vmem:[%s23825_s2 + $0x2f0] sm:$0xf0]  ;;  %v15028_v29 = vld [vmem:[%s23825_s2 + $0x2ac] sm:$0xf0] }
 0x37a   :  { %v4133_v1 = vsel %vm4130_vm7, %v4132_v63, %v4128_v34  ;;  %v11896_v63 = vld [vmem:[%s23825_s2 + $0x78] sm:$0xf0]  ;;  %v11895_v34 = vor.u32 %v14957_v21, %v11894_v7  ;;  %v12211_v4 = vor.u32 %v15032_v55, %v12208_v25 }
 0x37b   :  { %v19803_v43 = vmul.f32 %v15711_v15, %v4133_v1  ;;  %v11899_v24 = vor.u32 %v14953_v5, %v11896_v63  ;;  %v12240_v15 = vld [vmem:[%s23825_s2 + $0x330] sm:$0xf0]  ;;  %v11862_v1 = vld [vmem:[%s23825_s2 + $0x18] sm:$0xf]  ;;  %v15012_v5 = vld [vmem:[%s23825_s2 + $0x22c] sm:$0xf0] }
 0x37c   :  { %5073 = vmatpush.bf16.msrb.mxu0 %v11991_v47  ;;  %5099 = vmatpush.bf16.msra.mxu2 %v11995_v49  ;;  %v12271_v47 = vor.u32 %v15052_v48, %v12270_v31  ;;  %v12275_v49 = vor.u32 %v15048_v61, %v12272_v18  ;;  %v11863_v59 = vor.u32 %v14949_v16, %v11862_v1  ;;  %v15016_v61 = vld [vmem:[%s23825_s2 + $0x254] sm:$0xf]  ;;  %v12310_v16 = vld [vmem:[%s23825_s2 + $0x398] sm:$0xf]  ;;  %v12280_v55 = vld [vmem:[%s23825_s2 + $0x378] sm:$0xf0] }
 0x37d   :  { %v19813_v46 = vpack.c.bf16 %v19803_v43, %v19803_v43  ;;  %v12175_v31 = vor.u32 %v15028_v29, %v12174_v50  ;;  %v12144_v18 = vld [vmem:[%s23825_s2 + $0x270] sm:$0xf0]  ;;  %v15045_v50 = vld [vmem:[%s23825_s2 + $0x334] sm:$0xf0]  ;;  %v15041_v29 = vld [vmem:[%s23825_s2 + $0x31c] sm:$0xf] }
 0x37e   :  { %v12147_v21 = vor.u32 %v15016_v61, %v12144_v18  ;;  %v15008_v63 = vld [vmem:[%s23825_s2 + $0x214] sm:$0xf]  ;;  %v12216_v61 = vld [vmem:[%s23825_s2 + $0x2f8] sm:$0xf0] }
 0x37f   :  { %4935 = vmatmul.bf16.vlgmr.msra.gmra.mxu1 %v19813_v46  ;;  %4961 = vmatmul.bf16.vlgmr.msrb.gmra.mxu3 %v19813_v46 }
 0x380   :  { %5031 = vmatpush.bf16.msra.mxu1 %v12335_v12  ;;  %5057 = vmatpush.bf16.msrb.mxu3 %v12339_v32  ;;  %v12239_v12 = vor.u32 %v15044_v44, %v12238_v9  ;;  %v12243_v32 = vor.u32 %v15040_v37, %v12240_v15  ;;  %v15069_v9 = vld [vmem:[%s23825_s2 + $0x3f4] sm:$0xf0]  ;;  %v15065_v44 = vld [vmem:[%s23825_s2 + $0x3dc] sm:$0xf] }
 0x381   :  { %5074 = vmatpush.bf16.msrb.mxu0 %v11959_v30  ;;  %5100 = vmatpush.bf16.msra.mxu2 %v11963_v57  ;;  %v11867_v30 = vor.u32 %v14945_v39, %v11864_v40  ;;  %v15036_v57 = vld [vmem:[%s23825_s2 + $0x2ec] sm:$0xf0]  ;;  %v15061_v39 = vld [vmem:[%s23825_s2 + $0x3b4] sm:$0xf0]  ;;  %v15057_v40 = vld [vmem:[%s23825_s2 + $0x39c] sm:$0xf] }
 0x382   :  { %v12207_v58 = vor.u32 %v15036_v57, %v12206_v45  ;;  %v15049_v57 = vld [vmem:[%s23825_s2 + $0x35c] sm:$0xf] }
 0x384   :  { %5032 = vmatpush.bf16.msra.mxu1 %v12303_v51  ;;  %5058 = vmatpush.bf16.msrb.mxu3 %v12307_v54  ;;  %v15024_v51 = vld [vmem:[%s23825_s2 + $0x294] sm:$0xf] }
 0x385   :  { %5075 = vmatpush.bf16.msrb.mxu0 %v11927_v62  ;;  %5101 = vmatpush.bf16.msra.mxu2 %v11931_v11  ;;  %v12176_v54 = vld [vmem:[%s23825_s2 + $0x2b0] sm:$0xf0]  ;;  %v12142_v62 = vld [vmem:[%s23825_s2 + $0x250] sm:$0xf] }
 0x386   :  { %v12179_v48 = vor.u32 %v15024_v51, %v12176_v54  ;;  %v15020_v11 = vld [vmem:[%s23825_s2 + $0x26c] sm:$0xf0]  ;;  %v12248_v51 = vld [vmem:[%s23825_s2 + $0x338] sm:$0xf0] }
 0x387   :  { %v12143_v7 = vor.u32 %v15020_v11, %v12142_v62  ;;  %v15037_v62 = vld [vmem:[%s23825_s2 + $0x2f4] sm:$0xf0]  ;;  %v15033_v11 = vld [vmem:[%s23825_s2 + $0x2dc] sm:$0xf] }
 0x388   :  { %5033 = vmatpush.bf16.msra.mxu1 %v12271_v47  ;;  %5059 = vmatpush.bf16.msrb.mxu3 %v12275_v49  ;;  %v12112_v47 = vld [vmem:[%s23825_s2 + $0x230] sm:$0xf0]  ;;  %v12342_v49 = vld [vmem:[%s23825_s2 + $0x3d8] sm:$0xf] }
 0x389   :  { %5076 = vmatpush.bf16.msrb.mxu0 %v11895_v34  ;;  %5102 = vmatpush.bf16.msra.mxu2 %v11899_v24  ;;  %v12344_v34 = vld [vmem:[%s23825_s2 + $0x3f8] sm:$0xf0]  ;;  %v12115_v37 = vor.u32 %v15008_v63, %v12112_v47  ;;  %v12343_v15 = vor.u32 %v15069_v9, %v12342_v49  ;;  %v12150_v9 = vld [vmem:[%s23825_s2 + $0x258] sm:$0xf] }
 0x38a   :  { %v12347_v1 = vor.u32 %v15065_v44, %v12344_v34  ;;  %v12184_v63 = vld [vmem:[%s23825_s2 + $0x2b8] sm:$0xf0]  ;;  %v15021_v44 = vld [vmem:[%s23825_s2 + $0x274] sm:$0xf0] }
 0x38b   :  { %v15017_v34 = vld [vmem:[%s23825_s2 + $0x25c] sm:$0xf] }
 0x38c   :  { %5034 = vmatpush.bf16.msra.mxu1 %v12239_v12  ;;  %5060 = vmatpush.bf16.msrb.mxu3 %v12243_v32  ;;  %v12312_v12 = vld [vmem:[%s23825_s2 + $0x3b8] sm:$0xf0]  ;;  %v12311_v32 = vor.u32 %v15061_v39, %v12310_v16  ;;  %v15013_v16 = vld [vmem:[%s23825_s2 + $0x234] sm:$0xf0] }
 0x38d   :  { %5077 = vmatpush.bf16.msrb.mxu0 %v11863_v59  ;;  %5103 = vmatpush.bf16.msra.mxu2 %v11867_v30  ;;  %v12315_v45 = vor.u32 %v15057_v40, %v12312_v12  ;;  %v12278_v59 = vld [vmem:[%s23825_s2 + $0x358] sm:$0xf]  ;;  %v15009_v39 = vld [vmem:[%s23825_s2 + $0x21c] sm:$0xf] }
 0x38e   :  { %v15053_v30 = vld [vmem:[%s23825_s2 + $0x374] sm:$0xf0]  ;;  %v12120_v40 = vld [vmem:[%s23825_s2 + $0x238] sm:$0xf0] }
 0x38f   :  { %4987 = vmatmul.bf16.vlgmr.msrb.gmra.mxu1 %v19813_v46  ;;  %5013 = vmatmul.bf16.vlgmr.msra.gmra.mxu3 %v19813_v46  ;;  %v12279_v25 = vor.u32 %v15053_v30, %v12278_v59 }
 0x390   :  { %5035 = vmatpush.bf16.msra.mxu1 %v12207_v58  ;;  %5061 = vmatpush.bf16.msrb.mxu3 %v12211_v4  ;;  %v12283_v58 = vor.u32 %v15049_v57, %v12280_v55  ;;  %v12246_v4 = vld [vmem:[%s23825_s2 + $0x318] sm:$0xf]  ;;  %v12580_v57 = vld [vmem:[%s23825_s2 + $0x1c0] sm:$0xf] }
 0x391   :  { %5078 = vmatmul.bf16.vlgmr.msrb.gmra.mxu0 %v19550_v8  ;;  %5104 = vmatmul.bf16.vlgmr.msra.gmra.mxu2 %v19550_v8  ;;  %v12110_v8 = vld [vmem:[%s23825_s2 + $0x210] sm:$0xf]  ;;  %v12247_v54 = vor.u32 %v15045_v50, %v12246_v4  ;;  %v15130_v55 = vld [vmem:[%s23825_s2 + $0x1dc] sm:$0xf0] }
 0x392   :  { %v12111_v24 = vor.u32 %v15012_v5, %v12110_v8  ;;  %v15029_v8 = vld [vmem:[%s23825_s2 + $0x2b4] sm:$0xf0]  ;;  %v15025_v5 = vld [vmem:[%s23825_s2 + $0x29c] sm:$0xf]  ;;  %v12581_v4 = vor.u32 %v15130_v55, %v12580_v57  ;;  %v12420_v57 = vld [vmem:[%s23825_s2 + $0x80] sm:$0xf] }
 0x393   :  { %v12187_v49 = vor.u32 %v15025_v5, %v12184_v63  ;;  %v12518_v5 = vld [vmem:[%s23825_s2 + $0x160] sm:$0xf0]  ;;  %v15090_v55 = vld [vmem:[%s23825_s2 + $0x9c] sm:$0xf0] }
 0x394   :  { %5036 = vmatpush.bf16.msra.mxu1 %v12175_v31  ;;  %5062 = vmatpush.bf16.msrb.mxu3 %v12179_v48  ;;  %v12251_v31 = vor.u32 %v15041_v29, %v12248_v51  ;;  %v12214_v48 = vld [vmem:[%s23825_s2 + $0x2d8] sm:$0xf]  ;;  %v12548_v51 = vld [vmem:[%s23825_s2 + $0x180] sm:$0xf] }
 0x395   :  { %v12215_v18 = vor.u32 %v15037_v62, %v12214_v48  ;;  %6044 = vmatpush.bf16.msra.mxu0 %v12581_v4  ;;  %v12550_v62 = vld [vmem:[%s23825_s2 + $0x1a0] sm:$0xf0] }
 0x396   :  { %v12422_v4 = vld [vmem:[%s23825_s2 + $0xa0] sm:$0xf0] }
 0x398   :  { %5037 = vmatpush.bf16.msra.mxu1 %v12143_v7  ;;  %5063 = vmatpush.bf16.msrb.mxu3 %v12147_v21  ;;  %v12219_v7 = vor.u32 %v15033_v11, %v12216_v61  ;;  %v12182_v21 = vld [vmem:[%s23825_s2 + $0x298] sm:$0xf]  ;;  %v12516_v61 = vld [vmem:[%s23825_s2 + $0x140] sm:$0xf] }
 0x399   :  { %v12183_v47 = vor.u32 %v15029_v8, %v12182_v21 }
 0x39c   :  { %5038 = vmatpush.bf16.msra.mxu1 %v12111_v24  ;;  %5064 = vmatpush.bf16.msrb.mxu3 %v12115_v37  ;;  %v12152_v24 = vld [vmem:[%s23825_s2 + $0x278] sm:$0xf0]  ;;  %v12151_v37 = vor.u32 %v15021_v44, %v12150_v9  ;;  %v15106_v9 = vld [vmem:[%s23825_s2 + $0x11c] sm:$0xf0]  ;;  %v15102_v44 = vld [vmem:[%s23825_s2 + $0x104] sm:$0xf] }
 0x39f   :  { %5039 = vmatmul.bf16.vlgmr.msra.gmra.mxu1 %v19813_v46  ;;  %5065 = vmatmul.bf16.vlgmr.msrb.gmra.mxu3 %v19813_v46 }
 0x3a0   :  { %5083 = vmatpush.bf16.msrb.mxu1 %v12343_v15  ;;  %5109 = vmatpush.bf16.msra.mxu3 %v12347_v1  ;;  %v12155_v15 = vor.u32 %v15017_v34, %v12152_v24  ;;  %v12118_v1 = vld [vmem:[%s23825_s2 + $0x218] sm:$0xf]  ;;  %v12486_v24 = vld [vmem:[%s23825_s2 + $0x120] sm:$0xf0] }
 0x3a1   :  { %v12119_v12 = vor.u32 %v15013_v16, %v12118_v1  ;;  %v15098_v1 = vld [vmem:[%s23825_s2 + $0xdc] sm:$0xf0]  ;;  %v15094_v16 = vld [vmem:[%s23825_s2 + $0xc4] sm:$0xf] }
 0x3a4   :  { %5084 = vmatpush.bf16.msrb.mxu1 %v12311_v32  ;;  %5110 = vmatpush.bf16.msra.mxu3 %v12315_v45  ;;  %v12123_v32 = vor.u32 %v15009_v39, %v12120_v40 }
 0x3a8   :  { %5085 = vmatpush.bf16.msrb.mxu1 %v12279_v25  ;;  %5111 = vmatpush.bf16.msra.mxu3 %v12283_v58  ;;  %v15126_v25 = vld [vmem:[%s23825_s2 + $0x1c4] sm:$0xf] }
 0x3ac   :  { %5086 = vmatpush.bf16.msrb.mxu1 %v12247_v54  ;;  %5112 = vmatpush.bf16.msra.mxu3 %v12251_v31  ;;  %v15122_v54 = vld [vmem:[%s23825_s2 + $0x19c] sm:$0xf0]  ;;  %v15118_v31 = vld [vmem:[%s23825_s2 + $0x184] sm:$0xf] }
 0x3ad   :  { %v12549_v48 = vor.u32 %v15122_v54, %v12548_v51  ;;  %v12553_v11 = vor.u32 %v15118_v31, %v12550_v62  ;;  %v15082_v51 = vld [vmem:[%s23825_s2 + $0x5c] sm:$0xf0]  ;;  %v15078_v54 = vld [vmem:[%s23825_s2 + $0x44] sm:$0xf] }
 0x3ae   :  { %v12390_v62 = vld [vmem:[%s23825_s2 + $0x60] sm:$0xf0] }
 0x3af   :  { %6045 = vmatpush.bf16.msra.mxu0 %v12549_v48 }
 0x3b0   :  { %5087 = vmatpush.bf16.msrb.mxu1 %v12215_v18  ;;  %5113 = vmatpush.bf16.msra.mxu3 %v12219_v7  ;;  %v15114_v18 = vld [vmem:[%s23825_s2 + $0x15c] sm:$0xf0]  ;;  %v15110_v7 = vld [vmem:[%s23825_s2 + $0x144] sm:$0xf] }
 0x3b1   :  { %v12517_v8 = vor.u32 %v15114_v18, %v12516_v61  ;;  %v12521_v63 = vor.u32 %v15110_v7, %v12518_v5  ;;  %v12356_v18 = vld [vmem:[%s23825_s2] sm:$0xf] }
 0x3b2   :  { %v15074_v7 = vld [vmem:[%s23825_s2 + $0x1c] sm:$0xf0] }
 0x3b3   :  { %6046 = vmatpush.bf16.msra.mxu0 %v12517_v8  ;;  %v15070_v8 = vld [vmem:[%s23825_s2 + $0x4] sm:$0xf]  ;;  %v12357_v5 = vor.u32 %v15074_v7, %v12356_v18  ;;  %v12492_v7 = vld [vmem:[%s23825_s2 + $0x108] sm:$0xf] }
 0x3b4   :  { %5088 = vmatpush.bf16.msrb.mxu1 %v12183_v47  ;;  %5114 = vmatpush.bf16.msra.mxu3 %v12187_v49  ;;  %v12484_v49 = vld [vmem:[%s23825_s2 + $0x100] sm:$0xf] }
 0x3b5   :  { %v12485_v34 = vor.u32 %v15106_v9, %v12484_v49  ;;  %v15131_v49 = vld [vmem:[%s23825_s2 + $0x1e4] sm:$0xf0] }
 0x3b7   :  { %6047 = vmatpush.bf16.msra.mxu0 %v12485_v34  ;;  %v15127_v34 = vld [vmem:[%s23825_s2 + $0x1cc] sm:$0xf] }
 0x3b8   :  { %5089 = vmatpush.bf16.msrb.mxu1 %v12151_v37  ;;  %5115 = vmatpush.bf16.msra.mxu3 %v12155_v15  ;;  %v12489_v37 = vor.u32 %v15102_v44, %v12486_v24  ;;  %v12452_v15 = vld [vmem:[%s23825_s2 + $0xc0] sm:$0xf]  ;;  %v12590_v24 = vld [vmem:[%s23825_s2 + $0x1e8] sm:$0xf0] }
 0x3b9   :  { %v12453_v40 = vor.u32 %v15098_v1, %v12452_v15  ;;  %v477_v1 = vadd.f32 %v16972_v13, %v16839_v2  ;;  %v12558_v13 = vld [vmem:[%s23825_s2 + $0x1a8] sm:$0xf0] }
 0x3bb   :  { %6048 = vmatpush.bf16.msra.mxu0 %v12453_v40  ;;  %v12556_v40 = vld [vmem:[%s23825_s2 + $0x188] sm:$0xf] }
 0x3bc   :  { %5090 = vmatpush.bf16.msrb.mxu1 %v12119_v12  ;;  %5116 = vmatpush.bf16.msra.mxu3 %v12123_v32  ;;  %v12454_v12 = vld [vmem:[%s23825_s2 + $0xe0] sm:$0xf0] }
 0x3bd   :  { %v12457_v32 = vor.u32 %v15094_v16, %v12454_v12  ;;  %v15123_v12 = vld [vmem:[%s23825_s2 + $0x1a4] sm:$0xf0] }
 0x3bf   :  { %5091 = vmatmul.bf16.vlgmr.msrb.gmra.mxu1 %v19813_v46  ;;  %5117 = vmatmul.bf16.vlgmr.msra.gmra.mxu3 %v19813_v46  ;;  %v12582_v46 = vld [vmem:[%s23825_s2 + $0x1e0] sm:$0xf0] }
 0x3c0   :  { %v12585_v50 = vor.u32 %v15126_v25, %v12582_v46  ;;  %v15086_v25 = vld [vmem:[%s23825_s2 + $0x84] sm:$0xf] }
 0x3c1   :  { %v12425_v46 = vor.u32 %v15086_v25, %v12422_v4  ;;  %v15115_v4 = vld [vmem:[%s23825_s2 + $0x164] sm:$0xf0] }
 0x3c2   :  { %6070 = vmatpush.bf16.msrb.mxu2 %v12585_v50  ;;  %v12388_v50 = vld [vmem:[%s23825_s2 + $0x40] sm:$0xf] }
 0x3c3   :  { %v12389_v48 = vor.u32 %v15082_v51, %v12388_v50  ;;  %v15111_v51 = vld [vmem:[%s23825_s2 + $0x14c] sm:$0xf] }
 0x3c6   :  { %6071 = vmatpush.bf16.msrb.mxu2 %v12553_v11  ;;  %v12393_v11 = vor.u32 %v15078_v54, %v12390_v62  ;;  %v12526_v54 = vld [vmem:[%s23825_s2 + $0x168] sm:$0xf0] }
 0x3ca   :  { %6072 = vmatpush.bf16.msrb.mxu2 %v12521_v63  ;;  %v12358_v63 = vld [vmem:[%s23825_s2 + $0x20] sm:$0xf0] }
 0x3cb   :  { %v12361_v9 = vor.u32 %v15070_v8, %v12358_v63  ;;  %v15107_v8 = vld [vmem:[%s23825_s2 + $0x124] sm:$0xf0] }
 0x3cc   :  { %v20035_v45 = vpop.f32.mrf.mxu0 }
 0x3ce   :  { %6073 = vmatpush.bf16.msrb.mxu2 %v12489_v37  ;;  %v12593_v37 = vor.u32 %v15127_v34, %v12590_v24 }
 0x3d2   :  { %v20037_v59 = vpop.f32.mrf.mxu2  ;;  %6074 = vmatpush.bf16.msrb.mxu2 %v12457_v32  ;;  %v15119_v32 = vld [vmem:[%s23825_s2 + $0x18c] sm:$0xf] }
 0x3d4   :  { %v4925_v30 = vpop.f32.mrf.mxu0 }
 0x3d6   :  { %6075 = vmatpush.bf16.msrb.mxu2 %v12425_v46 }
 0x3da   :  { %v4951_v58 = vpop.f32.mrf.mxu2  ;;  %6076 = vmatpush.bf16.msrb.mxu2 %v12393_v11  ;;  %v12529_v11 = vor.u32 %v15111_v51, %v12526_v54 }
 0x3db   :  { %v12421_v58 = vor.u32 %v15090_v55, %v12420_v57  ;;  %v12557_v57 = vor.u32 %v15123_v12, %v12556_v40  ;;  %v12561_v55 = vor.u32 %v15119_v32, %v12558_v13  ;;  %v15095_v32 = vld [vmem:[%s23825_s2 + $0xcc] sm:$0xf] }
 0x3dc   :  { %v20051_v29 = vpop.f32.mrf.mxu0 }
 0x3dd   :  { %6049 = vmatpush.bf16.msra.mxu0 %v12421_v58  ;;  %v12524_v58 = vld [vmem:[%s23825_s2 + $0x148] sm:$0xf] }
 0x3de   :  { %6077 = vmatpush.bf16.msrb.mxu2 %v12361_v9  ;;  %v12525_v50 = vor.u32 %v15115_v4, %v12524_v58  ;;  %v15194_v9 = vld [vmem:[%s23825_s2 + $0x3dc] sm:$0xf0]  ;;  %v15182_v58 = vld [vmem:[%s23825_s2 + $0x384] sm:$0xf] }
 0x3df   :  { %v12806_v4 = vld [vmem:[%s23825_s2 + $0x3a0] sm:$0xf0] }
 0x3e0   :  { %v12809_v54 = vor.u32 %v15182_v58, %v12806_v4 }
 0x3e1   :  { %6050 = vmatpush.bf16.msra.mxu0 %v12389_v48  ;;  %v506_v48 = vadd.f32 %v16980_v17, %v16865_v14  ;;  %v15103_v17 = vld [vmem:[%s23825_s2 + $0x10c] sm:$0xf] }
 0x3e2   :  { %v20074_v21 = vpop.f32.mrf.mxu2  ;;  %6122 = vmatpush.bf16.msra.mxu2 %v12593_v37  ;;  %v12838_v37 = vld [vmem:[%s23825_s2 + $0x3e0] sm:$0xf0] }
 0x3e4   :  { %v4977_v47 = vpop.f32.mrf.mxu0 }
 0x3e5   :  { %v12588_v47 = vld [vmem:[%s23825_s2 + $0x1c8] sm:$0xf]  ;;  %6051 = vmatpush.bf16.msra.mxu0 %v12357_v5  ;;  %v12493_v5 = vor.u32 %v15107_v8, %v12492_v7  ;;  %v535_v7 = vadd.f32 %v17146_v19, %v17095_v33  ;;  %v12774_v19 = vld [vmem:[%s23825_s2 + $0x360] sm:$0xf0] }
 0x3e6   :  { %v12589_v44 = vor.u32 %v15131_v49, %v12588_v47  ;;  %6123 = vmatpush.bf16.msra.mxu2 %v12561_v55  ;;  %v12836_v49 = vld [vmem:[%s23825_s2 + $0x3c0] sm:$0xf] }
 0x3e7   :  { %v12837_v24 = vor.u32 %v15194_v9, %v12836_v49  ;;  %v12804_v55 = vld [vmem:[%s23825_s2 + $0x380] sm:$0xf]  ;;  %v12396_v49 = vld [vmem:[%s23825_s2 + $0x48] sm:$0xf] }
 0x3e9   :  { %6096 = vmatpush.bf16.msrb.mxu0 %v12589_v44  ;;  %v15190_v44 = vld [vmem:[%s23825_s2 + $0x3c4] sm:$0xf]  ;;  %6057 = vmatpush.bf16.msra.mxu1 %v12837_v24  ;;  %v15083_v24 = vld [vmem:[%s23825_s2 + $0x64] sm:$0xf0] }
 0x3ea   :  { %v5003_v39 = vpop.f32.mrf.mxu2  ;;  %6124 = vmatpush.bf16.msra.mxu2 %v12529_v11  ;;  %v12841_v40 = vor.u32 %v15190_v44, %v12838_v37  ;;  %v564_v37 = vadd.f32 %v17154_v27, %v17104_v41  ;;  %v12397_v27 = vor.u32 %v15083_v24, %v12396_v49  ;;  %v12708_v49 = vld [vmem:[%s23825_s2 + $0x2c0] sm:$0xf] }
 0x3ec   :  { %v20103_v30 = vpop.f32.mrf.mxu0  ;;  %6083 = vmatpush.bf16.msrb.mxu3 %v12841_v40  ;;  %v15079_v40 = vld [vmem:[%s23825_s2 + $0x4c] sm:$0xf] }
 0x3ed   :  { %6097 = vmatpush.bf16.msrb.mxu0 %v12557_v57  ;;  %v12462_v57 = vld [vmem:[%s23825_s2 + $0xe8] sm:$0xf0] }
 0x3ee   :  { %v12465_v13 = vor.u32 %v15095_v32, %v12462_v57 }
 0x3f0   :  { %6084 = vmatpush.bf16.msrb.mxu3 %v12809_v54  ;;  %v12742_v54 = vld [vmem:[%s23825_s2 + $0x320] sm:$0xf0] }
 0x3f1   :  { %6098 = vmatpush.bf16.msrb.mxu0 %v12525_v50 }
 0x3f2   :  { %v20126_v31 = vpop.f32.mrf.mxu2 }
 0x3f4   :  { %v5029_v61 = vpop.f32.mrf.mxu0 }
 0x3f5   :  { %6099 = vmatpush.bf16.msrb.mxu0 %v12493_v5  ;;  %v12772_v5 = vld [vmem:[%s23825_s2 + $0x340] sm:$0xf] }
 0x3fa   :  { %v5055_v39 = vpop.f32.mrf.mxu2 }
 0x3fc   :  { %v4936_v15 = vpop.f32.mrf.mxu1 }
 0x3fd   :  { %v4937_v16 = vadd.f32 %v4936_v15, %v20035_v45  ;;  %v12460_v15 = vld [vmem:[%s23825_s2 + $0xc8] sm:$0xf] }
 0x3ff   :  { %v5136_v45 = vadd.f32 %v4937_v16, %v477_v1  ;;  %v15099_v1 = vld [vmem:[%s23825_s2 + $0xe4] sm:$0xf0] }
 0x400   :  { %v12461_v12 = vor.u32 %v15099_v1, %v12460_v15 }
 0x401   :  { %v12348_v25 = vmul.f32 -1.442695, %v5136_v45 }
 0x402   :  { %v4962_v46 = vpop.f32.mrf.mxu3  ;;  %6100 = vmatpush.bf16.msrb.mxu0 %v12461_v12  ;;  %v12398_v12 = vld [vmem:[%s23825_s2 + $0x68] sm:$0xf0] }
 0x403   :  { %15712 = vpow2.f32 %v12348_v25  ;;  %v4963_v62 = vadd.f32 %v4962_v46, %v20037_v59  ;;  %v12494_v59 = vld [vmem:[%s23825_s2 + $0x128] sm:$0xf0]  ;;  %v15186_v25 = vld [vmem:[%s23825_s2 + $0x39c] sm:$0xf0] }
 0x404   :  { %v4938_v61 = vpop.f32.mrf.mxu1  ;;  %v12497_v47 = vor.u32 %v15103_v17, %v12494_v59  ;;  %v12805_v51 = vor.u32 %v15186_v25, %v12804_v55  ;;  %v15178_v59 = vld [vmem:[%s23825_s2 + $0x35c] sm:$0xf0] }
 0x405   :  { %v5137_v18 = vadd.f32 %v4963_v62, %v506_v48  ;;  %v12428_v48 = vld [vmem:[%s23825_s2 + $0x88] sm:$0xf]  ;;  %v15170_v55 = vld [vmem:[%s23825_s2 + $0x31c] sm:$0xf0] }
 0x406   :  { %6125 = vmatpush.bf16.msra.mxu2 %v12497_v47  ;;  %v15091_v62 = vld [vmem:[%s23825_s2 + $0xa4] sm:$0xf0]  ;;  %6058 = vmatpush.bf16.msra.mxu1 %v12805_v51  ;;  %v15174_v47 = vld [vmem:[%s23825_s2 + $0x344] sm:$0xf] }
 0x407   :  { %v12349_v63 = vmul.f32 -1.442695, %v5137_v18  ;;  %v12429_v61 = vor.u32 %v15091_v62, %v12428_v48  ;;  %v15087_v18 = vld [vmem:[%s23825_s2 + $0x8c] sm:$0xf]  ;;  %v15166_v51 = vld [vmem:[%s23825_s2 + $0x304] sm:$0xf] }
 0x408   :  { %v12745_v62 = vor.u32 %v15166_v51, %v12742_v54  ;;  %v12678_v51 = vld [vmem:[%s23825_s2 + $0x2a0] sm:$0xf0] }
 0x409   :  { %v15713_v34 = vpop.eup %15712  ;;  %15714 = vpow2.f32 %v12349_v63  ;;  %6101 = vmatpush.bf16.msrb.mxu0 %v12429_v61  ;;  %v12773_v63 = vor.u32 %v15178_v59, %v12772_v5  ;;  %v15075_v61 = vld [vmem:[%s23825_s2 + $0x24] sm:$0xf0]  ;;  %v12366_v5 = vld [vmem:[%s23825_s2 + $0x28] sm:$0xf0] }
 0x40a   :  { %v20215_v16 = vadd.f32 1.0, %v15713_v34  ;;  %v4964_v39 = vpop.f32.mrf.mxu3  ;;  %6126 = vmatpush.bf16.msra.mxu2 %v12465_v13 }
 0x40b   :  { %v12777_v39 = vor.u32 %v15174_v47, %v12774_v19  ;;  %6059 = vmatpush.bf16.msra.mxu1 %v12773_v63 }
 0x40c   :  { %15716 = vrcp.f32 %v20215_v16  ;;  %v4988_v45 = vpop.f32.mrf.mxu1  ;;  %v5153_v32 = vand.u32 2147483647, %v20215_v16  ;;  %v5155_v58 = vand.u32 2147483648, %v20215_v16  ;;  %vm5149_vm9 = vweird.f32 %v20215_v16 }
 0x40d   :  { %v4989_v46 = vadd.f32 %v4988_v45, %v20051_v29  ;;  %v12430_v29 = vld [vmem:[%s23825_s2 + $0xa8] sm:$0xf0]  ;;  %v12401_v45 = vor.u32 %v15079_v40, %v12398_v12  ;;  %6085 = vmatpush.bf16.msrb.mxu3 %v12777_v39  ;;  %6102 = vmatpush.bf16.msrb.mxu0 %v12397_v27 }
 0x40e   :  { %v20237_v50 = vpop.f32.mrf.mxu0  ;;  %v12433_v17 = vor.u32 %v15087_v18, %v12430_v29  ;;  %v15071_v18 = vld [vmem:[%s23825_s2 + $0xc] sm:$0xf]  ;;  %vm5154_vm11 = vcmp.eq.f32.partialorder %v5153_v32, 8.507059e+37  ;;  %v5156_v24 = vor.u32 1.1754944e-38, %v5155_v58 }
 0x40f   :  { %v15715_v11 = vpop.eup %15714  ;;  %v5138_v44 = vadd.f32 %v4989_v46, %v535_v7  ;;  %v12369_v63 = vor.u32 %v15071_v18, %v12366_v5 }
 0x410   :  { %v20253_v8 = vadd.f32 1.0, %v15715_v11  ;;  %6127 = vmatpush.bf16.msra.mxu2 %v12433_v17  ;;  %v12364_v11 = vld [vmem:[%s23825_s2 + $0x8] sm:$0xf] }
 0x411   :  { %v12365_v17 = vor.u32 %v15075_v61, %v12364_v11  ;;  %6086 = vmatpush.bf16.msrb.mxu3 %v12745_v62 }
 0x412   :  { %v20270_v9 = vpop.eup %15716  ;;  %15718 = vrcp.f32 %v20253_v8  ;;  %v5014_v34 = vpop.f32.mrf.mxu3  ;;  %v5174_v39 = vand.u32 2147483648, %v20253_v8  ;;  %vm5168_vm13 = vweird.f32 %v20253_v8 }
 0x413   :  { %v5145_v15 = vmul.f32 %v20270_v9, %v20215_v16  ;;  %v5015_v1 = vadd.f32 %v5014_v34, %v20074_v21  ;;  %v12740_v21 = vld [vmem:[%s23825_s2 + $0x300] sm:$0xf]  ;;  %15720 = vtanh.f32 %v5138_v44  ;;  %vm5150_vm8 = vweird.f32 %v20270_v9  ;;  %v15158_v34 = vld [vmem:[%s23825_s2 + $0x2c4] sm:$0xf]  ;;  %6103 = vmatpush.bf16.msrb.mxu0 %v12365_v17 }
 0x414   :  { %v20288_v57 = vpop.f32.mrf.mxu2  ;;  %v4990_v13 = vpop.f32.mrf.mxu1  ;;  %v12741_v46 = vor.u32 %v15170_v55, %v12740_v21  ;;  %6128 = vmatpush.bf16.msra.mxu2 %v12401_v45  ;;  %v15162_v44 = vld [vmem:[%s23825_s2 + $0x2dc] sm:$0xf0]  ;;  %vm5151_vm10 = vmor %vm5149_vm9, %vm5150_vm8  ;;  %v5172_v45 = vand.u32 2147483647, %v20253_v8  ;;  %v5175_v11 = vor.u32 1.1754944e-38, %v5174_v39 }
 0x415   :  { %v5146_v25 = vsub.f32 1.0, %v5145_v15  ;;  %v5139_v4 = vadd.f32 %v5015_v1, %v564_v37  ;;  %v12709_v37 = vor.u32 %v15162_v44, %v12708_v49  ;;  %v12710_v15 = vld [vmem:[%s23825_s2 + $0x2e0] sm:$0xf0]  ;;  %v12676_v55 = vld [vmem:[%s23825_s2 + $0x280] sm:$0xf] }
 0x416   :  { %v5081_v48 = vpop.f32.mrf.mxu0  ;;  %6060 = vmatpush.bf16.msra.mxu1 %v12741_v46  ;;  %v12713_v12 = vor.u32 %v15158_v34, %v12710_v15  ;;  %v15150_v46 = vld [vmem:[%s23825_s2 + $0x284] sm:$0xf]  ;;  %vm5173_vm15 = vcmp.eq.f32.partialorder %v5172_v45, 8.507059e+37  ;;  %v12846_v45 = vld [vmem:[%s23825_s2 + $0x3e8] sm:$0xf0] }
 0x417   :  { %v5147_v29 = vmul.f32 %v20270_v9, %v5146_v25  ;;  %v12350_v7 = vmul.f32 -1.442695, %v5139_v4  ;;  %v15154_v25 = vld [vmem:[%s23825_s2 + $0x29c] sm:$0xf0]  ;;  %v12681_v48 = vor.u32 %v15150_v46, %v12678_v51 }
 0x418   :  { %v15719_v59 = vpop.eup %15718  ;;  %6129 = vmatpush.bf16.msra.mxu2 %v12369_v63  ;;  %6087 = vmatpush.bf16.msrb.mxu3 %v12713_v12  ;;  %v12677_v54 = vor.u32 %v15154_v25, %v12676_v55  ;;  %v12646_v63 = vld [vmem:[%s23825_s2 + $0x260] sm:$0xf0]  ;;  %v15195_v12 = vld [vmem:[%s23825_s2 + $0x3e4] sm:$0xf0] }
 0x419   :  { %v5164_v47 = vmul.f32 %v15719_v59, %v20253_v8  ;;  %v5148_v19 = vadd.f32 %v20270_v9, %v5147_v29  ;;  %15722 = vpow2.f32 %v12350_v7  ;;  %v15721_v13 = vpop.eup %15720  ;;  %vm5169_vm12 = vweird.f32 %v15719_v59  ;;  %v12644_v29 = vld [vmem:[%s23825_s2 + $0x240] sm:$0xf] }
 0x41a   :  { %v5016_v16 = vpop.f32.mrf.mxu3  ;;  %6061 = vmatpush.bf16.msra.mxu1 %v12709_v37  ;;  %vm5170_vm14 = vmor %vm5168_vm13, %vm5169_vm12  ;;  %v15146_v7 = vld [vmem:[%s23825_s2 + $0x25c] sm:$0xf0] }
 0x41b   :  { %v5165_v1 = vsub.f32 1.0, %v5164_v47  ;;  %v5152_v40 = vsel %vm5151_vm10, %v20270_v9, %v5148_v19  ;;  %v12645_v8 = vor.u32 %v15146_v7, %v12644_v29  ;;  %v15138_v16 = vld [vmem:[%s23825_s2 + $0x21c] sm:$0xf0]  ;;  %v12780_v7 = vld [vmem:[%s23825_s2 + $0x348] sm:$0xf] }
 0x41c   :  { %v5157_v27 = vsel %vm5154_vm11, %v5156_v24, %v5152_v40  ;;  %v5107_v32 = vpop.f32.mrf.mxu2  ;;  %v5040_v21 = vpop.f32.mrf.mxu1  ;;  %6088 = vmatpush.bf16.msrb.mxu3 %v12681_v48  ;;  %v12612_v24 = vld [vmem:[%s23825_s2 + $0x200] sm:$0xf]  ;;  %v12844_v40 = vld [vmem:[%s23825_s2 + $0x3c8] sm:$0xf]  ;;  %v12814_v48 = vld [vmem:[%s23825_s2 + $0x3a8] sm:$0xf0] }
 0x41d   :  { %v5166_v58 = vmul.f32 %v15719_v59, %v5165_v1  ;;  %v5199_v4 = vmul.f32 %v15721_v13, %v5157_v27  ;;  %v5041_v9 = vadd.f32 %v5040_v21, %v20103_v30  ;;  %v12613_v1 = vor.u32 %v15138_v16, %v12612_v24  ;;  %v15128_v24 = vld [vmem:[%s23825_s2 + $0x1d4] sm:$0xf] }
 0x41e   :  { %6062 = vmatpush.bf16.msra.mxu1 %v12677_v54  ;;  %v12845_v27 = vor.u32 %v15195_v12, %v12844_v40  ;;  %v15167_v40 = vld [vmem:[%s23825_s2 + $0x30c] sm:$0xf] }
 0x41f   :  { %v15723_v62 = vpop.eup %15722  ;;  %v5167_v61 = vadd.f32 %v15719_v59, %v5166_v58  ;;  %v5203_v18 = vadd.f32 %v5041_v9, %v17163_v42  ;;  %v15142_v42 = vld [vmem:[%s23825_s2 + $0x244] sm:$0xf]  ;;  %v12812_v58 = vld [vmem:[%s23825_s2 + $0x388] sm:$0xf]  ;;  %v15183_v9 = vld [vmem:[%s23825_s2 + $0x38c] sm:$0xf] }
 0x420   :  { %v20352_v30 = vadd.f32 1.0, %v15723_v62  ;;  %v12649_v34 = vor.u32 %v15142_v42, %v12646_v63  ;;  %v12782_v42 = vld [vmem:[%s23825_s2 + $0x368] sm:$0xf0] }
 0x421   :  { %v5171_v17 = vsel %vm5170_vm14, %v15719_v59, %v5167_v61  ;;  %v12351_v5 = vmul.f32 -1.442695, %v5203_v18  ;;  %v12750_v12 = vld [vmem:[%s23825_s2 + $0x328] sm:$0xf0] }
 0x422   :  { %v5176_v47 = vsel %vm5173_vm15, %v5175_v11, %v5171_v17  ;;  %15724 = vrcp.f32 %v20352_v30  ;;  %v5066_v19 = vpop.f32.mrf.mxu3  ;;  %6063 = vmatpush.bf16.msra.mxu1 %v12645_v8  ;;  %6089 = vmatpush.bf16.msrb.mxu3 %v12649_v34  ;;  %v12817_v11 = vor.u32 %v15183_v9, %v12814_v48  ;;  %v5192_v61 = vand.u32 2147483647, %v20352_v30  ;;  %v15179_v17 = vld [vmem:[%s23825_s2 + $0x364] sm:$0xf0]  ;;  %v12566_v9 = vld [vmem:[%s23825_s2 + $0x1b0] sm:$0xf0] }
 0x423   :  { %v5198_v49 = vmul.f32 %v5176_v47, %v19457_v35  ;;  %15726 = vpow2.f32 %v12351_v5  ;;  %v5067_v59 = vadd.f32 %v5066_v19, %v20126_v31  ;;  %v15134_v35 = vld [vmem:[%s23825_s2 + $0x204] sm:$0xf]  ;;  %v5194_v18 = vand.u32 2147483648, %v20352_v30  ;;  %v15175_v5 = vld [vmem:[%s23825_s2 + $0x34c] sm:$0xf] }
 0x424   :  { %v5042_v44 = vpop.f32.mrf.mxu1  ;;  %v12614_v31 = vld [vmem:[%s23825_s2 + $0x220] sm:$0xf0]  ;;  %v12781_v8 = vor.u32 %v15179_v17, %v12780_v7  ;;  %vm5188_vm1 = vweird.f32 %v20352_v30  ;;  %v12596_v19 = vld [vmem:[%s23825_s2 + $0x1d0] sm:$0xf]  ;;  %vm5193_vm3 = vcmp.eq.f32.partialorder %v5192_v61, 8.507059e+37 }
 0x425   :  { %v20375_v37 = vadd.f32 %v5199_v4, %v5198_v49  ;;  %v5204_v15 = vadd.f32 %v5067_v59, %v17172_v60  ;;  %v12617_v39 = vor.u32 %v15134_v35, %v12614_v31  ;;  %v15191_v60 = vld [vmem:[%s23825_s2 + $0x3cc] sm:$0xf]  ;;  %v15187_v4 = vld [vmem:[%s23825_s2 + $0x3a4] sm:$0xf0]  ;;  %v15132_v49 = vld [vmem:[%s23825_s2 + $0x1ec] sm:$0xf0]  ;;  %v12785_v59 = vor.u32 %v15175_v5, %v12782_v42 }
 0x426   :  { %6064 = vmatpush.bf16.msra.mxu1 %v12613_v1  ;;  %v12849_v21 = vor.u32 %v15191_v60, %v12846_v45  ;;  %v12813_v54 = vor.u32 %v15187_v4, %v12812_v58  ;;  %v5195_v44 = vor.u32 1.1754944e-38, %v5194_v18  ;;  %v12748_v1 = vld [vmem:[%s23825_s2 + $0x308] sm:$0xf]  ;;  %v15120_v4 = vld [vmem:[%s23825_s2 + $0x194] sm:$0xf] }
 0x427   :  { %v12352_v13 = vmul.f32 -1.442695, %v5204_v15  ;;  %6090 = vmatpush.bf16.msrb.mxu3 %v12617_v39  ;;  %v15171_v35 = vld [vmem:[%s23825_s2 + $0x324] sm:$0xf0]  ;;  %v15159_v61 = vld [vmem:[%s23825_s2 + $0x2cc] sm:$0xf]  ;;  %v12569_v17 = vor.u32 %v15120_v4, %v12566_v9 }
 0x428   :  { %v15725_v32 = vpop.eup %15724  ;;  %v15163_v48 = vld [vmem:[%s23825_s2 + $0x2e4] sm:$0xf0]  ;;  %v12718_v18 = vld [vmem:[%s23825_s2 + $0x2e8] sm:$0xf0]  ;;  %v15116_v5 = vld [vmem:[%s23825_s2 + $0x16c] sm:$0xf0] }
 0x429   :  { %v15727_v55 = vpop.eup %15726  ;;  %v5184_v25 = vmul.f32 %v15725_v32, %v20352_v30  ;;  %15728 = vpow2.f32 %v12352_v13  ;;  %vm5189_vm0 = vweird.f32 %v15725_v32  ;;  %v12598_v30 = vld [vmem:[%s23825_s2 + $0x1f0] sm:$0xf0]  ;;  %v15147_v4 = vld [vmem:[%s23825_s2 + $0x264] sm:$0xf0] }
 0x42a   :  { %6109 = vmatpush.bf16.msrb.mxu1 %v12845_v27  ;;  %v20406_v46 = vadd.f32 1.0, %v15727_v55  ;;  %v5068_v51 = vpop.f32.mrf.mxu3  ;;  %15730 = vtanh.f32 %v20375_v37  ;;  %vm5190_vm2 = vmor %vm5188_vm1, %vm5189_vm0  ;;  %v12597_v27 = vor.u32 %v15132_v49, %v12596_v19  ;;  %v12601_v45 = vor.u32 %v15128_v24, %v12598_v30  ;;  %v12534_v42 = vld [vmem:[%s23825_s2 + $0x170] sm:$0xf0] }
 0x42b   :  { %v5185_v62 = vsub.f32 1.0, %v5184_v25  ;;  %6135 = vmatpush.bf16.msra.mxu3 %v12849_v21  ;;  %v15124_v21 = vld [vmem:[%s23825_s2 + $0x1ac] sm:$0xf0]  ;;  %v12749_v55 = vor.u32 %v15171_v35, %v12748_v1  ;;  %v12753_v51 = vor.u32 %v15167_v40, %v12750_v12  ;;  %v12721_v49 = vor.u32 %v15159_v61, %v12718_v18 }
 0x42c   :  { %15732 = vrcp.f32 %v20406_v46  ;;  %v12500_v40 = vld [vmem:[%s23825_s2 + $0x110] sm:$0xf]  ;;  %vm5216_vm6 = vweird.f32 %v20406_v46  ;;  %v5222_v9 = vand.u32 2147483648, %v20406_v46 }
 0x42d   :  { %v5186_v29 = vmul.f32 %v15725_v32, %v5185_v62  ;;  %v12532_v62 = vld [vmem:[%s23825_s2 + $0x150] sm:$0xf] }
 0x42e   :  { %6110 = vmatpush.bf16.msrb.mxu1 %v12813_v54  ;;  %v12716_v54 = vld [vmem:[%s23825_s2 + $0x2c8] sm:$0xf]  ;;  %v12533_v35 = vor.u32 %v15116_v5, %v12532_v62 }
 0x42f   :  { %v15729_v63 = vpop.eup %15728  ;;  %v5187_v47 = vadd.f32 %v15725_v32, %v5186_v29  ;;  %6136 = vmatpush.bf16.msra.mxu3 %v12817_v11  ;;  %v12717_v11 = vor.u32 %v15163_v48, %v12716_v54  ;;  %v15143_v54 = vld [vmem:[%s23825_s2 + $0x24c] sm:$0xf] }
 0x430   :  { %v20434_v34 = vadd.f32 1.0, %v15729_v63  ;;  %v15731_v16 = vpop.eup %15730  ;;  %v12654_v48 = vld [vmem:[%s23825_s2 + $0x268] sm:$0xf0] }
 0x431   :  { %v5191_v15 = vsel %vm5190_vm2, %v15725_v32, %v5187_v47  ;;  %v12564_v32 = vld [vmem:[%s23825_s2 + $0x190] sm:$0xf] }
 0x432   :  { %6111 = vmatpush.bf16.msrb.mxu1 %v12781_v8  ;;  %v20448_v31 = vpop.eup %15732  ;;  %v5196_v39 = vsel %vm5193_vm3, %v5195_v44, %v5191_v15  ;;  %15734 = vrcp.f32 %v20434_v34  ;;  %v12565_v7 = vor.u32 %v15124_v21, %v12564_v32  ;;  %v15112_v8 = vld [vmem:[%s23825_s2 + $0x154] sm:$0xf]  ;;  %v15155_v44 = vld [vmem:[%s23825_s2 + $0x2a4] sm:$0xf0]  ;;  %v12686_v15 = vld [vmem:[%s23825_s2 + $0x2a8] sm:$0xf0]  ;;  %vm5235_vm7 = vweird.f32 %v20434_v34 }
 0x433   :  { %v20457_v60 = vmul.f32 %v15731_v16, %v5196_v39  ;;  %v5212_v13 = vmul.f32 %v20448_v31, %v20406_v46  ;;  %6137 = vmatpush.bf16.msra.mxu3 %v12785_v59  ;;  %v12684_v59 = vld [vmem:[%s23825_s2 + $0x288] sm:$0xf]  ;;  %v15151_v16 = vld [vmem:[%s23825_s2 + $0x28c] sm:$0xf]  ;;  %v12537_v39 = vor.u32 %v15112_v8, %v12534_v42  ;;  %v5241_v12 = vand.u32 2147483648, %v20434_v34 }
 0x434   :  { %v12685_v30 = vor.u32 %v15155_v44, %v12684_v59  ;;  %vm5217_vm4 = vweird.f32 %v20448_v31  ;;  %v12657_v59 = vor.u32 %v15143_v54, %v12654_v48  ;;  %v12620_v44 = vld [vmem:[%s23825_s2 + $0x208] sm:$0xf]  ;;  %v15080_v54 = vld [vmem:[%s23825_s2 + $0x54] sm:$0xf] }
 0x435   :  { %v20469_v25 = vpack.c.bf16 %v20457_v60, %v20457_v60  ;;  %v5213_v58 = vsub.f32 1.0, %v5212_v13  ;;  %vm20557_vm8 = vmor %vm5216_vm6, %vm5217_vm4  ;;  %v5242_v5 = vor.u32 1.1754944e-38, %v5241_v12  ;;  %v12406_v48 = vld [vmem:[%s23825_s2 + $0x70] sm:$0xf0] }
 0x436   :  { %6112 = vmatpush.bf16.msrb.mxu1 %v12749_v55  ;;  %v12689_v55 = vor.u32 %v15151_v16, %v12686_v15 }
 0x437   :  { %6052 = vmatmul.bf16.vlgmr.msra.gmra.mxu0 %v20469_v25  ;;  %6078 = vmatmul.bf16.vlgmr.msrb.gmra.mxu2 %v20469_v25  ;;  %v5214_v19 = vmul.f32 %v20448_v31, %v5213_v58  ;;  %v12652_v58 = vld [vmem:[%s23825_s2 + $0x248] sm:$0xf] }
 0x438   :  { %v20494_v29 = vpop.eup %15734  ;;  %6148 = vmatpush.bf16.msra.mxu0 %v12597_v27  ;;  %6174 = vmatpush.bf16.msrb.mxu2 %v12601_v45  ;;  %v5239_v27 = vand.u32 2147483647, %v20434_v34  ;;  %v15104_v45 = vld [vmem:[%s23825_s2 + $0x114] sm:$0xf] }
 0x439   :  { %v5231_v63 = vmul.f32 %v20494_v29, %v20434_v34  ;;  %6138 = vmatpush.bf16.msra.mxu3 %v12753_v51  ;;  %vm5236_vm5 = vweird.f32 %v20494_v29  ;;  %v5215_v21 = vadd.f32 %v20448_v31, %v5214_v19  ;;  %v12653_v51 = vor.u32 %v15147_v4, %v12652_v58 }
 0x43a   :  { %6113 = vmatpush.bf16.msrb.mxu1 %v12717_v11  ;;  %v5220_v11 = vand.u32 2147483647, %v20406_v46  ;;  %vm20571_vm9 = vmor %vm5235_vm7, %vm5236_vm5  ;;  %vm5240_vm10 = vcmp.eq.f32.partialorder %v5239_v27, 8.507059e+37 }
 0x43b   :  { %v5232_v1 = vsub.f32 1.0, %v5231_v63  ;;  %v15096_v63 = vld [vmem:[%s23825_s2 + $0xd4] sm:$0xf]  ;;  %v5219_v19 = vsel %vm20557_vm8, %v20448_v31, %v5215_v21 }
 0x43c   :  { %v5092_v47 = vpop.f32.mrf.mxu1  ;;  %6149 = vmatpush.bf16.msra.mxu0 %v12565_v7  ;;  %6175 = vmatpush.bf16.msrb.mxu2 %v12569_v17  ;;  %v12468_v7 = vld [vmem:[%s23825_s2 + $0xd0] sm:$0xf]  ;;  %vm5221_vm11 = vcmp.eq.f32.partialorder %v5220_v11, 8.507059e+37 }
 0x43d   :  { %v5093_v24 = vadd.f32 %v5092_v47, %v20237_v50  ;;  %v15108_v50 = vld [vmem:[%s23825_s2 + $0x12c] sm:$0xf0]  ;;  %v5233_v32 = vmul.f32 %v20494_v29, %v5232_v1  ;;  %6139 = vmatpush.bf16.msra.mxu3 %v12721_v49  ;;  %v12470_v47 = vld [vmem:[%s23825_s2 + $0xf0] sm:$0xf0]  ;;  %v12622_v1 = vld [vmem:[%s23825_s2 + $0x228] sm:$0xf0] }
 0x43e   :  { %6114 = vmatpush.bf16.msrb.mxu1 %v12685_v30  ;;  %v15100_v17 = vld [vmem:[%s23825_s2 + $0xec] sm:$0xf0]  ;;  %v12501_v8 = vor.u32 %v15108_v50, %v12500_v40  ;;  %v5223_v30 = vor.u32 1.1754944e-38, %v5222_v9 }
 0x43f   :  { %v5205_v13 = vadd.f32 %v5093_v24, %v17334_v26  ;;  %v12502_v26 = vld [vmem:[%s23825_s2 + $0x130] sm:$0xf0]  ;;  %v5234_v61 = vadd.f32 %v20494_v29, %v5233_v32  ;;  %v15139_v24 = vld [vmem:[%s23825_s2 + $0x224] sm:$0xf0]  ;;  %v12469_v12 = vor.u32 %v15100_v17, %v12468_v7  ;;  %v12404_v9 = vld [vmem:[%s23825_s2 + $0x50] sm:$0xf] }
 0x440   :  { %6150 = vmatpush.bf16.msra.mxu0 %v12533_v35  ;;  %6176 = vmatpush.bf16.msrb.mxu2 %v12537_v39  ;;  %v12505_v42 = vor.u32 %v15104_v45, %v12502_v26  ;;  %v12621_v15 = vor.u32 %v15139_v24, %v12620_v44  ;;  %v5224_v40 = vsel %vm5221_vm11, %v5223_v30, %v5219_v19  ;;  %v15092_v45 = vld [vmem:[%s23825_s2 + $0xac] sm:$0xf0]  ;;  %v12438_v32 = vld [vmem:[%s23825_s2 + $0xb0] sm:$0xf0]  ;;  %v15125_v44 = vld [vmem:[%s23825_s2 + $0x1b4] sm:$0xf0] }
 0x441   :  { %15736 = vtanh.f32 %v5205_v13  ;;  %6140 = vmatpush.bf16.msra.mxu3 %v12689_v55  ;;  %v12436_v13 = vld [vmem:[%s23825_s2 + $0x90] sm:$0xf]  ;;  %v15072_v17 = vld [vmem:[%s23825_s2 + $0x14] sm:$0xf]  ;;  %v15121_v24 = vld [vmem:[%s23825_s2 + $0x19c] sm:$0xf] }
 0x442   :  { %v5118_v18 = vpop.f32.mrf.mxu3  ;;  %6115 = vmatpush.bf16.msrb.mxu1 %v12653_v51  ;;  %v12437_v58 = vor.u32 %v15092_v45, %v12436_v13  ;;  %v15084_v51 = vld [vmem:[%s23825_s2 + $0x6c] sm:$0xf0]  ;;  %v12574_v30 = vld [vmem:[%s23825_s2 + $0x1b8] sm:$0xf0]  ;;  %v15109_v45 = vld [vmem:[%s23825_s2 + $0x134] sm:$0xf0] }
 0x443   :  { %v5119_v46 = vadd.f32 %v5118_v18, %v20288_v57  ;;  %v5238_v57 = vsel %vm20571_vm9, %v20494_v29, %v5234_v61  ;;  %v15135_v29 = vld [vmem:[%s23825_s2 + $0x20c] sm:$0xf]  ;;  %v12405_v11 = vor.u32 %v15084_v51, %v12404_v9  ;;  %v12409_v61 = vor.u32 %v15080_v54, %v12406_v48  ;;  %v12372_v18 = vld [vmem:[%s23825_s2 + $0x10] sm:$0xf] }
 0x444   :  { %v5094_v49 = vpop.f32.mrf.mxu1  ;;  %v5243_v16 = vsel %vm5240_vm10, %v5242_v5, %v5238_v57  ;;  %6151 = vmatpush.bf16.msra.mxu0 %v12501_v8  ;;  %6177 = vmatpush.bf16.msrb.mxu2 %v12505_v42  ;;  %v12625_v21 = vor.u32 %v15135_v29, %v12622_v1  ;;  %v15076_v7 = vld [vmem:[%s23825_s2 + $0x2c] sm:$0xf0]  ;;  %v12374_v5 = vld [vmem:[%s23825_s2 + $0x30] sm:$0xf0]  ;;  %v15133_v8 = vld [vmem:[%s23825_s2 + $0x1f4] sm:$0xf0] }
 0x445   :  { %v5206_v31 = vadd.f32 %v5119_v46, %v17337_v56  ;;  %v5265_v35 = vmul.f32 %v5243_v16, %v19700_v3  ;;  %v12473_v56 = vor.u32 %v15096_v63, %v12470_v47  ;;  %v15088_v3 = vld [vmem:[%s23825_s2 + $0x94] sm:$0xf]  ;;  %6141 = vmatpush.bf16.msra.mxu3 %v12657_v59  ;;  %v12604_v46 = vld [vmem:[%s23825_s2 + $0x1d8] sm:$0xf]  ;;  %v15129_v42 = vld [vmem:[%s23825_s2 + $0x1dc] sm:$0xf]  ;;  %v12373_v47 = vor.u32 %v15076_v7, %v12372_v18 }
 0x446   :  { %6116 = vmatpush.bf16.msrb.mxu1 %v12621_v15  ;;  %v12441_v4 = vor.u32 %v15088_v3, %v12438_v32  ;;  %v12606_v63 = vld [vmem:[%s23825_s2 + $0x1f8] sm:$0xf0]  ;;  %v12377_v19 = vor.u32 %v15072_v17, %v12374_v5  ;;  %v12605_v57 = vor.u32 %v15133_v8, %v12604_v46  ;;  %v12572_v59 = vld [vmem:[%s23825_s2 + $0x198] sm:$0xf]  ;;  %v12577_v15 = vor.u32 %v15121_v24, %v12574_v30  ;;  %v15196_v48 = vld [vmem:[%s23825_s2 + $0x3ec] sm:$0xf0] }
 0x447   :  { %v15737_v39 = vpop.eup %15736  ;;  %v12353_v50 = vmul.f32 -1.442695, %v5206_v31  ;;  %6104 = vmatmul.bf16.vlgmr.msrb.gmra.mxu0 %v20469_v25  ;;  %6130 = vmatmul.bf16.vlgmr.msra.gmra.mxu2 %v20469_v25  ;;  %v12609_v49 = vor.u32 %v15129_v42, %v12606_v63  ;;  %v12573_v31 = vor.u32 %v15125_v44, %v12572_v59  ;;  %v12540_v29 = vld [vmem:[%s23825_s2 + $0x158] sm:$0xf]  ;;  %v15097_v5 = vld [vmem:[%s23825_s2 + $0xdc] sm:$0xf] }
 0x448   :  { %v5266_v27 = vmul.f32 %v15737_v39, %v5224_v40  ;;  %6152 = vmatpush.bf16.msra.mxu0 %v12469_v12  ;;  %6178 = vmatpush.bf16.msrb.mxu2 %v12473_v56  ;;  %v15113_v39 = vld [vmem:[%s23825_s2 + $0x15c] sm:$0xf]  ;;  %v12476_v18 = vld [vmem:[%s23825_s2 + $0xd8] sm:$0xf]  ;;  %v15184_v44 = vld [vmem:[%s23825_s2 + $0x394] sm:$0xf] }
 0x449   :  { %15738 = vpow2.f32 %v12353_v50  ;;  %6142 = vmatpush.bf16.msra.mxu3 %v12625_v21  ;;  %v12542_v40 = vld [vmem:[%s23825_s2 + $0x178] sm:$0xf0]  ;;  %v12822_v24 = vld [vmem:[%s23825_s2 + $0x3b0] sm:$0xf0]  ;;  %v12444_v30 = vld [vmem:[%s23825_s2 + $0x98] sm:$0xf] }
 0x44a   :  { %v20614_v26 = vadd.f32 %v5266_v27, %v5265_v35  ;;  %v5120_v55 = vpop.f32.mrf.mxu3  ;;  %v15117_v35 = vld [vmem:[%s23825_s2 + $0x174] sm:$0xf0]  ;;  %v12545_v13 = vor.u32 %v15113_v39, %v12542_v40  ;;  %v15105_v21 = vld [vmem:[%s23825_s2 + $0x11c] sm:$0xf]  ;;  %v15180_v39 = vld [vmem:[%s23825_s2 + $0x36c] sm:$0xf0] }
 0x44b   :  { %v12541_v56 = vor.u32 %v15117_v35, %v12540_v29  ;;  %v12508_v27 = vld [vmem:[%s23825_s2 + $0x118] sm:$0xf]  ;;  %v12510_v55 = vld [vmem:[%s23825_s2 + $0x138] sm:$0xf0]  ;;  %v12788_v35 = vld [vmem:[%s23825_s2 + $0x350] sm:$0xf] }
 0x44c   :  { %6153 = vmatpush.bf16.msra.mxu0 %v12437_v58  ;;  %6179 = vmatpush.bf16.msrb.mxu2 %v12441_v4  ;;  %v12852_v4 = vld [vmem:[%s23825_s2 + $0x3d0] sm:$0xf]  ;;  %v12509_v51 = vor.u32 %v15109_v45, %v12508_v27  ;;  %v12513_v54 = vor.u32 %v15105_v21, %v12510_v55  ;;  %v12478_v46 = vld [vmem:[%s23825_s2 + $0xf8] sm:$0xf0]  ;;  %v15085_v27 = vld [vmem:[%s23825_s2 + $0x74] sm:$0xf0] }
 0x44d   :  { %v12853_v42 = vor.u32 %v15196_v48, %v12852_v4  ;;  %v12481_v59 = vor.u32 %v15097_v5, %v12478_v46  ;;  %v15081_v45 = vld [vmem:[%s23825_s2 + $0x5c] sm:$0xf]  ;;  %v12756_v55 = vld [vmem:[%s23825_s2 + $0x310] sm:$0xf]  ;;  %v12380_v48 = vld [vmem:[%s23825_s2 + $0x18] sm:$0xf] }
 0x44e   :  { %v15164_v46 = vld [vmem:[%s23825_s2 + $0x2ec] sm:$0xf0] }
 0x44f   :  { %v15739_v62 = vpop.eup %15738 }
 0x450   :  { %v5249_v34 = vadd.f32 1.0, %v15739_v62  ;;  %6154 = vmatpush.bf16.msra.mxu0 %v12405_v11  ;;  %6180 = vmatpush.bf16.msrb.mxu2 %v12409_v61  ;;  %v15192_v62 = vld [vmem:[%s23825_s2 + $0x3d4] sm:$0xf] }
 0x451   :  { %v12854_v61 = vld [vmem:[%s23825_s2 + $0x3f0] sm:$0xf0] }
 0x452   :  { %15740 = vrcp.f32 %v5249_v34  ;;  %v5261_v12 = vand.u32 2147483648, %v5249_v34  ;;  %v5259_v32 = vand.u32 2147483647, %v5249_v34  ;;  %vm5255_vm13 = vweird.f32 %v5249_v34 }
 0x453   :  { %15742 = vtanh.f32 %v20614_v26  ;;  %v12857_v63 = vor.u32 %v15192_v62, %v12854_v61  ;;  %v15077_v62 = vld [vmem:[%s23825_s2 + $0x34] sm:$0xf0]  ;;  %v12382_v61 = vld [vmem:[%s23825_s2 + $0x38] sm:$0xf0] }
 0x454   :  { %6155 = vmatpush.bf16.msra.mxu0 %v12373_v47  ;;  %6181 = vmatpush.bf16.msrb.mxu2 %v12377_v19  ;;  %v5262_v9 = vor.u32 1.1754944e-38, %v5261_v12  ;;  %vm5260_vm15 = vcmp.eq.f32.partialorder %v5259_v32, 8.507059e+37  ;;  %v12820_v47 = vld [vmem:[%s23825_s2 + $0x390] sm:$0xf]  ;;  %v15176_v12 = vld [vmem:[%s23825_s2 + $0x354] sm:$0xf]  ;;  %v12789_v32 = vor.u32 %v15180_v39, %v12788_v35 }
 0x455   :  { %v15188_v19 = vld [vmem:[%s23825_s2 + $0x3ac] sm:$0xf0] }
 0x456   :  { %v12821_v29 = vor.u32 %v15188_v19, %v12820_v47 }
 0x457   :  { %6156 = vmatmul.bf16.vlgmr.msra.gmra.mxu0 %v20469_v25  ;;  %6182 = vmatmul.bf16.vlgmr.msrb.gmra.mxu2 %v20469_v25 }
 0x458   :  { %v15741_v16 = vpop.eup %15740  ;;  %6200 = vmatpush.bf16.msrb.mxu0 %v12605_v57  ;;  %6226 = vmatpush.bf16.msra.mxu2 %v12609_v49 }
 0x459   :  { %v5251_v1 = vmul.f32 %v15741_v16, %v5249_v34  ;;  %vm5256_vm12 = vweird.f32 %v15741_v16  ;;  %v15743_v7 = vpop.eup %15742  ;;  %v15101_v34 = vld [vmem:[%s23825_s2 + $0xf4] sm:$0xf0] }
 0x45a   :  { %vm5257_vm14 = vmor %vm5255_vm13, %vm5256_vm12  ;;  %v12477_v49 = vor.u32 %v15101_v34, %v12476_v18  ;;  %v12381_v34 = vor.u32 %v15077_v62, %v12380_v48  ;;  %v12796_v62 = vld [vmem:[%s23825_s2 + $0x358] sm:$0xf] }
 0x45b   :  { %v5252_v50 = vsub.f32 1.0, %v5251_v1  ;;  %v12825_v1 = vor.u32 %v15184_v44, %v12822_v24  ;;  %v15152_v44 = vld [vmem:[%s23825_s2 + $0x294] sm:$0xf] }
 0x45c   :  { %6201 = vmatpush.bf16.msrb.mxu0 %v12573_v31  ;;  %6227 = vmatpush.bf16.msra.mxu2 %v12577_v15  ;;  %v15089_v31 = vld [vmem:[%s23825_s2 + $0x9c] sm:$0xf]  ;;  %v12694_v24 = vld [vmem:[%s23825_s2 + $0x2b0] sm:$0xf0] }
 0x45d   :  { %v5253_v3 = vmul.f32 %v15741_v16, %v5252_v50  ;;  %v12446_v15 = vld [vmem:[%s23825_s2 + $0xb8] sm:$0xf0] }
 0x45e   :  { %v12449_v50 = vor.u32 %v15089_v31, %v12446_v15  ;;  %v12660_v31 = vld [vmem:[%s23825_s2 + $0x250] sm:$0xf] }
 0x45f   :  { %v5254_v58 = vadd.f32 %v15741_v16, %v5253_v3  ;;  %v12414_v3 = vld [vmem:[%s23825_s2 + $0x78] sm:$0xf0]  ;;  %v15148_v15 = vld [vmem:[%s23825_s2 + $0x26c] sm:$0xf0] }
 0x460   :  { %6202 = vmatpush.bf16.msrb.mxu0 %v12541_v56  ;;  %6228 = vmatpush.bf16.msra.mxu2 %v12545_v13  ;;  %v12790_v56 = vld [vmem:[%s23825_s2 + $0x370] sm:$0xf0]  ;;  %v12412_v13 = vld [vmem:[%s23825_s2 + $0x58] sm:$0xf]  ;;  %v12661_v35 = vor.u32 %v15148_v15, %v12660_v31  ;;  %v15153_v15 = vld [vmem:[%s23825_s2 + $0x29c] sm:$0xf] }
 0x461   :  { %v5258_v11 = vsel %vm5257_vm14, %v15741_v16, %v5254_v58  ;;  %v15093_v16 = vld [vmem:[%s23825_s2 + $0xb4] sm:$0xf0]  ;;  %v12793_v21 = vor.u32 %v15176_v12, %v12790_v56  ;;  %v15172_v58 = vld [vmem:[%s23825_s2 + $0x32c] sm:$0xf0]  ;;  %v12413_v4 = vor.u32 %v15085_v27, %v12412_v13  ;;  %v12630_v12 = vld [vmem:[%s23825_s2 + $0x230] sm:$0xf0] }
 0x462   :  { %v5263_v17 = vsel %vm5260_vm15, %v5262_v9, %v5258_v11  ;;  %v12445_v40 = vor.u32 %v15093_v16, %v12444_v30  ;;  %v12417_v9 = vor.u32 %v15081_v45, %v12414_v3  ;;  %v15073_v11 = vld [vmem:[%s23825_s2 + $0x1c] sm:$0xf]  ;;  %v12757_v18 = vor.u32 %v15172_v58, %v12756_v55  ;;  %v12860_v56 = vld [vmem:[%s23825_s2 + $0x3d8] sm:$0xf] }
 0x463   :  { %v20717_v8 = vmul.f32 %v15743_v7, %v5263_v17  ;;  %v12724_v17 = vld [vmem:[%s23825_s2 + $0x2d0] sm:$0xf]  ;;  %v12385_v5 = vor.u32 %v15073_v11, %v12382_v61  ;;  %v12697_v16 = vor.u32 %v15152_v44, %v12694_v24  ;;  %v15197_v13 = vld [vmem:[%s23825_s2 + $0x3f4] sm:$0xf0]  ;;  %v15193_v27 = vld [vmem:[%s23825_s2 + $0x3dc] sm:$0xf] }
 0x464   :  { %6203 = vmatpush.bf16.msrb.mxu0 %v12509_v51  ;;  %6229 = vmatpush.bf16.msra.mxu2 %v12513_v54  ;;  %v15168_v51 = vld [vmem:[%s23825_s2 + $0x314] sm:$0xf]  ;;  %v12725_v47 = vor.u32 %v15164_v46, %v12724_v17  ;;  %v12862_v45 = vld [vmem:[%s23825_s2 + $0x3f8] sm:$0xf0]  ;;  %v12828_v58 = vld [vmem:[%s23825_s2 + $0x398] sm:$0xf] }
 0x465   :  { %v20727_v57 = vpack.c.bf16 %v20717_v8, %v20717_v8  ;;  %v12758_v54 = vld [vmem:[%s23825_s2 + $0x330] sm:$0xf0]  ;;  %v12865_v55 = vor.u32 %v15193_v27, %v12862_v45  ;;  %v15181_v11 = vld [vmem:[%s23825_s2 + $0x374] sm:$0xf0]  ;;  %v15177_v61 = vld [vmem:[%s23825_s2 + $0x35c] sm:$0xf] }
 0x466   :  { %v12761_v7 = vor.u32 %v15168_v51, %v12758_v54  ;;  %v12830_v51 = vld [vmem:[%s23825_s2 + $0x3b8] sm:$0xf0]  ;;  %v15157_v31 = vld [vmem:[%s23825_s2 + $0x2b4] sm:$0xf0] }
 0x467   :  { %6065 = vmatmul.bf16.vlgmr.msra.gmra.mxu1 %v20727_v57  ;;  %6091 = vmatmul.bf16.vlgmr.msrb.gmra.mxu3 %v20727_v57  ;;  %v15169_v46 = vld [vmem:[%s23825_s2 + $0x31c] sm:$0xf]  ;;  %v15141_v27 = vld [vmem:[%s23825_s2 + $0x234] sm:$0xf0] }
 0x468   :  { %6161 = vmatpush.bf16.msra.mxu1 %v12853_v42  ;;  %6187 = vmatpush.bf16.msrb.mxu3 %v12857_v63  ;;  %v15160_v42 = vld [vmem:[%s23825_s2 + $0x2d4] sm:$0xf]  ;;  %v12734_v44 = vld [vmem:[%s23825_s2 + $0x2f8] sm:$0xf0] }
 0x469   :  { %6204 = vmatpush.bf16.msrb.mxu0 %v12477_v49  ;;  %6230 = vmatpush.bf16.msra.mxu2 %v12481_v59  ;;  %v12726_v63 = vld [vmem:[%s23825_s2 + $0x2f0] sm:$0xf0]  ;;  %v12692_v49 = vld [vmem:[%s23825_s2 + $0x290] sm:$0xf]  ;;  %v15137_v45 = vld [vmem:[%s23825_s2 + $0x21c] sm:$0xf] }
 0x46a   :  { %v12729_v19 = vor.u32 %v15160_v42, %v12726_v63  ;;  %v15156_v59 = vld [vmem:[%s23825_s2 + $0x2ac] sm:$0xf0]  ;;  %v12766_v42 = vld [vmem:[%s23825_s2 + $0x338] sm:$0xf0] }
 0x46b   :  { %v12693_v30 = vor.u32 %v15156_v59, %v12692_v49  ;;  %v15165_v49 = vld [vmem:[%s23825_s2 + $0x2f4] sm:$0xf0]  ;;  %v15161_v59 = vld [vmem:[%s23825_s2 + $0x2dc] sm:$0xf] }
 0x46c   :  { %6162 = vmatpush.bf16.msra.mxu1 %v12821_v29  ;;  %6188 = vmatpush.bf16.msrb.mxu3 %v12825_v1  ;;  %v15144_v29 = vld [vmem:[%s23825_s2 + $0x254] sm:$0xf] }
 0x46d   :  { %6205 = vmatpush.bf16.msrb.mxu0 %v12445_v40  ;;  %6231 = vmatpush.bf16.msra.mxu2 %v12449_v50  ;;  %v12662_v1 = vld [vmem:[%s23825_s2 + $0x270] sm:$0xf0]  ;;  %v15140_v40 = vld [vmem:[%s23825_s2 + $0x22c] sm:$0xf0] }
 0x46e   :  { %v12665_v39 = vor.u32 %v15144_v29, %v12662_v1  ;;  %v15136_v50 = vld [vmem:[%s23825_s2 + $0x214] sm:$0xf]  ;;  %v12702_v29 = vld [vmem:[%s23825_s2 + $0x2b8] sm:$0xf0] }
 0x470   :  { %6163 = vmatpush.bf16.msra.mxu1 %v12789_v32  ;;  %6189 = vmatpush.bf16.msrb.mxu3 %v12793_v21  ;;  %v12633_v32 = vor.u32 %v15136_v50, %v12630_v12  ;;  %v12861_v21 = vor.u32 %v15197_v13, %v12860_v56  ;;  %v12670_v50 = vld [vmem:[%s23825_s2 + $0x278] sm:$0xf0]  ;;  %v12636_v13 = vld [vmem:[%s23825_s2 + $0x218] sm:$0xf] }
 0x471   :  { %6206 = vmatpush.bf16.msrb.mxu0 %v12413_v4  ;;  %6232 = vmatpush.bf16.msra.mxu2 %v12417_v9  ;;  %v15189_v4 = vld [vmem:[%s23825_s2 + $0x3b4] sm:$0xf0]  ;;  %v15185_v9 = vld [vmem:[%s23825_s2 + $0x39c] sm:$0xf] }
 0x472   :  { %v12829_v54 = vor.u32 %v15189_v4, %v12828_v58  ;;  %v12833_v48 = vor.u32 %v15185_v9, %v12830_v51  ;;  %v13098_v9 = vld [vmem:[%s23825_s2 + $0x1c0] sm:$0xf] }
 0x473   :  { %v15258_v51 = vld [vmem:[%s23825_s2 + $0x1dc] sm:$0xf0] }
 0x474   :  { %6164 = vmatpush.bf16.msra.mxu1 %v12757_v18  ;;  %6190 = vmatpush.bf16.msrb.mxu3 %v12761_v7  ;;  %v12798_v18 = vld [vmem:[%s23825_s2 + $0x378] sm:$0xf0]  ;;  %v12797_v7 = vor.u32 %v15181_v11, %v12796_v62  ;;  %v13099_v62 = vor.u32 %v15258_v51, %v13098_v9  ;;  %v12906_v9 = vld [vmem:[%s23825_s2 + $0x40] sm:$0xf] }
 0x475   :  { %6207 = vmatpush.bf16.msrb.mxu0 %v12381_v34  ;;  %6233 = vmatpush.bf16.msra.mxu2 %v12385_v5  ;;  %v12801_v17 = vor.u32 %v15177_v61, %v12798_v18  ;;  %v12764_v34 = vld [vmem:[%s23825_s2 + $0x318] sm:$0xf]  ;;  %v13066_v18 = vld [vmem:[%s23825_s2 + $0x180] sm:$0xf] }
 0x476   :  { %v15173_v5 = vld [vmem:[%s23825_s2 + $0x334] sm:$0xf0]  ;;  %v15210_v51 = vld [vmem:[%s23825_s2 + $0x5c] sm:$0xf0] }
 0x477   :  { %6117 = vmatmul.bf16.vlgmr.msrb.gmra.mxu1 %v20727_v57  ;;  %6143 = vmatmul.bf16.vlgmr.msra.gmra.mxu3 %v20727_v57  ;;  %v12765_v63 = vor.u32 %v15173_v5, %v12764_v34  ;;  %v13068_v5 = vld [vmem:[%s23825_s2 + $0x1a0] sm:$0xf0] }
 0x478   :  { %6165 = vmatpush.bf16.msra.mxu1 %v12725_v47  ;;  %6191 = vmatpush.bf16.msrb.mxu3 %v12729_v19  ;;  %v12769_v47 = vor.u32 %v15169_v46, %v12766_v42  ;;  %v12732_v19 = vld [vmem:[%s23825_s2 + $0x2d8] sm:$0xf]  ;;  %v13034_v42 = vld [vmem:[%s23825_s2 + $0x140] sm:$0xf] }
 0x479   :  { %6208 = vmatmul.bf16.vlgmr.msrb.gmra.mxu0 %v20469_v25  ;;  %6234 = vmatmul.bf16.vlgmr.msra.gmra.mxu2 %v20469_v25  ;;  %v12628_v25 = vld [vmem:[%s23825_s2 + $0x210] sm:$0xf]  ;;  %v12733_v24 = vor.u32 %v15165_v49, %v12732_v19 }
 0x47a   :  { %v12629_v3 = vor.u32 %v15140_v40, %v12628_v25  ;;  %v15149_v25 = vld [vmem:[%s23825_s2 + $0x274] sm:$0xf0]  ;;  %v15145_v40 = vld [vmem:[%s23825_s2 + $0x25c] sm:$0xf]  ;;  %7168 = vmatpush.bf16.msra.mxu0 %v13099_v62  ;;  %v12907_v62 = vor.u32 %v15210_v51, %v12906_v9  ;;  %v13010_v9 = vld [vmem:[%s23825_s2 + $0x108] sm:$0xf] }
 0x47b   :  { %v12673_v56 = vor.u32 %v15145_v40, %v12670_v50  ;;  %v15235_v51 = vld [vmem:[%s23825_s2 + $0x124] sm:$0xf0] }
 0x47c   :  { %6166 = vmatpush.bf16.msra.mxu1 %v12693_v30  ;;  %6192 = vmatpush.bf16.msrb.mxu3 %v12697_v16  ;;  %v12737_v30 = vor.u32 %v15161_v59, %v12734_v44  ;;  %v12700_v16 = vld [vmem:[%s23825_s2 + $0x298] sm:$0xf]  ;;  %v13036_v59 = vld [vmem:[%s23825_s2 + $0x160] sm:$0xf0] }
 0x47d   :  { %v12701_v1 = vor.u32 %v15157_v31, %v12700_v16  ;;  %v15234_v16 = vld [vmem:[%s23825_s2 + $0x11c] sm:$0xf0]  ;;  %v15230_v31 = vld [vmem:[%s23825_s2 + $0x104] sm:$0xf] }
 0x480   :  { %6167 = vmatpush.bf16.msra.mxu1 %v12661_v35  ;;  %6193 = vmatpush.bf16.msrb.mxu3 %v12665_v39  ;;  %v12705_v35 = vor.u32 %v15153_v15, %v12702_v29  ;;  %v12668_v39 = vld [vmem:[%s23825_s2 + $0x258] sm:$0xf]  ;;  %v13004_v29 = vld [vmem:[%s23825_s2 + $0x120] sm:$0xf0] }
 0x481   :  { %v12669_v12 = vor.u32 %v15149_v25, %v12668_v39  ;;  %v15226_v39 = vld [vmem:[%s23825_s2 + $0xdc] sm:$0xf0]  ;;  %v15222_v25 = vld [vmem:[%s23825_s2 + $0xc4] sm:$0xf] }
 0x484   :  { %6168 = vmatpush.bf16.msra.mxu1 %v12629_v3  ;;  %6194 = vmatpush.bf16.msrb.mxu3 %v12633_v32  ;;  %v12638_v3 = vld [vmem:[%s23825_s2 + $0x238] sm:$0xf0]  ;;  %v12637_v32 = vor.u32 %v15141_v27, %v12636_v13  ;;  %v12938_v27 = vld [vmem:[%s23825_s2 + $0x80] sm:$0xf] }
 0x487   :  { %6169 = vmatmul.bf16.vlgmr.msra.gmra.mxu1 %v20727_v57  ;;  %6195 = vmatmul.bf16.vlgmr.msrb.gmra.mxu3 %v20727_v57 }
 0x488   :  { %6213 = vmatpush.bf16.msrb.mxu1 %v12861_v21  ;;  %6239 = vmatpush.bf16.msra.mxu3 %v12865_v55  ;;  %v12641_v21 = vor.u32 %v15137_v45, %v12638_v3  ;;  %v15218_v45 = vld [vmem:[%s23825_s2 + $0x9c] sm:$0xf0]  ;;  %v15214_v3 = vld [vmem:[%s23825_s2 + $0x84] sm:$0xf] }
 0x48c   :  { %6214 = vmatpush.bf16.msrb.mxu1 %v12829_v54  ;;  %6240 = vmatpush.bf16.msra.mxu3 %v12833_v48  ;;  %v15254_v54 = vld [vmem:[%s23825_s2 + $0x1c4] sm:$0xf] }
 0x490   :  { %6215 = vmatpush.bf16.msrb.mxu1 %v12797_v7  ;;  %6241 = vmatpush.bf16.msra.mxu3 %v12801_v17  ;;  %v15250_v7 = vld [vmem:[%s23825_s2 + $0x19c] sm:$0xf0]  ;;  %v15246_v17 = vld [vmem:[%s23825_s2 + $0x184] sm:$0xf] }
 0x491   :  { %v13067_v34 = vor.u32 %v15250_v7, %v13066_v18  ;;  %v13071_v46 = vor.u32 %v15246_v17, %v13068_v5  ;;  %v12874_v7 = vld [vmem:[%s23825_s2] sm:$0xf] }
 0x492   :  { %v15202_v17 = vld [vmem:[%s23825_s2 + $0x1c] sm:$0xf0] }
 0x493   :  { %7169 = vmatpush.bf16.msra.mxu0 %v13067_v34  ;;  %v15198_v34 = vld [vmem:[%s23825_s2 + $0x4] sm:$0xf]  ;;  %v12875_v5 = vor.u32 %v15202_v17, %v12874_v7 }
 0x494   :  { %6216 = vmatpush.bf16.msrb.mxu1 %v12765_v63  ;;  %6242 = vmatpush.bf16.msra.mxu3 %v12769_v47  ;;  %v15242_v63 = vld [vmem:[%s23825_s2 + $0x15c] sm:$0xf0]  ;;  %v15238_v47 = vld [vmem:[%s23825_s2 + $0x144] sm:$0xf] }
 0x495   :  { %v13035_v49 = vor.u32 %v15242_v63, %v13034_v42  ;;  %v13039_v44 = vor.u32 %v15238_v47, %v13036_v59  ;;  %v13106_v42 = vld [vmem:[%s23825_s2 + $0x1c8] sm:$0xf]  ;;  %v15255_v59 = vld [vmem:[%s23825_s2 + $0x1cc] sm:$0xf]  ;;  %v15318_v7 = vld [vmem:[%s23825_s2 + $0x3c4] sm:$0xf] }
 0x496   :  { %v15259_v63 = vld [vmem:[%s23825_s2 + $0x1e4] sm:$0xf0] }
 0x497   :  { %7170 = vmatpush.bf16.msra.mxu0 %v13035_v49  ;;  %v13107_v49 = vor.u32 %v15259_v63, %v13106_v42  ;;  %v15227_v42 = vld [vmem:[%s23825_s2 + $0xe4] sm:$0xf0] }
 0x498   :  { %6217 = vmatpush.bf16.msrb.mxu1 %v12733_v24  ;;  %6243 = vmatpush.bf16.msra.mxu3 %v12737_v30  ;;  %v13002_v30 = vld [vmem:[%s23825_s2 + $0x100] sm:$0xf] }
 0x499   :  { %v13003_v15 = vor.u32 %v15234_v16, %v13002_v30 }
 0x49b   :  { %7171 = vmatpush.bf16.msra.mxu0 %v13003_v15  ;;  %v13074_v15 = vld [vmem:[%s23825_s2 + $0x188] sm:$0xf] }
 0x49c   :  { %6218 = vmatpush.bf16.msrb.mxu1 %v12701_v1  ;;  %6244 = vmatpush.bf16.msra.mxu3 %v12705_v35  ;;  %v13007_v1 = vor.u32 %v15230_v31, %v13004_v29  ;;  %v12970_v35 = vld [vmem:[%s23825_s2 + $0xc0] sm:$0xf]  ;;  %v15251_v29 = vld [vmem:[%s23825_s2 + $0x1a4] sm:$0xf0] }
 0x49d   :  { %v12971_v50 = vor.u32 %v15226_v39, %v12970_v35  ;;  %v13075_v35 = vor.u32 %v15251_v29, %v13074_v15  ;;  %v13076_v39 = vld [vmem:[%s23825_s2 + $0x1a8] sm:$0xf0]  ;;  %v15314_v15 = vld [vmem:[%s23825_s2 + $0x39c] sm:$0xf0]  ;;  %v15310_v29 = vld [vmem:[%s23825_s2 + $0x384] sm:$0xf] }
 0x49f   :  { %7172 = vmatpush.bf16.msra.mxu0 %v12971_v50  ;;  %v13042_v50 = vld [vmem:[%s23825_s2 + $0x148] sm:$0xf] }
 0x4a0   :  { %6219 = vmatpush.bf16.msrb.mxu1 %v12669_v12  ;;  %6245 = vmatpush.bf16.msra.mxu3 %v12673_v56  ;;  %v12972_v12 = vld [vmem:[%s23825_s2 + $0xe0] sm:$0xf0] }
 0x4a1   :  { %v12975_v56 = vor.u32 %v15222_v25, %v12972_v12  ;;  %v15243_v12 = vld [vmem:[%s23825_s2 + $0x164] sm:$0xf0] }
 0x4a4   :  { %6220 = vmatpush.bf16.msrb.mxu1 %v12637_v32  ;;  %6246 = vmatpush.bf16.msra.mxu3 %v12641_v21  ;;  %v12939_v32 = vor.u32 %v15218_v45, %v12938_v27  ;;  %v12940_v21 = vld [vmem:[%s23825_s2 + $0xa0] sm:$0xf0]  ;;  %v13043_v27 = vor.u32 %v15243_v12, %v13042_v50  ;;  %v15239_v45 = vld [vmem:[%s23825_s2 + $0x14c] sm:$0xf]  ;;  %v15219_v50 = vld [vmem:[%s23825_s2 + $0xa4] sm:$0xf0] }
 0x4a6   :  { %7173 = vmatpush.bf16.msra.mxu0 %v12939_v32 }
 0x4a7   :  { %6221 = vmatmul.bf16.vlgmr.msrb.gmra.mxu1 %v20727_v57  ;;  %6247 = vmatmul.bf16.vlgmr.msra.gmra.mxu3 %v20727_v57  ;;  %v13100_v57 = vld [vmem:[%s23825_s2 + $0x1e0] sm:$0xf0] }
 0x4a8   :  { %v13103_v11 = vor.u32 %v15254_v54, %v13100_v57  ;;  %v15206_v54 = vld [vmem:[%s23825_s2 + $0x44] sm:$0xf] }
 0x4a9   :  { %v12908_v57 = vld [vmem:[%s23825_s2 + $0x60] sm:$0xf0] }
 0x4aa   :  { %7194 = vmatpush.bf16.msrb.mxu2 %v13103_v11  ;;  %v12911_v11 = vor.u32 %v15206_v54, %v12908_v57  ;;  %7174 = vmatpush.bf16.msra.mxu0 %v12907_v62  ;;  %v15231_v54 = vld [vmem:[%s23825_s2 + $0x10c] sm:$0xf]  ;;  %v13011_v62 = vor.u32 %v15235_v51, %v13010_v9  ;;  %v13292_v9 = vld [vmem:[%s23825_s2 + $0x360] sm:$0xf0]  ;;  %v12914_v51 = vld [vmem:[%s23825_s2 + $0x48] sm:$0xf] }
 0x4ae   :  { %7195 = vmatpush.bf16.msrb.mxu2 %v13071_v46  ;;  %v12876_v46 = vld [vmem:[%s23825_s2 + $0x20] sm:$0xf0]  ;;  %7175 = vmatpush.bf16.msra.mxu0 %v12875_v5 }
 0x4af   :  { %v12879_v47 = vor.u32 %v15198_v34, %v12876_v46  ;;  %v13356_v5 = vld [vmem:[%s23825_s2 + $0x3e0] sm:$0xf0]  ;;  %v12978_v46 = vld [vmem:[%s23825_s2 + $0xc8] sm:$0xf] }
 0x4b2   :  { %7196 = vmatpush.bf16.msrb.mxu2 %v13039_v44  ;;  %v13108_v44 = vld [vmem:[%s23825_s2 + $0x1e8] sm:$0xf0]  ;;  %7220 = vmatpush.bf16.msrb.mxu0 %v13107_v49  ;;  %v13359_v49 = vor.u32 %v15318_v7, %v13356_v5 }
 0x4b3   :  { %v15207_v7 = vld [vmem:[%s23825_s2 + $0x4c] sm:$0xf] }
 0x4b4   :  { %v20949_v55 = vpop.f32.mrf.mxu0  ;;  %7207 = vmatpush.bf16.msrb.mxu3 %v13359_v49 }
 0x4b6   :  { %7197 = vmatpush.bf16.msrb.mxu2 %v13007_v1  ;;  %v15247_v1 = vld [vmem:[%s23825_s2 + $0x18c] sm:$0xf]  ;;  %7221 = vmatpush.bf16.msrb.mxu0 %v13075_v35 }
 0x4b7   :  { %v13079_v25 = vor.u32 %v15247_v1, %v13076_v39  ;;  %v13324_v1 = vld [vmem:[%s23825_s2 + $0x3a0] sm:$0xf0] }
 0x4ba   :  { %v20951_v58 = vpop.f32.mrf.mxu2  ;;  %7198 = vmatpush.bf16.msrb.mxu2 %v12975_v56  ;;  %7222 = vmatpush.bf16.msrb.mxu0 %v13043_v27  ;;  %v15215_v27 = vld [vmem:[%s23825_s2 + $0x8c] sm:$0xf] }
 0x4bc   :  { %v6055_v4 = vpop.f32.mrf.mxu0 }
 0x4bd   :  { %v12943_v4 = vor.u32 %v15214_v3, %v12940_v21 }
 0x4be   :  { %7223 = vmatpush.bf16.msrb.mxu0 %v13011_v62 }
 0x4bf   :  { %7199 = vmatpush.bf16.msrb.mxu2 %v12943_v4 }
 0x4c2   :  { %v6081_v48 = vpop.f32.mrf.mxu2 }
 0x4c3   :  { %7200 = vmatpush.bf16.msrb.mxu2 %v12911_v11  ;;  %v13354_v11 = vld [vmem:[%s23825_s2 + $0x3c0] sm:$0xf] }
 0x4c4   :  { %v20965_v61 = vpop.f32.mrf.mxu0 }
 0x4c7   :  { %7201 = vmatpush.bf16.msrb.mxu2 %v12879_v47 }
 0x4ca   :  { %v20988_v19 = vpop.f32.mrf.mxu2 }
 0x4cc   :  { %v6107_v24 = vpop.f32.mrf.mxu0 }
 0x4cd   :  { %v13111_v24 = vor.u32 %v15255_v59, %v13108_v44  ;;  %v12979_v59 = vor.u32 %v15227_v42, %v12978_v46  ;;  %v15223_v44 = vld [vmem:[%s23825_s2 + $0xcc] sm:$0xf] }
 0x4cf   :  { %7246 = vmatpush.bf16.msra.mxu2 %v13111_v24  ;;  %v12980_v24 = vld [vmem:[%s23825_s2 + $0xe8] sm:$0xf0]  ;;  %7224 = vmatpush.bf16.msrb.mxu0 %v12979_v59 }
 0x4d2   :  { %v6133_v40 = vpop.f32.mrf.mxu2 }
 0x4d3   :  { %7247 = vmatpush.bf16.msra.mxu2 %v13079_v25  ;;  %v13327_v25 = vor.u32 %v15310_v29, %v13324_v1  ;;  %v12882_v29 = vld [vmem:[%s23825_s2 + $0x8] sm:$0xf]  ;;  %v15199_v1 = vld [vmem:[%s23825_s2 + $0xc] sm:$0xf] }
 0x4d4   :  { %v21017_v13 = vpop.f32.mrf.mxu0 }
 0x4d5   :  { %7208 = vmatpush.bf16.msrb.mxu3 %v13327_v25 }
 0x4da   :  { %v21040_v48 = vpop.f32.mrf.mxu2 }
 0x4dc   :  { %v6159_v18 = vpop.f32.mrf.mxu0 }
 0x4dd   :  { %v15322_v18 = vld [vmem:[%s23825_s2 + $0x3dc] sm:$0xf0] }
 0x4de   :  { %v13355_v34 = vor.u32 %v15322_v18, %v13354_v11 }
 0x4e0   :  { %7181 = vmatpush.bf16.msra.mxu1 %v13355_v34 }
 0x4e2   :  { %v6185_v31 = vpop.f32.mrf.mxu2 }
 0x4e3   :  { %v13322_v31 = vld [vmem:[%s23825_s2 + $0x380] sm:$0xf] }
 0x4e4   :  { %v6066_v30 = vpop.f32.mrf.mxu1 }
 0x4e5   :  { %v6067_v16 = vadd.f32 %v6066_v30, %v20949_v55  ;;  %v12983_v30 = vor.u32 %v15223_v44, %v12980_v24 }
 0x4e7   :  { %v6260_v55 = vadd.f32 %v6067_v16, %v16885_v23  ;;  %v13044_v23 = vld [vmem:[%s23825_s2 + $0x168] sm:$0xf0] }
 0x4e8   :  { %v13047_v32 = vor.u32 %v15239_v45, %v13044_v23 }
 0x4e9   :  { %v12866_v40 = vmul.f32 -1.442695, %v6260_v55  ;;  %v13323_v55 = vor.u32 %v15314_v15, %v13322_v31 }
 0x4ea   :  { %v6092_v56 = vpop.f32.mrf.mxu3  ;;  %7248 = vmatpush.bf16.msra.mxu2 %v13047_v32  ;;  %v15306_v32 = vld [vmem:[%s23825_s2 + $0x35c] sm:$0xf0] }
 0x4eb   :  { %15744 = vpow2.f32 %v12866_v40  ;;  %v6093_v3 = vadd.f32 %v6092_v56, %v20951_v58  ;;  %v13012_v58 = vld [vmem:[%s23825_s2 + $0x128] sm:$0xf0]  ;;  %v12946_v40 = vld [vmem:[%s23825_s2 + $0x88] sm:$0xf]  ;;  %7182 = vmatpush.bf16.msra.mxu1 %v13323_v55 }
 0x4ec   :  { %v6068_v21 = vpop.f32.mrf.mxu1  ;;  %v12947_v56 = vor.u32 %v15219_v50, %v12946_v40  ;;  %v12884_v40 = vld [vmem:[%s23825_s2 + $0x28] sm:$0xf0] }
 0x4ed   :  { %v6261_v4 = vadd.f32 %v6093_v3, %v16897_v28  ;;  %v13015_v28 = vor.u32 %v15231_v54, %v13012_v58  ;;  %v13290_v3 = vld [vmem:[%s23825_s2 + $0x340] sm:$0xf] }
 0x4ee   :  { %7225 = vmatpush.bf16.msrb.mxu0 %v12947_v56  ;;  %v13291_v21 = vor.u32 %v15306_v32, %v13290_v3  ;;  %v15286_v3 = vld [vmem:[%s23825_s2 + $0x2c4] sm:$0xf] }
 0x4ef   :  { %v12867_v57 = vmul.f32 -1.442695, %v6261_v4  ;;  %7249 = vmatpush.bf16.msra.mxu2 %v13015_v28  ;;  %v15302_v4 = vld [vmem:[%s23825_s2 + $0x344] sm:$0xf] }
 0x4f0   :  { %v13295_v18 = vor.u32 %v15302_v4, %v13292_v9  ;;  %7183 = vmatpush.bf16.msra.mxu1 %v13291_v21  ;;  %v13228_v4 = vld [vmem:[%s23825_s2 + $0x2e0] sm:$0xf0] }
 0x4f1   :  { %v15745_v17 = vpop.eup %15744  ;;  %15746 = vpow2.f32 %v12867_v57  ;;  %v15211_v57 = vld [vmem:[%s23825_s2 + $0x64] sm:$0xf0] }
 0x4f2   :  { %v21127_v63 = vadd.f32 1.0, %v15745_v17  ;;  %v6094_v47 = vpop.f32.mrf.mxu3  ;;  %v12915_v46 = vor.u32 %v15211_v57, %v12914_v51  ;;  %7209 = vmatpush.bf16.msrb.mxu3 %v13295_v18 }
 0x4f3   :  { %7250 = vmatpush.bf16.msra.mxu2 %v12983_v30  ;;  %v15298_v47 = vld [vmem:[%s23825_s2 + $0x31c] sm:$0xf0]  ;;  %v15294_v30 = vld [vmem:[%s23825_s2 + $0x304] sm:$0xf] }
 0x4f4   :  { %15748 = vrcp.f32 %v21127_v63  ;;  %v6118_v16 = vpop.f32.mrf.mxu1  ;;  %v6277_v17 = vand.u32 2147483647, %v21127_v63  ;;  %v6279_v59 = vand.u32 2147483648, %v21127_v63  ;;  %7226 = vmatpush.bf16.msrb.mxu0 %v12915_v46  ;;  %vm6273_vm1 = vweird.f32 %v21127_v63  ;;  %v15282_v46 = vld [vmem:[%s23825_s2 + $0x29c] sm:$0xf0] }
 0x4f5   :  { %v6119_v35 = vadd.f32 %v6118_v16, %v20965_v61  ;;  %v12948_v61 = vld [vmem:[%s23825_s2 + $0xa8] sm:$0xf0]  ;;  %v13260_v16 = vld [vmem:[%s23825_s2 + $0x320] sm:$0xf0] }
 0x4f6   :  { %v21149_v39 = vpop.f32.mrf.mxu0  ;;  %v12951_v23 = vor.u32 %v15215_v27, %v12948_v61  ;;  %v13263_v15 = vor.u32 %v15294_v30, %v13260_v16  ;;  %v13226_v61 = vld [vmem:[%s23825_s2 + $0x2c0] sm:$0xf]  ;;  %vm6278_vm3 = vcmp.eq.f32.partialorder %v6277_v17, 8.507059e+37  ;;  %v6280_v32 = vor.u32 1.1754944e-38, %v6279_v59 }
 0x4f7   :  { %v15747_v12 = vpop.eup %15746  ;;  %v6262_v62 = vadd.f32 %v6119_v35, %v17189_v10  ;;  %v12916_v10 = vld [vmem:[%s23825_s2 + $0x68] sm:$0xf0] }
 0x4f8   :  { %v21163_v45 = vadd.f32 1.0, %v15747_v12  ;;  %7251 = vmatpush.bf16.msra.mxu2 %v12951_v23  ;;  %v12919_v42 = vor.u32 %v15207_v7, %v12916_v10  ;;  %v12887_v12 = vor.u32 %v15199_v1, %v12884_v40  ;;  %7210 = vmatpush.bf16.msrb.mxu3 %v13263_v15  ;;  %v15290_v23 = vld [vmem:[%s23825_s2 + $0x2dc] sm:$0xf0] }
 0x4f9   :  { %v13227_v21 = vor.u32 %v15290_v23, %v13226_v61  ;;  %v13162_v15 = vld [vmem:[%s23825_s2 + $0x240] sm:$0xf] }
 0x4fa   :  { %v21180_v54 = vpop.eup %15748  ;;  %15750 = vrcp.f32 %v21163_v45  ;;  %v6144_v58 = vpop.f32.mrf.mxu3  ;;  %v6298_v51 = vand.u32 2147483648, %v21163_v45  ;;  %v6296_v7 = vand.u32 2147483647, %v21163_v45  ;;  %vm6292_vm5 = vweird.f32 %v21163_v45 }
 0x4fb   :  { %v6269_v28 = vmul.f32 %v21180_v54, %v21127_v63  ;;  %v6145_v11 = vadd.f32 %v6144_v58, %v20988_v19  ;;  %v13258_v19 = vld [vmem:[%s23825_s2 + $0x300] sm:$0xf]  ;;  %15752 = vtanh.f32 %v6262_v62  ;;  %vm6274_vm0 = vweird.f32 %v21180_v54 }
 0x4fc   :  { %v21197_v34 = vpop.f32.mrf.mxu2  ;;  %v6120_v5 = vpop.f32.mrf.mxu1  ;;  %v13259_v24 = vor.u32 %v15298_v47, %v13258_v19  ;;  %7252 = vmatpush.bf16.msra.mxu2 %v12919_v42  ;;  %vm6275_vm2 = vmor %vm6273_vm1, %vm6274_vm0  ;;  %v13231_v58 = vor.u32 %v15286_v3, %v13228_v4  ;;  %v15278_v47 = vld [vmem:[%s23825_s2 + $0x284] sm:$0xf]  ;;  %v6299_v30 = vor.u32 1.1754944e-38, %v6298_v51  ;;  %vm6297_vm7 = vcmp.eq.f32.partialorder %v6296_v7, 8.507059e+37  ;;  %v13130_v3 = vld [vmem:[%s23825_s2 + $0x200] sm:$0xf] }
 0x4fd   :  { %v6270_v49 = vsub.f32 1.0, %v6269_v28  ;;  %v6263_v44 = vadd.f32 %v6145_v11, %v17198_v20  ;;  %v15203_v20 = vld [vmem:[%s23825_s2 + $0x24] sm:$0xf0]  ;;  %v23884_v28 = vld [vmem:[#allocation17_spill] sm:$0xff] }
 0x4fe   :  { %v6211_v31 = vpop.f32.mrf.mxu0  ;;  %v12883_v25 = vor.u32 %v15203_v20, %v12882_v29  ;;  %7184 = vmatpush.bf16.msra.mxu1 %v13259_v24  ;;  %v593_v11 = vadd.f32 %v23884_v28, %v16991_v22  ;;  %v13194_v5 = vld [vmem:[%s23825_s2 + $0x280] sm:$0xf]  ;;  %7211 = vmatpush.bf16.msrb.mxu3 %v13231_v58  ;;  %v13362_v51 = vld [vmem:[%s23825_s2 + $0x3c8] sm:$0xf]  ;;  %v15319_v58 = vld [vmem:[%s23825_s2 + $0x3cc] sm:$0xf] }
 0x4ff   :  { %v6271_v35 = vmul.f32 %v21180_v54, %v6270_v49  ;;  %v12868_v55 = vmul.f32 -1.442695, %v6263_v44  ;;  %v13196_v49 = vld [vmem:[%s23825_s2 + $0x2a0] sm:$0xf0]  ;;  %v13195_v59 = vor.u32 %v15282_v46, %v13194_v5  ;;  %v15274_v29 = vld [vmem:[%s23825_s2 + $0x25c] sm:$0xf0] }
 0x500   :  { %v15751_v50 = vpop.eup %15750  ;;  %7227 = vmatpush.bf16.msrb.mxu0 %v12883_v25  ;;  %7253 = vmatpush.bf16.msra.mxu2 %v12887_v12  ;;  %v13199_v44 = vor.u32 %v15278_v47, %v13196_v49  ;;  %v23885_v12 = vld [vmem:[#allocation18_spill] sm:$0xff] }
 0x501   :  { %v6288_v56 = vmul.f32 %v15751_v50, %v21163_v45  ;;  %v6272_v27 = vadd.f32 %v21180_v54, %v6271_v35  ;;  %15754 = vpow2.f32 %v12868_v55  ;;  %v15753_v57 = vpop.eup %15752  ;;  %vm6293_vm4 = vweird.f32 %v15751_v50  ;;  %v15270_v35 = vld [vmem:[%s23825_s2 + $0x244] sm:$0xf]  ;;  %v13330_v5 = vld [vmem:[%s23825_s2 + $0x388] sm:$0xf]  ;;  %v13332_v49 = vld [vmem:[%s23825_s2 + $0x3a8] sm:$0xf0] }
 0x502   :  { %v6146_v63 = vpop.f32.mrf.mxu3  ;;  %7185 = vmatpush.bf16.msra.mxu1 %v13227_v21  ;;  %vm6294_vm6 = vmor %vm6292_vm5, %vm6293_vm4  ;;  %7212 = vmatpush.bf16.msrb.mxu3 %v13199_v44  ;;  %v13163_v45 = vor.u32 %v15274_v29, %v13162_v15  ;;  %v13164_v55 = vld [vmem:[%s23825_s2 + $0x260] sm:$0xf0]  ;;  %v15315_v46 = vld [vmem:[%s23825_s2 + $0x3a4] sm:$0xf0] }
 0x503   :  { %v6289_v9 = vsub.f32 1.0, %v6288_v56  ;;  %v6276_v62 = vsel %vm6275_vm2, %v21180_v54, %v6272_v27  ;;  %v622_v56 = vadd.f32 %v23885_v12, %v17002_v38  ;;  %v13167_v23 = vor.u32 %v15270_v35, %v13164_v55  ;;  %v15307_v15 = vld [vmem:[%s23825_s2 + $0x364] sm:$0xf0]  ;;  %v15303_v29 = vld [vmem:[%s23825_s2 + $0x34c] sm:$0xf] }
 0x504   :  { %v6281_v18 = vsel %vm6278_vm3, %v6280_v32, %v6276_v62  ;;  %v6237_v10 = vpop.f32.mrf.mxu2  ;;  %v6170_v17 = vpop.f32.mrf.mxu1  ;;  %v15266_v32 = vld [vmem:[%s23825_s2 + $0x21c] sm:$0xf0]  ;;  %v15323_v62 = vld [vmem:[%s23825_s2 + $0x3e4] sm:$0xf0]  ;;  %v13331_v47 = vor.u32 %v15315_v46, %v13330_v5  ;;  %v13114_v55 = vld [vmem:[%s23825_s2 + $0x1d0] sm:$0xf] }
 0x505   :  { %v6290_v54 = vmul.f32 %v15751_v50, %v6289_v9  ;;  %v6323_v42 = vmul.f32 %v15753_v57, %v6281_v18  ;;  %v6171_v19 = vadd.f32 %v6170_v17, %v21017_v13  ;;  %v13131_v4 = vor.u32 %v15266_v32, %v13130_v3  ;;  %v15299_v3 = vld [vmem:[%s23825_s2 + $0x324] sm:$0xf0] }
 0x506   :  { %7186 = vmatpush.bf16.msra.mxu1 %v13195_v59  ;;  %7213 = vmatpush.bf16.msrb.mxu3 %v13167_v23  ;;  %v13363_v28 = vor.u32 %v15323_v62, %v13362_v51  ;;  %v13266_v23 = vld [vmem:[%s23825_s2 + $0x308] sm:$0xf] }
 0x507   :  { %v15755_v24 = vpop.eup %15754  ;;  %v6291_v16 = vadd.f32 %v15751_v50, %v6290_v54  ;;  %v6327_v31 = vadd.f32 %v6171_v19, %v593_v11  ;;  %v13364_v11 = vld [vmem:[%s23825_s2 + $0x3e8] sm:$0xf0]  ;;  %v13234_v5 = vld [vmem:[%s23825_s2 + $0x2c8] sm:$0xf] }
 0x508   :  { %v21263_v13 = vadd.f32 1.0, %v15755_v24  ;;  %v13367_v7 = vor.u32 %v15319_v58, %v13364_v11  ;;  %v15311_v54 = vld [vmem:[%s23825_s2 + $0x38c] sm:$0xf]  ;;  %v13082_v58 = vld [vmem:[%s23825_s2 + $0x190] sm:$0xf] }
 0x509   :  { %v6295_v20 = vsel %vm6294_vm6, %v15751_v50, %v6291_v16  ;;  %v12869_v1 = vmul.f32 -1.442695, %v6327_v31  ;;  %v13335_v44 = vor.u32 %v15311_v54, %v13332_v49  ;;  %v13298_v31 = vld [vmem:[%s23825_s2 + $0x348] sm:$0xf]  ;;  %v21400_v54 = vld [vmem:[%s23825_s2 + $0x150] sm:$0xf] }
 0x50a   :  { %v6300_v25 = vsel %vm6297_vm7, %v6299_v30, %v6295_v20  ;;  %15756 = vrcp.f32 %v21263_v13  ;;  %v6196_v40 = vpop.f32.mrf.mxu3  ;;  %7187 = vmatpush.bf16.msra.mxu1 %v13163_v45  ;;  %v6316_v24 = vand.u32 2147483647, %v21263_v13  ;;  %v6318_v30 = vand.u32 2147483648, %v21263_v13  ;;  %v15291_v46 = vld [vmem:[%s23825_s2 + $0x2e4] sm:$0xf0] }
 0x50b   :  { %v6322_v50 = vmul.f32 %v6300_v25, %v20375_v37  ;;  %15758 = vpow2.f32 %v12869_v1  ;;  %v6197_v27 = vadd.f32 %v6196_v40, %v21040_v48  ;;  %v15262_v37 = vld [vmem:[%s23825_s2 + $0x204] sm:$0xf]  ;;  %v13299_v20 = vor.u32 %v15307_v15, %v13298_v31  ;;  %v13300_v1 = vld [vmem:[%s23825_s2 + $0x368] sm:$0xf0]  ;;  %v15260_v25 = vld [vmem:[%s23825_s2 + $0x1ec] sm:$0xf0] }
 0x50c   :  { %v6172_v61 = vpop.f32.mrf.mxu1  ;;  %v13132_v48 = vld [vmem:[%s23825_s2 + $0x220] sm:$0xf0]  ;;  %vm6312_vm9 = vweird.f32 %v21263_v13  ;;  %v13303_v40 = vor.u32 %v15303_v29, %v13300_v1  ;;  %v6319_v12 = vor.u32 1.1754944e-38, %v6318_v30  ;;  %vm6317_vm11 = vcmp.eq.f32.partialorder %v6316_v24, 8.507059e+37  ;;  %v13236_v49 = vld [vmem:[%s23825_s2 + $0x2e8] sm:$0xf0] }
 0x50d   :  { %v21288_v63 = vadd.f32 %v6323_v42, %v6322_v50  ;;  %v6328_v21 = vadd.f32 %v6197_v27, %v622_v56  ;;  %v13135_v9 = vor.u32 %v15262_v37, %v13132_v48  ;;  %v15256_v50 = vld [vmem:[%s23825_s2 + $0x1d4] sm:$0xf]  ;;  %v13268_v37 = vld [vmem:[%s23825_s2 + $0x328] sm:$0xf0]  ;;  %v13115_v51 = vor.u32 %v15260_v25, %v13114_v55  ;;  %v15244_v30 = vld [vmem:[%s23825_s2 + $0x16c] sm:$0xf0] }
 0x50e   :  { %7188 = vmatpush.bf16.msra.mxu1 %v13131_v4  ;;  %v15295_v4 = vld [vmem:[%s23825_s2 + $0x30c] sm:$0xf]  ;;  %v13052_v31 = vld [vmem:[%s23825_s2 + $0x170] sm:$0xf0] }
 0x50f   :  { %v12870_v57 = vmul.f32 -1.442695, %v6328_v21  ;;  %7214 = vmatpush.bf16.msrb.mxu3 %v13135_v9  ;;  %v23886_v55 = vld [vmem:[#allocation31_spill] sm:$0xff] }
 0x510   :  { %v15757_v18 = vpop.eup %15756  ;;  %v651_v25 = vadd.f32 %v23886_v55, %v17279_v6  ;;  %v13138_v55 = vld [vmem:[%s23825_s2 + $0x208] sm:$0xf] }
 0x511   :  { %v15759_v10 = vpop.eup %15758  ;;  %v6308_v17 = vmul.f32 %v15757_v18, %v21263_v13  ;;  %15760 = vpow2.f32 %v12870_v57  ;;  %vm6313_vm8 = vweird.f32 %v15757_v18  ;;  %v13116_v13 = vld [vmem:[%s23825_s2 + $0x1f0] sm:$0xf0]  ;;  %v15252_v57 = vld [vmem:[%s23825_s2 + $0x1ac] sm:$0xf0] }
 0x512   :  { %7233 = vmatpush.bf16.msrb.mxu1 %v13363_v28  ;;  %v21318_v42 = vadd.f32 1.0, %v15759_v10  ;;  %v6198_v19 = vpop.f32.mrf.mxu3  ;;  %15762 = vtanh.f32 %v21288_v63  ;;  %vm6314_vm10 = vmor %vm6312_vm9, %vm6313_vm8  ;;  %v13119_v62 = vor.u32 %v15256_v50, %v13116_v13  ;;  %v13267_v28 = vor.u32 %v15299_v3, %v13266_v23  ;;  %v13084_v10 = vld [vmem:[%s23825_s2 + $0x1b0] sm:$0xf0]  ;;  %v15279_v50 = vld [vmem:[%s23825_s2 + $0x28c] sm:$0xf] }
 0x513   :  { %v6309_v59 = vsub.f32 1.0, %v6308_v17  ;;  %7259 = vmatpush.bf16.msra.mxu3 %v13367_v7  ;;  %v15248_v7 = vld [vmem:[%s23825_s2 + $0x194] sm:$0xf]  ;;  %v13271_v17 = vor.u32 %v15295_v4, %v13268_v37  ;;  %v13235_v19 = vor.u32 %v15291_v46, %v13234_v5  ;;  %v13204_v13 = vld [vmem:[%s23825_s2 + $0x2a8] sm:$0xf0]  ;;  %v23887_v46 = vld [vmem:[#allocation32_spill] sm:$0xff] }
 0x514   :  { %15764 = vrcp.f32 %v21318_v42  ;;  %v13087_v24 = vor.u32 %v15248_v7, %v13084_v10  ;;  %v13018_v3 = vld [vmem:[%s23825_s2 + $0x110] sm:$0xf]  ;;  %vm6340_vm14 = vweird.f32 %v21318_v42  ;;  %v6346_v7 = vand.u32 2147483648, %v21318_v42  ;;  %v13172_v5 = vld [vmem:[%s23825_s2 + $0x268] sm:$0xf0] }
 0x515   :  { %v6310_v16 = vmul.f32 %v15757_v18, %v6309_v59 }
 0x516   :  { %7234 = vmatpush.bf16.msrb.mxu1 %v13331_v47  ;;  %v15287_v47 = vld [vmem:[%s23825_s2 + $0x2cc] sm:$0xf] }
 0x517   :  { %v15761_v45 = vpop.eup %15760  ;;  %v6311_v35 = vadd.f32 %v15757_v18, %v6310_v16  ;;  %7260 = vmatpush.bf16.msra.mxu3 %v13335_v44  ;;  %v13083_v44 = vor.u32 %v15252_v57, %v13082_v58  ;;  %v15240_v16 = vld [vmem:[%s23825_s2 + $0x154] sm:$0xf]  ;;  %v13239_v1 = vor.u32 %v15287_v47, %v13236_v49  ;;  %v13207_v57 = vor.u32 %v15279_v50, %v13204_v13  ;;  %v13140_v13 = vld [vmem:[%s23825_s2 + $0x228] sm:$0xf0] }
 0x518   :  { %v21346_v56 = vadd.f32 1.0, %v15761_v45  ;;  %v15763_v27 = vpop.eup %15762  ;;  %v13202_v45 = vld [vmem:[%s23825_s2 + $0x288] sm:$0xf]  ;;  %v13055_v23 = vor.u32 %v15240_v16, %v13052_v31  ;;  %v13020_v58 = vld [vmem:[%s23825_s2 + $0x130] sm:$0xf0] }
 0x519   :  { %v6315_v61 = vsel %vm6314_vm10, %v15757_v18, %v6311_v35  ;;  %v15283_v35 = vld [vmem:[%s23825_s2 + $0x2a4] sm:$0xf0]  ;;  %v6344_v47 = vand.u32 2147483647, %v21318_v42 }
 0x51a   :  { %7235 = vmatpush.bf16.msrb.mxu1 %v13299_v20  ;;  %v21360_v32 = vpop.eup %15764  ;;  %v6320_v21 = vsel %vm6317_vm11, %v6319_v12, %v6315_v61  ;;  %15766 = vrcp.f32 %v21346_v56  ;;  %v13203_v12 = vor.u32 %v15283_v35, %v13202_v45  ;;  %v13051_v61 = vor.u32 %v15244_v30, %v21400_v54  ;;  %v15228_v30 = vld [vmem:[%s23825_s2 + $0xec] sm:$0xf0] }
 0x51b   :  { %v21369_v48 = vmul.f32 %v15763_v27, %v6320_v21  ;;  %v6336_v9 = vmul.f32 %v21360_v32, %v21318_v42  ;;  %7261 = vmatpush.bf16.msra.mxu3 %v13303_v40  ;;  %v6365_v21 = vand.u32 2147483648, %v21346_v56  ;;  %vm6341_vm12 = vweird.f32 %v21360_v32 }
 0x51c   :  { %v6363_v37 = vand.u32 2147483647, %v21346_v56  ;;  %v680_v54 = vadd.f32 %v23887_v46, %v17282_v0  ;;  %vm6359_vm15 = vweird.f32 %v21346_v56  ;;  %vm21475_vm0 = vmor %vm6340_vm14, %vm6341_vm12  ;;  %vm6345_vm3 = vcmp.eq.f32.partialorder %v6344_v47, 8.507059e+37  ;;  %v12890_v47 = vld [vmem:[%s23825_s2 + $0x10] sm:$0xf] }
 0x51d   :  { %v21381_v11 = vpack.c.bf16 %v21369_v48, %v21369_v48  ;;  %v6337_v18 = vsub.f32 1.0, %v6336_v9  ;;  %v15232_v9 = vld [vmem:[%s23825_s2 + $0x114] sm:$0xf]  ;;  %v6366_v16 = vor.u32 1.1754944e-38, %v6365_v21 }
 0x51e   :  { %7236 = vmatpush.bf16.msrb.mxu1 %v13267_v28  ;;  %v13170_v28 = vld [vmem:[%s23825_s2 + $0x248] sm:$0xf]  ;;  %vm6364_vm2 = vcmp.eq.f32.partialorder %v6363_v37, 8.507059e+37 }
 0x51f   :  { %7176 = vmatmul.bf16.vlgmr.msra.gmra.mxu0 %v21381_v11  ;;  %7202 = vmatmul.bf16.vlgmr.msrb.gmra.mxu2 %v21381_v11  ;;  %v6338_v20 = vmul.f32 %v21360_v32, %v6337_v18  ;;  %v15275_v18 = vld [vmem:[%s23825_s2 + $0x264] sm:$0xf0] }
 0x520   :  { %v21408_v59 = vpop.eup %15766  ;;  %7272 = vmatpush.bf16.msra.mxu0 %v13115_v51  ;;  %7298 = vmatpush.bf16.msrb.mxu2 %v13119_v62  ;;  %v13171_v10 = vor.u32 %v15275_v18, %v13170_v28 }
 0x521   :  { %v6355_v15 = vmul.f32 %v21408_v59, %v21346_v56  ;;  %7262 = vmatpush.bf16.msra.mxu3 %v13271_v17  ;;  %vm6360_vm13 = vweird.f32 %v21408_v59  ;;  %v6339_v62 = vadd.f32 %v21360_v32, %v6338_v20  ;;  %v15271_v17 = vld [vmem:[%s23825_s2 + $0x24c] sm:$0xf]  ;;  %v12988_v20 = vld [vmem:[%s23825_s2 + $0xf0] sm:$0xf0]  ;;  %v13122_v56 = vld [vmem:[%s23825_s2 + $0x1d8] sm:$0xf] }
 0x522   :  { %7237 = vmatpush.bf16.msrb.mxu1 %v13235_v19  ;;  %vm21489_vm1 = vmor %vm6359_vm15, %vm6360_vm13  ;;  %v13175_v35 = vor.u32 %v15271_v17, %v13172_v5  ;;  %v15208_v17 = vld [vmem:[%s23825_s2 + $0x54] sm:$0xf] }
 0x523   :  { %v6356_v27 = vsub.f32 1.0, %v6355_v15  ;;  %v13023_v15 = vor.u32 %v15232_v9, %v13020_v58  ;;  %v15220_v9 = vld [vmem:[%s23825_s2 + $0xac] sm:$0xf0]  ;;  %v12924_v5 = vld [vmem:[%s23825_s2 + $0x70] sm:$0xf0] }
 0x524   :  { %v6222_v29 = vpop.f32.mrf.mxu1  ;;  %7273 = vmatpush.bf16.msra.mxu0 %v13083_v44  ;;  %7299 = vmatpush.bf16.msrb.mxu2 %v13087_v24  ;;  %v12986_v24 = vld [vmem:[%s23825_s2 + $0xd0] sm:$0xf]  ;;  %v12927_v19 = vor.u32 %v15208_v17, %v12924_v5  ;;  %v15320_v17 = vld [vmem:[%s23825_s2 + $0x3d4] sm:$0xf] }
 0x525   :  { %v6223_v40 = vadd.f32 %v6222_v29, %v21149_v39  ;;  %v15236_v39 = vld [vmem:[%s23825_s2 + $0x12c] sm:$0xf0]  ;;  %v6357_v51 = vmul.f32 %v21408_v59, %v6356_v27  ;;  %7263 = vmatpush.bf16.msra.mxu3 %v13239_v1  ;;  %v15224_v29 = vld [vmem:[%s23825_s2 + $0xd4] sm:$0xf]  ;;  %v6343_v1 = vsel %vm21475_vm0, %v21360_v32, %v6339_v62 }
 0x526   :  { %7238 = vmatpush.bf16.msrb.mxu1 %v13203_v12  ;;  %v13019_v31 = vor.u32 %v15236_v39, %v13018_v3  ;;  %v12987_v39 = vor.u32 %v15228_v30, %v12986_v24  ;;  %v12991_v21 = vor.u32 %v15224_v29, %v12988_v20  ;;  %v12892_v30 = vld [vmem:[%s23825_s2 + $0x30] sm:$0xf0] }
 0x527   :  { %v6329_v4 = vadd.f32 %v6223_v40, %v651_v25  ;;  %v6358_v49 = vadd.f32 %v21408_v59, %v6357_v51  ;;  %v15267_v25 = vld [vmem:[%s23825_s2 + $0x224] sm:$0xf0]  ;;  %v6347_v40 = vor.u32 1.1754944e-38, %v6346_v7  ;;  %v12956_v51 = vld [vmem:[%s23825_s2 + $0xb0] sm:$0xf0] }
 0x528   :  { %7274 = vmatpush.bf16.msra.mxu0 %v13051_v61  ;;  %7300 = vmatpush.bf16.msrb.mxu2 %v13055_v23  ;;  %v13139_v32 = vor.u32 %v15267_v25, %v13138_v55  ;;  %v12922_v7 = vld [vmem:[%s23825_s2 + $0x50] sm:$0xf]  ;;  %v13092_v55 = vld [vmem:[%s23825_s2 + $0x1b8] sm:$0xf0] }
 0x529   :  { %15768 = vtanh.f32 %v6329_v4  ;;  %7264 = vmatpush.bf16.msra.mxu3 %v13207_v57  ;;  %v6348_v23 = vsel %vm6345_vm3, %v6347_v40, %v6343_v1  ;;  %v12954_v4 = vld [vmem:[%s23825_s2 + $0x90] sm:$0xf] }
 0x52a   :  { %v6248_v44 = vpop.f32.mrf.mxu3  ;;  %7239 = vmatpush.bf16.msrb.mxu1 %v13171_v10  ;;  %v12955_v28 = vor.u32 %v15220_v9, %v12954_v4  ;;  %v15212_v10 = vld [vmem:[%s23825_s2 + $0x6c] sm:$0xf0]  ;;  %v15237_v4 = vld [vmem:[%s23825_s2 + $0x134] sm:$0xf0] }
 0x52b   :  { %v6249_v42 = vadd.f32 %v6248_v44, %v21197_v34  ;;  %v6362_v34 = vsel %vm21489_vm1, %v21408_v59, %v6358_v49  ;;  %v15263_v59 = vld [vmem:[%s23825_s2 + $0x20c] sm:$0xf]  ;;  %v15204_v49 = vld [vmem:[%s23825_s2 + $0x2c] sm:$0xf0]  ;;  %v15200_v44 = vld [vmem:[%s23825_s2 + $0x14] sm:$0xf] }
 0x52c   :  { %v6224_v45 = vpop.f32.mrf.mxu1  ;;  %v6367_v12 = vsel %vm6364_vm2, %v6366_v16, %v6362_v34  ;;  %7275 = vmatpush.bf16.msra.mxu0 %v13019_v31  ;;  %7301 = vmatpush.bf16.msrb.mxu2 %v13023_v15  ;;  %v13143_v62 = vor.u32 %v15263_v59, %v13140_v13  ;;  %v15261_v16 = vld [vmem:[%s23825_s2 + $0x1f4] sm:$0xf0]  ;;  %v13124_v31 = vld [vmem:[%s23825_s2 + $0x1f8] sm:$0xf0]  ;;  %v12891_v15 = vor.u32 %v15204_v49, %v12890_v47 }
 0x52d   :  { %v6330_v50 = vadd.f32 %v6249_v42, %v680_v54  ;;  %v6389_v27 = vmul.f32 %v6367_v12, %v20614_v26  ;;  %v15216_v26 = vld [vmem:[%s23825_s2 + $0x94] sm:$0xf]  ;;  %7265 = vmatpush.bf16.msra.mxu3 %v13175_v35  ;;  %v12923_v54 = vor.u32 %v15212_v10, %v12922_v7  ;;  %v15257_v42 = vld [vmem:[%s23825_s2 + $0x1dc] sm:$0xf]  ;;  %v12895_v29 = vor.u32 %v15200_v44, %v12892_v30  ;;  %v13090_v34 = vld [vmem:[%s23825_s2 + $0x198] sm:$0xf] }
 0x52e   :  { %7240 = vmatpush.bf16.msrb.mxu1 %v13139_v32  ;;  %v12959_v18 = vor.u32 %v15216_v26, %v12956_v51  ;;  %v13123_v20 = vor.u32 %v15261_v16, %v13122_v56  ;;  %v13127_v1 = vor.u32 %v15257_v42, %v13124_v31  ;;  %v15253_v45 = vld [vmem:[%s23825_s2 + $0x1b4] sm:$0xf0]  ;;  %v15249_v35 = vld [vmem:[%s23825_s2 + $0x19c] sm:$0xf]  ;;  %v15324_v10 = vld [vmem:[%s23825_s2 + $0x3ec] sm:$0xf0] }
 0x52f   :  { %v15769_v61 = vpop.eup %15768  ;;  %v12871_v3 = vmul.f32 -1.442695, %v6330_v50  ;;  %7228 = vmatmul.bf16.vlgmr.msrb.gmra.mxu0 %v21381_v11  ;;  %7254 = vmatmul.bf16.vlgmr.msra.gmra.mxu2 %v21381_v11  ;;  %v13091_v40 = vor.u32 %v15253_v45, %v13090_v34  ;;  %v13095_v12 = vor.u32 %v15249_v35, %v13092_v55  ;;  %v13058_v50 = vld [vmem:[%s23825_s2 + $0x158] sm:$0xf]  ;;  %v15241_v13 = vld [vmem:[%s23825_s2 + $0x15c] sm:$0xf] }
 0x530   :  { %v6390_v37 = vmul.f32 %v15769_v61, %v6348_v23  ;;  %7276 = vmatpush.bf16.msra.mxu0 %v12987_v39  ;;  %7302 = vmatpush.bf16.msrb.mxu2 %v12991_v21  ;;  %v15245_v59 = vld [vmem:[%s23825_s2 + $0x174] sm:$0xf0]  ;;  %v15233_v26 = vld [vmem:[%s23825_s2 + $0x11c] sm:$0xf]  ;;  %v13338_v42 = vld [vmem:[%s23825_s2 + $0x390] sm:$0xf] }
 0x531   :  { %15770 = vpow2.f32 %v12871_v3  ;;  %7266 = vmatpush.bf16.msra.mxu3 %v13143_v62  ;;  %v13059_v3 = vor.u32 %v15245_v59, %v13058_v50  ;;  %v13026_v21 = vld [vmem:[%s23825_s2 + $0x118] sm:$0xf]  ;;  %v13028_v51 = vld [vmem:[%s23825_s2 + $0x138] sm:$0xf0]  ;;  %v15316_v31 = vld [vmem:[%s23825_s2 + $0x3ac] sm:$0xf0] }
 0x532   :  { %v21531_v58 = vadd.f32 %v6390_v37, %v6389_v27  ;;  %v6250_v57 = vpop.f32.mrf.mxu3  ;;  %v13060_v27 = vld [vmem:[%s23825_s2 + $0x178] sm:$0xf0]  ;;  %v13031_v7 = vor.u32 %v15233_v26, %v13028_v51  ;;  %v15229_v49 = vld [vmem:[%s23825_s2 + $0xf4] sm:$0xf0]  ;;  %v13340_v34 = vld [vmem:[%s23825_s2 + $0x3b0] sm:$0xf0] }
 0x533   :  { %v13063_v39 = vor.u32 %v15241_v13, %v13060_v27  ;;  %v13370_v57 = vld [vmem:[%s23825_s2 + $0x3d0] sm:$0xf]  ;;  %v15225_v44 = vld [vmem:[%s23825_s2 + $0xdc] sm:$0xf]  ;;  %v12962_v45 = vld [vmem:[%s23825_s2 + $0x98] sm:$0xf] }
 0x534   :  { %7277 = vmatpush.bf16.msra.mxu0 %v12955_v28  ;;  %7303 = vmatpush.bf16.msrb.mxu2 %v12959_v18  ;;  %v13027_v18 = vor.u32 %v15237_v4, %v13026_v21  ;;  %v13371_v56 = vor.u32 %v15324_v10, %v13370_v57  ;;  %v15221_v35 = vld [vmem:[%s23825_s2 + $0xb4] sm:$0xf0]  ;;  %v15217_v55 = vld [vmem:[%s23825_s2 + $0x9c] sm:$0xf]  ;;  %v13306_v50 = vld [vmem:[%s23825_s2 + $0x350] sm:$0xf] }
 0x535   :  { %v12963_v59 = vor.u32 %v15221_v35, %v12962_v45  ;;  %v15304_v27 = vld [vmem:[%s23825_s2 + $0x354] sm:$0xf]  ;;  %v12932_v21 = vld [vmem:[%s23825_s2 + $0x78] sm:$0xf0]  ;;  %v15300_v26 = vld [vmem:[%s23825_s2 + $0x32c] sm:$0xf0] }
 0x536   :  { %v15296_v57 = vld [vmem:[%s23825_s2 + $0x314] sm:$0xf]  ;;  %v15201_v10 = vld [vmem:[%s23825_s2 + $0x1c] sm:$0xf]  ;;  %v13178_v45 = vld [vmem:[%s23825_s2 + $0x250] sm:$0xf] }
 0x537   :  { %v15771_v46 = vpop.eup %15770  ;;  %v15276_v35 = vld [vmem:[%s23825_s2 + $0x26c] sm:$0xf0] }
 0x538   :  { %v6373_v24 = vadd.f32 1.0, %v15771_v46  ;;  %7278 = vmatpush.bf16.msra.mxu0 %v12923_v54  ;;  %7304 = vmatpush.bf16.msrb.mxu2 %v12927_v19  ;;  %v13372_v46 = vld [vmem:[%s23825_s2 + $0x3f0] sm:$0xf0]  ;;  %v12994_v54 = vld [vmem:[%s23825_s2 + $0xd8] sm:$0xf] }
 0x539   :  { %v13375_v16 = vor.u32 %v15320_v17, %v13372_v46  ;;  %v12900_v17 = vld [vmem:[%s23825_s2 + $0x38] sm:$0xf0] }
 0x53a   :  { %15772 = vrcp.f32 %v6373_v24  ;;  %v6385_v23 = vand.u32 2147483648, %v6373_v24  ;;  %v6383_v9 = vand.u32 2147483647, %v6373_v24  ;;  %vm6379_vm5 = vweird.f32 %v6373_v24 }
 0x53b   :  { %15774 = vtanh.f32 %v21531_v58 }
 0x53c   :  { %7279 = vmatpush.bf16.msra.mxu0 %v12891_v15  ;;  %7305 = vmatpush.bf16.msrb.mxu2 %v12895_v29  ;;  %v6386_v28 = vor.u32 1.1754944e-38, %v6385_v23  ;;  %vm6384_vm7 = vcmp.eq.f32.partialorder %v6383_v9, 8.507059e+37  ;;  %v12995_v29 = vor.u32 %v15229_v49, %v12994_v54  ;;  %v12930_v23 = vld [vmem:[%s23825_s2 + $0x58] sm:$0xf]  ;;  %v13274_v9 = vld [vmem:[%s23825_s2 + $0x310] sm:$0xf] }
 0x53d   :  { %v13242_v54 = vld [vmem:[%s23825_s2 + $0x2d0] sm:$0xf] }
 0x53e   :  { %v15292_v49 = vld [vmem:[%s23825_s2 + $0x2ec] sm:$0xf0] }
 0x53f   :  { %7280 = vmatmul.bf16.vlgmr.msra.gmra.mxu0 %v21381_v11  ;;  %7306 = vmatmul.bf16.vlgmr.msrb.gmra.mxu2 %v21381_v11 }
 0x540   :  { %v15773_v25 = vpop.eup %15772  ;;  %7324 = vmatpush.bf16.msrb.mxu0 %v13123_v20  ;;  %7350 = vmatpush.bf16.msra.mxu2 %v13127_v1  ;;  %v15312_v1 = vld [vmem:[%s23825_s2 + $0x394] sm:$0xf] }
 0x541   :  { %v6375_v32 = vmul.f32 %v15773_v25, %v6373_v24  ;;  %vm6380_vm4 = vweird.f32 %v15773_v25  ;;  %v15775_v19 = vpop.eup %15774  ;;  %v12996_v24 = vld [vmem:[%s23825_s2 + $0xf8] sm:$0xf0] }
 0x542   :  { %vm6381_vm6 = vmor %vm6379_vm5, %vm6380_vm4  ;;  %v12999_v20 = vor.u32 %v15225_v44, %v12996_v24  ;;  %v15288_v44 = vld [vmem:[%s23825_s2 + $0x2d4] sm:$0xf] }
 0x543   :  { %v6376_v61 = vsub.f32 1.0, %v6375_v32  ;;  %v15308_v32 = vld [vmem:[%s23825_s2 + $0x36c] sm:$0xf0]  ;;  %v13244_v24 = vld [vmem:[%s23825_s2 + $0x2f0] sm:$0xf0] }
 0x544   :  { %7325 = vmatpush.bf16.msrb.mxu0 %v13091_v40  ;;  %7351 = vmatpush.bf16.msra.mxu2 %v13095_v12  ;;  %v13339_v40 = vor.u32 %v15316_v31, %v13338_v42  ;;  %v13343_v12 = vor.u32 %v15312_v1, %v13340_v34  ;;  %v13307_v4 = vor.u32 %v15308_v32, %v13306_v50  ;;  %v13210_v42 = vld [vmem:[%s23825_s2 + $0x290] sm:$0xf]  ;;  %v15264_v32 = vld [vmem:[%s23825_s2 + $0x214] sm:$0xf] }
 0x545   :  { %v6377_v37 = vmul.f32 %v15773_v25, %v6376_v61  ;;  %v13308_v61 = vld [vmem:[%s23825_s2 + $0x370] sm:$0xf0]  ;;  %v15284_v31 = vld [vmem:[%s23825_s2 + $0x2ac] sm:$0xf0] }
 0x546   :  { %v13211_v1 = vor.u32 %v15284_v31, %v13210_v42  ;;  %v15268_v50 = vld [vmem:[%s23825_s2 + $0x22c] sm:$0xf0]  ;;  %v13252_v42 = vld [vmem:[%s23825_s2 + $0x2f8] sm:$0xf0] }
 0x547   :  { %v6378_v62 = vadd.f32 %v15773_v25, %v6377_v37  ;;  %v13311_v37 = vor.u32 %v15304_v27, %v13308_v61  ;;  %v15325_v27 = vld [vmem:[%s23825_s2 + $0x3f4] sm:$0xf0]  ;;  %v15321_v61 = vld [vmem:[%s23825_s2 + $0x3dc] sm:$0xf] }
 0x548   :  { %7326 = vmatpush.bf16.msrb.mxu0 %v13059_v3  ;;  %7352 = vmatpush.bf16.msra.mxu2 %v13063_v39  ;;  %v15213_v3 = vld [vmem:[%s23825_s2 + $0x74] sm:$0xf0]  ;;  %v15209_v39 = vld [vmem:[%s23825_s2 + $0x5c] sm:$0xf] }
 0x549   :  { %v6382_v5 = vsel %vm6381_vm6, %v15773_v25, %v6378_v62  ;;  %v12964_v25 = vld [vmem:[%s23825_s2 + $0xb8] sm:$0xf0]  ;;  %v12931_v51 = vor.u32 %v15213_v3, %v12930_v23  ;;  %v12935_v62 = vor.u32 %v15209_v39, %v12932_v21 }
 0x54a   :  { %v6387_v47 = vsel %vm6384_vm7, %v6386_v28, %v6382_v5  ;;  %v12967_v13 = vor.u32 %v15217_v55, %v12964_v25  ;;  %v13276_v28 = vld [vmem:[%s23825_s2 + $0x330] sm:$0xf0]  ;;  %v13275_v5 = vor.u32 %v15300_v26, %v13274_v9  ;;  %v13380_v23 = vld [vmem:[%s23825_s2 + $0x3f8] sm:$0xf0]  ;;  %v15317_v9 = vld [vmem:[%s23825_s2 + $0x3b4] sm:$0xf0] }
 0x54b   :  { %v21634_v30 = vmul.f32 %v15775_v19, %v6387_v47  ;;  %v13279_v46 = vor.u32 %v15296_v57, %v13276_v28  ;;  %v12903_v47 = vor.u32 %v15201_v10, %v12900_v17  ;;  %v15272_v55 = vld [vmem:[%s23825_s2 + $0x254] sm:$0xf]  ;;  %v15313_v26 = vld [vmem:[%s23825_s2 + $0x39c] sm:$0xf]  ;;  %v13314_v28 = vld [vmem:[%s23825_s2 + $0x358] sm:$0xf] }
 0x54c   :  { %7327 = vmatpush.bf16.msrb.mxu0 %v13027_v18  ;;  %7353 = vmatpush.bf16.msra.mxu2 %v13031_v7  ;;  %v12898_v18 = vld [vmem:[%s23825_s2 + $0x18] sm:$0xf]  ;;  %v13180_v25 = vld [vmem:[%s23825_s2 + $0x270] sm:$0xf0]  ;;  %v13316_v10 = vld [vmem:[%s23825_s2 + $0x378] sm:$0xf0] }
 0x54d   :  { %v21644_v15 = vpack.c.bf16 %v21634_v30, %v21634_v30  ;;  %v15205_v7 = vld [vmem:[%s23825_s2 + $0x34] sm:$0xf0] }
 0x54e   :  { %v12899_v19 = vor.u32 %v15205_v7, %v12898_v18  ;;  %v15309_v18 = vld [vmem:[%s23825_s2 + $0x374] sm:$0xf0]  ;;  %v15305_v7 = vld [vmem:[%s23825_s2 + $0x35c] sm:$0xf] }
 0x54f   :  { %7189 = vmatmul.bf16.vlgmr.msra.gmra.mxu1 %v21644_v15  ;;  %7215 = vmatmul.bf16.vlgmr.msrb.gmra.mxu3 %v21644_v15  ;;  %v13315_v17 = vor.u32 %v15309_v18, %v13314_v28  ;;  %v13584_v18 = vld [vmem:[%s23825_s2 + $0x180] sm:$0xf] }
 0x550   :  { %7285 = vmatpush.bf16.msra.mxu1 %v13371_v56  ;;  %7311 = vmatpush.bf16.msrb.mxu3 %v13375_v16  ;;  %v13243_v56 = vor.u32 %v15292_v49, %v13242_v54  ;;  %v13247_v16 = vor.u32 %v15288_v44, %v13244_v24  ;;  %v15301_v54 = vld [vmem:[%s23825_s2 + $0x334] sm:$0xf0] }
 0x551   :  { %7328 = vmatpush.bf16.msrb.mxu0 %v12995_v29  ;;  %7354 = vmatpush.bf16.msra.mxu2 %v12999_v20  ;;  %v15280_v29 = vld [vmem:[%s23825_s2 + $0x294] sm:$0xf]  ;;  %v13250_v24 = vld [vmem:[%s23825_s2 + $0x2d8] sm:$0xf] }
 0x552   :  { %v13212_v20 = vld [vmem:[%s23825_s2 + $0x2b0] sm:$0xf0] }
 0x553   :  { %v13215_v34 = vor.u32 %v15280_v29, %v13212_v20  ;;  %v13218_v20 = vld [vmem:[%s23825_s2 + $0x298] sm:$0xf] }
 0x554   :  { %7286 = vmatpush.bf16.msra.mxu1 %v13339_v40  ;;  %7312 = vmatpush.bf16.msrb.mxu3 %v13343_v12  ;;  %v13179_v40 = vor.u32 %v15276_v35, %v13178_v45  ;;  %v13183_v12 = vor.u32 %v15272_v55, %v13180_v25  ;;  %v13220_v45 = vld [vmem:[%s23825_s2 + $0x2b8] sm:$0xf0]  ;;  %v13186_v25 = vld [vmem:[%s23825_s2 + $0x258] sm:$0xf] }
 0x555   :  { %7329 = vmatpush.bf16.msrb.mxu0 %v12963_v59  ;;  %7355 = vmatpush.bf16.msra.mxu2 %v12967_v13  ;;  %v13148_v59 = vld [vmem:[%s23825_s2 + $0x230] sm:$0xf0]  ;;  %v13378_v13 = vld [vmem:[%s23825_s2 + $0x3d8] sm:$0xf] }
 0x556   :  { %v13151_v39 = vor.u32 %v15264_v32, %v13148_v59  ;;  %v13379_v21 = vor.u32 %v15325_v27, %v13378_v13  ;;  %v13154_v59 = vld [vmem:[%s23825_s2 + $0x218] sm:$0xf]  ;;  %v15265_v27 = vld [vmem:[%s23825_s2 + $0x21c] sm:$0xf] }
 0x557   :  { %v15269_v13 = vld [vmem:[%s23825_s2 + $0x234] sm:$0xf0] }
 0x558   :  { %7287 = vmatpush.bf16.msra.mxu1 %v13307_v4  ;;  %7313 = vmatpush.bf16.msrb.mxu3 %v13311_v37  ;;  %v13383_v4 = vor.u32 %v15321_v61, %v13380_v23  ;;  %v13346_v37 = vld [vmem:[%s23825_s2 + $0x398] sm:$0xf]  ;;  %v13156_v61 = vld [vmem:[%s23825_s2 + $0x238] sm:$0xf0]  ;;  %v13155_v23 = vor.u32 %v15269_v13, %v13154_v59  ;;  %v15346_v59 = vld [vmem:[%s23825_s2 + $0x9c] sm:$0xf0] }
 0x559   :  { %7330 = vmatpush.bf16.msrb.mxu0 %v12931_v51  ;;  %7356 = vmatpush.bf16.msra.mxu2 %v12935_v62  ;;  %v13348_v51 = vld [vmem:[%s23825_s2 + $0x3b8] sm:$0xf0]  ;;  %v13347_v62 = vor.u32 %v15317_v9, %v13346_v37  ;;  %v13616_v37 = vld [vmem:[%s23825_s2 + $0x1c0] sm:$0xf]  ;;  %v15342_v13 = vld [vmem:[%s23825_s2 + $0x84] sm:$0xf] }
 0x55a   :  { %v13351_v57 = vor.u32 %v15313_v26, %v13348_v51  ;;  %v15386_v9 = vld [vmem:[%s23825_s2 + $0x1dc] sm:$0xf0]  ;;  %v15382_v26 = vld [vmem:[%s23825_s2 + $0x1c4] sm:$0xf] }
 0x55c   :  { %7288 = vmatpush.bf16.msra.mxu1 %v13275_v5  ;;  %7314 = vmatpush.bf16.msrb.mxu3 %v13279_v46  ;;  %v13319_v5 = vor.u32 %v15305_v7, %v13316_v10  ;;  %v13282_v46 = vld [vmem:[%s23825_s2 + $0x318] sm:$0xf]  ;;  %v15378_v7 = vld [vmem:[%s23825_s2 + $0x19c] sm:$0xf0]  ;;  %v15374_v10 = vld [vmem:[%s23825_s2 + $0x184] sm:$0xf] }
 0x55d   :  { %7331 = vmatpush.bf16.msrb.mxu0 %v12899_v19  ;;  %7357 = vmatpush.bf16.msra.mxu2 %v12903_v47  ;;  %v15297_v19 = vld [vmem:[%s23825_s2 + $0x31c] sm:$0xf]  ;;  %v13283_v49 = vor.u32 %v15301_v54, %v13282_v46  ;;  %v13552_v54 = vld [vmem:[%s23825_s2 + $0x140] sm:$0xf] }
 0x55e   :  { %v13284_v47 = vld [vmem:[%s23825_s2 + $0x338] sm:$0xf0] }
 0x55f   :  { %7241 = vmatmul.bf16.vlgmr.msrb.gmra.mxu1 %v21644_v15  ;;  %7267 = vmatmul.bf16.vlgmr.msra.gmra.mxu3 %v21644_v15  ;;  %v13287_v44 = vor.u32 %v15297_v19, %v13284_v47  ;;  %v15370_v19 = vld [vmem:[%s23825_s2 + $0x15c] sm:$0xf0]  ;;  %v15366_v47 = vld [vmem:[%s23825_s2 + $0x144] sm:$0xf] }
 0x560   :  { %7289 = vmatpush.bf16.msra.mxu1 %v13243_v56  ;;  %7315 = vmatpush.bf16.msrb.mxu3 %v13247_v16  ;;  %v15293_v56 = vld [vmem:[%s23825_s2 + $0x2f4] sm:$0xf0]  ;;  %v15289_v16 = vld [vmem:[%s23825_s2 + $0x2dc] sm:$0xf] }
 0x561   :  { %7332 = vmatmul.bf16.vlgmr.msrb.gmra.mxu0 %v21381_v11  ;;  %7358 = vmatmul.bf16.vlgmr.msra.gmra.mxu2 %v21381_v11  ;;  %v13146_v11 = vld [vmem:[%s23825_s2 + $0x210] sm:$0xf]  ;;  %v13251_v31 = vor.u32 %v15293_v56, %v13250_v24  ;;  %v13255_v29 = vor.u32 %v15289_v16, %v13252_v42  ;;  %v13554_v24 = vld [vmem:[%s23825_s2 + $0x160] sm:$0xf0]  ;;  %v13520_v42 = vld [vmem:[%s23825_s2 + $0x100] sm:$0xf] }
 0x562   :  { %v13147_v3 = vor.u32 %v15268_v50, %v13146_v11  ;;  %v13188_v11 = vld [vmem:[%s23825_s2 + $0x278] sm:$0xf0]  ;;  %v13557_v56 = vor.u32 %v15366_v47, %v13554_v24  ;;  %v15383_v47 = vld [vmem:[%s23825_s2 + $0x1cc] sm:$0xf] }
 0x564   :  { %7290 = vmatpush.bf16.msra.mxu1 %v13211_v1  ;;  %7316 = vmatpush.bf16.msrb.mxu3 %v13215_v34  ;;  %v15285_v1 = vld [vmem:[%s23825_s2 + $0x2b4] sm:$0xf0]  ;;  %v15281_v34 = vld [vmem:[%s23825_s2 + $0x29c] sm:$0xf] }
 0x565   :  { %v13219_v35 = vor.u32 %v15285_v1, %v13218_v20  ;;  %v13223_v55 = vor.u32 %v15281_v34, %v13220_v45  ;;  %v13522_v1 = vld [vmem:[%s23825_s2 + $0x120] sm:$0xf0]  ;;  %v13488_v45 = vld [vmem:[%s23825_s2 + $0xc0] sm:$0xf] }
 0x568   :  { %7291 = vmatpush.bf16.msra.mxu1 %v13179_v40  ;;  %7317 = vmatpush.bf16.msrb.mxu3 %v13183_v12  ;;  %v15277_v40 = vld [vmem:[%s23825_s2 + $0x274] sm:$0xf0]  ;;  %v15273_v12 = vld [vmem:[%s23825_s2 + $0x25c] sm:$0xf] }
 0x569   :  { %v13187_v50 = vor.u32 %v15277_v40, %v13186_v25  ;;  %v13191_v32 = vor.u32 %v15273_v12, %v13188_v11  ;;  %v13490_v12 = vld [vmem:[%s23825_s2 + $0xe0] sm:$0xf0] }
 0x56c   :  { %7292 = vmatpush.bf16.msra.mxu1 %v13147_v3  ;;  %7318 = vmatpush.bf16.msrb.mxu3 %v13151_v39  ;;  %v13159_v3 = vor.u32 %v15265_v27, %v13156_v61  ;;  %v13458_v61 = vld [vmem:[%s23825_s2 + $0xa0] sm:$0xf0] }
 0x56f   :  { %7293 = vmatmul.bf16.vlgmr.msra.gmra.mxu1 %v21644_v15  ;;  %7319 = vmatmul.bf16.vlgmr.msrb.gmra.mxu3 %v21644_v15 }
 0x570   :  { %7337 = vmatpush.bf16.msrb.mxu1 %v13379_v21  ;;  %7363 = vmatpush.bf16.msra.mxu3 %v13383_v4 }
 0x574   :  { %7338 = vmatpush.bf16.msrb.mxu1 %v13347_v62  ;;  %7364 = vmatpush.bf16.msra.mxu3 %v13351_v57  ;;  %v13617_v62 = vor.u32 %v15386_v9, %v13616_v37  ;;  %v15334_v37 = vld [vmem:[%s23825_s2 + $0x44] sm:$0xf] }
 0x576   :  { %8292 = vmatpush.bf16.msra.mxu0 %v13617_v62 }
 0x578   :  { %7339 = vmatpush.bf16.msrb.mxu1 %v13315_v17  ;;  %7365 = vmatpush.bf16.msra.mxu3 %v13319_v5  ;;  %v13585_v17 = vor.u32 %v15378_v7, %v13584_v18  ;;  %v13586_v5 = vld [vmem:[%s23825_s2 + $0x1a0] sm:$0xf0]  ;;  %v15330_v18 = vld [vmem:[%s23825_s2 + $0x1c] sm:$0xf0] }
 0x579   :  { %v13589_v46 = vor.u32 %v15374_v10, %v13586_v5  ;;  %v15326_v7 = vld [vmem:[%s23825_s2 + $0x4] sm:$0xf]  ;;  %v13624_v5 = vld [vmem:[%s23825_s2 + $0x1c8] sm:$0xf] }
 0x57a   :  { %8293 = vmatpush.bf16.msra.mxu0 %v13585_v17  ;;  %v13394_v17 = vld [vmem:[%s23825_s2 + $0x20] sm:$0xf0] }
 0x57c   :  { %7340 = vmatpush.bf16.msrb.mxu1 %v13283_v49  ;;  %7366 = vmatpush.bf16.msra.mxu3 %v13287_v44  ;;  %v13553_v44 = vor.u32 %v15370_v19, %v13552_v54  ;;  %v13397_v54 = vor.u32 %v15326_v7, %v13394_v17  ;;  %v15446_v7 = vld [vmem:[%s23825_s2 + $0x3c4] sm:$0xf] }
 0x57e   :  { %8294 = vmatpush.bf16.msra.mxu0 %v13553_v44  ;;  %v13626_v44 = vld [vmem:[%s23825_s2 + $0x1e8] sm:$0xf0] }
 0x57f   :  { %v13629_v24 = vor.u32 %v15383_v47, %v13626_v44 }
 0x580   :  { %7341 = vmatpush.bf16.msrb.mxu1 %v13251_v31  ;;  %7367 = vmatpush.bf16.msra.mxu3 %v13255_v29  ;;  %v15362_v31 = vld [vmem:[%s23825_s2 + $0x11c] sm:$0xf0]  ;;  %v15358_v29 = vld [vmem:[%s23825_s2 + $0x104] sm:$0xf] }
 0x581   :  { %v13521_v20 = vor.u32 %v15362_v31, %v13520_v42  ;;  %v13525_v34 = vor.u32 %v15358_v29, %v13522_v1  ;;  %v13592_v31 = vld [vmem:[%s23825_s2 + $0x188] sm:$0xf] }
 0x582   :  { %v15379_v29 = vld [vmem:[%s23825_s2 + $0x1a4] sm:$0xf0] }
 0x583   :  { %8295 = vmatpush.bf16.msra.mxu0 %v13521_v20  ;;  %v15375_v20 = vld [vmem:[%s23825_s2 + $0x18c] sm:$0xf]  ;;  %v13593_v1 = vor.u32 %v15379_v29, %v13592_v31  ;;  %v13840_v29 = vld [vmem:[%s23825_s2 + $0x380] sm:$0xf] }
 0x584   :  { %7342 = vmatpush.bf16.msrb.mxu1 %v13219_v35  ;;  %7368 = vmatpush.bf16.msra.mxu3 %v13223_v55  ;;  %v15354_v35 = vld [vmem:[%s23825_s2 + $0xdc] sm:$0xf0]  ;;  %v15350_v55 = vld [vmem:[%s23825_s2 + $0xc4] sm:$0xf] }
 0x585   :  { %v13489_v40 = vor.u32 %v15354_v35, %v13488_v45  ;;  %v13493_v11 = vor.u32 %v15350_v55, %v13490_v12 }
 0x587   :  { %8296 = vmatpush.bf16.msra.mxu0 %v13489_v40  ;;  %v15371_v40 = vld [vmem:[%s23825_s2 + $0x164] sm:$0xf0] }
 0x588   :  { %7343 = vmatpush.bf16.msrb.mxu1 %v13187_v50  ;;  %7369 = vmatpush.bf16.msra.mxu3 %v13191_v32  ;;  %v13456_v32 = vld [vmem:[%s23825_s2 + $0x80] sm:$0xf] }
 0x589   :  { %v13457_v27 = vor.u32 %v15346_v59, %v13456_v32  ;;  %v15367_v32 = vld [vmem:[%s23825_s2 + $0x14c] sm:$0xf] }
 0x58a   :  { %v13562_v59 = vld [vmem:[%s23825_s2 + $0x168] sm:$0xf0] }
 0x58b   :  { %8297 = vmatpush.bf16.msra.mxu0 %v13457_v27  ;;  %v13565_v27 = vor.u32 %v15367_v32, %v13562_v59  ;;  %v15343_v32 = vld [vmem:[%s23825_s2 + $0x8c] sm:$0xf]  ;;  %v23894_v59 = vld [vmem:[#allocation19_spill] sm:$0xff] }
 0x58c   :  { %7344 = vmatpush.bf16.msrb.mxu1 %v13155_v23  ;;  %7370 = vmatpush.bf16.msra.mxu3 %v13159_v3  ;;  %v13461_v23 = vor.u32 %v15342_v13, %v13458_v61  ;;  %v13424_v3 = vld [vmem:[%s23825_s2 + $0x40] sm:$0xf] }
 0x58f   :  { %7345 = vmatmul.bf16.vlgmr.msrb.gmra.mxu1 %v21644_v15  ;;  %7371 = vmatmul.bf16.vlgmr.msra.gmra.mxu3 %v21644_v15  ;;  %v13618_v15 = vld [vmem:[%s23825_s2 + $0x1e0] sm:$0xf0] }
 0x590   :  { %v13621_v57 = vor.u32 %v15382_v26, %v13618_v15 }
 0x592   :  { %8318 = vmatpush.bf16.msrb.mxu2 %v13621_v57  ;;  %v13392_v57 = vld [vmem:[%s23825_s2] sm:$0xf] }
 0x593   :  { %v13393_v10 = vor.u32 %v15330_v18, %v13392_v57  ;;  %v13872_v57 = vld [vmem:[%s23825_s2 + $0x3c0] sm:$0xf] }
 0x594   :  { %v15450_v18 = vld [vmem:[%s23825_s2 + $0x3dc] sm:$0xf0] }
 0x595   :  { %v13873_v17 = vor.u32 %v15450_v18, %v13872_v57  ;;  %v15339_v57 = vld [vmem:[%s23825_s2 + $0x64] sm:$0xf0]  ;;  %v23895_v18 = vld [vmem:[#allocation20_spill] sm:$0xff] }
 0x596   :  { %8319 = vmatpush.bf16.msrb.mxu2 %v13589_v46  ;;  %v15387_v46 = vld [vmem:[%s23825_s2 + $0x1e4] sm:$0xf0] }
 0x597   :  { %v13625_v19 = vor.u32 %v15387_v46, %v13624_v5  ;;  %v13874_v5 = vld [vmem:[%s23825_s2 + $0x3e0] sm:$0xf0]  ;;  %v13496_v46 = vld [vmem:[%s23825_s2 + $0xc8] sm:$0xf]  ;;  %8305 = vmatpush.bf16.msra.mxu1 %v13873_v17 }
 0x598   :  { %v13877_v44 = vor.u32 %v15446_v7, %v13874_v5  ;;  %v569_v7 = vadd.f32 %v23895_v18, %v17104_v41 }
 0x59a   :  { %8320 = vmatpush.bf16.msrb.mxu2 %v13557_v56  ;;  %8331 = vmatpush.bf16.msrb.mxu3 %v13877_v44 }
 0x59c   :  { %v21866_v39 = vpop.f32.mrf.mxu0 }
 0x59e   :  { %8321 = vmatpush.bf16.msrb.mxu2 %v13525_v34  ;;  %v13594_v34 = vld [vmem:[%s23825_s2 + $0x1a8] sm:$0xf0] }
 0x59f   :  { %v13597_v35 = vor.u32 %v15375_v20, %v13594_v34  ;;  %v15442_v20 = vld [vmem:[%s23825_s2 + $0x39c] sm:$0xf0]  ;;  %v13842_v34 = vld [vmem:[%s23825_s2 + $0x3a0] sm:$0xf0] }
 0x5a2   :  { %v21868_v21 = vpop.f32.mrf.mxu2  ;;  %8322 = vmatpush.bf16.msrb.mxu2 %v13493_v11 }
 0x5a4   :  { %v7179_v4 = vpop.f32.mrf.mxu0 }
 0x5a5   :  { %v15338_v4 = vld [vmem:[%s23825_s2 + $0x5c] sm:$0xf0] }
 0x5a6   :  { %8323 = vmatpush.bf16.msrb.mxu2 %v13461_v23  ;;  %v13425_v26 = vor.u32 %v15338_v4, %v13424_v3  ;;  %v23893_v23 = vld [vmem:[#allocation6_spill] sm:$0xff] }
 0x5a7   :  { %v13528_v4 = vld [vmem:[%s23825_s2 + $0x108] sm:$0xf] }
 0x5a8   :  { %8298 = vmatpush.bf16.msra.mxu0 %v13425_v26  ;;  %v15359_v26 = vld [vmem:[%s23825_s2 + $0x10c] sm:$0xf] }
 0x5aa   :  { %v7205_v51 = vpop.f32.mrf.mxu2 }
 0x5ab   :  { %v13426_v51 = vld [vmem:[%s23825_s2 + $0x60] sm:$0xf0] }
 0x5ac   :  { %v21882_v28 = vpop.f32.mrf.mxu0  ;;  %v13429_v62 = vor.u32 %v15334_v37, %v13426_v51  ;;  %8299 = vmatpush.bf16.msra.mxu0 %v13393_v10  ;;  %v15363_v37 = vld [vmem:[%s23825_s2 + $0x124] sm:$0xf0] }
 0x5ad   :  { %v13529_v51 = vor.u32 %v15363_v37, %v13528_v4  ;;  %v15430_v37 = vld [vmem:[%s23825_s2 + $0x344] sm:$0xf] }
 0x5ae   :  { %8324 = vmatpush.bf16.msrb.mxu2 %v13429_v62 }
 0x5b0   :  { %8344 = vmatpush.bf16.msrb.mxu0 %v13625_v19 }
 0x5b2   :  { %v21905_v49 = vpop.f32.mrf.mxu2  ;;  %8325 = vmatpush.bf16.msrb.mxu2 %v13397_v54  ;;  %v15355_v54 = vld [vmem:[%s23825_s2 + $0xe4] sm:$0xf0] }
 0x5b4   :  { %v7231_v16 = vpop.f32.mrf.mxu0  ;;  %8345 = vmatpush.bf16.msrb.mxu0 %v13593_v1  ;;  %v15438_v1 = vld [vmem:[%s23825_s2 + $0x384] sm:$0xf] }
 0x5b6   :  { %8370 = vmatpush.bf16.msra.mxu2 %v13629_v24  ;;  %v13497_v24 = vor.u32 %v15355_v54, %v13496_v46  ;;  %v15335_v46 = vld [vmem:[%s23825_s2 + $0x4c] sm:$0xf] }
 0x5b7   :  { %v13434_v54 = vld [vmem:[%s23825_s2 + $0x68] sm:$0xf0] }
 0x5ba   :  { %v7257_v25 = vpop.f32.mrf.mxu2  ;;  %8371 = vmatpush.bf16.msra.mxu2 %v13597_v35  ;;  %v13841_v35 = vor.u32 %v15442_v20, %v13840_v29 }
 0x5bb   :  { %v13560_v25 = vld [vmem:[%s23825_s2 + $0x148] sm:$0xf] }
 0x5bc   :  { %v21934_v50 = vpop.f32.mrf.mxu0  ;;  %v13561_v11 = vor.u32 %v15371_v40, %v13560_v25  ;;  %v13464_v25 = vld [vmem:[%s23825_s2 + $0x88] sm:$0xf]  ;;  %8306 = vmatpush.bf16.msra.mxu1 %v13841_v35 }
 0x5bd   :  { %v15347_v40 = vld [vmem:[%s23825_s2 + $0xa4] sm:$0xf0] }
 0x5be   :  { %8346 = vmatpush.bf16.msrb.mxu0 %v13561_v11  ;;  %8372 = vmatpush.bf16.msra.mxu2 %v13565_v27  ;;  %v13465_v11 = vor.u32 %v15347_v40, %v13464_v25  ;;  %v13400_v25 = vld [vmem:[%s23825_s2 + $0x8] sm:$0xf] }
 0x5bf   :  { %v15331_v40 = vld [vmem:[%s23825_s2 + $0x24] sm:$0xf0] }
 0x5c2   :  { %v21957_v9 = vpop.f32.mrf.mxu2  ;;  %8347 = vmatpush.bf16.msrb.mxu0 %v13529_v51  ;;  %v13432_v51 = vld [vmem:[%s23825_s2 + $0x48] sm:$0xf] }
 0x5c4   :  { %v7283_v15 = vpop.f32.mrf.mxu0 }
 0x5c6   :  { %8348 = vmatpush.bf16.msrb.mxu0 %v13497_v24 }
 0x5ca   :  { %v7309_v42 = vpop.f32.mrf.mxu2  ;;  %8349 = vmatpush.bf16.msrb.mxu0 %v13465_v11 }
 0x5cc   :  { %v7190_v56 = vpop.f32.mrf.mxu1 }
 0x5cd   :  { %v7191_v16 = vadd.f32 %v7190_v56, %v21866_v39  ;;  %v23892_v39 = vld [vmem:[#allocation5_spill] sm:$0xff]  ;;  %v15351_v56 = vld [vmem:[%s23825_s2 + $0xcc] sm:$0xf] }
 0x5cf   :  { %v7384_v45 = vadd.f32 %v7191_v16, %v23892_v39  ;;  %v13498_v16 = vld [vmem:[%s23825_s2 + $0xe8] sm:$0xf0] }
 0x5d0   :  { %v13501_v42 = vor.u32 %v15351_v56, %v13498_v16  ;;  %v13433_v56 = vor.u32 %v15339_v57, %v13432_v51  ;;  %v13437_v16 = vor.u32 %v15335_v46, %v13434_v54 }
 0x5d1   :  { %v13384_v55 = vmul.f32 -1.442695, %v7384_v45 }
 0x5d2   :  { %v7216_v12 = vpop.f32.mrf.mxu3  ;;  %8350 = vmatpush.bf16.msrb.mxu0 %v13433_v56  ;;  %v15410_v56 = vld [vmem:[%s23825_s2 + $0x29c] sm:$0xf0] }
 0x5d3   :  { %15776 = vpow2.f32 %v13384_v55  ;;  %v7217_v13 = vadd.f32 %v7216_v12, %v21868_v21  ;;  %v13530_v21 = vld [vmem:[%s23825_s2 + $0x128] sm:$0xf0]  ;;  %v13845_v55 = vor.u32 %v15438_v1, %v13842_v34  ;;  %v15422_v34 = vld [vmem:[%s23825_s2 + $0x304] sm:$0xf] }
 0x5d4   :  { %v7192_v61 = vpop.f32.mrf.mxu1  ;;  %v13533_v15 = vor.u32 %v15359_v26, %v13530_v21  ;;  %v13810_v26 = vld [vmem:[%s23825_s2 + $0x360] sm:$0xf0] }
 0x5d5   :  { %v7385_v3 = vadd.f32 %v7217_v13, %v23893_v23  ;;  %v540_v13 = vadd.f32 %v23894_v59, %v17095_v33  ;;  %8332 = vmatpush.bf16.msrb.mxu3 %v13845_v55  ;;  %v13808_v23 = vld [vmem:[%s23825_s2 + $0x340] sm:$0xf]  ;;  %v13813_v5 = vor.u32 %v15430_v37, %v13810_v26  ;;  %v13402_v59 = vld [vmem:[%s23825_s2 + $0x28] sm:$0xf0]  ;;  %v15414_v26 = vld [vmem:[%s23825_s2 + $0x2c4] sm:$0xf] }
 0x5d6   :  { %8373 = vmatpush.bf16.msra.mxu2 %v13533_v15  ;;  %v15418_v37 = vld [vmem:[%s23825_s2 + $0x2dc] sm:$0xf0] }
 0x5d7   :  { %v13385_v62 = vmul.f32 -1.442695, %v7385_v3  ;;  %v15434_v3 = vld [vmem:[%s23825_s2 + $0x35c] sm:$0xf0] }
 0x5d8   :  { %v13809_v4 = vor.u32 %v15434_v3, %v13808_v23 }
 0x5d9   :  { %v15777_v10 = vpop.eup %15776  ;;  %15778 = vpow2.f32 %v13385_v62  ;;  %8333 = vmatpush.bf16.msrb.mxu3 %v13813_v5 }
 0x5da   :  { %v22044_v19 = vadd.f32 1.0, %v15777_v10  ;;  %v7218_v47 = vpop.f32.mrf.mxu3  ;;  %8374 = vmatpush.bf16.msra.mxu2 %v13501_v42  ;;  %8307 = vmatpush.bf16.msra.mxu1 %v13809_v4  ;;  %v15426_v42 = vld [vmem:[%s23825_s2 + $0x31c] sm:$0xf0] }
 0x5db   :  { %v13744_v4 = vld [vmem:[%s23825_s2 + $0x2c0] sm:$0xf] }
 0x5dc   :  { %15780 = vrcp.f32 %v22044_v19  ;;  %v7242_v31 = vpop.f32.mrf.mxu1  ;;  %v7401_v47 = vand.u32 2147483647, %v22044_v19  ;;  %v7403_v29 = vand.u32 2147483648, %v22044_v19  ;;  %vm7397_vm9 = vweird.f32 %v22044_v19 }
 0x5dd   :  { %v7243_v39 = vadd.f32 %v7242_v31, %v21882_v28  ;;  %v13466_v28 = vld [vmem:[%s23825_s2 + $0xa8] sm:$0xf0] }
 0x5de   :  { %v22066_v45 = vpop.f32.mrf.mxu0  ;;  %v13469_v61 = vor.u32 %v15343_v32, %v13466_v28  ;;  %v13401_v28 = vor.u32 %v15331_v40, %v13400_v25  ;;  %vm7402_vm11 = vcmp.eq.f32.partialorder %v7401_v47, 8.507059e+37  ;;  %v7404_v51 = vor.u32 1.1754944e-38, %v7403_v29  ;;  %v13680_v25 = vld [vmem:[%s23825_s2 + $0x240] sm:$0xf] }
 0x5df   :  { %v15779_v12 = vpop.eup %15778  ;;  %v7386_v62 = vadd.f32 %v7243_v39, %v540_v13  ;;  %v13778_v39 = vld [vmem:[%s23825_s2 + $0x320] sm:$0xf0]  ;;  %v15402_v40 = vld [vmem:[%s23825_s2 + $0x25c] sm:$0xf0] }
 0x5e0   :  { %v22082_v27 = vadd.f32 1.0, %v15779_v12  ;;  %8375 = vmatpush.bf16.msra.mxu2 %v13469_v61  ;;  %v13781_v55 = vor.u32 %v15422_v34, %v13778_v39  ;;  %v15327_v12 = vld [vmem:[%s23825_s2 + $0xc] sm:$0xf]  ;;  %8351 = vmatpush.bf16.msrb.mxu0 %v13401_v28  ;;  %v13682_v28 = vld [vmem:[%s23825_s2 + $0x260] sm:$0xf0] }
 0x5e1   :  { %v13405_v61 = vor.u32 %v15327_v12, %v13402_v59 }
 0x5e2   :  { %v22099_v21 = vpop.eup %15780  ;;  %15782 = vrcp.f32 %v22082_v27  ;;  %v7268_v15 = vpop.f32.mrf.mxu3  ;;  %8334 = vmatpush.bf16.msrb.mxu3 %v13781_v55  ;;  %v7422_v18 = vand.u32 2147483648, %v22082_v27  ;;  %v7420_v46 = vand.u32 2147483647, %v22082_v27  ;;  %vm7416_vm13 = vweird.f32 %v22082_v27 }
 0x5e3   :  { %v7393_v10 = vmul.f32 %v22099_v21, %v22044_v19  ;;  %v7269_v17 = vadd.f32 %v7268_v15, %v21905_v49  ;;  %v13776_v49 = vld [vmem:[%s23825_s2 + $0x300] sm:$0xf]  ;;  %15784 = vtanh.f32 %v7386_v62  ;;  %vm7398_vm8 = vweird.f32 %v22099_v21  ;;  %v13746_v15 = vld [vmem:[%s23825_s2 + $0x2e0] sm:$0xf0] }
 0x5e4   :  { %v22117_v44 = vpop.f32.mrf.mxu2  ;;  %v7244_v24 = vpop.f32.mrf.mxu1  ;;  %v13777_v1 = vor.u32 %v15426_v42, %v13776_v49  ;;  %8376 = vmatpush.bf16.msra.mxu2 %v13437_v16  ;;  %vm7399_vm10 = vmor %vm7397_vm9, %vm7398_vm8  ;;  %v13745_v62 = vor.u32 %v15418_v37, %v13744_v4  ;;  %v15406_v42 = vld [vmem:[%s23825_s2 + $0x284] sm:$0xf]  ;;  %v7423_v34 = vor.u32 1.1754944e-38, %v7422_v18  ;;  %vm7421_vm15 = vcmp.eq.f32.partialorder %v7420_v46, 8.507059e+37  ;;  %v13648_v37 = vld [vmem:[%s23825_s2 + $0x200] sm:$0xf] }
 0x5e5   :  { %v7394_v31 = vsub.f32 1.0, %v7393_v10  ;;  %v7387_v20 = vadd.f32 %v7269_v17, %v569_v7  ;;  %v13749_v10 = vor.u32 %v15414_v26, %v13746_v15  ;;  %v13712_v24 = vld [vmem:[%s23825_s2 + $0x280] sm:$0xf]  ;;  %v13880_v18 = vld [vmem:[%s23825_s2 + $0x3c8] sm:$0xf] }
 0x5e6   :  { %v7335_v35 = vpop.f32.mrf.mxu0  ;;  %8308 = vmatpush.bf16.msra.mxu1 %v13777_v1  ;;  %v13713_v29 = vor.u32 %v15410_v56, %v13712_v24  ;;  %v15394_v26 = vld [vmem:[%s23825_s2 + $0x21c] sm:$0xf0]  ;;  %v13882_v46 = vld [vmem:[%s23825_s2 + $0x3e8] sm:$0xf0] }
 0x5e7   :  { %v7395_v11 = vmul.f32 %v22099_v21, %v7394_v31  ;;  %v13386_v32 = vmul.f32 -1.442695, %v7387_v20  ;;  %8335 = vmatpush.bf16.msrb.mxu3 %v13749_v10  ;;  %v13714_v31 = vld [vmem:[%s23825_s2 + $0x2a0] sm:$0xf0]  ;;  %v23896_v35 = vld [vmem:[#allocation15_spill] sm:$0xff]  ;;  %v13649_v15 = vor.u32 %v15394_v26, %v13648_v37 }
 0x5e8   :  { %v15783_v13 = vpop.eup %15782  ;;  %8377 = vmatpush.bf16.msra.mxu2 %v13405_v61  ;;  %v13717_v20 = vor.u32 %v15406_v42, %v13714_v31  ;;  %v15447_v10 = vld [vmem:[%s23825_s2 + $0x3cc] sm:$0xf] }
 0x5e9   :  { %v7412_v23 = vmul.f32 %v15783_v13, %v22082_v27  ;;  %v7396_v3 = vadd.f32 %v22099_v21, %v7395_v11  ;;  %15786 = vpow2.f32 %v13386_v32  ;;  %v15785_v17 = vpop.eup %15784  ;;  %vm7417_vm12 = vweird.f32 %v15783_v13  ;;  %v15398_v32 = vld [vmem:[%s23825_s2 + $0x244] sm:$0xf] }
 0x5ea   :  { %v7270_v19 = vpop.f32.mrf.mxu3  ;;  %8309 = vmatpush.bf16.msra.mxu1 %v13745_v62  ;;  %vm7418_vm14 = vmor %vm7416_vm13, %vm7417_vm12  ;;  %v13681_v27 = vor.u32 %v15402_v40, %v13680_v25  ;;  %v13685_v4 = vor.u32 %v15398_v32, %v13682_v28  ;;  %v13816_v25 = vld [vmem:[%s23825_s2 + $0x348] sm:$0xf] }
 0x5eb   :  { %v7413_v57 = vsub.f32 1.0, %v7412_v23  ;;  %v7400_v7 = vsel %vm7399_vm10, %v22099_v21, %v7396_v3  ;;  %8336 = vmatpush.bf16.msrb.mxu3 %v13717_v20  ;;  %v23897_v19 = vld [vmem:[#allocation16_spill] sm:$0xff]  ;;  %v13850_v20 = vld [vmem:[%s23825_s2 + $0x3a8] sm:$0xf0]  ;;  %v15435_v40 = vld [vmem:[%s23825_s2 + $0x364] sm:$0xf0] }
 0x5ec   :  { %v7405_v5 = vsel %vm7402_vm11, %v7404_v51, %v7400_v7  ;;  %v7361_v54 = vpop.f32.mrf.mxu2  ;;  %v7294_v47 = vpop.f32.mrf.mxu1  ;;  %v15451_v7 = vld [vmem:[%s23825_s2 + $0x3e4] sm:$0xf0] }
 0x5ed   :  { %v7414_v16 = vmul.f32 %v15783_v13, %v7413_v57  ;;  %v7447_v49 = vmul.f32 %v15785_v17, %v7405_v5  ;;  %v7295_v21 = vadd.f32 %v7294_v47, %v21934_v50  ;;  %v13881_v5 = vor.u32 %v15451_v7, %v13880_v18 }
 0x5ee   :  { %8310 = vmatpush.bf16.msra.mxu1 %v13713_v29  ;;  %v13885_v47 = vor.u32 %v15447_v10, %v13882_v46  ;;  %v15380_v46 = vld [vmem:[%s23825_s2 + $0x1ac] sm:$0xf0] }
 0x5ef   :  { %v15787_v1 = vpop.eup %15786  ;;  %v7415_v39 = vadd.f32 %v15783_v13, %v7414_v16  ;;  %v7451_v55 = vadd.f32 %v7295_v21, %v23896_v35  ;;  %8337 = vmatpush.bf16.msrb.mxu3 %v13685_v4  ;;  %v13848_v16 = vld [vmem:[%s23825_s2 + $0x388] sm:$0xf]  ;;  %v15439_v21 = vld [vmem:[%s23825_s2 + $0x38c] sm:$0xf]  ;;  %v15384_v4 = vld [vmem:[%s23825_s2 + $0x1d4] sm:$0xf] }
 0x5f0   :  { %v22181_v50 = vadd.f32 1.0, %v15787_v1 }
 0x5f1   :  { %v7419_v12 = vsel %vm7418_vm14, %v15783_v13, %v7415_v39  ;;  %v13387_v11 = vmul.f32 -1.442695, %v7451_v55 }
 0x5f2   :  { %v7424_v59 = vsel %vm7421_vm15, %v7423_v34, %v7419_v12  ;;  %15788 = vrcp.f32 %v22181_v50  ;;  %v7320_v61 = vpop.f32.mrf.mxu3  ;;  %8311 = vmatpush.bf16.msra.mxu1 %v13681_v27  ;;  %v13853_v34 = vor.u32 %v15439_v21, %v13850_v20  ;;  %v7440_v39 = vand.u32 2147483647, %v22181_v50  ;;  %v15431_v12 = vld [vmem:[%s23825_s2 + $0x34c] sm:$0xf]  ;;  %v13752_v21 = vld [vmem:[%s23825_s2 + $0x2c8] sm:$0xf] }
 0x5f3   :  { %v7446_v23 = vmul.f32 %v7424_v59, %v21288_v63  ;;  %15790 = vpow2.f32 %v13387_v11  ;;  %v7321_v13 = vadd.f32 %v7320_v61, %v21957_v9  ;;  %v15390_v63 = vld [vmem:[%s23825_s2 + $0x204] sm:$0xf]  ;;  %v7442_v35 = vand.u32 2147483648, %v22181_v50  ;;  %v13818_v27 = vld [vmem:[%s23825_s2 + $0x368] sm:$0xf0] }
 0x5f4   :  { %v7296_v3 = vpop.f32.mrf.mxu1  ;;  %v13650_v9 = vld [vmem:[%s23825_s2 + $0x220] sm:$0xf0]  ;;  %v13817_v11 = vor.u32 %v15435_v40, %v13816_v25  ;;  %vm7436_vm1 = vweird.f32 %v22181_v50  ;;  %v13632_v59 = vld [vmem:[%s23825_s2 + $0x1d0] sm:$0xf]  ;;  %vm7441_vm3 = vcmp.eq.f32.partialorder %v7440_v39, 8.507059e+37 }
 0x5f5   :  { %v22204_v51 = vadd.f32 %v7447_v49, %v7446_v23  ;;  %v7452_v62 = vadd.f32 %v7321_v13, %v23897_v19  ;;  %v13653_v57 = vor.u32 %v15390_v63, %v13650_v9  ;;  %v15443_v49 = vld [vmem:[%s23825_s2 + $0x3a4] sm:$0xf0]  ;;  %v15388_v61 = vld [vmem:[%s23825_s2 + $0x1ec] sm:$0xf0]  ;;  %v13821_v23 = vor.u32 %v15431_v12, %v13818_v27  ;;  %v15423_v9 = vld [vmem:[%s23825_s2 + $0x30c] sm:$0xf] }
 0x5f6   :  { %8312 = vmatpush.bf16.msra.mxu1 %v13649_v15  ;;  %v13849_v29 = vor.u32 %v15443_v49, %v13848_v16  ;;  %v7443_v13 = vor.u32 1.1754944e-38, %v7442_v35  ;;  %v13784_v19 = vld [vmem:[%s23825_s2 + $0x308] sm:$0xf]  ;;  %v13633_v10 = vor.u32 %v15388_v61, %v13632_v59  ;;  %v13602_v16 = vld [vmem:[%s23825_s2 + $0x1b0] sm:$0xf0] }
 0x5f7   :  { %v13388_v17 = vmul.f32 -1.442695, %v7452_v62  ;;  %8338 = vmatpush.bf16.msrb.mxu3 %v13653_v57  ;;  %v15427_v62 = vld [vmem:[%s23825_s2 + $0x324] sm:$0xf0]  ;;  %v13786_v57 = vld [vmem:[%s23825_s2 + $0x328] sm:$0xf0] }
 0x5f8   :  { %v15789_v54 = vpop.eup %15788  ;;  %v13789_v49 = vor.u32 %v15423_v9, %v13786_v57  ;;  %v15372_v25 = vld [vmem:[%s23825_s2 + $0x16c] sm:$0xf0]  ;;  %v15368_v40 = vld [vmem:[%s23825_s2 + $0x154] sm:$0xf]  ;;  %v13720_v59 = vld [vmem:[%s23825_s2 + $0x288] sm:$0xf] }
 0x5f9   :  { %v15791_v24 = vpop.eup %15790  ;;  %v7432_v56 = vmul.f32 %v15789_v54, %v22181_v50  ;;  %15792 = vpow2.f32 %v13388_v17  ;;  %vm7437_vm0 = vweird.f32 %v15789_v54  ;;  %v13634_v50 = vld [vmem:[%s23825_s2 + $0x1f0] sm:$0xf0]  ;;  %v15411_v61 = vld [vmem:[%s23825_s2 + $0x2a4] sm:$0xf0]  ;;  %v23898_v9 = vld [vmem:[#allocation29_spill] sm:$0xff] }
 0x5fa   :  { %8357 = vmatpush.bf16.msrb.mxu1 %v13881_v5  ;;  %v22235_v42 = vadd.f32 1.0, %v15791_v24  ;;  %v7322_v31 = vpop.f32.mrf.mxu3  ;;  %15794 = vtanh.f32 %v22204_v51  ;;  %vm7438_vm2 = vmor %vm7436_vm1, %vm7437_vm0  ;;  %v13637_v17 = vor.u32 %v15384_v4, %v13634_v50  ;;  %v13600_v5 = vld [vmem:[%s23825_s2 + $0x190] sm:$0xf]  ;;  %v13570_v12 = vld [vmem:[%s23825_s2 + $0x170] sm:$0xf0] }
 0x5fb   :  { %v7433_v1 = vsub.f32 1.0, %v7432_v56  ;;  %8383 = vmatpush.bf16.msra.mxu3 %v13885_v47  ;;  %v15376_v56 = vld [vmem:[%s23825_s2 + $0x194] sm:$0xf]  ;;  %v15419_v31 = vld [vmem:[%s23825_s2 + $0x2e4] sm:$0xf0]  ;;  %v13601_v35 = vor.u32 %v15380_v46, %v13600_v5 }
 0x5fc   :  { %15796 = vrcp.f32 %v22235_v42  ;;  %v13753_v20 = vor.u32 %v15419_v31, %v13752_v21  ;;  %v15407_v4 = vld [vmem:[%s23825_s2 + $0x28c] sm:$0xf]  ;;  %v13538_v46 = vld [vmem:[%s23825_s2 + $0x130] sm:$0xf0]  ;;  %vm7464_vm6 = vweird.f32 %v22235_v42 }
 0x5fd   :  { %v7434_v55 = vmul.f32 %v15789_v54, %v7433_v1  ;;  %v15415_v1 = vld [vmem:[%s23825_s2 + $0x2cc] sm:$0xf] }
 0x5fe   :  { %8358 = vmatpush.bf16.msrb.mxu1 %v13849_v29  ;;  %v13568_v29 = vld [vmem:[%s23825_s2 + $0x150] sm:$0xf]  ;;  %v13722_v50 = vld [vmem:[%s23825_s2 + $0x2a8] sm:$0xf0] }
 0x5ff   :  { %v15793_v32 = vpop.eup %15792  ;;  %v7435_v28 = vadd.f32 %v15789_v54, %v7434_v55  ;;  %8384 = vmatpush.bf16.msra.mxu3 %v13853_v34  ;;  %v13754_v34 = vld [vmem:[%s23825_s2 + $0x2e8] sm:$0xf0]  ;;  %v13605_v55 = vor.u32 %v15376_v56, %v13602_v16  ;;  %v15403_v56 = vld [vmem:[%s23825_s2 + $0x264] sm:$0xf0]  ;;  %v7470_v16 = vand.u32 2147483648, %v22235_v42 }
 0x600   :  { %v22263_v3 = vadd.f32 1.0, %v15793_v32  ;;  %v15795_v37 = vpop.eup %15794  ;;  %v15399_v21 = vld [vmem:[%s23825_s2 + $0x24c] sm:$0xf] }
 0x601   :  { %v7439_v26 = vsel %vm7438_vm2, %v15789_v54, %v7435_v28  ;;  %v13785_v54 = vor.u32 %v15427_v62, %v13784_v19  ;;  %v13757_v28 = vor.u32 %v15415_v1, %v13754_v34  ;;  %v13573_v19 = vor.u32 %v15368_v40, %v13570_v12  ;;  %v13536_v62 = vld [vmem:[%s23825_s2 + $0x110] sm:$0xf]  ;;  %v13690_v31 = vld [vmem:[%s23825_s2 + $0x268] sm:$0xf0] }
 0x602   :  { %8359 = vmatpush.bf16.msrb.mxu1 %v13817_v11  ;;  %v22277_v15 = vpop.eup %15796  ;;  %v7444_v63 = vsel %vm7441_vm3, %v7443_v13, %v7439_v26  ;;  %15798 = vrcp.f32 %v22263_v3  ;;  %v13721_v13 = vor.u32 %v15411_v61, %v13720_v59  ;;  %v13569_v26 = vor.u32 %v15372_v25, %v13568_v29  ;;  %v13656_v61 = vld [vmem:[%s23825_s2 + $0x208] sm:$0xf]  ;;  %v13442_v29 = vld [vmem:[%s23825_s2 + $0x70] sm:$0xf0] }
 0x603   :  { %v22286_v18 = vmul.f32 %v15795_v37, %v7444_v63  ;;  %v7460_v7 = vmul.f32 %v22277_v15, %v22235_v42  ;;  %8385 = vmatpush.bf16.msra.mxu3 %v13821_v23  ;;  %v7489_v63 = vand.u32 2147483648, %v22263_v3  ;;  %vm7465_vm4 = vweird.f32 %v22277_v15 }
 0x604   :  { %vm7483_vm7 = vweird.f32 %v22263_v3  ;;  %vm22386_vm8 = vmor %vm7464_vm6, %vm7465_vm4  ;;  %v13693_v59 = vor.u32 %v15399_v21, %v13690_v31  ;;  %v15340_v21 = vld [vmem:[%s23825_s2 + $0x6c] sm:$0xf0]  ;;  %v15336_v31 = vld [vmem:[%s23825_s2 + $0x54] sm:$0xf] }
 0x605   :  { %v22298_v47 = vpack.c.bf16 %v22286_v18, %v22286_v18  ;;  %v7461_v24 = vsub.f32 1.0, %v7460_v7  ;;  %v7487_v7 = vand.u32 2147483647, %v22263_v3  ;;  %v7490_v25 = vor.u32 1.1754944e-38, %v7489_v63 }
 0x606   :  { %8360 = vmatpush.bf16.msrb.mxu1 %v13785_v54  ;;  %v13725_v54 = vor.u32 %v15407_v4, %v13722_v50  ;;  %v23903_v50 = vld [vmem:[#allocation30_spill] sm:$0xff] }
 0x607   :  { %8300 = vmatmul.bf16.vlgmr.msra.gmra.mxu0 %v22298_v47  ;;  %8326 = vmatmul.bf16.vlgmr.msrb.gmra.mxu2 %v22298_v47  ;;  %v7462_v32 = vmul.f32 %v22277_v15, %v7461_v24  ;;  %v13688_v24 = vld [vmem:[%s23825_s2 + $0x248] sm:$0xf]  ;;  %vm7488_vm10 = vcmp.eq.f32.partialorder %v7487_v7, 8.507059e+37  ;;  %v13472_v7 = vld [vmem:[%s23825_s2 + $0x90] sm:$0xf] }
 0x608   :  { %v22323_v39 = vpop.eup %15798  ;;  %8396 = vmatpush.bf16.msra.mxu0 %v13633_v10  ;;  %8422 = vmatpush.bf16.msrb.mxu2 %v13637_v17  ;;  %v15360_v10 = vld [vmem:[%s23825_s2 + $0x114] sm:$0xf] }
 0x609   :  { %v7479_v11 = vmul.f32 %v22323_v39, %v22263_v3  ;;  %8386 = vmatpush.bf16.msra.mxu3 %v13789_v49  ;;  %vm7484_vm5 = vweird.f32 %v22323_v39  ;;  %v7463_v5 = vadd.f32 %v22277_v15, %v7462_v32  ;;  %v13689_v49 = vor.u32 %v15403_v56, %v13688_v24  ;;  %v15328_v3 = vld [vmem:[%s23825_s2 + $0x14] sm:$0xf] }
 0x60a   :  { %8361 = vmatpush.bf16.msrb.mxu1 %v13753_v20  ;;  %v7468_v20 = vand.u32 2147483647, %v22235_v42  ;;  %vm22400_vm9 = vmor %vm7483_vm7, %vm7484_vm5  ;;  %v13541_v12 = vor.u32 %v15360_v10, %v13538_v46 }
 0x60b   :  { %v7480_v37 = vsub.f32 1.0, %v7479_v11  ;;  %v15352_v11 = vld [vmem:[%s23825_s2 + $0xd4] sm:$0xf]  ;;  %v7467_v32 = vsel %vm22386_vm8, %v22277_v15, %v7463_v5 }
 0x60c   :  { %v7346_v27 = vpop.f32.mrf.mxu1  ;;  %8397 = vmatpush.bf16.msra.mxu0 %v13601_v35  ;;  %8423 = vmatpush.bf16.msrb.mxu2 %v13605_v55  ;;  %v13504_v35 = vld [vmem:[%s23825_s2 + $0xd0] sm:$0xf]  ;;  %vm7469_vm11 = vcmp.eq.f32.partialorder %v7468_v20, 8.507059e+37  ;;  %v13474_v5 = vld [vmem:[%s23825_s2 + $0xb0] sm:$0xf0] }
 0x60d   :  { %v7347_v23 = vadd.f32 %v7346_v27, %v22066_v45  ;;  %v15364_v45 = vld [vmem:[%s23825_s2 + $0x12c] sm:$0xf0]  ;;  %v7481_v17 = vmul.f32 %v22323_v39, %v7480_v37  ;;  %8387 = vmatpush.bf16.msra.mxu3 %v13757_v28  ;;  %v13506_v27 = vld [vmem:[%s23825_s2 + $0xf0] sm:$0xf0] }
 0x60e   :  { %8362 = vmatpush.bf16.msrb.mxu1 %v13721_v13  ;;  %v15356_v55 = vld [vmem:[%s23825_s2 + $0xec] sm:$0xf0]  ;;  %v13537_v40 = vor.u32 %v15364_v45, %v13536_v62  ;;  %v7471_v13 = vor.u32 1.1754944e-38, %v7470_v16 }
 0x60f   :  { %v7453_v57 = vadd.f32 %v7347_v23, %v23898_v9  ;;  %v7482_v1 = vadd.f32 %v22323_v39, %v7481_v17  ;;  %v15395_v23 = vld [vmem:[%s23825_s2 + $0x224] sm:$0xf0]  ;;  %v13505_v9 = vor.u32 %v15356_v55, %v13504_v35  ;;  %v15348_v17 = vld [vmem:[%s23825_s2 + $0xac] sm:$0xf0] }
 0x610   :  { %8398 = vmatpush.bf16.msra.mxu0 %v13569_v26  ;;  %8424 = vmatpush.bf16.msrb.mxu2 %v13573_v19  ;;  %v13657_v37 = vor.u32 %v15395_v23, %v13656_v61  ;;  %v13658_v26 = vld [vmem:[%s23825_s2 + $0x228] sm:$0xf0]  ;;  %v7472_v45 = vsel %vm7469_vm11, %v7471_v13, %v7467_v32  ;;  %v13473_v56 = vor.u32 %v15348_v17, %v13472_v7  ;;  %v13408_v35 = vld [vmem:[%s23825_s2 + $0x10] sm:$0xf]  ;;  %v13608_v61 = vld [vmem:[%s23825_s2 + $0x198] sm:$0xf] }
 0x611   :  { %15800 = vtanh.f32 %v7453_v57  ;;  %8388 = vmatpush.bf16.msra.mxu3 %v13725_v54  ;;  %v13509_v57 = vor.u32 %v15352_v11, %v13506_v27  ;;  %v15332_v55 = vld [vmem:[%s23825_s2 + $0x2c] sm:$0xf0]  ;;  %v15385_v11 = vld [vmem:[%s23825_s2 + $0x1dc] sm:$0xf]  ;;  %v15381_v23 = vld [vmem:[%s23825_s2 + $0x1b4] sm:$0xf0] }
 0x612   :  { %v7372_v34 = vpop.f32.mrf.mxu3  ;;  %8363 = vmatpush.bf16.msrb.mxu1 %v13689_v49  ;;  %v13440_v49 = vld [vmem:[%s23825_s2 + $0x50] sm:$0xf]  ;;  %v13642_v27 = vld [vmem:[%s23825_s2 + $0x1f8] sm:$0xf0]  ;;  %v13409_v32 = vor.u32 %v15332_v55, %v13408_v35  ;;  %v15365_v17 = vld [vmem:[%s23825_s2 + $0x134] sm:$0xf0] }
 0x613   :  { %v7373_v42 = vadd.f32 %v7372_v34, %v22117_v44  ;;  %v7486_v44 = vsel %vm22400_vm9, %v22323_v39, %v7482_v1  ;;  %v15391_v39 = vld [vmem:[%s23825_s2 + $0x20c] sm:$0xf]  ;;  %v13441_v1 = vor.u32 %v15340_v21, %v13440_v49  ;;  %v13445_v34 = vor.u32 %v15336_v31, %v13442_v29  ;;  %v15377_v13 = vld [vmem:[%s23825_s2 + $0x19c] sm:$0xf]  ;;  %v15452_v29 = vld [vmem:[%s23825_s2 + $0x3ec] sm:$0xf0] }
 0x614   :  { %v7348_v28 = vpop.f32.mrf.mxu1  ;;  %v7491_v4 = vsel %vm7488_vm10, %v7490_v25, %v7486_v44  ;;  %8399 = vmatpush.bf16.msra.mxu0 %v13537_v40  ;;  %8425 = vmatpush.bf16.msrb.mxu2 %v13541_v12  ;;  %v13661_v46 = vor.u32 %v15391_v39, %v13658_v26  ;;  %v13640_v40 = vld [vmem:[%s23825_s2 + $0x1d8] sm:$0xf] }
 0x615   :  { %v7454_v15 = vadd.f32 %v7373_v42, %v23903_v50  ;;  %v7513_v19 = vmul.f32 %v7491_v4, %v21531_v58  ;;  %v15344_v58 = vld [vmem:[%s23825_s2 + $0x94] sm:$0xf]  ;;  %8389 = vmatpush.bf16.msra.mxu3 %v13693_v59  ;;  %v15389_v12 = vld [vmem:[%s23825_s2 + $0x1f4] sm:$0xf0]  ;;  %v13645_v59 = vor.u32 %v15385_v11, %v13642_v27  ;;  %v13610_v4 = vld [vmem:[%s23825_s2 + $0x1b8] sm:$0xf0] }
 0x616   :  { %8364 = vmatpush.bf16.msrb.mxu1 %v13657_v37  ;;  %v13477_v16 = vor.u32 %v15344_v58, %v13474_v5  ;;  %v13410_v42 = vld [vmem:[%s23825_s2 + $0x30] sm:$0xf0]  ;;  %v13641_v28 = vor.u32 %v15389_v12, %v13640_v40  ;;  %v13613_v37 = vor.u32 %v15377_v13, %v13610_v4  ;;  %v13576_v39 = vld [vmem:[%s23825_s2 + $0x158] sm:$0xf]  ;;  %v13514_v40 = vld [vmem:[%s23825_s2 + $0xf8] sm:$0xf0] }
 0x617   :  { %v15801_v62 = vpop.eup %15800  ;;  %v13389_v63 = vmul.f32 -1.442695, %v7454_v15  ;;  %8352 = vmatmul.bf16.vlgmr.msrb.gmra.mxu0 %v22298_v47  ;;  %8378 = vmatmul.bf16.vlgmr.msra.gmra.mxu2 %v22298_v47  ;;  %v13413_v44 = vor.u32 %v15328_v3, %v13410_v42  ;;  %v13609_v15 = vor.u32 %v15381_v23, %v13608_v61  ;;  %v13512_v35 = vld [vmem:[%s23825_s2 + $0xd8] sm:$0xf]  ;;  %v15353_v42 = vld [vmem:[%s23825_s2 + $0xdc] sm:$0xf] }
 0x618   :  { %v7514_v10 = vmul.f32 %v15801_v62, %v7472_v45  ;;  %8400 = vmatpush.bf16.msra.mxu0 %v13505_v9  ;;  %8426 = vmatpush.bf16.msrb.mxu2 %v13509_v57  ;;  %v15369_v62 = vld [vmem:[%s23825_s2 + $0x15c] sm:$0xf]  ;;  %v13517_v61 = vor.u32 %v15353_v42, %v13514_v40  ;;  %v15440_v23 = vld [vmem:[%s23825_s2 + $0x394] sm:$0xf]  ;;  %v13480_v4 = vld [vmem:[%s23825_s2 + $0x98] sm:$0xf] }
 0x619   :  { %15802 = vpow2.f32 %v13389_v63  ;;  %8390 = vmatpush.bf16.msra.mxu3 %v13661_v46  ;;  %v13578_v45 = vld [vmem:[%s23825_s2 + $0x178] sm:$0xf0]  ;;  %v13858_v13 = vld [vmem:[%s23825_s2 + $0x3b0] sm:$0xf0]  ;;  %v15420_v40 = vld [vmem:[%s23825_s2 + $0x2ec] sm:$0xf0] }
 0x61a   :  { %v22443_v54 = vadd.f32 %v7514_v10, %v7513_v19  ;;  %v7374_v24 = vpop.f32.mrf.mxu3  ;;  %v15373_v19 = vld [vmem:[%s23825_s2 + $0x174] sm:$0xf0]  ;;  %v13581_v7 = vor.u32 %v15369_v62, %v13578_v45  ;;  %v15361_v46 = vld [vmem:[%s23825_s2 + $0x11c] sm:$0xf]  ;;  %v15436_v62 = vld [vmem:[%s23825_s2 + $0x36c] sm:$0xf0] }
 0x61b   :  { %v13577_v57 = vor.u32 %v15373_v19, %v13576_v39  ;;  %v13544_v10 = vld [vmem:[%s23825_s2 + $0x118] sm:$0xf]  ;;  %v13546_v24 = vld [vmem:[%s23825_s2 + $0x138] sm:$0xf0]  ;;  %v13824_v19 = vld [vmem:[%s23825_s2 + $0x350] sm:$0xf] }
 0x61c   :  { %8401 = vmatpush.bf16.msra.mxu0 %v13473_v56  ;;  %8427 = vmatpush.bf16.msrb.mxu2 %v13477_v16  ;;  %v13888_v16 = vld [vmem:[%s23825_s2 + $0x3d0] sm:$0xf]  ;;  %v13545_v21 = vor.u32 %v15365_v17, %v13544_v10  ;;  %v13549_v31 = vor.u32 %v15361_v46, %v13546_v24  ;;  %v15341_v10 = vld [vmem:[%s23825_s2 + $0x74] sm:$0xf0]  ;;  %v15337_v17 = vld [vmem:[%s23825_s2 + $0x5c] sm:$0xf] }
 0x61d   :  { %v13889_v11 = vor.u32 %v15452_v29, %v13888_v16  ;;  %v13792_v24 = vld [vmem:[%s23825_s2 + $0x310] sm:$0xf]  ;;  %v13416_v29 = vld [vmem:[%s23825_s2 + $0x18] sm:$0xf] }
 0x61f   :  { %v15803_v20 = vpop.eup %15802 }
 0x620   :  { %v7497_v25 = vadd.f32 1.0, %v15803_v20  ;;  %8402 = vmatpush.bf16.msra.mxu0 %v13441_v1  ;;  %8428 = vmatpush.bf16.msrb.mxu2 %v13445_v34  ;;  %v15448_v20 = vld [vmem:[%s23825_s2 + $0x3d4] sm:$0xf] }
 0x621   :  { %v13890_v34 = vld [vmem:[%s23825_s2 + $0x3f0] sm:$0xf0] }
 0x622   :  { %15804 = vrcp.f32 %v7497_v25  ;;  %v7509_v9 = vand.u32 2147483648, %v7497_v25  ;;  %v7507_v5 = vand.u32 2147483647, %v7497_v25  ;;  %vm7503_vm13 = vweird.f32 %v7497_v25 }
 0x623   :  { %15806 = vtanh.f32 %v22443_v54  ;;  %v13893_v27 = vor.u32 %v15448_v20, %v13890_v34  ;;  %v15333_v20 = vld [vmem:[%s23825_s2 + $0x34] sm:$0xf0]  ;;  %v13418_v34 = vld [vmem:[%s23825_s2 + $0x38] sm:$0xf0] }
 0x624   :  { %8403 = vmatpush.bf16.msra.mxu0 %v13409_v32  ;;  %8429 = vmatpush.bf16.msrb.mxu2 %v13413_v44  ;;  %v7510_v49 = vor.u32 1.1754944e-38, %v7509_v9  ;;  %vm7508_vm15 = vcmp.eq.f32.partialorder %v7507_v5, 8.507059e+37  ;;  %v13856_v32 = vld [vmem:[%s23825_s2 + $0x390] sm:$0xf]  ;;  %v15432_v9 = vld [vmem:[%s23825_s2 + $0x354] sm:$0xf]  ;;  %v13825_v5 = vor.u32 %v15436_v62, %v13824_v19 }
 0x625   :  { %v15444_v44 = vld [vmem:[%s23825_s2 + $0x3ac] sm:$0xf0] }
 0x626   :  { %v13857_v39 = vor.u32 %v15444_v44, %v13856_v32 }
 0x627   :  { %8404 = vmatmul.bf16.vlgmr.msra.gmra.mxu0 %v22298_v47  ;;  %8430 = vmatmul.bf16.vlgmr.msrb.gmra.mxu2 %v22298_v47 }
 0x628   :  { %v15805_v50 = vpop.eup %15804  ;;  %8448 = vmatpush.bf16.msrb.mxu0 %v13641_v28  ;;  %8474 = vmatpush.bf16.msra.mxu2 %v13645_v59 }
 0x629   :  { %v7499_v26 = vmul.f32 %v15805_v50, %v7497_v25  ;;  %vm7504_vm12 = vweird.f32 %v15805_v50  ;;  %v15807_v55 = vpop.eup %15806  ;;  %v15357_v25 = vld [vmem:[%s23825_s2 + $0xf4] sm:$0xf0] }
 0x62a   :  { %vm7505_vm14 = vmor %vm7503_vm13, %vm7504_vm12  ;;  %v13513_v59 = vor.u32 %v15357_v25, %v13512_v35  ;;  %v13417_v25 = vor.u32 %v15333_v20, %v13416_v29  ;;  %v13832_v20 = vld [vmem:[%s23825_s2 + $0x358] sm:$0xf] }
 0x62b   :  { %v7500_v63 = vsub.f32 1.0, %v7499_v26  ;;  %v13861_v26 = vor.u32 %v15440_v23, %v13858_v13  ;;  %v15408_v23 = vld [vmem:[%s23825_s2 + $0x294] sm:$0xf] }
 0x62c   :  { %8449 = vmatpush.bf16.msrb.mxu0 %v13609_v15  ;;  %8475 = vmatpush.bf16.msra.mxu2 %v13613_v37  ;;  %v15345_v15 = vld [vmem:[%s23825_s2 + $0x9c] sm:$0xf]  ;;  %v13730_v13 = vld [vmem:[%s23825_s2 + $0x2b0] sm:$0xf0] }
 0x62d   :  { %v7501_v58 = vmul.f32 %v15805_v50, %v7500_v63  ;;  %v13482_v37 = vld [vmem:[%s23825_s2 + $0xb8] sm:$0xf0] }
 0x62e   :  { %v13485_v63 = vor.u32 %v15345_v15, %v13482_v37  ;;  %v13696_v15 = vld [vmem:[%s23825_s2 + $0x250] sm:$0xf] }
 0x62f   :  { %v7502_v56 = vadd.f32 %v15805_v50, %v7501_v58  ;;  %v13450_v58 = vld [vmem:[%s23825_s2 + $0x78] sm:$0xf0]  ;;  %v15404_v37 = vld [vmem:[%s23825_s2 + $0x26c] sm:$0xf0] }
 0x630   :  { %8450 = vmatpush.bf16.msrb.mxu0 %v13577_v57  ;;  %8476 = vmatpush.bf16.msra.mxu2 %v13581_v7  ;;  %v13826_v57 = vld [vmem:[%s23825_s2 + $0x370] sm:$0xf0]  ;;  %v13448_v7 = vld [vmem:[%s23825_s2 + $0x58] sm:$0xf]  ;;  %v13697_v19 = vor.u32 %v15404_v37, %v13696_v15  ;;  %v15409_v37 = vld [vmem:[%s23825_s2 + $0x29c] sm:$0xf] }
 0x631   :  { %v7506_v1 = vsel %vm7505_vm14, %v15805_v50, %v7502_v56  ;;  %v15349_v50 = vld [vmem:[%s23825_s2 + $0xb4] sm:$0xf0]  ;;  %v13829_v46 = vor.u32 %v15432_v9, %v13826_v57  ;;  %v15428_v56 = vld [vmem:[%s23825_s2 + $0x32c] sm:$0xf0]  ;;  %v13449_v16 = vor.u32 %v15341_v10, %v13448_v7  ;;  %v13666_v9 = vld [vmem:[%s23825_s2 + $0x230] sm:$0xf0] }
 0x632   :  { %v7511_v3 = vsel %vm7508_vm15, %v7510_v49, %v7506_v1  ;;  %v13481_v45 = vor.u32 %v15349_v50, %v13480_v4  ;;  %v13453_v49 = vor.u32 %v15337_v17, %v13450_v58  ;;  %v15329_v1 = vld [vmem:[%s23825_s2 + $0x1c] sm:$0xf]  ;;  %v13793_v35 = vor.u32 %v15428_v56, %v13792_v24  ;;  %v13896_v57 = vld [vmem:[%s23825_s2 + $0x3d8] sm:$0xf] }
 0x633   :  { %v22546_v12 = vmul.f32 %v15807_v55, %v7511_v3  ;;  %v13760_v3 = vld [vmem:[%s23825_s2 + $0x2d0] sm:$0xf]  ;;  %v13421_v42 = vor.u32 %v15329_v1, %v13418_v34  ;;  %v13733_v50 = vor.u32 %v15408_v23, %v13730_v13  ;;  %v15453_v7 = vld [vmem:[%s23825_s2 + $0x3f4] sm:$0xf0]  ;;  %v15449_v10 = vld [vmem:[%s23825_s2 + $0x3dc] sm:$0xf] }
 0x634   :  { %8451 = vmatpush.bf16.msrb.mxu0 %v13545_v21  ;;  %8477 = vmatpush.bf16.msra.mxu2 %v13549_v31  ;;  %v15424_v21 = vld [vmem:[%s23825_s2 + $0x314] sm:$0xf]  ;;  %v13761_v32 = vor.u32 %v15420_v40, %v13760_v3  ;;  %v13898_v17 = vld [vmem:[%s23825_s2 + $0x3f8] sm:$0xf0]  ;;  %v13864_v56 = vld [vmem:[%s23825_s2 + $0x398] sm:$0xf] }
 0x635   :  { %v22556_v28 = vpack.c.bf16 %v22546_v12, %v22546_v12  ;;  %v13794_v31 = vld [vmem:[%s23825_s2 + $0x330] sm:$0xf0]  ;;  %v13901_v24 = vor.u32 %v15449_v10, %v13898_v17  ;;  %v15437_v1 = vld [vmem:[%s23825_s2 + $0x374] sm:$0xf0]  ;;  %v15433_v34 = vld [vmem:[%s23825_s2 + $0x35c] sm:$0xf] }
 0x636   :  { %v13797_v55 = vor.u32 %v15424_v21, %v13794_v31  ;;  %v13866_v21 = vld [vmem:[%s23825_s2 + $0x3b8] sm:$0xf0]  ;;  %v15413_v15 = vld [vmem:[%s23825_s2 + $0x2b4] sm:$0xf0] }
 0x637   :  { %8313 = vmatmul.bf16.vlgmr.msra.gmra.mxu1 %v22556_v28  ;;  %8339 = vmatmul.bf16.vlgmr.msrb.gmra.mxu3 %v22556_v28  ;;  %v15425_v40 = vld [vmem:[%s23825_s2 + $0x31c] sm:$0xf]  ;;  %v15397_v10 = vld [vmem:[%s23825_s2 + $0x234] sm:$0xf0] }
 0x638   :  { %8409 = vmatpush.bf16.msra.mxu1 %v13889_v11  ;;  %8435 = vmatpush.bf16.msrb.mxu3 %v13893_v27  ;;  %v15416_v11 = vld [vmem:[%s23825_s2 + $0x2d4] sm:$0xf]  ;;  %v13770_v23 = vld [vmem:[%s23825_s2 + $0x2f8] sm:$0xf0] }
 0x639   :  { %8452 = vmatpush.bf16.msrb.mxu0 %v13513_v59  ;;  %8478 = vmatpush.bf16.msra.mxu2 %v13517_v61  ;;  %v13762_v27 = vld [vmem:[%s23825_s2 + $0x2f0] sm:$0xf0]  ;;  %v13728_v59 = vld [vmem:[%s23825_s2 + $0x290] sm:$0xf]  ;;  %v15393_v17 = vld [vmem:[%s23825_s2 + $0x21c] sm:$0xf] }
 0x63a   :  { %v13765_v44 = vor.u32 %v15416_v11, %v13762_v27  ;;  %v15412_v61 = vld [vmem:[%s23825_s2 + $0x2ac] sm:$0xf0]  ;;  %v13802_v11 = vld [vmem:[%s23825_s2 + $0x338] sm:$0xf0] }
 0x63b   :  { %v13729_v4 = vor.u32 %v15412_v61, %v13728_v59  ;;  %v15421_v59 = vld [vmem:[%s23825_s2 + $0x2f4] sm:$0xf0]  ;;  %v15417_v61 = vld [vmem:[%s23825_s2 + $0x2dc] sm:$0xf] }
 0x63c   :  { %8410 = vmatpush.bf16.msra.mxu1 %v13857_v39  ;;  %8436 = vmatpush.bf16.msrb.mxu3 %v13861_v26  ;;  %v15400_v39 = vld [vmem:[%s23825_s2 + $0x254] sm:$0xf] }
 0x63d   :  { %8453 = vmatpush.bf16.msrb.mxu0 %v13481_v45  ;;  %8479 = vmatpush.bf16.msra.mxu2 %v13485_v63  ;;  %v13698_v26 = vld [vmem:[%s23825_s2 + $0x270] sm:$0xf0]  ;;  %v15396_v45 = vld [vmem:[%s23825_s2 + $0x22c] sm:$0xf0] }
 0x63e   :  { %v13701_v62 = vor.u32 %v15400_v39, %v13698_v26  ;;  %v15392_v63 = vld [vmem:[%s23825_s2 + $0x214] sm:$0xf]  ;;  %v13738_v39 = vld [vmem:[%s23825_s2 + $0x2b8] sm:$0xf0] }
 0x640   :  { %8411 = vmatpush.bf16.msra.mxu1 %v13825_v5  ;;  %8437 = vmatpush.bf16.msrb.mxu3 %v13829_v46  ;;  %v13669_v5 = vor.u32 %v15392_v63, %v13666_v9  ;;  %v13897_v46 = vor.u32 %v15453_v7, %v13896_v57  ;;  %v13706_v63 = vld [vmem:[%s23825_s2 + $0x278] sm:$0xf0]  ;;  %v13672_v7 = vld [vmem:[%s23825_s2 + $0x218] sm:$0xf] }
 0x641   :  { %8454 = vmatpush.bf16.msrb.mxu0 %v13449_v16  ;;  %8480 = vmatpush.bf16.msra.mxu2 %v13453_v49  ;;  %v15445_v16 = vld [vmem:[%s23825_s2 + $0x3b4] sm:$0xf0]  ;;  %v15441_v49 = vld [vmem:[%s23825_s2 + $0x39c] sm:$0xf] }
 0x642   :  { %v13865_v31 = vor.u32 %v15445_v16, %v13864_v56  ;;  %v13869_v29 = vor.u32 %v15441_v49, %v13866_v21  ;;  %v14134_v49 = vld [vmem:[%s23825_s2 + $0x1c0] sm:$0xf] }
 0x643   :  { %v15514_v21 = vld [vmem:[%s23825_s2 + $0x1dc] sm:$0xf0] }
 0x644   :  { %8412 = vmatpush.bf16.msra.mxu1 %v13793_v35  ;;  %8438 = vmatpush.bf16.msrb.mxu3 %v13797_v55  ;;  %v13834_v35 = vld [vmem:[%s23825_s2 + $0x378] sm:$0xf0]  ;;  %v13833_v55 = vor.u32 %v15437_v1, %v13832_v20  ;;  %v14135_v20 = vor.u32 %v15514_v21, %v14134_v49  ;;  %v13942_v49 = vld [vmem:[%s23825_s2 + $0x40] sm:$0xf] }
 0x645   :  { %8455 = vmatpush.bf16.msrb.mxu0 %v13417_v25  ;;  %8481 = vmatpush.bf16.msra.mxu2 %v13421_v42  ;;  %v13837_v3 = vor.u32 %v15433_v34, %v13834_v35  ;;  %v13800_v25 = vld [vmem:[%s23825_s2 + $0x318] sm:$0xf]  ;;  %v14102_v35 = vld [vmem:[%s23825_s2 + $0x180] sm:$0xf] }
 0x646   :  { %v15429_v42 = vld [vmem:[%s23825_s2 + $0x334] sm:$0xf0]  ;;  %v15466_v21 = vld [vmem:[%s23825_s2 + $0x5c] sm:$0xf0] }
 0x647   :  { %8365 = vmatmul.bf16.vlgmr.msrb.gmra.mxu1 %v22556_v28  ;;  %8391 = vmatmul.bf16.vlgmr.msra.gmra.mxu3 %v22556_v28  ;;  %v13801_v27 = vor.u32 %v15429_v42, %v13800_v25  ;;  %v14104_v42 = vld [vmem:[%s23825_s2 + $0x1a0] sm:$0xf0] }
 0x648   :  { %8413 = vmatpush.bf16.msra.mxu1 %v13761_v32  ;;  %8439 = vmatpush.bf16.msrb.mxu3 %v13765_v44  ;;  %v13805_v32 = vor.u32 %v15425_v40, %v13802_v11  ;;  %v13768_v44 = vld [vmem:[%s23825_s2 + $0x2d8] sm:$0xf]  ;;  %v14070_v11 = vld [vmem:[%s23825_s2 + $0x140] sm:$0xf] }
 0x649   :  { %8456 = vmatmul.bf16.vlgmr.msrb.gmra.mxu0 %v22298_v47  ;;  %8482 = vmatmul.bf16.vlgmr.msra.gmra.mxu2 %v22298_v47  ;;  %v13664_v47 = vld [vmem:[%s23825_s2 + $0x210] sm:$0xf]  ;;  %v13769_v13 = vor.u32 %v15421_v59, %v13768_v44 }
 0x64a   :  { %v13665_v58 = vor.u32 %v15396_v45, %v13664_v47  ;;  %v15405_v47 = vld [vmem:[%s23825_s2 + $0x274] sm:$0xf0]  ;;  %v15401_v45 = vld [vmem:[%s23825_s2 + $0x25c] sm:$0xf]  ;;  %9416 = vmatpush.bf16.msra.mxu0 %v14135_v20  ;;  %v13943_v20 = vor.u32 %v15466_v21, %v13942_v49 }
 0x64b   :  { %v13709_v57 = vor.u32 %v15401_v45, %v13706_v63  ;;  %v23905_v21 = vld [vmem:[#allocation8_spill] sm:$0xff] }
 0x64c   :  { %8414 = vmatpush.bf16.msra.mxu1 %v13729_v4  ;;  %8440 = vmatpush.bf16.msrb.mxu3 %v13733_v50  ;;  %v13773_v4 = vor.u32 %v15417_v61, %v13770_v23  ;;  %v13736_v50 = vld [vmem:[%s23825_s2 + $0x298] sm:$0xf]  ;;  %v14072_v61 = vld [vmem:[%s23825_s2 + $0x160] sm:$0xf0] }
 0x64d   :  { %v13737_v26 = vor.u32 %v15413_v15, %v13736_v50  ;;  %v15490_v50 = vld [vmem:[%s23825_s2 + $0x11c] sm:$0xf0]  ;;  %v15486_v15 = vld [vmem:[%s23825_s2 + $0x104] sm:$0xf] }
 0x650   :  { %8415 = vmatpush.bf16.msra.mxu1 %v13697_v19  ;;  %8441 = vmatpush.bf16.msrb.mxu3 %v13701_v62  ;;  %v13741_v19 = vor.u32 %v15409_v37, %v13738_v39  ;;  %v13704_v62 = vld [vmem:[%s23825_s2 + $0x258] sm:$0xf]  ;;  %v14040_v39 = vld [vmem:[%s23825_s2 + $0x120] sm:$0xf0] }
 0x651   :  { %v13705_v9 = vor.u32 %v15405_v47, %v13704_v62  ;;  %v15482_v62 = vld [vmem:[%s23825_s2 + $0xdc] sm:$0xf0]  ;;  %v15478_v47 = vld [vmem:[%s23825_s2 + $0xc4] sm:$0xf] }
 0x654   :  { %8416 = vmatpush.bf16.msra.mxu1 %v13665_v58  ;;  %8442 = vmatpush.bf16.msrb.mxu3 %v13669_v5  ;;  %v13674_v58 = vld [vmem:[%s23825_s2 + $0x238] sm:$0xf0]  ;;  %v13673_v5 = vor.u32 %v15397_v10, %v13672_v7  ;;  %v13974_v10 = vld [vmem:[%s23825_s2 + $0x80] sm:$0xf] }
 0x657   :  { %8417 = vmatmul.bf16.vlgmr.msra.gmra.mxu1 %v22556_v28  ;;  %8443 = vmatmul.bf16.vlgmr.msrb.gmra.mxu3 %v22556_v28 }
 0x658   :  { %8461 = vmatpush.bf16.msrb.mxu1 %v13897_v46  ;;  %8487 = vmatpush.bf16.msra.mxu3 %v13901_v24  ;;  %v13677_v46 = vor.u32 %v15393_v17, %v13674_v58  ;;  %v15474_v17 = vld [vmem:[%s23825_s2 + $0x9c] sm:$0xf0]  ;;  %v15470_v58 = vld [vmem:[%s23825_s2 + $0x84] sm:$0xf] }
 0x65c   :  { %8462 = vmatpush.bf16.msrb.mxu1 %v13865_v31  ;;  %8488 = vmatpush.bf16.msra.mxu3 %v13869_v29  ;;  %v15510_v31 = vld [vmem:[%s23825_s2 + $0x1c4] sm:$0xf] }
 0x660   :  { %8463 = vmatpush.bf16.msrb.mxu1 %v13833_v55  ;;  %8489 = vmatpush.bf16.msra.mxu3 %v13837_v3  ;;  %v15506_v55 = vld [vmem:[%s23825_s2 + $0x19c] sm:$0xf0]  ;;  %v15502_v3 = vld [vmem:[%s23825_s2 + $0x184] sm:$0xf] }
 0x661   :  { %v14103_v25 = vor.u32 %v15506_v55, %v14102_v35  ;;  %v14107_v40 = vor.u32 %v15502_v3, %v14104_v42  ;;  %v13910_v55 = vld [vmem:[%s23825_s2] sm:$0xf] }
 0x662   :  { %v15458_v3 = vld [vmem:[%s23825_s2 + $0x1c] sm:$0xf0] }
 0x663   :  { %9417 = vmatpush.bf16.msra.mxu0 %v14103_v25  ;;  %v15454_v25 = vld [vmem:[%s23825_s2 + $0x4] sm:$0xf]  ;;  %v13911_v42 = vor.u32 %v15458_v3, %v13910_v55 }
 0x664   :  { %8464 = vmatpush.bf16.msrb.mxu1 %v13801_v27  ;;  %8490 = vmatpush.bf16.msra.mxu3 %v13805_v32  ;;  %v15498_v27 = vld [vmem:[%s23825_s2 + $0x15c] sm:$0xf0]  ;;  %v15494_v32 = vld [vmem:[%s23825_s2 + $0x144] sm:$0xf] }
 0x665   :  { %v14071_v59 = vor.u32 %v15498_v27, %v14070_v11  ;;  %v14075_v23 = vor.u32 %v15494_v32, %v14072_v61  ;;  %v14142_v11 = vld [vmem:[%s23825_s2 + $0x1c8] sm:$0xf]  ;;  %v15511_v61 = vld [vmem:[%s23825_s2 + $0x1cc] sm:$0xf] }
 0x666   :  { %v15515_v27 = vld [vmem:[%s23825_s2 + $0x1e4] sm:$0xf0] }
 0x667   :  { %9418 = vmatpush.bf16.msra.mxu0 %v14071_v59  ;;  %v14143_v59 = vor.u32 %v15515_v27, %v14142_v11 }
 0x668   :  { %8465 = vmatpush.bf16.msrb.mxu1 %v13769_v13  ;;  %8491 = vmatpush.bf16.msra.mxu3 %v13773_v4  ;;  %v14038_v4 = vld [vmem:[%s23825_s2 + $0x100] sm:$0xf] }
 0x669   :  { %v14039_v37 = vor.u32 %v15490_v50, %v14038_v4 }
 0x66b   :  { %9419 = vmatpush.bf16.msra.mxu0 %v14039_v37  ;;  %v14110_v37 = vld [vmem:[%s23825_s2 + $0x188] sm:$0xf] }
 0x66c   :  { %8466 = vmatpush.bf16.msrb.mxu1 %v13737_v26  ;;  %8492 = vmatpush.bf16.msra.mxu3 %v13741_v19  ;;  %v14043_v26 = vor.u32 %v15486_v15, %v14040_v39  ;;  %v14006_v19 = vld [vmem:[%s23825_s2 + $0xc0] sm:$0xf]  ;;  %v15507_v39 = vld [vmem:[%s23825_s2 + $0x1a4] sm:$0xf0] }
 0x66d   :  { %v14007_v63 = vor.u32 %v15482_v62, %v14006_v19  ;;  %v14111_v19 = vor.u32 %v15507_v39, %v14110_v37  ;;  %v14112_v62 = vld [vmem:[%s23825_s2 + $0x1a8] sm:$0xf0] }
 0x66e   :  { %v14016_v37 = vld [vmem:[%s23825_s2 + $0xe8] sm:$0xf0] }
 0x66f   :  { %9420 = vmatpush.bf16.msra.mxu0 %v14007_v63 }
 0x670   :  { %8467 = vmatpush.bf16.msrb.mxu1 %v13705_v9  ;;  %8493 = vmatpush.bf16.msra.mxu3 %v13709_v57  ;;  %v14008_v9 = vld [vmem:[%s23825_s2 + $0xe0] sm:$0xf0] }
 0x671   :  { %v14011_v57 = vor.u32 %v15478_v47, %v14008_v9  ;;  %v14078_v9 = vld [vmem:[%s23825_s2 + $0x148] sm:$0xf] }
 0x674   :  { %8468 = vmatpush.bf16.msrb.mxu1 %v13673_v5  ;;  %8494 = vmatpush.bf16.msra.mxu3 %v13677_v46  ;;  %v13975_v5 = vor.u32 %v15474_v17, %v13974_v10  ;;  %v13976_v46 = vld [vmem:[%s23825_s2 + $0xa0] sm:$0xf0] }
 0x676   :  { %9421 = vmatpush.bf16.msra.mxu0 %v13975_v5  ;;  %v14080_v5 = vld [vmem:[%s23825_s2 + $0x168] sm:$0xf0] }
 0x677   :  { %8469 = vmatmul.bf16.vlgmr.msrb.gmra.mxu1 %v22556_v28  ;;  %8495 = vmatmul.bf16.vlgmr.msra.gmra.mxu3 %v22556_v28  ;;  %v14136_v28 = vld [vmem:[%s23825_s2 + $0x1e0] sm:$0xf0] }
 0x678   :  { %v14139_v1 = vor.u32 %v15510_v31, %v14136_v28  ;;  %v15462_v31 = vld [vmem:[%s23825_s2 + $0x44] sm:$0xf] }
 0x679   :  { %v13944_v28 = vld [vmem:[%s23825_s2 + $0x60] sm:$0xf0] }
 0x67a   :  { %9442 = vmatpush.bf16.msrb.mxu2 %v14139_v1  ;;  %v13947_v1 = vor.u32 %v15462_v31, %v13944_v28  ;;  %9422 = vmatpush.bf16.msra.mxu0 %v13943_v20  ;;  %v14046_v20 = vld [vmem:[%s23825_s2 + $0x108] sm:$0xf] }
 0x67b   :  { %v15491_v28 = vld [vmem:[%s23825_s2 + $0x124] sm:$0xf0] }
 0x67e   :  { %9443 = vmatpush.bf16.msrb.mxu2 %v14107_v40  ;;  %v13912_v40 = vld [vmem:[%s23825_s2 + $0x20] sm:$0xf0]  ;;  %9423 = vmatpush.bf16.msra.mxu0 %v13911_v42  ;;  %v15578_v42 = vld [vmem:[%s23825_s2 + $0x3dc] sm:$0xf0] }
 0x67f   :  { %v13915_v32 = vor.u32 %v15454_v25, %v13912_v40  ;;  %v14390_v25 = vld [vmem:[%s23825_s2 + $0x3c0] sm:$0xf]  ;;  %v15574_v40 = vld [vmem:[%s23825_s2 + $0x3c4] sm:$0xf] }
 0x680   :  { %v14391_v27 = vor.u32 %v15578_v42, %v14390_v25  ;;  %v15467_v42 = vld [vmem:[%s23825_s2 + $0x64] sm:$0xf0] }
 0x682   :  { %9444 = vmatpush.bf16.msrb.mxu2 %v14075_v23  ;;  %v14144_v23 = vld [vmem:[%s23825_s2 + $0x1e8] sm:$0xf0]  ;;  %9468 = vmatpush.bf16.msrb.mxu0 %v14143_v59  ;;  %v14014_v59 = vld [vmem:[%s23825_s2 + $0xc8] sm:$0xf] }
 0x683   :  { %9429 = vmatpush.bf16.msra.mxu1 %v14391_v27 }
 0x684   :  { %v22778_v24 = vpop.f32.mrf.mxu0 }
 0x686   :  { %9445 = vmatpush.bf16.msrb.mxu2 %v14043_v26  ;;  %v15503_v26 = vld [vmem:[%s23825_s2 + $0x18c] sm:$0xf]  ;;  %9469 = vmatpush.bf16.msrb.mxu0 %v14111_v19  ;;  %v14358_v19 = vld [vmem:[%s23825_s2 + $0x380] sm:$0xf] }
 0x68a   :  { %v22780_v56 = vpop.f32.mrf.mxu2  ;;  %9446 = vmatpush.bf16.msrb.mxu2 %v14011_v57  ;;  %v15499_v57 = vld [vmem:[%s23825_s2 + $0x164] sm:$0xf0] }
 0x68b   :  { %v14079_v17 = vor.u32 %v15499_v57, %v14078_v9 }
 0x68c   :  { %v8303_v16 = vpop.f32.mrf.mxu0 }
 0x68d   :  { %v13979_v16 = vor.u32 %v15470_v58, %v13976_v46  ;;  %v15495_v58 = vld [vmem:[%s23825_s2 + $0x14c] sm:$0xf]  ;;  %9470 = vmatpush.bf16.msrb.mxu0 %v14079_v17  ;;  %v15475_v17 = vld [vmem:[%s23825_s2 + $0xa4] sm:$0xf0] }
 0x68f   :  { %9447 = vmatpush.bf16.msrb.mxu2 %v13979_v16  ;;  %v14083_v16 = vor.u32 %v15495_v58, %v14080_v5 }
 0x692   :  { %v8329_v29 = vpop.f32.mrf.mxu2 }
 0x693   :  { %9448 = vmatpush.bf16.msrb.mxu2 %v13947_v1  ;;  %v15487_v1 = vld [vmem:[%s23825_s2 + $0x10c] sm:$0xf] }
 0x694   :  { %v22794_v34 = vpop.f32.mrf.mxu0 }
 0x697   :  { %9449 = vmatpush.bf16.msrb.mxu2 %v13915_v32  ;;  %v14392_v32 = vld [vmem:[%s23825_s2 + $0x3e0] sm:$0xf0] }
 0x69a   :  { %v22817_v44 = vpop.f32.mrf.mxu2 }
 0x69c   :  { %v8355_v13 = vpop.f32.mrf.mxu0 }
 0x69d   :  { %v14147_v13 = vor.u32 %v15511_v61, %v14144_v23  ;;  %v15483_v61 = vld [vmem:[%s23825_s2 + $0xe4] sm:$0xf0] }
 0x69f   :  { %9494 = vmatpush.bf16.msra.mxu2 %v14147_v13 }
 0x6a2   :  { %v8381_v45 = vpop.f32.mrf.mxu2 }
 0x6a3   :  { %v14115_v45 = vor.u32 %v15503_v26, %v14112_v62  ;;  %v15570_v62 = vld [vmem:[%s23825_s2 + $0x39c] sm:$0xf0] }
 0x6a4   :  { %v22846_v7 = vpop.f32.mrf.mxu0  ;;  %v14359_v9 = vor.u32 %v15570_v62, %v14358_v19  ;;  %v23907_v19 = vld [vmem:[#allocation22_spill] sm:$0xff] }
 0x6a5   :  { %9495 = vmatpush.bf16.msra.mxu2 %v14115_v45 }
 0x6a6   :  { %9430 = vmatpush.bf16.msra.mxu1 %v14359_v9 }
 0x6a9   :  { %9496 = vmatpush.bf16.msra.mxu2 %v14083_v16 }
 0x6aa   :  { %v22869_v29 = vpop.f32.mrf.mxu2 }
 0x6ac   :  { %v8407_v35 = vpop.f32.mrf.mxu0 }
 0x6ad   :  { %v14047_v35 = vor.u32 %v15491_v28, %v14046_v20  ;;  %v15558_v28 = vld [vmem:[%s23825_s2 + $0x344] sm:$0xf] }
 0x6af   :  { %9471 = vmatpush.bf16.msrb.mxu0 %v14047_v35  ;;  %v13950_v35 = vld [vmem:[%s23825_s2 + $0x48] sm:$0xf] }
 0x6b2   :  { %v8433_v15 = vpop.f32.mrf.mxu2 }
 0x6b3   :  { %v15479_v15 = vld [vmem:[%s23825_s2 + $0xcc] sm:$0xf] }
 0x6b4   :  { %v8314_v4 = vpop.f32.mrf.mxu1  ;;  %v14019_v39 = vor.u32 %v15479_v15, %v14016_v37  ;;  %v15554_v37 = vld [vmem:[%s23825_s2 + $0x31c] sm:$0xf0] }
 0x6b5   :  { %v8315_v50 = vadd.f32 %v8314_v4, %v22778_v24  ;;  %v23904_v24 = vld [vmem:[#allocation7_spill] sm:$0xff]  ;;  %v14395_v4 = vor.u32 %v15574_v40, %v14392_v32  ;;  %v15463_v32 = vld [vmem:[%s23825_s2 + $0x4c] sm:$0xf] }
 0x6b7   :  { %v8508_v47 = vadd.f32 %v8315_v50, %v23904_v24  ;;  %v14015_v50 = vor.u32 %v15483_v61, %v14014_v59  ;;  %9455 = vmatpush.bf16.msrb.mxu3 %v14395_v4  ;;  %v15566_v24 = vld [vmem:[%s23825_s2 + $0x384] sm:$0xf]  ;;  %v13952_v59 = vld [vmem:[%s23825_s2 + $0x68] sm:$0xf0] }
 0x6b8   :  { %v13955_v15 = vor.u32 %v15463_v32, %v13952_v59 }
 0x6b9   :  { %v13902_v63 = vmul.f32 -1.442695, %v8508_v47  ;;  %9472 = vmatpush.bf16.msrb.mxu0 %v14015_v50  ;;  %v14360_v47 = vld [vmem:[%s23825_s2 + $0x3a0] sm:$0xf0]  ;;  %v13951_v50 = vor.u32 %v15467_v42, %v13950_v35  ;;  %v15546_v35 = vld [vmem:[%s23825_s2 + $0x2dc] sm:$0xf0] }
 0x6ba   :  { %v8340_v10 = vpop.f32.mrf.mxu3  ;;  %v14363_v57 = vor.u32 %v15566_v24, %v14360_v47  ;;  %v15550_v47 = vld [vmem:[%s23825_s2 + $0x304] sm:$0xf] }
 0x6bb   :  { %15808 = vpow2.f32 %v13902_v63  ;;  %v8341_v46 = vadd.f32 %v8340_v10, %v22780_v56  ;;  %v14048_v56 = vld [vmem:[%s23825_s2 + $0x128] sm:$0xf0]  ;;  %v13982_v10 = vld [vmem:[%s23825_s2 + $0x88] sm:$0xf]  ;;  %v14264_v42 = vld [vmem:[%s23825_s2 + $0x2e0] sm:$0xf0] }
 0x6bc   :  { %v8316_v49 = vpop.f32.mrf.mxu1  ;;  %v14051_v3 = vor.u32 %v15487_v1, %v14048_v56  ;;  %v13983_v5 = vor.u32 %v15475_v17, %v13982_v10  ;;  %9456 = vmatpush.bf16.msrb.mxu3 %v14363_v57  ;;  %v14328_v1 = vld [vmem:[%s23825_s2 + $0x360] sm:$0xf0]  ;;  %v13918_v10 = vld [vmem:[%s23825_s2 + $0x8] sm:$0xf] }
 0x6bd   :  { %v8509_v31 = vadd.f32 %v8341_v46, %v23905_v21  ;;  %v15471_v46 = vld [vmem:[%s23825_s2 + $0x8c] sm:$0xf]  ;;  %v14326_v21 = vld [vmem:[%s23825_s2 + $0x340] sm:$0xf]  ;;  %v14331_v27 = vor.u32 %v15558_v28, %v14328_v1  ;;  %v15459_v17 = vld [vmem:[%s23825_s2 + $0x24] sm:$0xf0] }
 0x6be   :  { %9497 = vmatpush.bf16.msra.mxu2 %v14051_v3  ;;  %9473 = vmatpush.bf16.msrb.mxu0 %v13983_v5  ;;  %v14262_v1 = vld [vmem:[%s23825_s2 + $0x2c0] sm:$0xf] }
 0x6bf   :  { %v13903_v55 = vmul.f32 -1.442695, %v8509_v31  ;;  %v15562_v31 = vld [vmem:[%s23825_s2 + $0x35c] sm:$0xf0] }
 0x6c0   :  { %v14327_v20 = vor.u32 %v15562_v31, %v14326_v21  ;;  %9457 = vmatpush.bf16.msrb.mxu3 %v14331_v27 }
 0x6c1   :  { %v15809_v11 = vpop.eup %15808  ;;  %15810 = vpow2.f32 %v13903_v55  ;;  %v23906_v55 = vld [vmem:[#allocation21_spill] sm:$0xff] }
 0x6c2   :  { %v22956_v23 = vadd.f32 1.0, %v15809_v11  ;;  %v8342_v13 = vpop.f32.mrf.mxu3  ;;  %9498 = vmatpush.bf16.msra.mxu2 %v14019_v39  ;;  %9431 = vmatpush.bf16.msra.mxu1 %v14327_v20 }
 0x6c3   :  { %9474 = vmatpush.bf16.msrb.mxu0 %v13951_v50 }
 0x6c4   :  { %15812 = vrcp.f32 %v22956_v23  ;;  %v8366_v26 = vpop.f32.mrf.mxu1  ;;  %v8525_v61 = vand.u32 2147483647, %v22956_v23  ;;  %vm8521_vm1 = vweird.f32 %v22956_v23 }
 0x6c5   :  { %v8367_v45 = vadd.f32 %v8366_v26, %v22794_v34  ;;  %v13984_v34 = vld [vmem:[%s23825_s2 + $0xa8] sm:$0xf0]  ;;  %v8527_v26 = vand.u32 2147483648, %v22956_v23 }
 0x6c6   :  { %v22978_v63 = vpop.f32.mrf.mxu0  ;;  %v13987_v49 = vor.u32 %v15471_v46, %v13984_v34  ;;  %v13919_v34 = vor.u32 %v15459_v17, %v13918_v10  ;;  %vm8526_vm3 = vcmp.eq.f32.partialorder %v8525_v61, 8.507059e+37 }
 0x6c7   :  { %v15811_v58 = vpop.eup %15810  ;;  %v8510_v3 = vadd.f32 %v8367_v45, %v23906_v55  ;;  %v14296_v45 = vld [vmem:[%s23825_s2 + $0x320] sm:$0xf0] }
 0x6c8   :  { %v22992_v16 = vadd.f32 1.0, %v15811_v58  ;;  %9499 = vmatpush.bf16.msra.mxu2 %v13987_v49  ;;  %v14299_v57 = vor.u32 %v15550_v47, %v14296_v45  ;;  %v15455_v58 = vld [vmem:[%s23825_s2 + $0xc] sm:$0xf]  ;;  %v15542_v55 = vld [vmem:[%s23825_s2 + $0x2c4] sm:$0xf]  ;;  %9475 = vmatpush.bf16.msrb.mxu0 %v13919_v34 }
 0x6c9   :  { %v13920_v49 = vld [vmem:[%s23825_s2 + $0x28] sm:$0xf0]  ;;  %v14267_v32 = vor.u32 %v15542_v55, %v14264_v42  ;;  %v15522_v42 = vld [vmem:[%s23825_s2 + $0x21c] sm:$0xf0] }
 0x6ca   :  { %v23009_v56 = vpop.eup %15812  ;;  %15814 = vrcp.f32 %v22992_v16  ;;  %v8392_v25 = vpop.f32.mrf.mxu3  ;;  %v13923_v31 = vor.u32 %v15455_v58, %v13920_v49  ;;  %9458 = vmatpush.bf16.msrb.mxu3 %v14299_v57  ;;  %vm8540_vm5 = vweird.f32 %v22992_v16  ;;  %v14198_v58 = vld [vmem:[%s23825_s2 + $0x240] sm:$0xf]  ;;  %v15526_v49 = vld [vmem:[%s23825_s2 + $0x244] sm:$0xf] }
 0x6cb   :  { %v8517_v40 = vmul.f32 %v23009_v56, %v22956_v23  ;;  %v8393_v11 = vadd.f32 %v8392_v25, %v22817_v44  ;;  %v14294_v44 = vld [vmem:[%s23825_s2 + $0x300] sm:$0xf]  ;;  %15816 = vtanh.f32 %v8510_v3  ;;  %vm8522_vm0 = vweird.f32 %v23009_v56 }
 0x6cc   :  { %v23026_v13 = vpop.f32.mrf.mxu2  ;;  %v8368_v4 = vpop.f32.mrf.mxu1  ;;  %v14295_v24 = vor.u32 %v15554_v37, %v14294_v44  ;;  %9500 = vmatpush.bf16.msra.mxu2 %v13955_v15  ;;  %vm8523_vm2 = vmor %vm8521_vm1, %vm8522_vm0  ;;  %v8528_v3 = vor.u32 1.1754944e-38, %v8527_v26  ;;  %v14263_v25 = vor.u32 %v15546_v35, %v14262_v1  ;;  %v8544_v15 = vand.u32 2147483647, %v22992_v16  ;;  %v15538_v26 = vld [vmem:[%s23825_s2 + $0x29c] sm:$0xf0]  ;;  %v23909_v1 = vld [vmem:[#allocation14_spill] sm:$0xff] }
 0x6cd   :  { %v8518_v39 = vsub.f32 1.0, %v8517_v40  ;;  %v8511_v62 = vadd.f32 %v8393_v11, %v23907_v19  ;;  %v8546_v11 = vand.u32 2147483648, %v22992_v16  ;;  %v23908_v4 = vld [vmem:[#allocation13_spill] sm:$0xff]  ;;  %v617_v35 = vadd.f32 %v23909_v1, %v17002_v38  ;;  %v15516_v1 = vld [vmem:[%s23825_s2 + $0x1ec] sm:$0xf0] }
 0x6ce   :  { %v8459_v9 = vpop.f32.mrf.mxu0  ;;  %9432 = vmatpush.bf16.msra.mxu1 %v14295_v24  ;;  %v588_v50 = vadd.f32 %v23908_v4, %v16991_v22  ;;  %9459 = vmatpush.bf16.msrb.mxu3 %v14267_v32  ;;  %v15534_v22 = vld [vmem:[%s23825_s2 + $0x284] sm:$0xf]  ;;  %vm8545_vm7 = vcmp.eq.f32.partialorder %v8544_v15, 8.507059e+37  ;;  %v14398_v32 = vld [vmem:[%s23825_s2 + $0x3c8] sm:$0xf] }
 0x6cf   :  { %v8519_v5 = vmul.f32 %v23009_v56, %v8518_v39  ;;  %v13904_v46 = vmul.f32 -1.442695, %v8511_v62  ;;  %v14230_v39 = vld [vmem:[%s23825_s2 + $0x280] sm:$0xf]  ;;  %v14232_v24 = vld [vmem:[%s23825_s2 + $0x2a0] sm:$0xf0] }
 0x6d0   :  { %v15815_v21 = vpop.eup %15814  ;;  %9501 = vmatpush.bf16.msra.mxu2 %v13923_v31  ;;  %v14231_v47 = vor.u32 %v15538_v26, %v14230_v39  ;;  %v14235_v45 = vor.u32 %v15534_v22, %v14232_v24  ;;  %v8547_v57 = vor.u32 1.1754944e-38, %v8546_v11  ;;  %v14200_v31 = vld [vmem:[%s23825_s2 + $0x260] sm:$0xf0]  ;;  %v15575_v4 = vld [vmem:[%s23825_s2 + $0x3cc] sm:$0xf] }
 0x6d1   :  { %v8536_v20 = vmul.f32 %v15815_v21, %v22992_v16  ;;  %v8520_v28 = vadd.f32 %v23009_v56, %v8519_v5  ;;  %15818 = vpow2.f32 %v13904_v46  ;;  %v15817_v59 = vpop.eup %15816  ;;  %vm8541_vm4 = vweird.f32 %v15815_v21  ;;  %v15530_v5 = vld [vmem:[%s23825_s2 + $0x25c] sm:$0xf0]  ;;  %v14400_v15 = vld [vmem:[%s23825_s2 + $0x3e8] sm:$0xf0] }
 0x6d2   :  { %v8394_v23 = vpop.f32.mrf.mxu3  ;;  %9433 = vmatpush.bf16.msra.mxu1 %v14263_v25  ;;  %vm8542_vm6 = vmor %vm8540_vm5, %vm8541_vm4  ;;  %9460 = vmatpush.bf16.msrb.mxu3 %v14235_v45  ;;  %v14199_v16 = vor.u32 %v15530_v5, %v14198_v58  ;;  %v14166_v25 = vld [vmem:[%s23825_s2 + $0x200] sm:$0xf]  ;;  %v14368_v45 = vld [vmem:[%s23825_s2 + $0x3a8] sm:$0xf0] }
 0x6d3   :  { %v8537_v40 = vsub.f32 1.0, %v8536_v20  ;;  %v8524_v27 = vsel %vm8523_vm2, %v23009_v56, %v8520_v28  ;;  %v14203_v23 = vor.u32 %v15526_v49, %v14200_v31  ;;  %v14167_v38 = vor.u32 %v15522_v42, %v14166_v25  ;;  %v14334_v5 = vld [vmem:[%s23825_s2 + $0x348] sm:$0xf]  ;;  %v14336_v49 = vld [vmem:[%s23825_s2 + $0x368] sm:$0xf0] }
 0x6d4   :  { %v8529_v61 = vsel %vm8526_vm3, %v8528_v3, %v8524_v27  ;;  %v8485_v44 = vpop.f32.mrf.mxu2  ;;  %v8418_v37 = vpop.f32.mrf.mxu1  ;;  %v14302_v42 = vld [vmem:[%s23825_s2 + $0x308] sm:$0xf] }
 0x6d5   :  { %v8538_v56 = vmul.f32 %v15815_v21, %v8537_v40  ;;  %v8571_v19 = vmul.f32 %v15817_v59, %v8529_v61  ;;  %v8419_v62 = vadd.f32 %v8418_v37, %v22846_v7  ;;  %v15579_v59 = vld [vmem:[%s23825_s2 + $0x3e4] sm:$0xf0]  ;;  %v14403_v37 = vor.u32 %v15575_v4, %v14400_v15  ;;  %v15508_v15 = vld [vmem:[%s23825_s2 + $0x1ac] sm:$0xf0] }
 0x6d6   :  { %9434 = vmatpush.bf16.msra.mxu1 %v14231_v47  ;;  %9461 = vmatpush.bf16.msrb.mxu3 %v14203_v23  ;;  %v14399_v61 = vor.u32 %v15579_v59, %v14398_v32 }
 0x6d7   :  { %v15819_v9 = vpop.eup %15818  ;;  %v8539_v10 = vadd.f32 %v15815_v21, %v8538_v56  ;;  %v8575_v17 = vadd.f32 %v8419_v62, %v588_v50  ;;  %v14366_v56 = vld [vmem:[%s23825_s2 + $0x388] sm:$0xf]  ;;  %v15567_v62 = vld [vmem:[%s23825_s2 + $0x38c] sm:$0xf] }
 0x6d8   :  { %v23092_v7 = vadd.f32 1.0, %v15819_v9 }
 0x6d9   :  { %v8543_v46 = vsel %vm8542_vm6, %v15815_v21, %v8539_v10  ;;  %v13905_v34 = vmul.f32 -1.442695, %v8575_v17 }
 0x6da   :  { %v8548_v20 = vsel %vm8545_vm7, %v8547_v57, %v8543_v46  ;;  %15820 = vrcp.f32 %v23092_v7  ;;  %v8444_v28 = vpop.f32.mrf.mxu3  ;;  %9435 = vmatpush.bf16.msra.mxu1 %v14199_v16  ;;  %v14371_v57 = vor.u32 %v15567_v62, %v14368_v45  ;;  %v8564_v10 = vand.u32 2147483647, %v23092_v7  ;;  %v15563_v46 = vld [vmem:[%s23825_s2 + $0x364] sm:$0xf0] }
 0x6db   :  { %v8570_v21 = vmul.f32 %v8548_v20, %v22204_v51  ;;  %15822 = vpow2.f32 %v13905_v34  ;;  %v8445_v55 = vadd.f32 %v8444_v28, %v22869_v29  ;;  %v15518_v51 = vld [vmem:[%s23825_s2 + $0x204] sm:$0xf]  ;;  %v8566_v17 = vand.u32 2147483648, %v23092_v7  ;;  %v15559_v34 = vld [vmem:[%s23825_s2 + $0x34c] sm:$0xf] }
 0x6dc   :  { %v8420_v3 = vpop.f32.mrf.mxu1  ;;  %v14168_v29 = vld [vmem:[%s23825_s2 + $0x220] sm:$0xf0]  ;;  %v14335_v16 = vor.u32 %v15563_v46, %v14334_v5  ;;  %vm8560_vm9 = vweird.f32 %v23092_v7  ;;  %v14150_v28 = vld [vmem:[%s23825_s2 + $0x1d0] sm:$0xf]  ;;  %vm8565_vm11 = vcmp.eq.f32.partialorder %v8564_v10, 8.507059e+37 }
 0x6dd   :  { %v23117_v40 = vadd.f32 %v8571_v19, %v8570_v21  ;;  %v8576_v11 = vadd.f32 %v8445_v55, %v617_v35  ;;  %v14171_v27 = vor.u32 %v15518_v51, %v14168_v29  ;;  %v15571_v19 = vld [vmem:[%s23825_s2 + $0x3a4] sm:$0xf0]  ;;  %v14339_v35 = vor.u32 %v15559_v34, %v14336_v49  ;;  %v15512_v3 = vld [vmem:[%s23825_s2 + $0x1d4] sm:$0xf]  ;;  %v15551_v29 = vld [vmem:[%s23825_s2 + $0x30c] sm:$0xf] }
 0x6de   :  { %9436 = vmatpush.bf16.msra.mxu1 %v14167_v38  ;;  %v14367_v47 = vor.u32 %v15571_v19, %v14366_v56  ;;  %v8567_v21 = vor.u32 1.1754944e-38, %v8566_v17  ;;  %v14151_v4 = vor.u32 %v15516_v1, %v14150_v28  ;;  %v14120_v56 = vld [vmem:[%s23825_s2 + $0x1b0] sm:$0xf0]  ;;  %v14270_v62 = vld [vmem:[%s23825_s2 + $0x2c8] sm:$0xf] }
 0x6df   :  { %v13906_v50 = vmul.f32 -1.442695, %v8576_v11  ;;  %9462 = vmatpush.bf16.msrb.mxu3 %v14171_v27  ;;  %v15555_v11 = vld [vmem:[%s23825_s2 + $0x324] sm:$0xf0]  ;;  %v14304_v27 = vld [vmem:[%s23825_s2 + $0x328] sm:$0xf0] }
 0x6e0   :  { %v15821_v44 = vpop.eup %15820  ;;  %v14307_v19 = vor.u32 %v15551_v29, %v14304_v27  ;;  %v15500_v5 = vld [vmem:[%s23825_s2 + $0x16c] sm:$0xf0]  ;;  %v15496_v46 = vld [vmem:[%s23825_s2 + $0x154] sm:$0xf]  ;;  %v14238_v28 = vld [vmem:[%s23825_s2 + $0x288] sm:$0xf] }
 0x6e1   :  { %v15823_v39 = vpop.eup %15822  ;;  %v8556_v26 = vmul.f32 %v15821_v44, %v23092_v7  ;;  %15824 = vpow2.f32 %v13906_v50  ;;  %vm8561_vm8 = vweird.f32 %v15821_v44  ;;  %v14152_v7 = vld [vmem:[%s23825_s2 + $0x1f0] sm:$0xf0]  ;;  %v15539_v1 = vld [vmem:[%s23825_s2 + $0x2a4] sm:$0xf0] }
 0x6e2   :  { %9481 = vmatpush.bf16.msrb.mxu1 %v14399_v61  ;;  %v23147_v22 = vadd.f32 1.0, %v15823_v39  ;;  %v8446_v24 = vpop.f32.mrf.mxu3  ;;  %15826 = vtanh.f32 %v23117_v40  ;;  %vm8562_vm10 = vmor %vm8560_vm9, %vm8561_vm8  ;;  %v14155_v50 = vor.u32 %v15512_v3, %v14152_v7  ;;  %v14118_v61 = vld [vmem:[%s23825_s2 + $0x190] sm:$0xf]  ;;  %v14088_v34 = vld [vmem:[%s23825_s2 + $0x170] sm:$0xf0]  ;;  %v14239_v7 = vor.u32 %v15539_v1, %v14238_v28 }
 0x6e3   :  { %v8557_v9 = vsub.f32 1.0, %v8556_v26  ;;  %9507 = vmatpush.bf16.msra.mxu3 %v14403_v37  ;;  %v15504_v26 = vld [vmem:[%s23825_s2 + $0x194] sm:$0xf]  ;;  %v15547_v24 = vld [vmem:[%s23825_s2 + $0x2e4] sm:$0xf0]  ;;  %v14119_v17 = vor.u32 %v15508_v15, %v14118_v61 }
 0x6e4   :  { %15828 = vrcp.f32 %v23147_v22  ;;  %v14271_v45 = vor.u32 %v15547_v24, %v14270_v62  ;;  %v14056_v15 = vld [vmem:[%s23825_s2 + $0x130] sm:$0xf0]  ;;  %vm8588_vm14 = vweird.f32 %v23147_v22  ;;  %v15527_v62 = vld [vmem:[%s23825_s2 + $0x24c] sm:$0xf] }
 0x6e5   :  { %v8558_v58 = vmul.f32 %v15821_v44, %v8557_v9  ;;  %v15543_v9 = vld [vmem:[%s23825_s2 + $0x2cc] sm:$0xf] }
 0x6e6   :  { %9482 = vmatpush.bf16.msrb.mxu1 %v14367_v47  ;;  %v23229_v47 = vld [vmem:[%s23825_s2 + $0x150] sm:$0xf]  ;;  %v14208_v24 = vld [vmem:[%s23825_s2 + $0x268] sm:$0xf0] }
 0x6e7   :  { %v15825_v31 = vpop.eup %15824  ;;  %v8559_v20 = vadd.f32 %v15821_v44, %v8558_v58  ;;  %9508 = vmatpush.bf16.msra.mxu3 %v14371_v57  ;;  %v14272_v57 = vld [vmem:[%s23825_s2 + $0x2e8] sm:$0xf0]  ;;  %v14123_v58 = vor.u32 %v15504_v26, %v14120_v56  ;;  %v15531_v26 = vld [vmem:[%s23825_s2 + $0x264] sm:$0xf0]  ;;  %v8594_v56 = vand.u32 2147483648, %v23147_v22  ;;  %v14211_v1 = vor.u32 %v15527_v62, %v14208_v24 }
 0x6e8   :  { %v23175_v55 = vadd.f32 1.0, %v15825_v31  ;;  %v15827_v23 = vpop.eup %15826  ;;  %v15464_v62 = vld [vmem:[%s23825_s2 + $0x54] sm:$0xf] }
 0x6e9   :  { %v8563_v25 = vsel %vm8562_vm10, %v15821_v44, %v8559_v20  ;;  %v14303_v44 = vor.u32 %v15555_v11, %v14302_v42  ;;  %v14275_v20 = vor.u32 %v15543_v9, %v14272_v57  ;;  %v14087_v11 = vor.u32 %v15500_v5, %v23229_v47  ;;  %v23911_v47 = vld [vmem:[#allocation28_spill] sm:$0xff]  ;;  %v14022_v5 = vld [vmem:[%s23825_s2 + $0xd0] sm:$0xf]  ;;  %v13960_v24 = vld [vmem:[%s23825_s2 + $0x70] sm:$0xf0] }
 0x6ea   :  { %9483 = vmatpush.bf16.msrb.mxu1 %v14335_v16  ;;  %v23189_v38 = vpop.eup %15828  ;;  %v8568_v51 = vsel %vm8565_vm11, %v8567_v21, %v8563_v25  ;;  %15830 = vrcp.f32 %v23175_v55  ;;  %v14240_v25 = vld [vmem:[%s23825_s2 + $0x2a8] sm:$0xf0]  ;;  %v8613_v29 = vand.u32 2147483648, %v23175_v55  ;;  %vm8607_vm15 = vweird.f32 %v23175_v55 }
 0x6eb   :  { %v23198_v32 = vmul.f32 %v15827_v23, %v8568_v51  ;;  %v8584_v59 = vmul.f32 %v23189_v38, %v23147_v22  ;;  %9509 = vmatpush.bf16.msra.mxu3 %v14339_v35  ;;  %v23910_v35 = vld [vmem:[#allocation27_spill] sm:$0xff]  ;;  %v15535_v23 = vld [vmem:[%s23825_s2 + $0x28c] sm:$0xf]  ;;  %v14091_v51 = vor.u32 %v15496_v46, %v14088_v34  ;;  %vm8589_vm12 = vweird.f32 %v23189_v38 }
 0x6ec   :  { %v646_v21 = vadd.f32 %v23910_v35, %v17279_v6  ;;  %v14054_v6 = vld [vmem:[%s23825_s2 + $0x110] sm:$0xf]  ;;  %vm23304_vm0 = vmor %vm8588_vm14, %vm8589_vm12  ;;  %v8592_v57 = vand.u32 2147483647, %v23147_v22  ;;  %v8614_v46 = vor.u32 1.1754944e-38, %v8613_v29  ;;  %v13963_v9 = vor.u32 %v15464_v62, %v13960_v24 }
 0x6ed   :  { %v23210_v37 = vpack.c.bf16 %v23198_v32, %v23198_v32  ;;  %v8585_v39 = vsub.f32 1.0, %v8584_v59  ;;  %v8611_v59 = vand.u32 2147483647, %v23175_v55  ;;  %v14174_v35 = vld [vmem:[%s23825_s2 + $0x208] sm:$0xf] }
 0x6ee   :  { %9484 = vmatpush.bf16.msrb.mxu1 %v14303_v44  ;;  %v14243_v44 = vor.u32 %v15535_v23, %v14240_v25  ;;  %v14176_v25 = vld [vmem:[%s23825_s2 + $0x228] sm:$0xf0]  ;;  %vm8593_vm3 = vcmp.eq.f32.partialorder %v8592_v57, 8.507059e+37  ;;  %v13926_v57 = vld [vmem:[%s23825_s2 + $0x10] sm:$0xf] }
 0x6ef   :  { %9424 = vmatmul.bf16.vlgmr.msra.gmra.mxu0 %v23210_v37  ;;  %9450 = vmatmul.bf16.vlgmr.msrb.gmra.mxu2 %v23210_v37  ;;  %v8586_v31 = vmul.f32 %v23189_v38, %v8585_v39  ;;  %v14206_v39 = vld [vmem:[%s23825_s2 + $0x248] sm:$0xf]  ;;  %vm8612_vm2 = vcmp.eq.f32.partialorder %v8611_v59, 8.507059e+37  ;;  %v15576_v62 = vld [vmem:[%s23825_s2 + $0x3d4] sm:$0xf] }
 0x6f0   :  { %v23237_v10 = vpop.eup %15830  ;;  %9520 = vmatpush.bf16.msra.mxu0 %v14151_v4  ;;  %9546 = vmatpush.bf16.msrb.mxu2 %v14155_v50  ;;  %v15488_v4 = vld [vmem:[%s23825_s2 + $0x114] sm:$0xf] }
 0x6f1   :  { %v8603_v16 = vmul.f32 %v23237_v10, %v23175_v55  ;;  %9510 = vmatpush.bf16.msra.mxu3 %v14307_v19  ;;  %vm8608_vm13 = vweird.f32 %v23237_v10  ;;  %v8587_v61 = vadd.f32 %v23189_v38, %v8586_v31  ;;  %v14207_v19 = vor.u32 %v15531_v26, %v14206_v39  ;;  %v14024_v31 = vld [vmem:[%s23825_s2 + $0xf0] sm:$0xf0]  ;;  %v14158_v55 = vld [vmem:[%s23825_s2 + $0x1d8] sm:$0xf] }
 0x6f2   :  { %9485 = vmatpush.bf16.msrb.mxu1 %v14271_v45  ;;  %v675_v45 = vadd.f32 %v23911_v47, %v17282_v0  ;;  %v15484_v0 = vld [vmem:[%s23825_s2 + $0xec] sm:$0xf0]  ;;  %vm23318_vm1 = vmor %vm8607_vm15, %vm8608_vm13 }
 0x6f3   :  { %v8604_v42 = vsub.f32 1.0, %v8603_v16  ;;  %v14059_v16 = vor.u32 %v15488_v4, %v14056_v15  ;;  %v15476_v4 = vld [vmem:[%s23825_s2 + $0xac] sm:$0xf0] }
 0x6f4   :  { %v8470_v49 = vpop.f32.mrf.mxu1  ;;  %9521 = vmatpush.bf16.msra.mxu0 %v14119_v17  ;;  %9547 = vmatpush.bf16.msrb.mxu2 %v14123_v58 }
 0x6f5   :  { %v8471_v3 = vadd.f32 %v8470_v49, %v22978_v63  ;;  %v15492_v63 = vld [vmem:[%s23825_s2 + $0x12c] sm:$0xf0]  ;;  %v8605_v50 = vmul.f32 %v23237_v10, %v8604_v42  ;;  %9511 = vmatpush.bf16.msra.mxu3 %v14275_v20  ;;  %v15480_v49 = vld [vmem:[%s23825_s2 + $0xd4] sm:$0xf]  ;;  %v8591_v20 = vsel %vm23304_vm0, %v23189_v38, %v8587_v61 }
 0x6f6   :  { %9486 = vmatpush.bf16.msrb.mxu1 %v14239_v7  ;;  %v14055_v34 = vor.u32 %v15492_v63, %v14054_v6  ;;  %v14023_v63 = vor.u32 %v15484_v0, %v14022_v5  ;;  %v14027_v29 = vor.u32 %v15480_v49, %v14024_v31  ;;  %v13928_v0 = vld [vmem:[%s23825_s2 + $0x30] sm:$0xf0] }
 0x6f7   :  { %v8577_v27 = vadd.f32 %v8471_v3, %v646_v21  ;;  %v8606_v17 = vadd.f32 %v23237_v10, %v8605_v50  ;;  %v15523_v21 = vld [vmem:[%s23825_s2 + $0x224] sm:$0xf0]  ;;  %v8595_v3 = vor.u32 1.1754944e-38, %v8594_v56  ;;  %v13992_v50 = vld [vmem:[%s23825_s2 + $0xb0] sm:$0xf0] }
 0x6f8   :  { %9522 = vmatpush.bf16.msra.mxu0 %v14087_v11  ;;  %9548 = vmatpush.bf16.msrb.mxu2 %v14091_v51  ;;  %v14175_v38 = vor.u32 %v15523_v21, %v14174_v35  ;;  %v13958_v56 = vld [vmem:[%s23825_s2 + $0x50] sm:$0xf]  ;;  %v14128_v35 = vld [vmem:[%s23825_s2 + $0x1b8] sm:$0xf0] }
 0x6f9   :  { %15832 = vtanh.f32 %v8577_v27  ;;  %9512 = vmatpush.bf16.msra.mxu3 %v14243_v44  ;;  %v8596_v51 = vsel %vm8593_vm3, %v8595_v3, %v8591_v20  ;;  %v13990_v27 = vld [vmem:[%s23825_s2 + $0x90] sm:$0xf] }
 0x6fa   :  { %v8496_v58 = vpop.f32.mrf.mxu3  ;;  %9487 = vmatpush.bf16.msrb.mxu1 %v14207_v19  ;;  %v13991_v39 = vor.u32 %v15476_v4, %v13990_v27  ;;  %v15468_v19 = vld [vmem:[%s23825_s2 + $0x6c] sm:$0xf0]  ;;  %v15493_v27 = vld [vmem:[%s23825_s2 + $0x134] sm:$0xf0] }
 0x6fb   :  { %v8497_v22 = vadd.f32 %v8496_v58, %v23026_v13  ;;  %v8610_v13 = vsel %vm23318_vm1, %v23237_v10, %v8606_v17  ;;  %v15519_v10 = vld [vmem:[%s23825_s2 + $0x20c] sm:$0xf]  ;;  %v15460_v17 = vld [vmem:[%s23825_s2 + $0x2c] sm:$0xf0]  ;;  %v15456_v58 = vld [vmem:[%s23825_s2 + $0x14] sm:$0xf] }
 0x6fc   :  { %v8472_v28 = vpop.f32.mrf.mxu1  ;;  %v8615_v7 = vsel %vm8612_vm2, %v8614_v46, %v8610_v13  ;;  %9523 = vmatpush.bf16.msra.mxu0 %v14055_v34  ;;  %9549 = vmatpush.bf16.msrb.mxu2 %v14059_v16  ;;  %v14179_v61 = vor.u32 %v15519_v10, %v14176_v25  ;;  %v15517_v46 = vld [vmem:[%s23825_s2 + $0x1f4] sm:$0xf0]  ;;  %v14160_v34 = vld [vmem:[%s23825_s2 + $0x1f8] sm:$0xf0]  ;;  %v13927_v16 = vor.u32 %v15460_v17, %v13926_v57 }
 0x6fd   :  { %v8578_v23 = vadd.f32 %v8497_v22, %v675_v45  ;;  %v8637_v42 = vmul.f32 %v8615_v7, %v22443_v54  ;;  %v15472_v54 = vld [vmem:[%s23825_s2 + $0x94] sm:$0xf]  ;;  %9513 = vmatpush.bf16.msra.mxu3 %v14211_v1  ;;  %v13959_v45 = vor.u32 %v15468_v19, %v13958_v56  ;;  %v15513_v22 = vld [vmem:[%s23825_s2 + $0x1dc] sm:$0xf]  ;;  %v13931_v49 = vor.u32 %v15456_v58, %v13928_v0  ;;  %v14126_v13 = vld [vmem:[%s23825_s2 + $0x198] sm:$0xf] }
 0x6fe   :  { %9488 = vmatpush.bf16.msrb.mxu1 %v14175_v38  ;;  %v13995_v26 = vor.u32 %v15472_v54, %v13992_v50  ;;  %v14159_v31 = vor.u32 %v15517_v46, %v14158_v55  ;;  %v14163_v20 = vor.u32 %v15513_v22, %v14160_v34  ;;  %v15509_v28 = vld [vmem:[%s23825_s2 + $0x1b4] sm:$0xf0]  ;;  %v15505_v1 = vld [vmem:[%s23825_s2 + $0x19c] sm:$0xf]  ;;  %v15580_v19 = vld [vmem:[%s23825_s2 + $0x3ec] sm:$0xf0] }
 0x6ff   :  { %v15833_v11 = vpop.eup %15832  ;;  %v13907_v6 = vmul.f32 -1.442695, %v8578_v23  ;;  %9476 = vmatmul.bf16.vlgmr.msrb.gmra.mxu0 %v23210_v37  ;;  %9502 = vmatmul.bf16.vlgmr.msra.gmra.mxu2 %v23210_v37  ;;  %v14127_v3 = vor.u32 %v15509_v28, %v14126_v13  ;;  %v14131_v7 = vor.u32 %v15505_v1, %v14128_v35  ;;  %v14094_v23 = vld [vmem:[%s23825_s2 + $0x158] sm:$0xf]  ;;  %v15497_v25 = vld [vmem:[%s23825_s2 + $0x15c] sm:$0xf] }
 0x700   :  { %v8638_v59 = vmul.f32 %v15833_v11, %v8596_v51  ;;  %9524 = vmatpush.bf16.msra.mxu0 %v14023_v63  ;;  %9550 = vmatpush.bf16.msrb.mxu2 %v14027_v29  ;;  %v15501_v10 = vld [vmem:[%s23825_s2 + $0x174] sm:$0xf0]  ;;  %v15489_v54 = vld [vmem:[%s23825_s2 + $0x11c] sm:$0xf]  ;;  %v14374_v22 = vld [vmem:[%s23825_s2 + $0x390] sm:$0xf] }
 0x701   :  { %15834 = vpow2.f32 %v13907_v6  ;;  %9514 = vmatpush.bf16.msra.mxu3 %v14179_v61  ;;  %v14095_v6 = vor.u32 %v15501_v10, %v14094_v23  ;;  %v14062_v29 = vld [vmem:[%s23825_s2 + $0x118] sm:$0xf]  ;;  %v14064_v50 = vld [vmem:[%s23825_s2 + $0x138] sm:$0xf0]  ;;  %v15572_v34 = vld [vmem:[%s23825_s2 + $0x3ac] sm:$0xf0] }
 0x702   :  { %v23360_v15 = vadd.f32 %v8638_v59, %v8637_v42  ;;  %v8498_v44 = vpop.f32.mrf.mxu3  ;;  %v14096_v42 = vld [vmem:[%s23825_s2 + $0x178] sm:$0xf0]  ;;  %v14067_v56 = vor.u32 %v15489_v54, %v14064_v50  ;;  %v15485_v17 = vld [vmem:[%s23825_s2 + $0xf4] sm:$0xf0]  ;;  %v14376_v13 = vld [vmem:[%s23825_s2 + $0x3b0] sm:$0xf0] }
 0x703   :  { %v14099_v63 = vor.u32 %v15497_v25, %v14096_v42  ;;  %v14406_v44 = vld [vmem:[%s23825_s2 + $0x3d0] sm:$0xf]  ;;  %v15481_v58 = vld [vmem:[%s23825_s2 + $0xdc] sm:$0xf]  ;;  %v13998_v28 = vld [vmem:[%s23825_s2 + $0x98] sm:$0xf] }
 0x704   :  { %9525 = vmatpush.bf16.msra.mxu0 %v13991_v39  ;;  %9551 = vmatpush.bf16.msrb.mxu2 %v13995_v26  ;;  %v14063_v26 = vor.u32 %v15493_v27, %v14062_v29  ;;  %v14407_v55 = vor.u32 %v15580_v19, %v14406_v44  ;;  %v15477_v1 = vld [vmem:[%s23825_s2 + $0xb4] sm:$0xf0]  ;;  %v15473_v35 = vld [vmem:[%s23825_s2 + $0x9c] sm:$0xf]  ;;  %v14342_v23 = vld [vmem:[%s23825_s2 + $0x350] sm:$0xf] }
 0x705   :  { %v13999_v10 = vor.u32 %v15477_v1, %v13998_v28  ;;  %v15560_v42 = vld [vmem:[%s23825_s2 + $0x354] sm:$0xf]  ;;  %v13968_v29 = vld [vmem:[%s23825_s2 + $0x78] sm:$0xf0]  ;;  %v15556_v54 = vld [vmem:[%s23825_s2 + $0x32c] sm:$0xf0] }
 0x706   :  { %v15552_v44 = vld [vmem:[%s23825_s2 + $0x314] sm:$0xf]  ;;  %v15457_v19 = vld [vmem:[%s23825_s2 + $0x1c] sm:$0xf]  ;;  %v14214_v28 = vld [vmem:[%s23825_s2 + $0x250] sm:$0xf] }
 0x707   :  { %v15835_v47 = vpop.eup %15834  ;;  %v15532_v1 = vld [vmem:[%s23825_s2 + $0x26c] sm:$0xf0] }
 0x708   :  { %v8621_v5 = vadd.f32 1.0, %v15835_v47  ;;  %9526 = vmatpush.bf16.msra.mxu0 %v13959_v45  ;;  %9552 = vmatpush.bf16.msrb.mxu2 %v13963_v9  ;;  %v14408_v47 = vld [vmem:[%s23825_s2 + $0x3f0] sm:$0xf0]  ;;  %v14030_v45 = vld [vmem:[%s23825_s2 + $0xd8] sm:$0xf] }
 0x709   :  { %v14411_v46 = vor.u32 %v15576_v62, %v14408_v47  ;;  %v13936_v62 = vld [vmem:[%s23825_s2 + $0x38] sm:$0xf0] }
 0x70a   :  { %15836 = vrcp.f32 %v8621_v5  ;;  %v8633_v51 = vand.u32 2147483648, %v8621_v5  ;;  %v8631_v4 = vand.u32 2147483647, %v8621_v5  ;;  %vm8627_vm5 = vweird.f32 %v8621_v5 }
 0x70b   :  { %15838 = vtanh.f32 %v23360_v15 }
 0x70c   :  { %9527 = vmatpush.bf16.msra.mxu0 %v13927_v16  ;;  %9553 = vmatpush.bf16.msrb.mxu2 %v13931_v49  ;;  %v8634_v39 = vor.u32 1.1754944e-38, %v8633_v51  ;;  %vm8632_vm7 = vcmp.eq.f32.partialorder %v8631_v4, 8.507059e+37  ;;  %v14031_v49 = vor.u32 %v15485_v17, %v14030_v45  ;;  %v13966_v51 = vld [vmem:[%s23825_s2 + $0x58] sm:$0xf]  ;;  %v14310_v4 = vld [vmem:[%s23825_s2 + $0x310] sm:$0xf] }
 0x70d   :  { %v14278_v45 = vld [vmem:[%s23825_s2 + $0x2d0] sm:$0xf] }
 0x70e   :  { %v15548_v17 = vld [vmem:[%s23825_s2 + $0x2ec] sm:$0xf0] }
 0x70f   :  { %9528 = vmatmul.bf16.vlgmr.msra.gmra.mxu0 %v23210_v37  ;;  %9554 = vmatmul.bf16.vlgmr.msrb.gmra.mxu2 %v23210_v37 }
 0x710   :  { %v15837_v21 = vpop.eup %15836  ;;  %9572 = vmatpush.bf16.msrb.mxu0 %v14159_v31  ;;  %9598 = vmatpush.bf16.msra.mxu2 %v14163_v20  ;;  %v15568_v20 = vld [vmem:[%s23825_s2 + $0x394] sm:$0xf] }
 0x711   :  { %v8623_v38 = vmul.f32 %v15837_v21, %v8621_v5  ;;  %vm8628_vm4 = vweird.f32 %v15837_v21  ;;  %v15839_v9 = vpop.eup %15838  ;;  %v14032_v5 = vld [vmem:[%s23825_s2 + $0xf8] sm:$0xf0] }
 0x712   :  { %vm8629_vm6 = vmor %vm8627_vm5, %vm8628_vm4  ;;  %v14035_v31 = vor.u32 %v15481_v58, %v14032_v5  ;;  %v15544_v58 = vld [vmem:[%s23825_s2 + $0x2d4] sm:$0xf] }
 0x713   :  { %v8624_v11 = vsub.f32 1.0, %v8623_v38  ;;  %v15564_v38 = vld [vmem:[%s23825_s2 + $0x36c] sm:$0xf0]  ;;  %v14280_v5 = vld [vmem:[%s23825_s2 + $0x2f0] sm:$0xf0] }
 0x714   :  { %9573 = vmatpush.bf16.msrb.mxu0 %v14127_v3  ;;  %9599 = vmatpush.bf16.msra.mxu2 %v14131_v7  ;;  %v14375_v3 = vor.u32 %v15572_v34, %v14374_v22  ;;  %v14379_v7 = vor.u32 %v15568_v20, %v14376_v13  ;;  %v14343_v27 = vor.u32 %v15564_v38, %v14342_v23  ;;  %v14246_v22 = vld [vmem:[%s23825_s2 + $0x290] sm:$0xf]  ;;  %v15520_v38 = vld [vmem:[%s23825_s2 + $0x214] sm:$0xf] }
 0x715   :  { %v8625_v59 = vmul.f32 %v15837_v21, %v8624_v11  ;;  %v14344_v11 = vld [vmem:[%s23825_s2 + $0x370] sm:$0xf0]  ;;  %v15540_v34 = vld [vmem:[%s23825_s2 + $0x2ac] sm:$0xf0] }
 0x716   :  { %v14247_v20 = vor.u32 %v15540_v34, %v14246_v22  ;;  %v15524_v23 = vld [vmem:[%s23825_s2 + $0x22c] sm:$0xf0]  ;;  %v14288_v22 = vld [vmem:[%s23825_s2 + $0x2f8] sm:$0xf0] }
 0x717   :  { %v8626_v61 = vadd.f32 %v15837_v21, %v8625_v59  ;;  %v14347_v59 = vor.u32 %v15560_v42, %v14344_v11  ;;  %v15581_v42 = vld [vmem:[%s23825_s2 + $0x3f4] sm:$0xf0]  ;;  %v15577_v11 = vld [vmem:[%s23825_s2 + $0x3dc] sm:$0xf] }
 0x718   :  { %9574 = vmatpush.bf16.msrb.mxu0 %v14095_v6  ;;  %9600 = vmatpush.bf16.msra.mxu2 %v14099_v63  ;;  %v15469_v6 = vld [vmem:[%s23825_s2 + $0x74] sm:$0xf0]  ;;  %v15465_v63 = vld [vmem:[%s23825_s2 + $0x5c] sm:$0xf] }
 0x719   :  { %v8630_v24 = vsel %vm8629_vm6, %v15837_v21, %v8626_v61  ;;  %v14000_v21 = vld [vmem:[%s23825_s2 + $0xb8] sm:$0xf0]  ;;  %v13967_v50 = vor.u32 %v15469_v6, %v13966_v51  ;;  %v13971_v61 = vor.u32 %v15465_v63, %v13968_v29 }
 0x71a   :  { %v8635_v57 = vsel %vm8632_vm7, %v8634_v39, %v8630_v24  ;;  %v14003_v25 = vor.u32 %v15473_v35, %v14000_v21  ;;  %v14312_v39 = vld [vmem:[%s23825_s2 + $0x330] sm:$0xf0]  ;;  %v14311_v24 = vor.u32 %v15556_v54, %v14310_v4  ;;  %v14416_v51 = vld [vmem:[%s23825_s2 + $0x3f8] sm:$0xf0]  ;;  %v15573_v4 = vld [vmem:[%s23825_s2 + $0x3b4] sm:$0xf0] }
 0x71b   :  { %v23463_v0 = vmul.f32 %v15839_v9, %v8635_v57  ;;  %v14315_v47 = vor.u32 %v15552_v44, %v14312_v39  ;;  %v13939_v57 = vor.u32 %v15457_v19, %v13936_v62  ;;  %v15528_v35 = vld [vmem:[%s23825_s2 + $0x254] sm:$0xf]  ;;  %v15569_v54 = vld [vmem:[%s23825_s2 + $0x39c] sm:$0xf]  ;;  %v14350_v39 = vld [vmem:[%s23825_s2 + $0x358] sm:$0xf] }
 0x71c   :  { %9575 = vmatpush.bf16.msrb.mxu0 %v14063_v26  ;;  %9601 = vmatpush.bf16.msra.mxu2 %v14067_v56  ;;  %v13934_v26 = vld [vmem:[%s23825_s2 + $0x18] sm:$0xf]  ;;  %v14216_v21 = vld [vmem:[%s23825_s2 + $0x270] sm:$0xf0]  ;;  %v14352_v19 = vld [vmem:[%s23825_s2 + $0x378] sm:$0xf0] }
 0x71d   :  { %v23473_v16 = vpack.c.bf16 %v23463_v0, %v23463_v0  ;;  %v15461_v56 = vld [vmem:[%s23825_s2 + $0x34] sm:$0xf0] }
 0x71e   :  { %v13935_v9 = vor.u32 %v15461_v56, %v13934_v26  ;;  %v15565_v26 = vld [vmem:[%s23825_s2 + $0x374] sm:$0xf0]  ;;  %v15561_v56 = vld [vmem:[%s23825_s2 + $0x35c] sm:$0xf] }
 0x71f   :  { %9437 = vmatmul.bf16.vlgmr.msra.gmra.mxu1 %v23473_v16  ;;  %9463 = vmatmul.bf16.vlgmr.msrb.gmra.mxu3 %v23473_v16  ;;  %v14351_v62 = vor.u32 %v15565_v26, %v14350_v39  ;;  %v23916_v26 = vld [vmem:[#allocation33_spill] sm:$0xff] }
 0x720   :  { %9533 = vmatpush.bf16.msra.mxu1 %v14407_v55  ;;  %9559 = vmatpush.bf16.msrb.mxu3 %v14411_v46  ;;  %v14279_v55 = vor.u32 %v15548_v17, %v14278_v45  ;;  %v14283_v46 = vor.u32 %v15544_v58, %v14280_v5  ;;  %v15557_v45 = vld [vmem:[%s23825_s2 + $0x334] sm:$0xf0] }
 0x721   :  { %9576 = vmatpush.bf16.msrb.mxu0 %v14031_v49  ;;  %9602 = vmatpush.bf16.msra.mxu2 %v14035_v31  ;;  %v15536_v49 = vld [vmem:[%s23825_s2 + $0x294] sm:$0xf]  ;;  %v14286_v5 = vld [vmem:[%s23825_s2 + $0x2d8] sm:$0xf] }
 0x722   :  { %v14248_v31 = vld [vmem:[%s23825_s2 + $0x2b0] sm:$0xf0] }
 0x723   :  { %v14251_v13 = vor.u32 %v15536_v49, %v14248_v31  ;;  %v14254_v31 = vld [vmem:[%s23825_s2 + $0x298] sm:$0xf] }
 0x724   :  { %9534 = vmatpush.bf16.msra.mxu1 %v14375_v3  ;;  %9560 = vmatpush.bf16.msrb.mxu3 %v14379_v7  ;;  %v14215_v3 = vor.u32 %v15532_v1, %v14214_v28  ;;  %v14219_v7 = vor.u32 %v15528_v35, %v14216_v21  ;;  %v14256_v28 = vld [vmem:[%s23825_s2 + $0x2b8] sm:$0xf0]  ;;  %v14222_v21 = vld [vmem:[%s23825_s2 + $0x258] sm:$0xf] }
 0x725   :  { %9577 = vmatpush.bf16.msrb.mxu0 %v13999_v10  ;;  %9603 = vmatpush.bf16.msra.mxu2 %v14003_v25  ;;  %v14184_v10 = vld [vmem:[%s23825_s2 + $0x230] sm:$0xf0]  ;;  %v14414_v25 = vld [vmem:[%s23825_s2 + $0x3d8] sm:$0xf] }
 0x726   :  { %v14187_v63 = vor.u32 %v15520_v38, %v14184_v10  ;;  %v14415_v29 = vor.u32 %v15581_v42, %v14414_v25  ;;  %v14190_v10 = vld [vmem:[%s23825_s2 + $0x218] sm:$0xf]  ;;  %v15521_v42 = vld [vmem:[%s23825_s2 + $0x21c] sm:$0xf] }
 0x727   :  { %v15525_v25 = vld [vmem:[%s23825_s2 + $0x234] sm:$0xf0] }
 0x728   :  { %9535 = vmatpush.bf16.msra.mxu1 %v14343_v27  ;;  %9561 = vmatpush.bf16.msrb.mxu3 %v14347_v59  ;;  %v14419_v27 = vor.u32 %v15577_v11, %v14416_v51  ;;  %v14382_v59 = vld [vmem:[%s23825_s2 + $0x398] sm:$0xf]  ;;  %v14192_v11 = vld [vmem:[%s23825_s2 + $0x238] sm:$0xf0]  ;;  %v14191_v51 = vor.u32 %v15525_v25, %v14190_v10 }
 0x729   :  { %9578 = vmatpush.bf16.msrb.mxu0 %v13967_v50  ;;  %9604 = vmatpush.bf16.msra.mxu2 %v13971_v61  ;;  %v14384_v50 = vld [vmem:[%s23825_s2 + $0x3b8] sm:$0xf0]  ;;  %v14383_v61 = vor.u32 %v15573_v4, %v14382_v59  ;;  %v15586_v59 = vld [vmem:[%s23827_s4 + $0x20] sm:$0xff] }
 0x72a   :  { %v14387_v44 = vor.u32 %v15569_v54, %v14384_v50  ;;  %v15585_v4 = vld [vmem:[%s23827_s4 + $0x18] sm:$0xff]  ;;  %v15583_v54 = vld [vmem:[%s23827_s4 + $0x8] sm:$0xff] }
 0x72c   :  { %9536 = vmatpush.bf16.msra.mxu1 %v14311_v24  ;;  %9562 = vmatpush.bf16.msrb.mxu3 %v14315_v47  ;;  %v14355_v24 = vor.u32 %v15561_v56, %v14352_v19  ;;  %v14318_v47 = vld [vmem:[%s23825_s2 + $0x318] sm:$0xf]  ;;  %v9777_v56 = vpack.c.bf16 %v18626_v53, %v23916_v26 }
 0x72d   :  { %9579 = vmatpush.bf16.msrb.mxu0 %v13935_v9  ;;  %9605 = vmatpush.bf16.msra.mxu2 %v13939_v57  ;;  %v15553_v9 = vld [vmem:[%s23825_s2 + $0x31c] sm:$0xf]  ;;  %v14319_v17 = vor.u32 %v15557_v45, %v14318_v47  ;;  %v9778_v45 = vpack.c.bf16 %v20457_v60, %v19538_v52  ;;  %v23918_v60 = vld [vmem:[#allocation10_spill] sm:$0xff] }
 0x72e   :  { %v14320_v57 = vld [vmem:[%s23825_s2 + $0x338] sm:$0xf0] }
 0x72f   :  { %9489 = vmatmul.bf16.vlgmr.msrb.gmra.mxu1 %v23473_v16  ;;  %9515 = vmatmul.bf16.vlgmr.msra.gmra.mxu3 %v23473_v16  ;;  %v14323_v58 = vor.u32 %v15553_v9, %v14320_v57 }
 0x730   :  { %9537 = vmatpush.bf16.msra.mxu1 %v14279_v55  ;;  %9563 = vmatpush.bf16.msrb.mxu3 %v14283_v46  ;;  %v15549_v55 = vld [vmem:[%s23825_s2 + $0x2f4] sm:$0xf0]  ;;  %v15545_v46 = vld [vmem:[%s23825_s2 + $0x2dc] sm:$0xf] }
 0x731   :  { %9580 = vmatmul.bf16.vlgmr.msrb.gmra.mxu0 %v23210_v37  ;;  %9606 = vmatmul.bf16.vlgmr.msra.gmra.mxu2 %v23210_v37  ;;  %v14182_v37 = vld [vmem:[%s23825_s2 + $0x210] sm:$0xf]  ;;  %v14287_v34 = vor.u32 %v15549_v55, %v14286_v5  ;;  %v14291_v49 = vor.u32 %v15545_v46, %v14288_v22  ;;  %v9779_v5 = vpack.c.bf16 %v22286_v18, %v21369_v48  ;;  %v23917_v55 = vld [vmem:[#allocation9_spill] sm:$0xff] }
 0x732   :  { %v14183_v6 = vor.u32 %v15524_v23, %v14182_v37  ;;  %v14224_v37 = vld [vmem:[%s23825_s2 + $0x278] sm:$0xf0]  ;;  %v487_v46 = vadd.f32 %v23917_v55, %v16839_v2 }
 0x734   :  { %9538 = vmatpush.bf16.msra.mxu1 %v14247_v20  ;;  %9564 = vmatpush.bf16.msrb.mxu3 %v14251_v13  ;;  %v15541_v20 = vld [vmem:[%s23825_s2 + $0x2b4] sm:$0xf0]  ;;  %v15537_v13 = vld [vmem:[%s23825_s2 + $0x29c] sm:$0xf] }
 0x735   :  { %v14255_v1 = vor.u32 %v15541_v20, %v14254_v31  ;;  %v14259_v35 = vor.u32 %v15537_v13, %v14256_v28  ;;  %v516_v20 = vadd.f32 %v23918_v60, %v16865_v14 }
 0x738   :  { %9539 = vmatpush.bf16.msra.mxu1 %v14215_v3  ;;  %9565 = vmatpush.bf16.msrb.mxu3 %v14219_v7  ;;  %v15533_v3 = vld [vmem:[%s23825_s2 + $0x274] sm:$0xf0]  ;;  %v15529_v7 = vld [vmem:[%s23825_s2 + $0x25c] sm:$0xf] }
 0x739   :  { %v14223_v23 = vor.u32 %v15533_v3, %v14222_v21  ;;  %v14227_v38 = vor.u32 %v15529_v7, %v14224_v37 }
 0x73c   :  { %9540 = vmatpush.bf16.msra.mxu1 %v14183_v6  ;;  %9566 = vmatpush.bf16.msrb.mxu3 %v14187_v63  ;;  %v14195_v6 = vor.u32 %v15521_v42, %v14192_v11  ;;  %v15589_v63 = vld [vmem:[%s23827_s4 + $0x38] sm:$0xff] }
 0x73d   :  { %v23920_v11 = vld [vmem:[#allocation24_spill] sm:$0xff] }
 0x73f   :  { %9541 = vmatmul.bf16.vlgmr.msra.gmra.mxu1 %v23473_v16  ;;  %9567 = vmatmul.bf16.vlgmr.msrb.gmra.mxu3 %v23473_v16 }
 0x740   :  { %9585 = vmatpush.bf16.msrb.mxu1 %v14415_v29  ;;  %9611 = vmatpush.bf16.msra.mxu3 %v14419_v27  ;;  %v15588_v29 = vld [vmem:[%s23827_s4 + $0x30] sm:$0xff]  ;;  %v15587_v27 = vld [vmem:[%s23827_s4 + $0x28] sm:$0xff] }
 0x744   :  { %9586 = vmatpush.bf16.msrb.mxu1 %v14383_v61  ;;  %9612 = vmatpush.bf16.msra.mxu3 %v14387_v44  ;;  %v15582_v61 = vld [vmem:[%s23827_s4] sm:$0xff] }
 0x748   :  { %9587 = vmatpush.bf16.msrb.mxu1 %v14351_v62  ;;  %9613 = vmatpush.bf16.msra.mxu3 %v14355_v24 }
 0x74c   :  { %9588 = vmatpush.bf16.msrb.mxu1 %v14319_v17  ;;  %9614 = vmatpush.bf16.msra.mxu3 %v14323_v58 }
 0x750   :  { %9589 = vmatpush.bf16.msrb.mxu1 %v14287_v34  ;;  %9615 = vmatpush.bf16.msra.mxu3 %v14291_v49 }
 0x754   :  { %9590 = vmatpush.bf16.msrb.mxu1 %v14255_v1  ;;  %9616 = vmatpush.bf16.msra.mxu3 %v14259_v35 }
 0x758   :  { %9591 = vmatpush.bf16.msrb.mxu1 %v14223_v23  ;;  %9617 = vmatpush.bf16.msra.mxu3 %v14227_v38  ;;  %v23919_v23 = vld [vmem:[#allocation23_spill] sm:$0xff] }
 0x759   :  { %v545_v38 = vadd.f32 %v23919_v23, %v17095_v33 }
 0x75c   :  { %9592 = vmatpush.bf16.msrb.mxu1 %v14191_v51  ;;  %9618 = vmatpush.bf16.msra.mxu3 %v14195_v6  ;;  %v574_v51 = vadd.f32 %v23920_v11, %v17104_v41  ;;  %v15595_v11 = vld [vmem:[%s23828_s5 + $0x28] sm:$0xff] }
 0x75f   :  { %9593 = vmatmul.bf16.vlgmr.msrb.gmra.mxu1 %v23473_v16  ;;  %9619 = vmatmul.bf16.vlgmr.msra.gmra.mxu3 %v23473_v16  ;;  %v15584_v16 = vld [vmem:[%s23827_s4 + $0x10] sm:$0xff] }
 0x760   :  { %9950 = vmatpush.bf16.msra.mxu1 %v15589_v63 }
 0x764   :  { %9951 = vmatpush.bf16.msra.mxu1 %v15588_v29 }
 0x768   :  { %9952 = vmatpush.bf16.msra.mxu1 %v15587_v27 }
 0x76c   :  { %9953 = vmatpush.bf16.msra.mxu1 %v15586_v59  ;;  %v9425_v50 = vpop.f32.mrf.mxu0 }
 0x770   :  { %9954 = vmatpush.bf16.msra.mxu1 %v15585_v4 }
 0x772   :  { %v9451_v44 = vpop.f32.mrf.mxu2 }
 0x774   :  { %9955 = vmatpush.bf16.msra.mxu1 %v15584_v16  ;;  %v9427_v39 = vpop.f32.mrf.mxu0 }
 0x778   :  { %9956 = vmatpush.bf16.msra.mxu1 %v15583_v54 }
 0x77a   :  { %v9453_v19 = vpop.f32.mrf.mxu2 }
 0x77c   :  { %9957 = vmatpush.bf16.msra.mxu1 %v15582_v61  ;;  %v9477_v62 = vpop.f32.mrf.mxu0 }
 0x77f   :  { %9958 = vmatmul.bf16.vlgmr.msra.gmra.mxu1 %v9777_v56 }
 0x782   :  { %v9503_v24 = vpop.f32.mrf.mxu2 }
 0x784   :  { %v9479_v47 = vpop.f32.mrf.mxu0 }
 0x78a   :  { %v9505_v9 = vpop.f32.mrf.mxu2 }
 0x78c   :  { %v23723_v57 = vpop.f32.mrf.mxu0 }
 0x78f   :  { %9963 = vmatmul.bf16.gmra.mxu1 %v9778_v45 }
 0x792   :  { %v23725_v17 = vpop.f32.mrf.mxu2 }
 0x794   :  { %v9531_v58 = vpop.f32.mrf.mxu0 }
 0x79a   :  { %v9557_v34 = vpop.f32.mrf.mxu2 }
 0x79c   :  { %v9438_v53 = vpop.f32.mrf.mxu1 }
 0x79d   :  { %v9439_v22 = vadd.f32 %v9438_v53, %v9425_v50 }
 0x79f   :  { %9968 = vmatmul.bf16.gmra.mxu1 %v9779_v5  ;;  %v9632_v49 = vadd.f32 %v9439_v22, %v487_v46 }
 0x7a1   :  { %v14420_v31 = vmul.f32 -1.442695, %v9632_v49  ;;  %v23921_v49 = vld [vmem:[#allocation11_spill] sm:$0xff] }
 0x7a2   :  { %v9464_v52 = vpop.f32.mrf.mxu3 }
 0x7a3   :  { %15840 = vpow2.f32 %v14420_v31  ;;  %v9465_v13 = vadd.f32 %v9464_v52, %v9451_v44 }
 0x7a4   :  { %v9440_v28 = vpop.f32.mrf.mxu1 }
 0x7a5   :  { %v9633_v1 = vadd.f32 %v9465_v13, %v516_v20 }
 0x7a7   :  { %v14421_v35 = vmul.f32 -1.442695, %v9633_v1 }
 0x7a9   :  { %v15841_v21 = vpop.eup %15840  ;;  %15842 = vpow2.f32 %v14421_v35 }
 0x7aa   :  { %v9639_v48 = vadd.f32 1.0, %v15841_v21  ;;  %v9466_v18 = vpop.f32.mrf.mxu3 }
 0x7ac   :  { %15844 = vrcp.f32 %v9639_v48  ;;  %v9490_v3 = vpop.f32.mrf.mxu1  ;;  %v9651_v16 = vand.u32 2147483648, %v9639_v48  ;;  %v9649_v33 = vand.u32 2147483647, %v9639_v48  ;;  %vm9645_vm9 = vweird.f32 %v9639_v48 }
 0x7ad   :  { %v9491_v2 = vadd.f32 %v9490_v3, %v9477_v62  ;;  %v23922_v3 = vld [vmem:[#allocation12_spill] sm:$0xff] }
 0x7ae   :  { %v23733_v7 = vpop.f32.mrf.mxu0  ;;  %v9652_v41 = vor.u32 1.1754944e-38, %v9651_v16  ;;  %vm9650_vm11 = vcmp.eq.f32.partialorder %v9649_v33, 8.507059e+37  ;;  %v15594_v16 = vld [vmem:[%s23828_s5 + $0x20] sm:$0xff] }
 0x7af   :  { %v15843_v37 = vpop.eup %15842  ;;  %v9634_v25 = vadd.f32 %v9491_v2, %v545_v38  ;;  %v15596_v38 = vld [vmem:[%s23828_s5 + $0x30] sm:$0xff] }
 0x7b0   :  { %v9658_v10 = vadd.f32 1.0, %v15843_v37 }
 0x7b2   :  { %v15845_v14 = vpop.eup %15844  ;;  %15846 = vrcp.f32 %v9658_v10  ;;  %v9516_v42 = vpop.f32.mrf.mxu3  ;;  %v9670_v47 = vand.u32 2147483648, %v9658_v10  ;;  %v9668_v9 = vand.u32 2147483647, %v9658_v10  ;;  %vm9664_vm13 = vweird.f32 %v9658_v10 }
 0x7b3   :  { %v9641_v6 = vmul.f32 %v15845_v14, %v9639_v48  ;;  %v9517_v63 = vadd.f32 %v9516_v42, %v9503_v24  ;;  %15848 = vtanh.f32 %v9634_v25  ;;  %vm9646_vm8 = vweird.f32 %v15845_v14  ;;  %v15597_v48 = vld [vmem:[%s23828_s5 + $0x38] sm:$0xff] }
 0x7b4   :  { %v23739_v29 = vpop.f32.mrf.mxu2  ;;  %v9492_v27 = vpop.f32.mrf.mxu1  ;;  %vm9647_vm10 = vmor %vm9645_vm9, %vm9646_vm8  ;;  %v9671_v52 = vor.u32 1.1754944e-38, %v9670_v47  ;;  %vm9669_vm15 = vcmp.eq.f32.partialorder %v9668_v9, 8.507059e+37  ;;  %9873 = vmatpush.bf16.msra.mxu0 %v15597_v48 }
 0x7b5   :  { %v9642_v59 = vsub.f32 1.0, %v9641_v6  ;;  %v9635_v4 = vadd.f32 %v9517_v63, %v574_v51 }
 0x7b6   :  { %v9583_v54 = vpop.f32.mrf.mxu0 }
 0x7b7   :  { %v9643_v50 = vmul.f32 %v15845_v14, %v9642_v59  ;;  %v14422_v61 = vmul.f32 -1.442695, %v9635_v4 }
 0x7b8   :  { %v15847_v44 = vpop.eup %15846  ;;  %9874 = vmatpush.bf16.msra.mxu0 %v15596_v38 }
 0x7b9   :  { %v9660_v39 = vmul.f32 %v15847_v44, %v9658_v10  ;;  %v9644_v26 = vadd.f32 %v15845_v14, %v9643_v50  ;;  %15850 = vpow2.f32 %v14422_v61  ;;  %v15849_v24 = vpop.eup %15848  ;;  %vm9665_vm12 = vweird.f32 %v15847_v44 }
 0x7ba   :  { %v9518_v56 = vpop.f32.mrf.mxu3  ;;  %vm9666_vm14 = vmor %vm9664_vm13, %vm9665_vm12 }
 0x7bb   :  { %v9661_v19 = vsub.f32 1.0, %v9660_v39  ;;  %v9648_v62 = vsel %vm9647_vm10, %v15845_v14, %v9644_v26  ;;  %v15593_v26 = vld [vmem:[%s23828_s5 + $0x18] sm:$0xff] }
 0x7bc   :  { %v9653_v45 = vsel %vm9650_vm11, %v9652_v41, %v9648_v62  ;;  %v9609_v58 = vpop.f32.mrf.mxu2  ;;  %v9542_v5 = vpop.f32.mrf.mxu1  ;;  %9875 = vmatpush.bf16.msra.mxu0 %v15595_v11  ;;  %v15592_v62 = vld [vmem:[%s23828_s5 + $0x10] sm:$0xff] }
 0x7bd   :  { %v9662_v53 = vmul.f32 %v15847_v44, %v9661_v19  ;;  %v9695_v55 = vmul.f32 %v15849_v24, %v9653_v45  ;;  %v9543_v46 = vadd.f32 %v9542_v5, %v23723_v57  ;;  %v15591_v58 = vld [vmem:[%s23828_s5 + $0x8] sm:$0xff] }
 0x7bf   :  { %v15851_v22 = vpop.eup %15850  ;;  %v9663_v34 = vadd.f32 %v15847_v44, %v9662_v53  ;;  %v9699_v31 = vadd.f32 %v9543_v46, %v23921_v49 }
 0x7c0   :  { %v9678_v60 = vadd.f32 1.0, %v15851_v22  ;;  %9876 = vmatpush.bf16.msra.mxu0 %v15594_v16 }
 0x7c1   :  { %v9667_v20 = vsel %vm9666_vm14, %v15847_v44, %v9663_v34  ;;  %v14423_v13 = vmul.f32 -1.442695, %v9699_v31 }
 0x7c2   :  { %v9672_v28 = vsel %vm9669_vm15, %v9671_v52, %v9667_v20  ;;  %15852 = vrcp.f32 %v9678_v60  ;;  %v9568_v1 = vpop.f32.mrf.mxu3  ;;  %v9690_v42 = vand.u32 2147483648, %v9678_v60  ;;  %v9688_v6 = vand.u32 2147483647, %v9678_v60 }
 0x7c3   :  { %v9694_v35 = vmul.f32 %v9672_v28, %v23117_v40  ;;  %15854 = vpow2.f32 %v14423_v13  ;;  %v9569_v21 = vadd.f32 %v9568_v1, %v23725_v17  ;;  %vm9684_vm1 = vweird.f32 %v9678_v60 }
 0x7c4   :  { %v9544_v57 = vpop.f32.mrf.mxu1  ;;  %v9691_v4 = vor.u32 1.1754944e-38, %v9690_v42  ;;  %vm9689_vm3 = vcmp.eq.f32.partialorder %v9688_v6, 8.507059e+37  ;;  %9877 = vmatpush.bf16.msra.mxu0 %v15593_v26 }
 0x7c5   :  { %v9696_v18 = vadd.f32 %v9695_v55, %v9694_v35  ;;  %v9700_v2 = vadd.f32 %v9569_v21, %v23922_v3 }
 0x7c7   :  { %v14424_v37 = vmul.f32 -1.442695, %v9700_v2 }
 0x7c8   :  { %v15853_v23 = vpop.eup %15852  ;;  %9878 = vmatpush.bf16.msra.mxu0 %v15592_v62 }
 0x7c9   :  { %v15855_v10 = vpop.eup %15854  ;;  %v9680_v40 = vmul.f32 %v15853_v23, %v9678_v60  ;;  %15856 = vpow2.f32 %v14424_v37  ;;  %vm9685_vm0 = vweird.f32 %v15853_v23 }
 0x7ca   :  { %v23752_v14 = vadd.f32 1.0, %v15855_v10  ;;  %v9570_v17 = vpop.f32.mrf.mxu3  ;;  %15858 = vtanh.f32 %v9696_v18  ;;  %vm9686_vm2 = vmor %vm9684_vm1, %vm9685_vm0  ;;  %v23926_v18 = vld [vmem:[#allocation26_spill] sm:$0xff] }
 0x7cb   :  { %v9681_v25 = vsub.f32 1.0, %v9680_v40 }
 0x7cc   :  { %15860 = vrcp.f32 %v23752_v14  ;;  %vm9712_vm6 = vweird.f32 %v23752_v14  ;;  %v9718_v49 = vand.u32 2147483648, %v23752_v14  ;;  %9879 = vmatpush.bf16.msra.mxu0 %v15591_v58  ;;  %v9716_v52 = vand.u32 2147483647, %v23752_v14 }
 0x7cd   :  { %v9682_v51 = vmul.f32 %v15853_v23, %v9681_v25 }
 0x7ce   :  { %v9719_v57 = vor.u32 1.1754944e-38, %v9718_v49  ;;  %vm9717_vm11 = vcmp.eq.f32.partialorder %v9716_v52, 8.507059e+37 }
 0x7cf   :  { %v15857_v63 = vpop.eup %15856  ;;  %v9683_v27 = vadd.f32 %v15853_v23, %v9682_v51 }
 0x7d0   :  { %v9725_v59 = vadd.f32 1.0, %v15857_v63  ;;  %v15859_v54 = vpop.eup %15858 }
 0x7d1   :  { %v9687_v50 = vsel %vm9686_vm2, %v15853_v23, %v9683_v27 }
 0x7d2   :  { %v15861_v33 = vpop.eup %15860  ;;  %15862 = vrcp.f32 %v9725_v59  ;;  %v9692_v61 = vsel %vm9689_vm3, %v9691_v4, %v9687_v50  ;;  %v9737_v53 = vand.u32 2147483648, %v9725_v59  ;;  %v9735_v34 = vand.u32 2147483647, %v9725_v59 }
 0x7d3   :  { %v9708_v44 = vmul.f32 %v15861_v33, %v23752_v14  ;;  %v9698_v39 = vmul.f32 %v15859_v54, %v9692_v61  ;;  %vm9713_vm4 = vweird.f32 %v15861_v33  ;;  %vm9731_vm7 = vweird.f32 %v9725_v59 }
 0x7d4   :  { %vm23779_vm8 = vmor %vm9712_vm6, %vm9713_vm4  ;;  %v9738_v13 = vor.u32 1.1754944e-38, %v9737_v53  ;;  %vm9736_vm10 = vcmp.eq.f32.partialorder %v9735_v34, 8.507059e+37  ;;  %v9807_v61 = vpack.c.bf16 %v19803_v43, %v20717_v8 }
 0x7d5   :  { %v9709_v41 = vsub.f32 1.0, %v9708_v44  ;;  %v9780_v56 = vpack.c.bf16 %v9698_v39, %v23198_v32  ;;  %v23923_v32 = vld [vmem:[#allocation25_spill] sm:$0xff]  ;;  %v23927_v44 = vld [vmem:[#allocation34_spill] sm:$0xff] }
 0x7d6   :  { %v9808_v39 = vpack.c.bf16 %v23927_v44, %v18886_v36 }
 0x7d7   :  { %9973 = vmatmul.bf16.gmra.mxu1 %v9780_v56  ;;  %v9710_v45 = vmul.f32 %v15861_v33, %v9709_v41  ;;  %v15615_v56 = vld [vmem:[%s23829_s6] ss:$0 sm:$0xff] }
 0x7d8   :  { %v15863_v19 = vpop.eup %15862 }
 0x7d9   :  { %v9727_v24 = vmul.f32 %v15863_v19, %v9725_v59  ;;  %vm9732_vm5 = vweird.f32 %v15863_v19  ;;  %v9711_v22 = vadd.f32 %v15861_v33, %v9710_v45 }
 0x7da   :  { %vm9733_vm9 = vmor %vm9731_vm7, %vm9732_vm5 }
 0x7db   :  { %v9728_v5 = vsub.f32 1.0, %v9727_v24  ;;  %v9715_v1 = vsel %vm23779_vm8, %v15861_v33, %v9711_v22  ;;  %v9806_v33 = vpack.c.bf16 %v21634_v30, %v22546_v12 }
 0x7dc   :  { %v9594_v47 = vpop.f32.mrf.mxu1  ;;  %v9720_v23 = vsel %vm9717_vm11, %v9719_v57, %v9715_v1 }
 0x7dd   :  { %v9595_v9 = vadd.f32 %v9594_v47, %v23733_v7  ;;  %v9729_v46 = vmul.f32 %v15863_v19, %v9728_v5  ;;  %v15590_v7 = vld [vmem:[%s23828_s5] sm:$0xff] }
 0x7de   :  { %9880 = vmatpush.bf16.msra.mxu0 %v15590_v7 }
 0x7df   :  { %v9701_v55 = vadd.f32 %v9595_v9, %v23923_v32  ;;  %v9730_v60 = vadd.f32 %v15863_v19, %v9729_v46 }
 0x7e1   :  { %15864 = vtanh.f32 %v9701_v55  ;;  %v9734_v35 = vsel %vm9733_vm9, %v15863_v19, %v9730_v60 }
 0x7e2   :  { %v9620_v20 = vpop.f32.mrf.mxu3  ;;  %v9739_v48 = vsel %vm9736_vm10, %v9738_v13, %v9734_v35 }
 0x7e3   :  { %v9621_v28 = vadd.f32 %v9620_v20, %v23739_v29  ;;  %v9761_v2 = vmul.f32 %v9739_v48, %v23360_v15 }
 0x7e4   :  { %v9596_v21 = vpop.f32.mrf.mxu1 }
 0x7e5   :  { %v9702_v3 = vadd.f32 %v9621_v28, %v23926_v18 }
 0x7e7   :  { %v15865_v37 = vpop.eup %15864  ;;  %v14425_v38 = vmul.f32 -1.442695, %v9702_v3 }
 0x7e8   :  { %v9762_v10 = vmul.f32 %v15865_v37, %v9720_v23 }
 0x7e9   :  { %15866 = vpow2.f32 %v14425_v38 }
 0x7ea   :  { %v9763_v29 = vadd.f32 %v9762_v10, %v9761_v2  ;;  %v9622_v40 = vpop.f32.mrf.mxu3 }
 0x7ef   :  { %v15867_v14 = vpop.eup %15866 }
 0x7f0   :  { %v9745_v17 = vadd.f32 1.0, %v15867_v14 }
 0x7f2   :  { %15868 = vrcp.f32 %v9745_v17  ;;  %v9757_v51 = vand.u32 2147483648, %v9745_v17  ;;  %v9755_v63 = vand.u32 2147483647, %v9745_v17  ;;  %vm9751_vm13 = vweird.f32 %v9745_v17 }
 0x7f3   :  { %15870 = vtanh.f32 %v9763_v29 }
 0x7f4   :  { %v9758_v27 = vor.u32 1.1754944e-38, %v9757_v51  ;;  %vm9756_vm15 = vcmp.eq.f32.partialorder %v9755_v63, 8.507059e+37 }
 0x7f8   :  { %v15869_v25 = vpop.eup %15868 }
 0x7f9   :  { %v9747_v42 = vmul.f32 %v15869_v25, %v9745_v17  ;;  %vm9752_vm12 = vweird.f32 %v15869_v25  ;;  %v15871_v4 = vpop.eup %15870 }
 0x7fa   :  { %vm9753_vm14 = vmor %vm9751_vm13, %vm9752_vm12 }
 0x7fb   :  { %v9748_v11 = vsub.f32 1.0, %v9747_v42 }
 0x7fc   :  { %v9959_v26 = vpop.f32.mrf.mxu1 }
 0x7fd   :  { %v9749_v6 = vmul.f32 %v15869_v25, %v9748_v11 }
 0x7ff   :  { %v9750_v15 = vadd.f32 %v15869_v25, %v9749_v6 }
 0x801   :  { %v9754_v59 = vsel %vm9753_vm14, %v15869_v25, %v9750_v15 }
 0x802   :  { %v9759_v16 = vsel %vm9756_vm15, %v9758_v27, %v9754_v59 }
 0x803   :  { %v9765_v54 = vmul.f32 %v15871_v4, %v9759_v16 }
 0x804   :  { %v9961_v41 = vpop.f32.mrf.mxu1 }
 0x805   :  { %v9805_v50 = vpack.c.bf16 %v23463_v0, %v9765_v54 }
 0x807   :  { %9881 = vmatmul.bf16.vlgmr.msra.gmra.mxu0 %v9805_v50 }
 0x80c   :  { %v9964_v30 = vpop.f32.mrf.mxu1 }
 0x814   :  { %v9966_v47 = vpop.f32.mrf.mxu1 }
 0x817   :  { %9886 = vmatmul.bf16.gmra.mxu0 %v9806_v33 }
 0x81c   :  { %v9969_v53 = vpop.f32.mrf.mxu1 }
 0x824   :  { %v9971_v22 = vpop.f32.mrf.mxu1 }
 0x827   :  { %9891 = vmatmul.bf16.gmra.mxu0 %v9807_v61 }
 0x837   :  { %9896 = vmatmul.bf16.gmra.mxu0 %v9808_v39 }
 0x854   :  { %v9974_v31 = vpop.f32.mrf.mxu1 }
 0x85c   :  { %v9976_v13 = vpop.f32.mrf.mxu1 }
 0x884   :  { %v9882_v0 = vpop.f32.mrf.mxu0 }
 0x885   :  { %v9960_v19 = vadd.f32 %v9959_v26, %v9882_v0 }
 0x887   :  { %v9983_v62 = vadd.f32 %v15615_v56, %v9960_v19 }
 0x889   :  { %9991 = vst [vmem:[%s23830_s7] sm:$0xff] %v9983_v62 }
 0x88c   :  { %v9884_v43 = vpop.f32.mrf.mxu0 }
 0x88d   :  { %v9962_v8 = vadd.f32 %v9961_v41, %v9884_v43 }
 0x88f   :  { %v9984_v12 = vadd.f32 %v15615_v56, %v9962_v8 }
 0x891   :  { %9992 = vst [vmem:[%s23830_s7 + $0x8] sm:$0xff] %v9984_v12 }
 0x894   :  { %v9887_v36 = vpop.f32.mrf.mxu0 }
 0x895   :  { %v9965_v24 = vadd.f32 %v9964_v30, %v9887_v36 }
 0x897   :  { %v9985_v45 = vadd.f32 %v15615_v56, %v9965_v24 }
 0x899   :  { %9993 = vst [vmem:[%s23830_s7 + $0x10] sm:$0xff] %v9985_v45 }
 0x89c   :  { %v9889_v9 = vpop.f32.mrf.mxu0 }
 0x89d   :  { %v9967_v58 = vadd.f32 %v9966_v47, %v9889_v9 }
 0x89f   :  { %v9986_v5 = vadd.f32 %v15615_v56, %v9967_v58 }
 0x8a1   :  { %9994 = vst [vmem:[%s23830_s7 + $0x18] sm:$0xff] %v9986_v5 }
 0x8a4   :  { %v9892_v32 = vpop.f32.mrf.mxu0 }
 0x8a5   :  { %v9970_v55 = vadd.f32 %v9969_v53, %v9892_v32 }
 0x8a7   :  { %v9987_v46 = vadd.f32 %v15615_v56, %v9970_v55 }
 0x8a9   :  { %9995 = vst [vmem:[%s23830_s7 + $0x20] sm:$0xff] %v9987_v46 }
 0x8ac   :  { %v9894_v34 = vpop.f32.mrf.mxu0 }
 0x8ad   :  { %v9972_v49 = vadd.f32 %v9971_v22, %v9894_v34 }
 0x8af   :  { %v9988_v7 = vadd.f32 %v15615_v56, %v9972_v49 }
 0x8b1   :  { %9996 = vst [vmem:[%s23830_s7 + $0x28] sm:$0xff] %v9988_v7 }
 0x8b4   :  { %v9897_v52 = vpop.f32.mrf.mxu0 }
 0x8b5   :  { %v9975_v60 = vadd.f32 %v9974_v31, %v9897_v52 }
 0x8b7   :  { %v9989_v20 = vadd.f32 %v15615_v56, %v9975_v60 }
 0x8b9   :  { %9997 = vst [vmem:[%s23830_s7 + $0x30] sm:$0xff] %v9989_v20 }
 0x8bc   :  { %v9899_v28 = vpop.f32.mrf.mxu0 }
 0x8bd   :  { %v9977_v1 = vadd.f32 %v9976_v13, %v9899_v28 }
 0x8bf   :  { %v9990_v35 = vadd.f32 %v15615_v56, %v9977_v1 }
 0x8c1   :  { %9998 = vst [vmem:[%s23830_s7 + $0x38] sm:$0xff] %v9990_v35 }

</bundles_post_ra>
